<compile_context>
chip_gen: v7x
topology: tpu7x:2x2x1
jax: 0.10.0
libtpu: 0.0.40
codegen_flags: <defaults>
</compile_context>

<pallas_src>
import functools

import jax
import jax.numpy as jnp
from jax import lax
from jax.experimental import pallas as pl
from jax.experimental.pallas import tpu as pltpu

NUM_FEATURES = 9     # conv1 in_channels
H1 = 32              # conv1 out_channels
H2 = 64              # conv2 out_channels
EDGE_HIDDEN = 16     # hidden width of the edge MLPs


def _elu(v):
    # F.elu with alpha=1
    return jnp.where(v > 0, v, jnp.exp(jnp.minimum(v, 0.0)) - 1.0)


# ---------------------------------------------------------------------------
# NNConv(aggr='mean') + ELU, tiled over edges.
# ---------------------------------------------------------------------------
def _nnconv_elu_kernel(e_true,
                       x_ref, ea_ref, src_ref, dst_ref,
                       w1_ref, b1_ref, w2k_ref, b2m_ref, root_ref, bias_ref,
                       invdeg_ref, out_ref):
    j = pl.program_id(0)
    n_tiles = pl.num_programs(0)
    te = ea_ref.shape[0]
    n_nodes = x_ref.shape[0]

    @pl.when(j == 0)
    def _init():
        out_ref[...] = jnp.zeros_like(out_ref)

    # ---- edge MLP hidden layer: h = relu(ea * w1 + b1)   (TE, 16), f32 VPU ----
    h = jnp.maximum(ea_ref[...] * w1_ref[...] + b1_ref[...], 0.0)

    # ---- gather source-node features via per-tile one-hot (bf16 MXU, f32 acc) ----
    src = src_ref[...]                                               # (TE, 1) int32
    lane_nodes = lax.broadcasted_iota(jnp.int32, (te, n_nodes), 1)
    s_gather = jnp.where(lane_nodes == src, 1.0, 0.0).astype(jnp.bfloat16)
    x_bf = x_ref[...].astype(jnp.bfloat16)
    x_src = jnp.dot(s_gather, x_bf, preferred_element_type=jnp.float32)   # (TE, fin)
    x_src_bf = x_src.astype(jnp.bfloat16)

    # ---- per-edge message without materializing (TE, fin*fout):
    #      msg[e] = x_src[e] @ (h[e] @ w2 + b2).reshape(fin, fout)
    #             = x_src[e] @ B2 + sum_k h[e, k] * (x_src[e] @ W2_k)
    w2k = w2k_ref[...].astype(jnp.bfloat16)                          # (16, fin, fout)
    b2m = b2m_ref[...].astype(jnp.bfloat16)                          # (fin, fout)
    msg = jnp.dot(x_src_bf, b2m, preferred_element_type=jnp.float32)      # (TE, fout)
    for k in range(EDGE_HIDDEN):                                     # static unroll
        t_k = jnp.dot(x_src_bf, w2k[k], preferred_element_type=jnp.float32)
        msg = msg + h[:, k:k + 1] * t_k

    # ---- scatter-add this edge tile into the resident node accumulator ----
    dst = dst_ref[...]                                               # (1, TE) int32
    sub_nodes = lax.broadcasted_iota(jnp.int32, (n_nodes, te), 0)
    lane_edges = lax.broadcasted_iota(jnp.int32, (n_nodes, te), 1)
    valid = (j * te + lane_edges) < e_true                           # mask padded edges
    a_scatter = jnp.where((sub_nodes == dst) & valid, 1.0, 0.0).astype(jnp.bfloat16)
    out_ref[...] += jnp.dot(a_scatter, msg.astype(jnp.bfloat16),
                            preferred_element_type=jnp.float32)

    # ---- finalize: mean aggregation, root weight, bias, ELU ----
    @pl.when(j == n_tiles - 1)
    def _fin():
        agg = out_ref[...] * invdeg_ref[...]                         # (N, fout)
        root = jnp.dot(x_ref[...], root_ref[...],
                       preferred_element_type=jnp.float32)
        out_ref[...] = _elu(agg + root + bias_ref[...])


def _nnconv_elu(x_pad, ea_pad, src_pad, dst_row, invdeg,
                w1, b1, w2k, b2m, root, bias,
                fin, fout, e_true, edge_tile):
    n_pad = x_pad.shape[0]
    e_pad = ea_pad.shape[0]
    n_tiles = e_pad // edge_tile
    full2 = lambda j: (0, 0)

    return pl.pallas_call(
        functools.partial(_nnconv_elu_kernel, e_true),
        out_shape=jax.ShapeDtypeStruct((n_pad, fout), jnp.float32),
        grid=(n_tiles,),
        in_specs=[
            pl.BlockSpec((n_pad, fin), full2),                         # x (VMEM-resident)
            pl.BlockSpec((edge_tile, 1), lambda j: (j, 0)),            # edge_attr tile
            pl.BlockSpec((edge_tile, 1), lambda j: (j, 0)),            # src tile
            pl.BlockSpec((1, edge_tile), lambda j: (0, j)),            # dst tile (lane-dense)
            pl.BlockSpec((1, EDGE_HIDDEN), full2),                     # edge-MLP w1
            pl.BlockSpec((1, EDGE_HIDDEN), full2),                     # edge-MLP b1
            pl.BlockSpec((EDGE_HIDDEN, fin, fout), lambda j: (0, 0, 0)),  # packed w2
            pl.BlockSpec((fin, fout), full2),                          # packed b2
            pl.BlockSpec((fin, fout), full2),                          # root weight
            pl.BlockSpec((1, fout), full2),                            # conv bias
            pl.BlockSpec((n_pad, 1), full2),                           # 1/deg (precomputed)
        ],
        out_specs=pl.BlockSpec((n_pad, fout), full2),                  # resident accumulator
        compiler_params=pltpu.CompilerParams(
            dimension_semantics=("arbitrary",)),
    )(x_pad, ea_pad, src_pad, dst_row, w1, b1, w2k, b2m, root, bias, invdeg)


# ---------------------------------------------------------------------------
# global_mean_pool + fc1 + ELU + fc2  (tiny tail, separate small kernel)
# ---------------------------------------------------------------------------
def _pool_fc_kernel(nf_ref, batch_ref, invcnt_ref,
                    fc1w_ref, fc1b_ref, fc2w_ref, fc2b_ref, out_ref):
    n_graphs = out_ref.shape[0]
    n_nodes = nf_ref.shape[0]
    bvec = batch_ref[...]                                            # (1, N)
    pool = jnp.where(
        lax.broadcasted_iota(jnp.int32, (n_graphs, n_nodes), 0) == bvec, 1.0, 0.0)
    pooled = jnp.dot(pool, nf_ref[...], preferred_element_type=jnp.float32)
    pooled = pooled * invcnt_ref[...]
    hfc = _elu(jnp.dot(pooled, fc1w_ref[...], preferred_element_type=jnp.float32)
               + fc1b_ref[...])
    out_ref[...] = (jnp.dot(hfc, fc2w_ref[...], preferred_element_type=jnp.float32)
                    + fc2b_ref[...])


# ---------------------------------------------------------------------------
# Forward wrapper
# ---------------------------------------------------------------------------
@functools.partial(jax.jit, static_argnames=("num_graphs", "edge_tile"))
def gcn_forward(x, edge_index, edge_attr, batch, params, num_graphs, edge_tile=256):
    if edge_tile % 128 != 0:
        raise ValueError("edge_tile must be a multiple of 128 (lane-dense dst blocks)")
    n = x.shape[0]
    e = edge_attr.shape[0]
    n_pad = ((n + 7) // 8) * 8
    e_pad = ((e + edge_tile - 1) // edge_tile) * edge_tile

    src = edge_index[0].astype(jnp.int32)
    dst = edge_index[1].astype(jnp.int32)

    # Cheap O(E)/O(N) segment counts (precomputed, not derived from dense one-hots).
    deg = jnp.zeros((n_pad,), jnp.float32).at[dst].add(1.0)
    invdeg = jnp.where(deg > 0, 1.0 / jnp.maximum(deg, 1.0), 0.0).reshape(n_pad, 1)
    cnt = jnp.zeros((num_graphs,), jnp.float32).at[batch.astype(jnp.int32)].add(1.0)
    invcnt = (1.0 / jnp.maximum(cnt, 1.0)).reshape(num_graphs, 1)

    # Pad node / edge arrays to tile multiples (padded edges masked in-kernel).
    x_pad = jnp.zeros((n_pad, NUM_FEATURES), jnp.float32).at[:n].set(x.astype(jnp.float32))
    ea_pad = jnp.zeros((e_pad, 1), jnp.float32).at[:e].set(
        edge_attr.astype(jnp.float32).reshape(e, 1))
    src_pad = jnp.zeros((e_pad, 1), jnp.int32).at[:e, 0].set(src)
    dst_row = jnp.zeros((1, e_pad), jnp.int32).at[0, :e].set(dst)
    batch_row = jnp.full((1, n_pad), num_graphs, jnp.int32).at[0, :n].set(
        batch.astype(jnp.int32))

    # Host-side packing:  W2_k[f, o] = nn_w2[f*fout + o, k],  B2[f, o] = nn_b2[f*fout + o]
    def pack(nn_w2, nn_b2, fin, fout):
        return nn_w2.T.reshape(EDGE_HIDDEN, fin, fout), nn_b2.reshape(fin, fout)

    w2k1, b2m1 = pack(params["nn1_w2"], params["nn1_b2"], NUM_FEATURES, H1)
    w2k2, b2m2 = pack(params["nn2_w2"], params["nn2_b2"], H1, H2)

    h1 = _nnconv_elu(x_pad, ea_pad, src_pad, dst_row, invdeg,
                     params["nn1_w1"].T, params["nn1_b1"].reshape(1, -1),
                     w2k1, b2m1, params["conv1_root"],
                     params["conv1_bias"].reshape(1, -1),
                     NUM_FEATURES, H1, e, edge_tile)

    node_feat_pad = _nnconv_elu(h1, ea_pad, src_pad, dst_row, invdeg,
                                params["nn2_w1"].T, params["nn2_b1"].reshape(1, -1),
                                w2k2, b2m2, params["conv2_root"],
                                params["conv2_bias"].reshape(1, -1),
                                H1, H2, e, edge_tile)

    vmem = pl.BlockSpec(memory_space=pltpu.MemorySpace.VMEM)
    out = pl.pallas_call(
        _pool_fc_kernel,
        out_shape=jax.ShapeDtypeStruct((num_graphs, H2), jnp.float32),
        in_specs=[vmem] * 7,
        out_specs=vmem,
    )(node_feat_pad, batch_row, invcnt,
      params["fc1_w"].T, params["fc1_b"].reshape(1, -1),
      params["fc2_w"].T, params["fc2_b"].reshape(1, -1))

    return out, node_feat_pad[:n]


# ---------------------------------------------------------------------------
# Pure-JAX reference (torch_geometric NNConv(aggr='mean') semantics) + params
# ---------------------------------------------------------------------------
def gcn_reference(x, edge_index, edge_attr, batch, params, num_graphs):
    src, dst = edge_index[0], edge_index[1]
    N = x.shape[0]

    def nnconv(x_in, w1, b1, w2, b2, root, bias, fin, fout):
        h = jnp.maximum(edge_attr @ w1.T + b1, 0.0)
        W = (h @ w2.T + b2).reshape(-1, fin, fout)
        x_src = x_in[src]
        msg = jnp.einsum("ef,efo->eo", x_src, W)
        summ = jnp.zeros((N, fout), jnp.float32).at[dst].add(msg)
        deg = jnp.zeros((N, 1), jnp.float32).at[dst].add(1.0)
        agg = jnp.where(deg > 0, summ / jnp.maximum(deg, 1.0), 0.0)
        return agg + x_in @ root + bias

    h1 = _elu(nnconv(x, params["nn1_w1"], params["nn1_b1"],
                     params["nn1_w2"], params["nn1_b2"],
                     params["conv1_root"], params["conv1_bias"], NUM_FEATURES, H1))
    node_feat = _elu(nnconv(h1, params["nn2_w1"], params["nn2_b1"],
                            params["nn2_w2"], params["nn2_b2"],
                            params["conv2_root"], params["conv2_bias"], H1, H2))
    cnt = jnp.zeros((num_graphs, 1), jnp.float32).at[batch].add(1.0)
    pooled = jnp.zeros((num_graphs, H2), jnp.float32).at[batch].add(node_feat)
    pooled = pooled / jnp.maximum(cnt, 1.0)
    hh = _elu(pooled @ params["fc1_w"].T + params["fc1_b"])
    return hh @ params["fc2_w"].T + params["fc2_b"], node_feat


def init_params(key):
    specs = {
        "nn1_w1": (EDGE_HIDDEN, 1), "nn1_b1": (EDGE_HIDDEN,),
        "nn1_w2": (NUM_FEATURES * H1, EDGE_HIDDEN), "nn1_b2": (NUM_FEATURES * H1,),
        "conv1_root": (NUM_FEATURES, H1), "conv1_bias": (H1,),
        "nn2_w1": (EDGE_HIDDEN, 1), "nn2_b1": (EDGE_HIDDEN,),
        "nn2_w2": (H1 * H2, EDGE_HIDDEN), "nn2_b2": (H1 * H2,),
        "conv2_root": (H1, H2), "conv2_bias": (H2,),
        "fc1_w": (H2, H2), "fc1_b": (H2,),
        "fc2_w": (H2, H2), "fc2_b": (H2,),
    }
    keys = jax.random.split(key, len(specs))
    return {name: 0.1 * jax.random.normal(k, shape, jnp.float32)
            for (name, shape), k in zip(specs.items(), keys)}


if __name__ == "__main__":
    key = jax.random.PRNGKey(0)
    ks = jax.random.split(key, 8)

    N, E, B = 16, 200, 2          # E=200 -> padded to 256, two edge tiles of 128
    x = jax.random.normal(ks[0], (N, NUM_FEATURES), jnp.float32)
    edge_attr = jax.random.normal(ks[1], (E, 1), jnp.float32)
    src = jax.random.randint(ks[2], (E,), 0, N, jnp.int32)
    dst = jax.random.randint(ks[3], (E,), 0, N, jnp.int32)
    edge_index = jnp.stack([src, dst], axis=0)
    batch = jnp.concatenate([jnp.zeros(N // 2, jnp.int32),
                             jnp.ones(N - N // 2, jnp.int32)])

    params = init_params(ks[4])

    out, node_feat = gcn_forward(x, edge_index, edge_attr, batch, params,
                                 num_graphs=B, edge_tile=128)
    jax.block_until_ready((out, node_feat))

    ref_out, ref_nf = gcn_reference(x, edge_index, edge_attr, batch, params, B)
    assert out.shape == (B, H2) and node_feat.shape == (N, H2)
    # bf16 MXU operands with f32 accumulation -> compare with bf16-level tolerance.
    assert jnp.allclose(out, ref_out, rtol=2e-2, atol=2e-2), \
        float(jnp.max(jnp.abs(out - ref_out)))
    assert jnp.allclose(node_feat, ref_nf, rtol=2e-2, atol=2e-2), \
        float(jnp.max(jnp.abs(node_feat - ref_nf)))

    print("KERNEL_OK")
</pallas_src>

<mosaic_0001>
module attributes {stable_mosaic.version = 11 : i64} {
  func.func private @main(%arg0: i32) attributes {dimension_semantics = [#tpu.dimension_semantics<core_parallel>], iteration_bounds = array<i64: 2>, tpu.core_type = #tpu.core_type<sc_scalar_subcore>, window_params = []} {
    return
  }
}

module attributes {stable_mosaic.version = 11 : i64} {
  func.func private @main(%arg0: i32) attributes {dimension_semantics = [#tpu.dimension_semantics<core_parallel>], iteration_bounds = array<i64: 2>, tpu.core_type = #tpu.core_type<sc_scalar_subcore>, window_params = []} {
    return
  }
}

module attributes {stable_mosaic.version = 11 : i64} {
  func.func @_nnconv_elu_kernel(%arg0: i32, %arg1: memref<16x9xf32, #tpu.memory_space<vmem>>, %arg2: memref<128x1xf32, #tpu.memory_space<vmem>>, %arg3: memref<128x1xi32, #tpu.memory_space<vmem>>, %arg4: memref<1x128xi32, #tpu.memory_space<vmem>>, %arg5: memref<1x16xf32, #tpu.memory_space<vmem>>, %arg6: memref<1x16xf32, #tpu.memory_space<vmem>>, %arg7: memref<16x9x32xf32, #tpu.memory_space<vmem>>, %arg8: memref<9x32xf32, #tpu.memory_space<vmem>>, %arg9: memref<9x32xf32, #tpu.memory_space<vmem>>, %arg10: memref<1x32xf32, #tpu.memory_space<vmem>>, %arg11: memref<16x1xf32, #tpu.memory_space<vmem>>, %arg12: memref<16x32xf32, #tpu.memory_space<vmem>>) attributes {dimension_semantics = [#tpu.dimension_semantics<arbitrary>], iteration_bounds = array<i64: 2>, scalar_prefetch = 0 : i64, scratch_operands = 0 : i64, tpu.core_type = #tpu.core_type<tc>, window_params = [{pipeline_mode = #tpu.pipeline_mode<synchronous>, transform_indices = @transform_0, window_bounds = array<i64: 16, 9>}, {transform_indices = @transform_1, window_bounds = array<i64: 128, 1>}, {transform_indices = @transform_2, window_bounds = array<i64: 128, 1>}, {transform_indices = @transform_3, window_bounds = array<i64: 1, 128>}, {pipeline_mode = #tpu.pipeline_mode<synchronous>, transform_indices = @transform_4, window_bounds = array<i64: 1, 16>}, {pipeline_mode = #tpu.pipeline_mode<synchronous>, transform_indices = @transform_5, window_bounds = array<i64: 1, 16>}, {pipeline_mode = #tpu.pipeline_mode<synchronous>, transform_indices = @transform_6, window_bounds = array<i64: 16, 9, 32>}, {pipeline_mode = #tpu.pipeline_mode<synchronous>, transform_indices = @transform_7, window_bounds = array<i64: 9, 32>}, {pipeline_mode = #tpu.pipeline_mode<synchronous>, transform_indices = @transform_8, window_bounds = array<i64: 9, 32>}, {pipeline_mode = #tpu.pipeline_mode<synchronous>, transform_indices = @transform_9, window_bounds = array<i64: 1, 32>}, {pipeline_mode = #tpu.pipeline_mode<synchronous>, transform_indices = @transform_10, window_bounds = array<i64: 16, 1>}, {pipeline_mode = #tpu.pipeline_mode<synchronous>, transform_indices = @transform_11, window_bounds = array<i64: 16, 32>}]} {
    %c0_i32 = arith.constant 0 : i32
    %0 = arith.cmpi eq, %arg0, %c0_i32 : i32
    %1 = arith.extui %0 : i1 to i32
    %c0_i32_0 = arith.constant 0 : i32
    %2 = arith.cmpi ne, %1, %c0_i32_0 : i32
    scf.if %2 {
      %cst_45 = arith.constant 0.000000e+00 : f32
      %165 = vector.broadcast %cst_45 : f32 to vector<16x32xf32>
      %c0_46 = arith.constant 0 : index
      %c0_47 = arith.constant 0 : index
      %166 = vector.load %arg12[%c0_46, %c0_47] : memref<16x32xf32, #tpu.memory_space<vmem>>, vector<16x32xf32>
      tpu.vector_store %arg12[%c0_46, %c0_47], %165 {strides = array<i32>} : memref<16x32xf32, #tpu.memory_space<vmem>>, vector<16x32xf32>,
    } else {
    }
    %c0 = arith.constant 0 : index
    %c0_1 = arith.constant 0 : index
    %3 = vector.load %arg2[%c0, %c0_1] : memref<128x1xf32, #tpu.memory_space<vmem>>, vector<128x1xf32>
    %c0_2 = arith.constant 0 : index
    %c0_3 = arith.constant 0 : index
    %4 = vector.load %arg5[%c0_2, %c0_3] : memref<1x16xf32, #tpu.memory_space<vmem>>, vector<1x16xf32>
    %5 = vector.broadcast %3 : vector<128x1xf32> to vector<128x16xf32>
    %6 = vector.broadcast %4 : vector<1x16xf32> to vector<128x16xf32>
    %7 = arith.mulf %5, %6 : vector<128x16xf32>
    %c0_4 = arith.constant 0 : index
    %c0_5 = arith.constant 0 : index
    %8 = vector.load %arg6[%c0_4, %c0_5] : memref<1x16xf32, #tpu.memory_space<vmem>>, vector<1x16xf32>
    %9 = vector.broadcast %8 : vector<1x16xf32> to vector<128x16xf32>
    %10 = arith.addf %7, %9 : vector<128x16xf32>
    %cst = arith.constant 0.000000e+00 : f32
    %11 = vector.broadcast %cst : f32 to vector<128x16xf32>
    %12 = arith.maximumf %10, %11 : vector<128x16xf32>
    %c0_6 = arith.constant 0 : index
    %c0_7 = arith.constant 0 : index
    %13 = vector.load %arg3[%c0_6, %c0_7] : memref<128x1xi32, #tpu.memory_space<vmem>>, vector<128x1xi32>
    %14 = tpu.iota {dimensions = array<i32: 1>} : vector<128x16xi32>
    %15 = vector.broadcast %13 : vector<128x1xi32> to vector<128x16xi32>
    %16 = arith.cmpi eq, %14, %15 : vector<128x16xi32>
    %cst_8 = arith.constant 1.000000e+00 : f32
    %cst_9 = arith.constant 0.000000e+00 : f32
    %17 = vector.broadcast %cst_8 : f32 to vector<128x16xf32>
    %18 = vector.broadcast %cst_9 : f32 to vector<128x16xf32>
    %19 = arith.select %16, %17, %18 : vector<128x16xi1>, vector<128x16xf32>
    %20 = arith.truncf %19 : vector<128x16xf32> to vector<128x16xbf16>
    %c0_10 = arith.constant 0 : index
    %c0_11 = arith.constant 0 : index
    %21 = vector.load %arg1[%c0_10, %c0_11] : memref<16x9xf32, #tpu.memory_space<vmem>>, vector<16x9xf32>
    %22 = arith.truncf %21 : vector<16x9xf32> to vector<16x9xbf16>
    %cst_12 = arith.constant dense<0.000000e+00> : vector<128x9xf32>
    %23 = tpu.matmul %20, %22, %cst_12 {dimension_numbers = #tpu.dot_dimension_numbers<[1], [0], [0], [1], [0, 0, 1, 1], [], []>} : vector<128x16xbf16>, vector<16x9xbf16>, vector<128x9xf32> -> vector<128x9xf32>
    %24 = arith.truncf %23 : vector<128x9xf32> to vector<128x9xbf16>
    %c0_13 = arith.constant 0 : index
    %c0_14 = arith.constant 0 : index
    %c0_15 = arith.constant 0 : index
    %25 = vector.load %arg7[%c0_13, %c0_14, %c0_15] : memref<16x9x32xf32, #tpu.memory_space<vmem>>, vector<16x9x32xf32>
    %26 = arith.truncf %25 : vector<16x9x32xf32> to vector<16x9x32xbf16>
    %c0_16 = arith.constant 0 : index
    %c0_17 = arith.constant 0 : index
    %27 = vector.load %arg8[%c0_16, %c0_17] : memref<9x32xf32, #tpu.memory_space<vmem>>, vector<9x32xf32>
    %28 = arith.truncf %27 : vector<9x32xf32> to vector<9x32xbf16>
    %cst_18 = arith.constant dense<0.000000e+00> : vector<128x32xf32>
    %29 = tpu.matmul %24, %28, %cst_18 {dimension_numbers = #tpu.dot_dimension_numbers<[1], [0], [0], [1], [0, 0, 1, 1], [], []>} : vector<128x9xbf16>, vector<9x32xbf16>, vector<128x32xf32> -> vector<128x32xf32>
    %30 = vector.extract_strided_slice %26 {offsets = [0, 0, 0], sizes = [1, 9, 32], strides = [1, 1, 1]} : vector<16x9x32xbf16> to vector<1x9x32xbf16>
    %31 = vector.shape_cast %30 : vector<1x9x32xbf16> to vector<9x32xbf16>
    %cst_19 = arith.constant dense<0.000000e+00> : vector<128x32xf32>
    %32 = tpu.matmul %24, %31, %cst_19 {dimension_numbers = #tpu.dot_dimension_numbers<[1], [0], [0], [1], [0, 0, 1, 1], [], []>} : vector<128x9xbf16>, vector<9x32xbf16>, vector<128x32xf32> -> vector<128x32xf32>
    %33 = vector.extract_strided_slice %12 {offsets = [0, 0], sizes = [128, 1], strides = [1, 1]} : vector<128x16xf32> to vector<128x1xf32>
    %34 = vector.broadcast %33 : vector<128x1xf32> to vector<128x32xf32>
    %35 = arith.mulf %34, %32 : vector<128x32xf32>
    %36 = arith.addf %29, %35 : vector<128x32xf32>
    %37 = vector.extract_strided_slice %26 {offsets = [1, 0, 0], sizes = [1, 9, 32], strides = [1, 1, 1]} : vector<16x9x32xbf16> to vector<1x9x32xbf16>
    %38 = vector.shape_cast %37 : vector<1x9x32xbf16> to vector<9x32xbf16>
    %cst_20 = arith.constant dense<0.000000e+00> : vector<128x32xf32>
    %39 = tpu.matmul %24, %38, %cst_20 {dimension_numbers = #tpu.dot_dimension_numbers<[1], [0], [0], [1], [0, 0, 1, 1], [], []>} : vector<128x9xbf16>, vector<9x32xbf16>, vector<128x32xf32> -> vector<128x32xf32>
    %40 = vector.extract_strided_slice %12 {offsets = [0, 1], sizes = [128, 1], strides = [1, 1]} : vector<128x16xf32> to vector<128x1xf32>
    %41 = vector.broadcast %40 : vector<128x1xf32> to vector<128x32xf32>
    %42 = arith.mulf %41, %39 : vector<128x32xf32>
    %43 = arith.addf %36, %42 : vector<128x32xf32>
    %44 = vector.extract_strided_slice %26 {offsets = [2, 0, 0], sizes = [1, 9, 32], strides = [1, 1, 1]} : vector<16x9x32xbf16> to vector<1x9x32xbf16>
    %45 = vector.shape_cast %44 : vector<1x9x32xbf16> to vector<9x32xbf16>
    %cst_21 = arith.constant dense<0.000000e+00> : vector<128x32xf32>
    %46 = tpu.matmul %24, %45, %cst_21 {dimension_numbers = #tpu.dot_dimension_numbers<[1], [0], [0], [1], [0, 0, 1, 1], [], []>} : vector<128x9xbf16>, vector<9x32xbf16>, vector<128x32xf32> -> vector<128x32xf32>
    %47 = vector.extract_strided_slice %12 {offsets = [0, 2], sizes = [128, 1], strides = [1, 1]} : vector<128x16xf32> to vector<128x1xf32>
    %48 = vector.broadcast %47 : vector<128x1xf32> to vector<128x32xf32>
    %49 = arith.mulf %48, %46 : vector<128x32xf32>
    %50 = arith.addf %43, %49 : vector<128x32xf32>
    %51 = vector.extract_strided_slice %26 {offsets = [3, 0, 0], sizes = [1, 9, 32], strides = [1, 1, 1]} : vector<16x9x32xbf16> to vector<1x9x32xbf16>
    %52 = vector.shape_cast %51 : vector<1x9x32xbf16> to vector<9x32xbf16>
    %cst_22 = arith.constant dense<0.000000e+00> : vector<128x32xf32>
    %53 = tpu.matmul %24, %52, %cst_22 {dimension_numbers = #tpu.dot_dimension_numbers<[1], [0], [0], [1], [0, 0, 1, 1], [], []>} : vector<128x9xbf16>, vector<9x32xbf16>, vector<128x32xf32> -> vector<128x32xf32>
    %54 = vector.extract_strided_slice %12 {offsets = [0, 3], sizes = [128, 1], strides = [1, 1]} : vector<128x16xf32> to vector<128x1xf32>
    %55 = vector.broadcast %54 : vector<128x1xf32> to vector<128x32xf32>
    %56 = arith.mulf %55, %53 : vector<128x32xf32>
    %57 = arith.addf %50, %56 : vector<128x32xf32>
    %58 = vector.extract_strided_slice %26 {offsets = [4, 0, 0], sizes = [1, 9, 32], strides = [1, 1, 1]} : vector<16x9x32xbf16> to vector<1x9x32xbf16>
    %59 = vector.shape_cast %58 : vector<1x9x32xbf16> to vector<9x32xbf16>
    %cst_23 = arith.constant dense<0.000000e+00> : vector<128x32xf32>
    %60 = tpu.matmul %24, %59, %cst_23 {dimension_numbers = #tpu.dot_dimension_numbers<[1], [0], [0], [1], [0, 0, 1, 1], [], []>} : vector<128x9xbf16>, vector<9x32xbf16>, vector<128x32xf32> -> vector<128x32xf32>
    %61 = vector.extract_strided_slice %12 {offsets = [0, 4], sizes = [128, 1], strides = [1, 1]} : vector<128x16xf32> to vector<128x1xf32>
    %62 = vector.broadcast %61 : vector<128x1xf32> to vector<128x32xf32>
    %63 = arith.mulf %62, %60 : vector<128x32xf32>
    %64 = arith.addf %57, %63 : vector<128x32xf32>
    %65 = vector.extract_strided_slice %26 {offsets = [5, 0, 0], sizes = [1, 9, 32], strides = [1, 1, 1]} : vector<16x9x32xbf16> to vector<1x9x32xbf16>
    %66 = vector.shape_cast %65 : vector<1x9x32xbf16> to vector<9x32xbf16>
    %cst_24 = arith.constant dense<0.000000e+00> : vector<128x32xf32>
    %67 = tpu.matmul %24, %66, %cst_24 {dimension_numbers = #tpu.dot_dimension_numbers<[1], [0], [0], [1], [0, 0, 1, 1], [], []>} : vector<128x9xbf16>, vector<9x32xbf16>, vector<128x32xf32> -> vector<128x32xf32>
    %68 = vector.extract_strided_slice %12 {offsets = [0, 5], sizes = [128, 1], strides = [1, 1]} : vector<128x16xf32> to vector<128x1xf32>
    %69 = vector.broadcast %68 : vector<128x1xf32> to vector<128x32xf32>
    %70 = arith.mulf %69, %67 : vector<128x32xf32>
    %71 = arith.addf %64, %70 : vector<128x32xf32>
    %72 = vector.extract_strided_slice %26 {offsets = [6, 0, 0], sizes = [1, 9, 32], strides = [1, 1, 1]} : vector<16x9x32xbf16> to vector<1x9x32xbf16>
    %73 = vector.shape_cast %72 : vector<1x9x32xbf16> to vector<9x32xbf16>
    %cst_25 = arith.constant dense<0.000000e+00> : vector<128x32xf32>
    %74 = tpu.matmul %24, %73, %cst_25 {dimension_numbers = #tpu.dot_dimension_numbers<[1], [0], [0], [1], [0, 0, 1, 1], [], []>} : vector<128x9xbf16>, vector<9x32xbf16>, vector<128x32xf32> -> vector<128x32xf32>
    %75 = vector.extract_strided_slice %12 {offsets = [0, 6], sizes = [128, 1], strides = [1, 1]} : vector<128x16xf32> to vector<128x1xf32>
    %76 = vector.broadcast %75 : vector<128x1xf32> to vector<128x32xf32>
    %77 = arith.mulf %76, %74 : vector<128x32xf32>
    %78 = arith.addf %71, %77 : vector<128x32xf32>
    %79 = vector.extract_strided_slice %26 {offsets = [7, 0, 0], sizes = [1, 9, 32], strides = [1, 1, 1]} : vector<16x9x32xbf16> to vector<1x9x32xbf16>
    %80 = vector.shape_cast %79 : vector<1x9x32xbf16> to vector<9x32xbf16>
    %cst_26 = arith.constant dense<0.000000e+00> : vector<128x32xf32>
    %81 = tpu.matmul %24, %80, %cst_26 {dimension_numbers = #tpu.dot_dimension_numbers<[1], [0], [0], [1], [0, 0, 1, 1], [], []>} : vector<128x9xbf16>, vector<9x32xbf16>, vector<128x32xf32> -> vector<128x32xf32>
    %82 = vector.extract_strided_slice %12 {offsets = [0, 7], sizes = [128, 1], strides = [1, 1]} : vector<128x16xf32> to vector<128x1xf32>
    %83 = vector.broadcast %82 : vector<128x1xf32> to vector<128x32xf32>
    %84 = arith.mulf %83, %81 : vector<128x32xf32>
    %85 = arith.addf %78, %84 : vector<128x32xf32>
    %86 = vector.extract_strided_slice %26 {offsets = [8, 0, 0], sizes = [1, 9, 32], strides = [1, 1, 1]} : vector<16x9x32xbf16> to vector<1x9x32xbf16>
    %87 = vector.shape_cast %86 : vector<1x9x32xbf16> to vector<9x32xbf16>
    %cst_27 = arith.constant dense<0.000000e+00> : vector<128x32xf32>
    %88 = tpu.matmul %24, %87, %cst_27 {dimension_numbers = #tpu.dot_dimension_numbers<[1], [0], [0], [1], [0, 0, 1, 1], [], []>} : vector<128x9xbf16>, vector<9x32xbf16>, vector<128x32xf32> -> vector<128x32xf32>
    %89 = vector.extract_strided_slice %12 {offsets = [0, 8], sizes = [128, 1], strides = [1, 1]} : vector<128x16xf32> to vector<128x1xf32>
    %90 = vector.broadcast %89 : vector<128x1xf32> to vector<128x32xf32>
    %91 = arith.mulf %90, %88 : vector<128x32xf32>
    %92 = arith.addf %85, %91 : vector<128x32xf32>
    %93 = vector.extract_strided_slice %26 {offsets = [9, 0, 0], sizes = [1, 9, 32], strides = [1, 1, 1]} : vector<16x9x32xbf16> to vector<1x9x32xbf16>
    %94 = vector.shape_cast %93 : vector<1x9x32xbf16> to vector<9x32xbf16>
    %cst_28 = arith.constant dense<0.000000e+00> : vector<128x32xf32>
    %95 = tpu.matmul %24, %94, %cst_28 {dimension_numbers = #tpu.dot_dimension_numbers<[1], [0], [0], [1], [0, 0, 1, 1], [], []>} : vector<128x9xbf16>, vector<9x32xbf16>, vector<128x32xf32> -> vector<128x32xf32>
    %96 = vector.extract_strided_slice %12 {offsets = [0, 9], sizes = [128, 1], strides = [1, 1]} : vector<128x16xf32> to vector<128x1xf32>
    %97 = vector.broadcast %96 : vector<128x1xf32> to vector<128x32xf32>
    %98 = arith.mulf %97, %95 : vector<128x32xf32>
    %99 = arith.addf %92, %98 : vector<128x32xf32>
    %100 = vector.extract_strided_slice %26 {offsets = [10, 0, 0], sizes = [1, 9, 32], strides = [1, 1, 1]} : vector<16x9x32xbf16> to vector<1x9x32xbf16>
    %101 = vector.shape_cast %100 : vector<1x9x32xbf16> to vector<9x32xbf16>
    %cst_29 = arith.constant dense<0.000000e+00> : vector<128x32xf32>
    %102 = tpu.matmul %24, %101, %cst_29 {dimension_numbers = #tpu.dot_dimension_numbers<[1], [0], [0], [1], [0, 0, 1, 1], [], []>} : vector<128x9xbf16>, vector<9x32xbf16>, vector<128x32xf32> -> vector<128x32xf32>
    %103 = vector.extract_strided_slice %12 {offsets = [0, 10], sizes = [128, 1], strides = [1, 1]} : vector<128x16xf32> to vector<128x1xf32>
    %104 = vector.broadcast %103 : vector<128x1xf32> to vector<128x32xf32>
    %105 = arith.mulf %104, %102 : vector<128x32xf32>
    %106 = arith.addf %99, %105 : vector<128x32xf32>
    %107 = vector.extract_strided_slice %26 {offsets = [11, 0, 0], sizes = [1, 9, 32], strides = [1, 1, 1]} : vector<16x9x32xbf16> to vector<1x9x32xbf16>
    %108 = vector.shape_cast %107 : vector<1x9x32xbf16> to vector<9x32xbf16>
    %cst_30 = arith.constant dense<0.000000e+00> : vector<128x32xf32>
    %109 = tpu.matmul %24, %108, %cst_30 {dimension_numbers = #tpu.dot_dimension_numbers<[1], [0], [0], [1], [0, 0, 1, 1], [], []>} : vector<128x9xbf16>, vector<9x32xbf16>, vector<128x32xf32> -> vector<128x32xf32>
    %110 = vector.extract_strided_slice %12 {offsets = [0, 11], sizes = [128, 1], strides = [1, 1]} : vector<128x16xf32> to vector<128x1xf32>
    %111 = vector.broadcast %110 : vector<128x1xf32> to vector<128x32xf32>
    %112 = arith.mulf %111, %109 : vector<128x32xf32>
    %113 = arith.addf %106, %112 : vector<128x32xf32>
    %114 = vector.extract_strided_slice %26 {offsets = [12, 0, 0], sizes = [1, 9, 32], strides = [1, 1, 1]} : vector<16x9x32xbf16> to vector<1x9x32xbf16>
    %115 = vector.shape_cast %114 : vector<1x9x32xbf16> to vector<9x32xbf16>
    %cst_31 = arith.constant dense<0.000000e+00> : vector<128x32xf32>
    %116 = tpu.matmul %24, %115, %cst_31 {dimension_numbers = #tpu.dot_dimension_numbers<[1], [0], [0], [1], [0, 0, 1, 1], [], []>} : vector<128x9xbf16>, vector<9x32xbf16>, vector<128x32xf32> -> vector<128x32xf32>
    %117 = vector.extract_strided_slice %12 {offsets = [0, 12], sizes = [128, 1], strides = [1, 1]} : vector<128x16xf32> to vector<128x1xf32>
    %118 = vector.broadcast %117 : vector<128x1xf32> to vector<128x32xf32>
    %119 = arith.mulf %118, %116 : vector<128x32xf32>
    %120 = arith.addf %113, %119 : vector<128x32xf32>
    %121 = vector.extract_strided_slice %26 {offsets = [13, 0, 0], sizes = [1, 9, 32], strides = [1, 1, 1]} : vector<16x9x32xbf16> to vector<1x9x32xbf16>
    %122 = vector.shape_cast %121 : vector<1x9x32xbf16> to vector<9x32xbf16>
    %cst_32 = arith.constant dense<0.000000e+00> : vector<128x32xf32>
    %123 = tpu.matmul %24, %122, %cst_32 {dimension_numbers = #tpu.dot_dimension_numbers<[1], [0], [0], [1], [0, 0, 1, 1], [], []>} : vector<128x9xbf16>, vector<9x32xbf16>, vector<128x32xf32> -> vector<128x32xf32>
    %124 = vector.extract_strided_slice %12 {offsets = [0, 13], sizes = [128, 1], strides = [1, 1]} : vector<128x16xf32> to vector<128x1xf32>
    %125 = vector.broadcast %124 : vector<128x1xf32> to vector<128x32xf32>
    %126 = arith.mulf %125, %123 : vector<128x32xf32>
    %127 = arith.addf %120, %126 : vector<128x32xf32>
    %128 = vector.extract_strided_slice %26 {offsets = [14, 0, 0], sizes = [1, 9, 32], strides = [1, 1, 1]} : vector<16x9x32xbf16> to vector<1x9x32xbf16>
    %129 = vector.shape_cast %128 : vector<1x9x32xbf16> to vector<9x32xbf16>
    %cst_33 = arith.constant dense<0.000000e+00> : vector<128x32xf32>
    %130 = tpu.matmul %24, %129, %cst_33 {dimension_numbers = #tpu.dot_dimension_numbers<[1], [0], [0], [1], [0, 0, 1, 1], [], []>} : vector<128x9xbf16>, vector<9x32xbf16>, vector<128x32xf32> -> vector<128x32xf32>
    %131 = vector.extract_strided_slice %12 {offsets = [0, 14], sizes = [128, 1], strides = [1, 1]} : vector<128x16xf32> to vector<128x1xf32>
    %132 = vector.broadcast %131 : vector<128x1xf32> to vector<128x32xf32>
    %133 = arith.mulf %132, %130 : vector<128x32xf32>
    %134 = arith.addf %127, %133 : vector<128x32xf32>
    %135 = vector.extract_strided_slice %26 {offsets = [15, 0, 0], sizes = [1, 9, 32], strides = [1, 1, 1]} : vector<16x9x32xbf16> to vector<1x9x32xbf16>
    %136 = vector.shape_cast %135 : vector<1x9x32xbf16> to vector<9x32xbf16>
    %cst_34 = arith.constant dense<0.000000e+00> : vector<128x32xf32>
    %137 = tpu.matmul %24, %136, %cst_34 {dimension_numbers = #tpu.dot_dimension_numbers<[1], [0], [0], [1], [0, 0, 1, 1], [], []>} : vector<128x9xbf16>, vector<9x32xbf16>, vector<128x32xf32> -> vector<128x32xf32>
    %138 = vector.extract_strided_slice %12 {offsets = [0, 15], sizes = [128, 1], strides = [1, 1]} : vector<128x16xf32> to vector<128x1xf32>
    %139 = vector.broadcast %138 : vector<128x1xf32> to vector<128x32xf32>
    %140 = arith.mulf %139, %137 : vector<128x32xf32>
    %141 = arith.addf %134, %140 : vector<128x32xf32>
    %c0_35 = arith.constant 0 : index
    %c0_36 = arith.constant 0 : index
    %142 = vector.load %arg4[%c0_35, %c0_36] : memref<1x128xi32, #tpu.memory_space<vmem>>, vector<1x128xi32>
    %143 = tpu.iota {dimensions = array<i32: 0>} : vector<16x128xi32>
    %144 = tpu.iota {dimensions = array<i32: 1>} : vector<16x128xi32>
    %c128_i32 = arith.constant 128 : i32
    %145 = arith.muli %arg0, %c128_i32 : i32
    %146 = vector.broadcast %145 : i32 to vector<16x128xi32>
    %147 = arith.addi %146, %144 : vector<16x128xi32>
    %c200_i32 = arith.constant 200 : i32
    %148 = vector.broadcast %c200_i32 : i32 to vector<16x128xi32>
    %149 = arith.cmpi slt, %147, %148 : vector<16x128xi32>
    %150 = vector.broadcast %142 : vector<1x128xi32> to vector<16x128xi32>
    %151 = arith.cmpi eq, %143, %150 : vector<16x128xi32>
    %152 = arith.andi %151, %149 : vector<16x128xi1>
    %cst_37 = arith.constant 1.000000e+00 : f32
    %cst_38 = arith.constant 0.000000e+00 : f32
    %153 = vector.broadcast %cst_37 : f32 to vector<16x128xf32>
    %154 = vector.broadcast %cst_38 : f32 to vector<16x128xf32>
    %155 = arith.select %152, %153, %154 : vector<16x128xi1>, vector<16x128xf32>
    %156 = arith.truncf %155 : vector<16x128xf32> to vector<16x128xbf16>
    %c0_39 = arith.constant 0 : index
    %c0_40 = arith.constant 0 : index
    %157 = vector.load %arg12[%c0_39, %c0_40] : memref<16x32xf32, #tpu.memory_space<vmem>>, vector<16x32xf32>
    %158 = arith.truncf %141 : vector<128x32xf32> to vector<128x32xbf16>
    %cst_41 = arith.constant dense<0.000000e+00> : vector<16x32xf32>
    %159 = tpu.matmul %156, %158, %cst_41 {dimension_numbers = #tpu.dot_dimension_numbers<[1], [0], [0], [1], [0, 0, 1, 1], [], []>} : vector<16x128xbf16>, vector<128x32xbf16>, vector<16x32xf32> -> vector<16x32xf32>
    %160 = arith.addf %157, %159 : vector<16x32xf32>
    %c0_42 = arith.constant 0 : index
    %c0_43 = arith.constant 0 : index
    %161 = vector.load %arg12[%c0_42, %c0_43] : memref<16x32xf32, #tpu.memory_space<vmem>>, vector<16x32xf32>
    tpu.vector_store %arg12[%c0_42, %c0_43], %160 {strides = array<i32>} : memref<16x32xf32, #tpu.memory_space<vmem>>, vector<16x32xf32>,
    %c1_i32 = arith.constant 1 : i32
    %162 = arith.cmpi eq, %arg0, %c1_i32 : i32
    %163 = arith.extui %162 : i1 to i32
    %c0_i32_44 = arith.constant 0 : i32
    %164 = arith.cmpi ne, %163, %c0_i32_44 : i32
    scf.if %164 {
      %c0_45 = arith.constant 0 : index
      %c0_46 = arith.constant 0 : index
      %165 = vector.load %arg12[%c0_45, %c0_46] : memref<16x32xf32, #tpu.memory_space<vmem>>, vector<16x32xf32>
      %c0_47 = arith.constant 0 : index
      %c0_48 = arith.constant 0 : index
      %166 = vector.load %arg11[%c0_47, %c0_48] : memref<16x1xf32, #tpu.memory_space<vmem>>, vector<16x1xf32>
      %167 = vector.broadcast %166 : vector<16x1xf32> to vector<16x32xf32>
      %168 = arith.mulf %165, %167 : vector<16x32xf32>
      %c0_49 = arith.constant 0 : index
      %c0_50 = arith.constant 0 : index
      %169 = vector.load %arg1[%c0_49, %c0_50] : memref<16x9xf32, #tpu.memory_space<vmem>>, vector<16x9xf32>
      %c0_51 = arith.constant 0 : index
      %c0_52 = arith.constant 0 : index
      %170 = vector.load %arg9[%c0_51, %c0_52] : memref<9x32xf32, #tpu.memory_space<vmem>>, vector<9x32xf32>
      %cst_53 = arith.constant dense<0.000000e+00> : vector<16x32xf32>
      %171 = tpu.matmul %169, %170, %cst_53 {dimension_numbers = #tpu.dot_dimension_numbers<[1], [0], [0], [1], [0, 0, 1, 1], [], []>} : vector<16x9xf32>, vector<9x32xf32>, vector<16x32xf32> -> vector<16x32xf32>
      %172 = arith.addf %168, %171 : vector<16x32xf32>
      %c0_54 = arith.constant 0 : index
      %c0_55 = arith.constant 0 : index
      %173 = vector.load %arg10[%c0_54, %c0_55] : memref<1x32xf32, #tpu.memory_space<vmem>>, vector<1x32xf32>
      %174 = vector.broadcast %173 : vector<1x32xf32> to vector<16x32xf32>
      %175 = arith.addf %172, %174 : vector<16x32xf32>
      %cst_56 = arith.constant 0.000000e+00 : f32
      %176 = vector.broadcast %cst_56 : f32 to vector<16x32xf32>
      %177 = arith.cmpf ogt, %175, %176 : vector<16x32xf32>
      %cst_57 = arith.constant 0.000000e+00 : f32
      %178 = vector.broadcast %cst_57 : f32 to vector<16x32xf32>
      %179 = arith.minimumf %175, %178 : vector<16x32xf32>
      %180 = math.exp %179 : vector<16x32xf32>
      %cst_58 = arith.constant 1.000000e+00 : f32
      %181 = vector.broadcast %cst_58 : f32 to vector<16x32xf32>
      %182 = arith.subf %180, %181 : vector<16x32xf32>
      %183 = arith.select %177, %175, %182 : vector<16x32xi1>, vector<16x32xf32>
      %c0_59 = arith.constant 0 : index
      %c0_60 = arith.constant 0 : index
      %184 = vector.load %arg12[%c0_59, %c0_60] : memref<16x32xf32, #tpu.memory_space<vmem>>, vector<16x32xf32>
      tpu.vector_store %arg12[%c0_59, %c0_60], %183 {strides = array<i32>} : memref<16x32xf32, #tpu.memory_space<vmem>>, vector<16x32xf32>,
    } else {
    }
    return
  }
  func.func @transform_0(%arg0: i32) -> (i32, i32) {
    %c0_i32 = arith.constant 0 : i32
    %c0_i32_0 = arith.constant 0 : i32
    %c0_i32_1 = arith.constant 0 : i32
    return %c0_i32, %c0_i32_0 : i32, i32
  }
  func.func @transform_1(%arg0: i32) -> (i32, i32) {
    %c0_i32 = arith.constant 0 : i32
    %c0_i32_0 = arith.constant 0 : i32
    return %arg0, %c0_i32 : i32, i32
  }
  func.func @transform_2(%arg0: i32) -> (i32, i32) {
    %c0_i32 = arith.constant 0 : i32
    %c0_i32_0 = arith.constant 0 : i32
    return %arg0, %c0_i32 : i32, i32
  }
  func.func @transform_3(%arg0: i32) -> (i32, i32) {
    %c0_i32 = arith.constant 0 : i32
    %c0_i32_0 = arith.constant 0 : i32
    return %c0_i32, %arg0 : i32, i32
  }
  func.func @transform_4(%arg0: i32) -> (i32, i32) {
    %c0_i32 = arith.constant 0 : i32
    %c0_i32_0 = arith.constant 0 : i32
    %c0_i32_1 = arith.constant 0 : i32
    return %c0_i32, %c0_i32_0 : i32, i32
  }
  func.func @transform_5(%arg0: i32) -> (i32, i32) {
    %c0_i32 = arith.constant 0 : i32
    %c0_i32_0 = arith.constant 0 : i32
    %c0_i32_1 = arith.constant 0 : i32
    return %c0_i32, %c0_i32_0 : i32, i32
  }
  func.func @transform_6(%arg0: i32) -> (i32, i32, i32) {
    %c0_i32 = arith.constant 0 : i32
    %c0_i32_0 = arith.constant 0 : i32
    %c0_i32_1 = arith.constant 0 : i32
    %c0_i32_2 = arith.constant 0 : i32
    return %c0_i32, %c0_i32_0, %c0_i32_1 : i32, i32, i32
  }
  func.func @transform_7(%arg0: i32) -> (i32, i32) {
    %c0_i32 = arith.constant 0 : i32
    %c0_i32_0 = arith.constant 0 : i32
    %c0_i32_1 = arith.constant 0 : i32
    return %c0_i32, %c0_i32_0 : i32, i32
  }
  func.func @transform_8(%arg0: i32) -> (i32, i32) {
    %c0_i32 = arith.constant 0 : i32
    %c0_i32_0 = arith.constant 0 : i32
    %c0_i32_1 = arith.constant 0 : i32
    return %c0_i32, %c0_i32_0 : i32, i32
  }
  func.func @transform_9(%arg0: i32) -> (i32, i32) {
    %c0_i32 = arith.constant 0 : i32
    %c0_i32_0 = arith.constant 0 : i32
    %c0_i32_1 = arith.constant 0 : i32
    return %c0_i32, %c0_i32_0 : i32, i32
  }
  func.func @transform_10(%arg0: i32) -> (i32, i32) {
    %c0_i32 = arith.constant 0 : i32
    %c0_i32_0 = arith.constant 0 : i32
    %c0_i32_1 = arith.constant 0 : i32
    return %c0_i32, %c0_i32_0 : i32, i32
  }
  func.func @transform_11(%arg0: i32) -> (i32, i32) {
    %c0_i32 = arith.constant 0 : i32
    %c0_i32_0 = arith.constant 0 : i32
    %c0_i32_1 = arith.constant 0 : i32
    return %c0_i32, %c0_i32_0 : i32, i32
  }
}

module attributes {stable_mosaic.version = 11 : i64} {
  func.func @_pool_fc_kernel(%arg0: memref<16x64xf32, #tpu.memory_space<vmem>>, %arg1: memref<1x16xi32, #tpu.memory_space<vmem>>, %arg2: memref<2x1xf32, #tpu.memory_space<vmem>>, %arg3: memref<64x64xf32, #tpu.memory_space<vmem>>, %arg4: memref<1x64xf32, #tpu.memory_space<vmem>>, %arg5: memref<64x64xf32, #tpu.memory_space<vmem>>, %arg6: memref<1x64xf32, #tpu.memory_space<vmem>>, %arg7: memref<2x64xf32, #tpu.memory_space<vmem>>) attributes {dimension_semantics = [], scalar_prefetch = 0 : i64, scratch_operands = 0 : i64, tpu.core_type = #tpu.core_type<tc>} {
    %c0 = arith.constant 0 : index
    %c0_0 = arith.constant 0 : index
    %0 = vector.load %arg1[%c0, %c0_0] : memref<1x16xi32, #tpu.memory_space<vmem>>, vector<1x16xi32>
    %1 = tpu.iota {dimensions = array<i32: 0>} : vector<2x16xi32>
    %2 = vector.broadcast %0 : vector<1x16xi32> to vector<2x16xi32>
    %3 = arith.cmpi eq, %1, %2 : vector<2x16xi32>
    %cst = arith.constant 1.000000e+00 : f32
    %cst_1 = arith.constant 0.000000e+00 : f32
    %4 = vector.broadcast %cst : f32 to vector<2x16xf32>
    %5 = vector.broadcast %cst_1 : f32 to vector<2x16xf32>
    %6 = arith.select %3, %4, %5 : vector<2x16xi1>, vector<2x16xf32>
    %c0_2 = arith.constant 0 : index
    %c0_3 = arith.constant 0 : index
    %7 = vector.load %arg0[%c0_2, %c0_3] : memref<16x64xf32, #tpu.memory_space<vmem>>, vector<16x64xf32>
    %cst_4 = arith.constant dense<0.000000e+00> : vector<2x64xf32>
    %8 = tpu.matmul %6, %7, %cst_4 {dimension_numbers = #tpu.dot_dimension_numbers<[1], [0], [0], [1], [0, 0, 1, 1], [], []>} : vector<2x16xf32>, vector<16x64xf32>, vector<2x64xf32> -> vector<2x64xf32>
    %c0_5 = arith.constant 0 : index
    %c0_6 = arith.constant 0 : index
    %9 = vector.load %arg2[%c0_5, %c0_6] : memref<2x1xf32, #tpu.memory_space<vmem>>, vector<2x1xf32>
    %10 = vector.broadcast %9 : vector<2x1xf32> to vector<2x64xf32>
    %11 = arith.mulf %8, %10 : vector<2x64xf32>
    %c0_7 = arith.constant 0 : index
    %c0_8 = arith.constant 0 : index
    %12 = vector.load %arg3[%c0_7, %c0_8] : memref<64x64xf32, #tpu.memory_space<vmem>>, vector<64x64xf32>
    %cst_9 = arith.constant dense<0.000000e+00> : vector<2x64xf32>
    %13 = tpu.matmul %11, %12, %cst_9 {dimension_numbers = #tpu.dot_dimension_numbers<[1], [0], [0], [1], [0, 0, 1, 1], [], []>} : vector<2x64xf32>, vector<64x64xf32>, vector<2x64xf32> -> vector<2x64xf32>
    %c0_10 = arith.constant 0 : index
    %c0_11 = arith.constant 0 : index
    %14 = vector.load %arg4[%c0_10, %c0_11] : memref<1x64xf32, #tpu.memory_space<vmem>>, vector<1x64xf32>
    %15 = vector.broadcast %14 : vector<1x64xf32> to vector<2x64xf32>
    %16 = arith.addf %13, %15 : vector<2x64xf32>
    %cst_12 = arith.constant 0.000000e+00 : f32
    %17 = vector.broadcast %cst_12 : f32 to vector<2x64xf32>
    %18 = arith.cmpf ogt, %16, %17 : vector<2x64xf32>
    %cst_13 = arith.constant 0.000000e+00 : f32
    %19 = vector.broadcast %cst_13 : f32 to vector<2x64xf32>
    %20 = arith.minimumf %16, %19 : vector<2x64xf32>
    %21 = math.exp %20 : vector<2x64xf32>
    %cst_14 = arith.constant 1.000000e+00 : f32
    %22 = vector.broadcast %cst_14 : f32 to vector<2x64xf32>
    %23 = arith.subf %21, %22 : vector<2x64xf32>
    %24 = arith.select %18, %16, %23 : vector<2x64xi1>, vector<2x64xf32>
    %c0_15 = arith.constant 0 : index
    %c0_16 = arith.constant 0 : index
    %25 = vector.load %arg5[%c0_15, %c0_16] : memref<64x64xf32, #tpu.memory_space<vmem>>, vector<64x64xf32>
    %cst_17 = arith.constant dense<0.000000e+00> : vector<2x64xf32>
    %26 = tpu.matmul %24, %25, %cst_17 {dimension_numbers = #tpu.dot_dimension_numbers<[1], [0], [0], [1], [0, 0, 1, 1], [], []>} : vector<2x64xf32>, vector<64x64xf32>, vector<2x64xf32> -> vector<2x64xf32>
    %c0_18 = arith.constant 0 : index
    %c0_19 = arith.constant 0 : index
    %27 = vector.load %arg6[%c0_18, %c0_19] : memref<1x64xf32, #tpu.memory_space<vmem>>, vector<1x64xf32>
    %28 = vector.broadcast %27 : vector<1x64xf32> to vector<2x64xf32>
    %29 = arith.addf %26, %28 : vector<2x64xf32>
    %c0_20 = arith.constant 0 : index
    %c0_21 = arith.constant 0 : index
    %30 = vector.load %arg7[%c0_20, %c0_21] : memref<2x64xf32, #tpu.memory_space<vmem>>, vector<2x64xf32>
    tpu.vector_store %arg7[%c0_20, %c0_21], %29 {strides = array<i32>} : memref<2x64xf32, #tpu.memory_space<vmem>>, vector<2x64xf32>,
    return
  }
}

module attributes {stable_mosaic.version = 11 : i64} {
  func.func @_nnconv_elu_kernel(%arg0: i32, %arg1: memref<16x32xf32, #tpu.memory_space<vmem>>, %arg2: memref<128x1xf32, #tpu.memory_space<vmem>>, %arg3: memref<128x1xi32, #tpu.memory_space<vmem>>, %arg4: memref<1x128xi32, #tpu.memory_space<vmem>>, %arg5: memref<1x16xf32, #tpu.memory_space<vmem>>, %arg6: memref<1x16xf32, #tpu.memory_space<vmem>>, %arg7: memref<16x32x64xf32, #tpu.memory_space<vmem>>, %arg8: memref<32x64xf32, #tpu.memory_space<vmem>>, %arg9: memref<32x64xf32, #tpu.memory_space<vmem>>, %arg10: memref<1x64xf32, #tpu.memory_space<vmem>>, %arg11: memref<16x1xf32, #tpu.memory_space<vmem>>, %arg12: memref<16x64xf32, #tpu.memory_space<vmem>>) attributes {dimension_semantics = [#tpu.dimension_semantics<arbitrary>], iteration_bounds = array<i64: 2>, scalar_prefetch = 0 : i64, scratch_operands = 0 : i64, tpu.core_type = #tpu.core_type<tc>, window_params = [{pipeline_mode = #tpu.pipeline_mode<synchronous>, transform_indices = @transform_0, window_bounds = array<i64: 16, 32>}, {transform_indices = @transform_1, window_bounds = array<i64: 128, 1>}, {transform_indices = @transform_2, window_bounds = array<i64: 128, 1>}, {transform_indices = @transform_3, window_bounds = array<i64: 1, 128>}, {pipeline_mode = #tpu.pipeline_mode<synchronous>, transform_indices = @transform_4, window_bounds = array<i64: 1, 16>}, {pipeline_mode = #tpu.pipeline_mode<synchronous>, transform_indices = @transform_5, window_bounds = array<i64: 1, 16>}, {pipeline_mode = #tpu.pipeline_mode<synchronous>, transform_indices = @transform_6, window_bounds = array<i64: 16, 32, 64>}, {pipeline_mode = #tpu.pipeline_mode<synchronous>, transform_indices = @transform_7, window_bounds = array<i64: 32, 64>}, {pipeline_mode = #tpu.pipeline_mode<synchronous>, transform_indices = @transform_8, window_bounds = array<i64: 32, 64>}, {pipeline_mode = #tpu.pipeline_mode<synchronous>, transform_indices = @transform_9, window_bounds = array<i64: 1, 64>}, {pipeline_mode = #tpu.pipeline_mode<synchronous>, transform_indices = @transform_10, window_bounds = array<i64: 16, 1>}, {pipeline_mode = #tpu.pipeline_mode<synchronous>, transform_indices = @transform_11, window_bounds = array<i64: 16, 64>}]} {
    %c0_i32 = arith.constant 0 : i32
    %0 = arith.cmpi eq, %arg0, %c0_i32 : i32
    %1 = arith.extui %0 : i1 to i32
    %c0_i32_0 = arith.constant 0 : i32
    %2 = arith.cmpi ne, %1, %c0_i32_0 : i32
    scf.if %2 {
      %cst_45 = arith.constant 0.000000e+00 : f32
      %165 = vector.broadcast %cst_45 : f32 to vector<16x64xf32>
      %c0_46 = arith.constant 0 : index
      %c0_47 = arith.constant 0 : index
      %166 = vector.load %arg12[%c0_46, %c0_47] : memref<16x64xf32, #tpu.memory_space<vmem>>, vector<16x64xf32>
      tpu.vector_store %arg12[%c0_46, %c0_47], %165 {strides = array<i32>} : memref<16x64xf32, #tpu.memory_space<vmem>>, vector<16x64xf32>,
    } else {
    }
    %c0 = arith.constant 0 : index
    %c0_1 = arith.constant 0 : index
    %3 = vector.load %arg2[%c0, %c0_1] : memref<128x1xf32, #tpu.memory_space<vmem>>, vector<128x1xf32>
    %c0_2 = arith.constant 0 : index
    %c0_3 = arith.constant 0 : index
    %4 = vector.load %arg5[%c0_2, %c0_3] : memref<1x16xf32, #tpu.memory_space<vmem>>, vector<1x16xf32>
    %5 = vector.broadcast %3 : vector<128x1xf32> to vector<128x16xf32>
    %6 = vector.broadcast %4 : vector<1x16xf32> to vector<128x16xf32>
    %7 = arith.mulf %5, %6 : vector<128x16xf32>
    %c0_4 = arith.constant 0 : index
    %c0_5 = arith.constant 0 : index
    %8 = vector.load %arg6[%c0_4, %c0_5] : memref<1x16xf32, #tpu.memory_space<vmem>>, vector<1x16xf32>
    %9 = vector.broadcast %8 : vector<1x16xf32> to vector<128x16xf32>
    %10 = arith.addf %7, %9 : vector<128x16xf32>
    %cst = arith.constant 0.000000e+00 : f32
    %11 = vector.broadcast %cst : f32 to vector<128x16xf32>
    %12 = arith.maximumf %10, %11 : vector<128x16xf32>
    %c0_6 = arith.constant 0 : index
    %c0_7 = arith.constant 0 : index
    %13 = vector.load %arg3[%c0_6, %c0_7] : memref<128x1xi32, #tpu.memory_space<vmem>>, vector<128x1xi32>
    %14 = tpu.iota {dimensions = array<i32: 1>} : vector<128x16xi32>
    %15 = vector.broadcast %13 : vector<128x1xi32> to vector<128x16xi32>
    %16 = arith.cmpi eq, %14, %15 : vector<128x16xi32>
    %cst_8 = arith.constant 1.000000e+00 : f32
    %cst_9 = arith.constant 0.000000e+00 : f32
    %17 = vector.broadcast %cst_8 : f32 to vector<128x16xf32>
    %18 = vector.broadcast %cst_9 : f32 to vector<128x16xf32>
    %19 = arith.select %16, %17, %18 : vector<128x16xi1>, vector<128x16xf32>
    %20 = arith.truncf %19 : vector<128x16xf32> to vector<128x16xbf16>
    %c0_10 = arith.constant 0 : index
    %c0_11 = arith.constant 0 : index
    %21 = vector.load %arg1[%c0_10, %c0_11] : memref<16x32xf32, #tpu.memory_space<vmem>>, vector<16x32xf32>
    %22 = arith.truncf %21 : vector<16x32xf32> to vector<16x32xbf16>
    %cst_12 = arith.constant dense<0.000000e+00> : vector<128x32xf32>
    %23 = tpu.matmul %20, %22, %cst_12 {dimension_numbers = #tpu.dot_dimension_numbers<[1], [0], [0], [1], [0, 0, 1, 1], [], []>} : vector<128x16xbf16>, vector<16x32xbf16>, vector<128x32xf32> -> vector<128x32xf32>
    %24 = arith.truncf %23 : vector<128x32xf32> to vector<128x32xbf16>
    %c0_13 = arith.constant 0 : index
    %c0_14 = arith.constant 0 : index
    %c0_15 = arith.constant 0 : index
    %25 = vector.load %arg7[%c0_13, %c0_14, %c0_15] : memref<16x32x64xf32, #tpu.memory_space<vmem>>, vector<16x32x64xf32>
    %26 = arith.truncf %25 : vector<16x32x64xf32> to vector<16x32x64xbf16>
    %c0_16 = arith.constant 0 : index
    %c0_17 = arith.constant 0 : index
    %27 = vector.load %arg8[%c0_16, %c0_17] : memref<32x64xf32, #tpu.memory_space<vmem>>, vector<32x64xf32>
    %28 = arith.truncf %27 : vector<32x64xf32> to vector<32x64xbf16>
    %cst_18 = arith.constant dense<0.000000e+00> : vector<128x64xf32>
    %29 = tpu.matmul %24, %28, %cst_18 {dimension_numbers = #tpu.dot_dimension_numbers<[1], [0], [0], [1], [0, 0, 1, 1], [], []>} : vector<128x32xbf16>, vector<32x64xbf16>, vector<128x64xf32> -> vector<128x64xf32>
    %30 = vector.extract_strided_slice %26 {offsets = [0, 0, 0], sizes = [1, 32, 64], strides = [1, 1, 1]} : vector<16x32x64xbf16> to vector<1x32x64xbf16>
    %31 = vector.shape_cast %30 : vector<1x32x64xbf16> to vector<32x64xbf16>
    %cst_19 = arith.constant dense<0.000000e+00> : vector<128x64xf32>
    %32 = tpu.matmul %24, %31, %cst_19 {dimension_numbers = #tpu.dot_dimension_numbers<[1], [0], [0], [1], [0, 0, 1, 1], [], []>} : vector<128x32xbf16>, vector<32x64xbf16>, vector<128x64xf32> -> vector<128x64xf32>
    %33 = vector.extract_strided_slice %12 {offsets = [0, 0], sizes = [128, 1], strides = [1, 1]} : vector<128x16xf32> to vector<128x1xf32>
    %34 = vector.broadcast %33 : vector<128x1xf32> to vector<128x64xf32>
    %35 = arith.mulf %34, %32 : vector<128x64xf32>
    %36 = arith.addf %29, %35 : vector<128x64xf32>
    %37 = vector.extract_strided_slice %26 {offsets = [1, 0, 0], sizes = [1, 32, 64], strides = [1, 1, 1]} : vector<16x32x64xbf16> to vector<1x32x64xbf16>
    %38 = vector.shape_cast %37 : vector<1x32x64xbf16> to vector<32x64xbf16>
    %cst_20 = arith.constant dense<0.000000e+00> : vector<128x64xf32>
    %39 = tpu.matmul %24, %38, %cst_20 {dimension_numbers = #tpu.dot_dimension_numbers<[1], [0], [0], [1], [0, 0, 1, 1], [], []>} : vector<128x32xbf16>, vector<32x64xbf16>, vector<128x64xf32> -> vector<128x64xf32>
    %40 = vector.extract_strided_slice %12 {offsets = [0, 1], sizes = [128, 1], strides = [1, 1]} : vector<128x16xf32> to vector<128x1xf32>
    %41 = vector.broadcast %40 : vector<128x1xf32> to vector<128x64xf32>
    %42 = arith.mulf %41, %39 : vector<128x64xf32>
    %43 = arith.addf %36, %42 : vector<128x64xf32>
    %44 = vector.extract_strided_slice %26 {offsets = [2, 0, 0], sizes = [1, 32, 64], strides = [1, 1, 1]} : vector<16x32x64xbf16> to vector<1x32x64xbf16>
    %45 = vector.shape_cast %44 : vector<1x32x64xbf16> to vector<32x64xbf16>
    %cst_21 = arith.constant dense<0.000000e+00> : vector<128x64xf32>
    %46 = tpu.matmul %24, %45, %cst_21 {dimension_numbers = #tpu.dot_dimension_numbers<[1], [0], [0], [1], [0, 0, 1, 1], [], []>} : vector<128x32xbf16>, vector<32x64xbf16>, vector<128x64xf32> -> vector<128x64xf32>
    %47 = vector.extract_strided_slice %12 {offsets = [0, 2], sizes = [128, 1], strides = [1, 1]} : vector<128x16xf32> to vector<128x1xf32>
    %48 = vector.broadcast %47 : vector<128x1xf32> to vector<128x64xf32>
    %49 = arith.mulf %48, %46 : vector<128x64xf32>
    %50 = arith.addf %43, %49 : vector<128x64xf32>
    %51 = vector.extract_strided_slice %26 {offsets = [3, 0, 0], sizes = [1, 32, 64], strides = [1, 1, 1]} : vector<16x32x64xbf16> to vector<1x32x64xbf16>
    %52 = vector.shape_cast %51 : vector<1x32x64xbf16> to vector<32x64xbf16>
    %cst_22 = arith.constant dense<0.000000e+00> : vector<128x64xf32>
    %53 = tpu.matmul %24, %52, %cst_22 {dimension_numbers = #tpu.dot_dimension_numbers<[1], [0], [0], [1], [0, 0, 1, 1], [], []>} : vector<128x32xbf16>, vector<32x64xbf16>, vector<128x64xf32> -> vector<128x64xf32>
    %54 = vector.extract_strided_slice %12 {offsets = [0, 3], sizes = [128, 1], strides = [1, 1]} : vector<128x16xf32> to vector<128x1xf32>
    %55 = vector.broadcast %54 : vector<128x1xf32> to vector<128x64xf32>
    %56 = arith.mulf %55, %53 : vector<128x64xf32>
    %57 = arith.addf %50, %56 : vector<128x64xf32>
    %58 = vector.extract_strided_slice %26 {offsets = [4, 0, 0], sizes = [1, 32, 64], strides = [1, 1, 1]} : vector<16x32x64xbf16> to vector<1x32x64xbf16>
    %59 = vector.shape_cast %58 : vector<1x32x64xbf16> to vector<32x64xbf16>
    %cst_23 = arith.constant dense<0.000000e+00> : vector<128x64xf32>
    %60 = tpu.matmul %24, %59, %cst_23 {dimension_numbers = #tpu.dot_dimension_numbers<[1], [0], [0], [1], [0, 0, 1, 1], [], []>} : vector<128x32xbf16>, vector<32x64xbf16>, vector<128x64xf32> -> vector<128x64xf32>
    %61 = vector.extract_strided_slice %12 {offsets = [0, 4], sizes = [128, 1], strides = [1, 1]} : vector<128x16xf32> to vector<128x1xf32>
    %62 = vector.broadcast %61 : vector<128x1xf32> to vector<128x64xf32>
    %63 = arith.mulf %62, %60 : vector<128x64xf32>
    %64 = arith.addf %57, %63 : vector<128x64xf32>
    %65 = vector.extract_strided_slice %26 {offsets = [5, 0, 0], sizes = [1, 32, 64], strides = [1, 1, 1]} : vector<16x32x64xbf16> to vector<1x32x64xbf16>
    %66 = vector.shape_cast %65 : vector<1x32x64xbf16> to vector<32x64xbf16>
    %cst_24 = arith.constant dense<0.000000e+00> : vector<128x64xf32>
    %67 = tpu.matmul %24, %66, %cst_24 {dimension_numbers = #tpu.dot_dimension_numbers<[1], [0], [0], [1], [0, 0, 1, 1], [], []>} : vector<128x32xbf16>, vector<32x64xbf16>, vector<128x64xf32> -> vector<128x64xf32>
    %68 = vector.extract_strided_slice %12 {offsets = [0, 5], sizes = [128, 1], strides = [1, 1]} : vector<128x16xf32> to vector<128x1xf32>
    %69 = vector.broadcast %68 : vector<128x1xf32> to vector<128x64xf32>
    %70 = arith.mulf %69, %67 : vector<128x64xf32>
    %71 = arith.addf %64, %70 : vector<128x64xf32>
    %72 = vector.extract_strided_slice %26 {offsets = [6, 0, 0], sizes = [1, 32, 64], strides = [1, 1, 1]} : vector<16x32x64xbf16> to vector<1x32x64xbf16>
    %73 = vector.shape_cast %72 : vector<1x32x64xbf16> to vector<32x64xbf16>
    %cst_25 = arith.constant dense<0.000000e+00> : vector<128x64xf32>
    %74 = tpu.matmul %24, %73, %cst_25 {dimension_numbers = #tpu.dot_dimension_numbers<[1], [0], [0], [1], [0, 0, 1, 1], [], []>} : vector<128x32xbf16>, vector<32x64xbf16>, vector<128x64xf32> -> vector<128x64xf32>
    %75 = vector.extract_strided_slice %12 {offsets = [0, 6], sizes = [128, 1], strides = [1, 1]} : vector<128x16xf32> to vector<128x1xf32>
    %76 = vector.broadcast %75 : vector<128x1xf32> to vector<128x64xf32>
    %77 = arith.mulf %76, %74 : vector<128x64xf32>
    %78 = arith.addf %71, %77 : vector<128x64xf32>
    %79 = vector.extract_strided_slice %26 {offsets = [7, 0, 0], sizes = [1, 32, 64], strides = [1, 1, 1]} : vector<16x32x64xbf16> to vector<1x32x64xbf16>
    %80 = vector.shape_cast %79 : vector<1x32x64xbf16> to vector<32x64xbf16>
    %cst_26 = arith.constant dense<0.000000e+00> : vector<128x64xf32>
    %81 = tpu.matmul %24, %80, %cst_26 {dimension_numbers = #tpu.dot_dimension_numbers<[1], [0], [0], [1], [0, 0, 1, 1], [], []>} : vector<128x32xbf16>, vector<32x64xbf16>, vector<128x64xf32> -> vector<128x64xf32>
    %82 = vector.extract_strided_slice %12 {offsets = [0, 7], sizes = [128, 1], strides = [1, 1]} : vector<128x16xf32> to vector<128x1xf32>
    %83 = vector.broadcast %82 : vector<128x1xf32> to vector<128x64xf32>
    %84 = arith.mulf %83, %81 : vector<128x64xf32>
    %85 = arith.addf %78, %84 : vector<128x64xf32>
    %86 = vector.extract_strided_slice %26 {offsets = [8, 0, 0], sizes = [1, 32, 64], strides = [1, 1, 1]} : vector<16x32x64xbf16> to vector<1x32x64xbf16>
    %87 = vector.shape_cast %86 : vector<1x32x64xbf16> to vector<32x64xbf16>
    %cst_27 = arith.constant dense<0.000000e+00> : vector<128x64xf32>
    %88 = tpu.matmul %24, %87, %cst_27 {dimension_numbers = #tpu.dot_dimension_numbers<[1], [0], [0], [1], [0, 0, 1, 1], [], []>} : vector<128x32xbf16>, vector<32x64xbf16>, vector<128x64xf32> -> vector<128x64xf32>
    %89 = vector.extract_strided_slice %12 {offsets = [0, 8], sizes = [128, 1], strides = [1, 1]} : vector<128x16xf32> to vector<128x1xf32>
    %90 = vector.broadcast %89 : vector<128x1xf32> to vector<128x64xf32>
    %91 = arith.mulf %90, %88 : vector<128x64xf32>
    %92 = arith.addf %85, %91 : vector<128x64xf32>
    %93 = vector.extract_strided_slice %26 {offsets = [9, 0, 0], sizes = [1, 32, 64], strides = [1, 1, 1]} : vector<16x32x64xbf16> to vector<1x32x64xbf16>
    %94 = vector.shape_cast %93 : vector<1x32x64xbf16> to vector<32x64xbf16>
    %cst_28 = arith.constant dense<0.000000e+00> : vector<128x64xf32>
    %95 = tpu.matmul %24, %94, %cst_28 {dimension_numbers = #tpu.dot_dimension_numbers<[1], [0], [0], [1], [0, 0, 1, 1], [], []>} : vector<128x32xbf16>, vector<32x64xbf16>, vector<128x64xf32> -> vector<128x64xf32>
    %96 = vector.extract_strided_slice %12 {offsets = [0, 9], sizes = [128, 1], strides = [1, 1]} : vector<128x16xf32> to vector<128x1xf32>
    %97 = vector.broadcast %96 : vector<128x1xf32> to vector<128x64xf32>
    %98 = arith.mulf %97, %95 : vector<128x64xf32>
    %99 = arith.addf %92, %98 : vector<128x64xf32>
    %100 = vector.extract_strided_slice %26 {offsets = [10, 0, 0], sizes = [1, 32, 64], strides = [1, 1, 1]} : vector<16x32x64xbf16> to vector<1x32x64xbf16>
    %101 = vector.shape_cast %100 : vector<1x32x64xbf16> to vector<32x64xbf16>
    %cst_29 = arith.constant dense<0.000000e+00> : vector<128x64xf32>
    %102 = tpu.matmul %24, %101, %cst_29 {dimension_numbers = #tpu.dot_dimension_numbers<[1], [0], [0], [1], [0, 0, 1, 1], [], []>} : vector<128x32xbf16>, vector<32x64xbf16>, vector<128x64xf32> -> vector<128x64xf32>
    %103 = vector.extract_strided_slice %12 {offsets = [0, 10], sizes = [128, 1], strides = [1, 1]} : vector<128x16xf32> to vector<128x1xf32>
    %104 = vector.broadcast %103 : vector<128x1xf32> to vector<128x64xf32>
    %105 = arith.mulf %104, %102 : vector<128x64xf32>
    %106 = arith.addf %99, %105 : vector<128x64xf32>
    %107 = vector.extract_strided_slice %26 {offsets = [11, 0, 0], sizes = [1, 32, 64], strides = [1, 1, 1]} : vector<16x32x64xbf16> to vector<1x32x64xbf16>
    %108 = vector.shape_cast %107 : vector<1x32x64xbf16> to vector<32x64xbf16>
    %cst_30 = arith.constant dense<0.000000e+00> : vector<128x64xf32>
    %109 = tpu.matmul %24, %108, %cst_30 {dimension_numbers = #tpu.dot_dimension_numbers<[1], [0], [0], [1], [0, 0, 1, 1], [], []>} : vector<128x32xbf16>, vector<32x64xbf16>, vector<128x64xf32> -> vector<128x64xf32>
    %110 = vector.extract_strided_slice %12 {offsets = [0, 11], sizes = [128, 1], strides = [1, 1]} : vector<128x16xf32> to vector<128x1xf32>
    %111 = vector.broadcast %110 : vector<128x1xf32> to vector<128x64xf32>
    %112 = arith.mulf %111, %109 : vector<128x64xf32>
    %113 = arith.addf %106, %112 : vector<128x64xf32>
    %114 = vector.extract_strided_slice %26 {offsets = [12, 0, 0], sizes = [1, 32, 64], strides = [1, 1, 1]} : vector<16x32x64xbf16> to vector<1x32x64xbf16>
    %115 = vector.shape_cast %114 : vector<1x32x64xbf16> to vector<32x64xbf16>
    %cst_31 = arith.constant dense<0.000000e+00> : vector<128x64xf32>
    %116 = tpu.matmul %24, %115, %cst_31 {dimension_numbers = #tpu.dot_dimension_numbers<[1], [0], [0], [1], [0, 0, 1, 1], [], []>} : vector<128x32xbf16>, vector<32x64xbf16>, vector<128x64xf32> -> vector<128x64xf32>
    %117 = vector.extract_strided_slice %12 {offsets = [0, 12], sizes = [128, 1], strides = [1, 1]} : vector<128x16xf32> to vector<128x1xf32>
    %118 = vector.broadcast %117 : vector<128x1xf32> to vector<128x64xf32>
    %119 = arith.mulf %118, %116 : vector<128x64xf32>
    %120 = arith.addf %113, %119 : vector<128x64xf32>
    %121 = vector.extract_strided_slice %26 {offsets = [13, 0, 0], sizes = [1, 32, 64], strides = [1, 1, 1]} : vector<16x32x64xbf16> to vector<1x32x64xbf16>
    %122 = vector.shape_cast %121 : vector<1x32x64xbf16> to vector<32x64xbf16>
    %cst_32 = arith.constant dense<0.000000e+00> : vector<128x64xf32>
    %123 = tpu.matmul %24, %122, %cst_32 {dimension_numbers = #tpu.dot_dimension_numbers<[1], [0], [0], [1], [0, 0, 1, 1], [], []>} : vector<128x32xbf16>, vector<32x64xbf16>, vector<128x64xf32> -> vector<128x64xf32>
    %124 = vector.extract_strided_slice %12 {offsets = [0, 13], sizes = [128, 1], strides = [1, 1]} : vector<128x16xf32> to vector<128x1xf32>
    %125 = vector.broadcast %124 : vector<128x1xf32> to vector<128x64xf32>
    %126 = arith.mulf %125, %123 : vector<128x64xf32>
    %127 = arith.addf %120, %126 : vector<128x64xf32>
    %128 = vector.extract_strided_slice %26 {offsets = [14, 0, 0], sizes = [1, 32, 64], strides = [1, 1, 1]} : vector<16x32x64xbf16> to vector<1x32x64xbf16>
    %129 = vector.shape_cast %128 : vector<1x32x64xbf16> to vector<32x64xbf16>
    %cst_33 = arith.constant dense<0.000000e+00> : vector<128x64xf32>
    %130 = tpu.matmul %24, %129, %cst_33 {dimension_numbers = #tpu.dot_dimension_numbers<[1], [0], [0], [1], [0, 0, 1, 1], [], []>} : vector<128x32xbf16>, vector<32x64xbf16>, vector<128x64xf32> -> vector<128x64xf32>
    %131 = vector.extract_strided_slice %12 {offsets = [0, 14], sizes = [128, 1], strides = [1, 1]} : vector<128x16xf32> to vector<128x1xf32>
    %132 = vector.broadcast %131 : vector<128x1xf32> to vector<128x64xf32>
    %133 = arith.mulf %132, %130 : vector<128x64xf32>
    %134 = arith.addf %127, %133 : vector<128x64xf32>
    %135 = vector.extract_strided_slice %26 {offsets = [15, 0, 0], sizes = [1, 32, 64], strides = [1, 1, 1]} : vector<16x32x64xbf16> to vector<1x32x64xbf16>
    %136 = vector.shape_cast %135 : vector<1x32x64xbf16> to vector<32x64xbf16>
    %cst_34 = arith.constant dense<0.000000e+00> : vector<128x64xf32>
    %137 = tpu.matmul %24, %136, %cst_34 {dimension_numbers = #tpu.dot_dimension_numbers<[1], [0], [0], [1], [0, 0, 1, 1], [], []>} : vector<128x32xbf16>, vector<32x64xbf16>, vector<128x64xf32> -> vector<128x64xf32>
    %138 = vector.extract_strided_slice %12 {offsets = [0, 15], sizes = [128, 1], strides = [1, 1]} : vector<128x16xf32> to vector<128x1xf32>
    %139 = vector.broadcast %138 : vector<128x1xf32> to vector<128x64xf32>
    %140 = arith.mulf %139, %137 : vector<128x64xf32>
    %141 = arith.addf %134, %140 : vector<128x64xf32>
    %c0_35 = arith.constant 0 : index
    %c0_36 = arith.constant 0 : index
    %142 = vector.load %arg4[%c0_35, %c0_36] : memref<1x128xi32, #tpu.memory_space<vmem>>, vector<1x128xi32>
    %143 = tpu.iota {dimensions = array<i32: 0>} : vector<16x128xi32>
    %144 = tpu.iota {dimensions = array<i32: 1>} : vector<16x128xi32>
    %c128_i32 = arith.constant 128 : i32
    %145 = arith.muli %arg0, %c128_i32 : i32
    %146 = vector.broadcast %145 : i32 to vector<16x128xi32>
    %147 = arith.addi %146, %144 : vector<16x128xi32>
    %c200_i32 = arith.constant 200 : i32
    %148 = vector.broadcast %c200_i32 : i32 to vector<16x128xi32>
    %149 = arith.cmpi slt, %147, %148 : vector<16x128xi32>
    %150 = vector.broadcast %142 : vector<1x128xi32> to vector<16x128xi32>
    %151 = arith.cmpi eq, %143, %150 : vector<16x128xi32>
    %152 = arith.andi %151, %149 : vector<16x128xi1>
    %cst_37 = arith.constant 1.000000e+00 : f32
    %cst_38 = arith.constant 0.000000e+00 : f32
    %153 = vector.broadcast %cst_37 : f32 to vector<16x128xf32>
    %154 = vector.broadcast %cst_38 : f32 to vector<16x128xf32>
    %155 = arith.select %152, %153, %154 : vector<16x128xi1>, vector<16x128xf32>
    %156 = arith.truncf %155 : vector<16x128xf32> to vector<16x128xbf16>
    %c0_39 = arith.constant 0 : index
    %c0_40 = arith.constant 0 : index
    %157 = vector.load %arg12[%c0_39, %c0_40] : memref<16x64xf32, #tpu.memory_space<vmem>>, vector<16x64xf32>
    %158 = arith.truncf %141 : vector<128x64xf32> to vector<128x64xbf16>
    %cst_41 = arith.constant dense<0.000000e+00> : vector<16x64xf32>
    %159 = tpu.matmul %156, %158, %cst_41 {dimension_numbers = #tpu.dot_dimension_numbers<[1], [0], [0], [1], [0, 0, 1, 1], [], []>} : vector<16x128xbf16>, vector<128x64xbf16>, vector<16x64xf32> -> vector<16x64xf32>
    %160 = arith.addf %157, %159 : vector<16x64xf32>
    %c0_42 = arith.constant 0 : index
    %c0_43 = arith.constant 0 : index
    %161 = vector.load %arg12[%c0_42, %c0_43] : memref<16x64xf32, #tpu.memory_space<vmem>>, vector<16x64xf32>
    tpu.vector_store %arg12[%c0_42, %c0_43], %160 {strides = array<i32>} : memref<16x64xf32, #tpu.memory_space<vmem>>, vector<16x64xf32>,
    %c1_i32 = arith.constant 1 : i32
    %162 = arith.cmpi eq, %arg0, %c1_i32 : i32
    %163 = arith.extui %162 : i1 to i32
    %c0_i32_44 = arith.constant 0 : i32
    %164 = arith.cmpi ne, %163, %c0_i32_44 : i32
    scf.if %164 {
      %c0_45 = arith.constant 0 : index
      %c0_46 = arith.constant 0 : index
      %165 = vector.load %arg12[%c0_45, %c0_46] : memref<16x64xf32, #tpu.memory_space<vmem>>, vector<16x64xf32>
      %c0_47 = arith.constant 0 : index
      %c0_48 = arith.constant 0 : index
      %166 = vector.load %arg11[%c0_47, %c0_48] : memref<16x1xf32, #tpu.memory_space<vmem>>, vector<16x1xf32>
      %167 = vector.broadcast %166 : vector<16x1xf32> to vector<16x64xf32>
      %168 = arith.mulf %165, %167 : vector<16x64xf32>
      %c0_49 = arith.constant 0 : index
      %c0_50 = arith.constant 0 : index
      %169 = vector.load %arg1[%c0_49, %c0_50] : memref<16x32xf32, #tpu.memory_space<vmem>>, vector<16x32xf32>
      %c0_51 = arith.constant 0 : index
      %c0_52 = arith.constant 0 : index
      %170 = vector.load %arg9[%c0_51, %c0_52] : memref<32x64xf32, #tpu.memory_space<vmem>>, vector<32x64xf32>
      %cst_53 = arith.constant dense<0.000000e+00> : vector<16x64xf32>
      %171 = tpu.matmul %169, %170, %cst_53 {dimension_numbers = #tpu.dot_dimension_numbers<[1], [0], [0], [1], [0, 0, 1, 1], [], []>} : vector<16x32xf32>, vector<32x64xf32>, vector<16x64xf32> -> vector<16x64xf32>
      %172 = arith.addf %168, %171 : vector<16x64xf32>
      %c0_54 = arith.constant 0 : index
      %c0_55 = arith.constant 0 : index
      %173 = vector.load %arg10[%c0_54, %c0_55] : memref<1x64xf32, #tpu.memory_space<vmem>>, vector<1x64xf32>
      %174 = vector.broadcast %173 : vector<1x64xf32> to vector<16x64xf32>
      %175 = arith.addf %172, %174 : vector<16x64xf32>
      %cst_56 = arith.constant 0.000000e+00 : f32
      %176 = vector.broadcast %cst_56 : f32 to vector<16x64xf32>
      %177 = arith.cmpf ogt, %175, %176 : vector<16x64xf32>
      %cst_57 = arith.constant 0.000000e+00 : f32
      %178 = vector.broadcast %cst_57 : f32 to vector<16x64xf32>
      %179 = arith.minimumf %175, %178 : vector<16x64xf32>
      %180 = math.exp %179 : vector<16x64xf32>
      %cst_58 = arith.constant 1.000000e+00 : f32
      %181 = vector.broadcast %cst_58 : f32 to vector<16x64xf32>
      %182 = arith.subf %180, %181 : vector<16x64xf32>
      %183 = arith.select %177, %175, %182 : vector<16x64xi1>, vector<16x64xf32>
      %c0_59 = arith.constant 0 : index
      %c0_60 = arith.constant 0 : index
      %184 = vector.load %arg12[%c0_59, %c0_60] : memref<16x64xf32, #tpu.memory_space<vmem>>, vector<16x64xf32>
      tpu.vector_store %arg12[%c0_59, %c0_60], %183 {strides = array<i32>} : memref<16x64xf32, #tpu.memory_space<vmem>>, vector<16x64xf32>,
    } else {
    }
    return
  }
  func.func @transform_0(%arg0: i32) -> (i32, i32) {
    %c0_i32 = arith.constant 0 : i32
    %c0_i32_0 = arith.constant 0 : i32
    %c0_i32_1 = arith.constant 0 : i32
    return %c0_i32, %c0_i32_0 : i32, i32
  }
  func.func @transform_1(%arg0: i32) -> (i32, i32) {
    %c0_i32 = arith.constant 0 : i32
    %c0_i32_0 = arith.constant 0 : i32
    return %arg0, %c0_i32 : i32, i32
  }
  func.func @transform_2(%arg0: i32) -> (i32, i32) {
    %c0_i32 = arith.constant 0 : i32
    %c0_i32_0 = arith.constant 0 : i32
    return %arg0, %c0_i32 : i32, i32
  }
  func.func @transform_3(%arg0: i32) -> (i32, i32) {
    %c0_i32 = arith.constant 0 : i32
    %c0_i32_0 = arith.constant 0 : i32
    return %c0_i32, %arg0 : i32, i32
  }
  func.func @transform_4(%arg0: i32) -> (i32, i32) {
    %c0_i32 = arith.constant 0 : i32
    %c0_i32_0 = arith.constant 0 : i32
    %c0_i32_1 = arith.constant 0 : i32
    return %c0_i32, %c0_i32_0 : i32, i32
  }
  func.func @transform_5(%arg0: i32) -> (i32, i32) {
    %c0_i32 = arith.constant 0 : i32
    %c0_i32_0 = arith.constant 0 : i32
    %c0_i32_1 = arith.constant 0 : i32
    return %c0_i32, %c0_i32_0 : i32, i32
  }
  func.func @transform_6(%arg0: i32) -> (i32, i32, i32) {
    %c0_i32 = arith.constant 0 : i32
    %c0_i32_0 = arith.constant 0 : i32
    %c0_i32_1 = arith.constant 0 : i32
    %c0_i32_2 = arith.constant 0 : i32
    return %c0_i32, %c0_i32_0, %c0_i32_1 : i32, i32, i32
  }
  func.func @transform_7(%arg0: i32) -> (i32, i32) {
    %c0_i32 = arith.constant 0 : i32
    %c0_i32_0 = arith.constant 0 : i32
    %c0_i32_1 = arith.constant 0 : i32
    return %c0_i32, %c0_i32_0 : i32, i32
  }
  func.func @transform_8(%arg0: i32) -> (i32, i32) {
    %c0_i32 = arith.constant 0 : i32
    %c0_i32_0 = arith.constant 0 : i32
    %c0_i32_1 = arith.constant 0 : i32
    return %c0_i32, %c0_i32_0 : i32, i32
  }
  func.func @transform_9(%arg0: i32) -> (i32, i32) {
    %c0_i32 = arith.constant 0 : i32
    %c0_i32_0 = arith.constant 0 : i32
    %c0_i32_1 = arith.constant 0 : i32
    return %c0_i32, %c0_i32_0 : i32, i32
  }
  func.func @transform_10(%arg0: i32) -> (i32, i32) {
    %c0_i32 = arith.constant 0 : i32
    %c0_i32_0 = arith.constant 0 : i32
    %c0_i32_1 = arith.constant 0 : i32
    return %c0_i32, %c0_i32_0 : i32, i32
  }
  func.func @transform_11(%arg0: i32) -> (i32, i32) {
    %c0_i32 = arith.constant 0 : i32
    %c0_i32_0 = arith.constant 0 : i32
    %c0_i32_1 = arith.constant 0 : i32
    return %c0_i32, %c0_i32_0 : i32, i32
  }
}

</mosaic_0001>

<bundles_post_ra>
// kernel: gcn_forward.5
= control target key start
LH: loop header
LB: loop body
LE: loop exit
PB: predicated region body
PF: predicated region fallthrough
CT: control target
= control target key end

     0   :  { %v28_v2 = vlaneseq  ;;  %v450_v4 = vmov 0.0|0.0   ;;  %vm451_vm0 = vmmov 0   ;;  %v452_v6 = vmov 0.0   ;;  %s578_s0 = inlined_call_operand.vmem [shape: f32[16,64], index: 0, kind: input, shape index: {}]   ;;  %s579_s1 = inlined_call_operand.vmem [shape: s32[1,16], index: 1, kind: input, shape index: {}]   ;;  %s580_s2 = inlined_call_operand.vmem [shape: f32[2,1], index: 2, kind: input, shape index: {}]   ;;  %s581_s3 = inlined_call_operand.vmem [shape: f32[64,64], index: 3, kind: input, shape index: {}]   ;;  %s582_s4 = inlined_call_operand.vmem [shape: f32[1,64], index: 4, kind: input, shape index: {}]   ;;  %s583_s5 = inlined_call_operand.vmem [shape: f32[64,64], index: 5, kind: input, shape index: {}]   ;;  %s584_s6 = inlined_call_operand.vmem [shape: f32[1,64], index: 6, kind: input, shape index: {}]   ;;  %s585_s7 = inlined_call_operand.hbm [shape: f32[2,64], index: 7, kind: output, shape index: {}]  }
   0x1   :  { %v36_v0 = vld [vmem:[%s578_s0] sm:$0xff]  ;;  %v37_v1 = vld [vmem:[%s578_s0 + $0x8] sm:$0xff]  ;;  %391 = vmatprep.subr.bf16.mxu0 %v450_v4  ;;  %350 = vmatprep.mubr.msk.f32.mxu0 %vm451_vm0, %v452_v6  ;;  %v453_v10 = vmov 0   ;;  %v121_v12 = vld [vmem:[%s581_s3 + $0x10] sm:$0xff]  ;;  %vm38_vm1 = vcmask 130048  }
   0x2   :  { %v119_v3 = vld [vmem:[%s581_s3] sm:$0xff]  ;;  %v392_v5 = vpack.c.bf16 %v37_v1, %v36_v0  ;;  %v29_v9 = vshrl.u32 %v28_v2, 7  ;;  %423 = vset.pattern.permute.xlu0 %v453_v10  ;;  %394 = vmatprep.subr.bf16.mxu1 %v450_v4  ;;  %v120_v11 = vld [vmem:[%s581_s3 + $0x8] sm:$0xff]  ;;  %v122_v13 = vld [vmem:[%s581_s3 + $0x18] sm:$0xff] }
   0x3   :  { %v318_v7 = vld [vmem:[%s579_s1] ss:$0 sm:$0xff]  ;;  %v395_v14 = vpack.c.bf16 %v120_v11, %v119_v3 }
   0x4   :  { %v112_v8 = vld [vmem:[%s580_s2] sm:$0x3]  ;;  %393 = vmatpush3.bf16.msra.mxu0 %v392_v5 }
   0x5   :  { %115 = vperm.xlu0 %423, %v112_v8  }
   0x6   :  { %12 = vsyncpa [#allocation3], 0  ;;  %vm34_vm2 = vcmp.eq.s32.totalorder %v29_v9, %v318_v7  ;;  %369 = vmatprep.mubr.msk.f32.mxu1 %vm451_vm0, %v452_v6  ;;  %406 = vmatprep.subr.bf16.mxu0 %v450_v4  ;;  %v398_v16 = vpack.c.bf16 %v122_v13, %v121_v12  ;;  %v123_v17 = vld [vmem:[%s581_s3 + $0x20] sm:$0xff]  ;;  %v124_v18 = vld [vmem:[%s581_s3 + $0x28] sm:$0xff]  ;;  %vm134_vm3 = vcmask 523264   ;;  %s454_s1 = smov [#allocation2]  }
   0x7   :  { %v35_v15 = vsel %vm34_vm2, 1.0, %v452_v6  ;;  %396 = vmatpush3.bf16.msra.mxu1 %v395_v14  ;;  %v401_v19 = vpack.c.bf16 %v124_v18, %v123_v17  ;;  %v125_v20 = vld [vmem:[%s581_s3 + $0x30] sm:$0xff]  ;;  %v126_v21 = vld [vmem:[%s581_s3 + $0x38] sm:$0xff]  ;;  %v214_v27 = vld [vmem:[%s583_s5] sm:$0xff]  ;;  %s310_s2 = sshll.u32 %s454_s1, 4  ;;  %vm302_vm5 = vcmask 517120   ;;  %s311_s2 = int_to_ptr.vmem [resolvable:$true] %s310_s2 }
   0x8   :  { %351 = vmatmul.mubr.msk.f32.vlgmr.msra.gmra.mrb[0].mxu0 %vm38_vm1, %v35_v15  ;;  %397 = vmatprep.subr.bf16.mxu1 %v450_v4  ;;  %v404_v22 = vpack.c.bf16 %v126_v21, %v125_v20  ;;  %v215_v28 = vld [vmem:[%s583_s5 + $0x8] sm:$0xff]  ;;  %v216_v30 = vld [vmem:[%s583_s5 + $0x10] sm:$0xff]  ;;  %v217_v31 = vld [vmem:[%s583_s5 + $0x18] sm:$0xff]  ;;  %p431_p1 = scmp.lt.s32.totalorder %s311_s2, %s311_s2 }
   0x9   :  { %388 = vmatprep.mubr.msk.f32.mxu0 %vm451_vm0, %v452_v6  ;;  %v407_v29 = vpack.c.bf16 %v215_v28, %v214_v27  ;;  %v410_v32 = vpack.c.bf16 %v217_v31, %v216_v30  ;;  %v218_v33 = vld [vmem:[%s583_s5 + $0x20] sm:$0xff]  ;;  %v219_v34 = vld [vmem:[%s583_s5 + $0x28] sm:$0xff]  ;;  %v220_v36 = vld [vmem:[%s583_s5 + $0x30] sm:$0xff] }
   0xa   :  { %v413_v35 = vpack.c.bf16 %v219_v34, %v218_v33  ;;  %v221_v37 = vld [vmem:[%s583_s5 + $0x38] sm:$0xff]  ;;  %v320_v39 = vld [vmem:[%s582_s4] ss:$0 sm:$0xff]  ;;  %s426_s4 = scalar_lea.vmem %s311_s2, 32 }
   0xb   :  { %399 = vmatpush3.bf16.msra.mxu1 %v398_v16  ;;  %408 = vmatpush3.bf16.msra.mxu0 %v407_v29  ;;  %v416_v38 = vpack.c.bf16 %v221_v37, %v220_v36  ;;  %v323_v48 = vld [vmem:[%s584_s6] ss:$0 sm:$0xff]  ;;  %p427_p0 = scmp.ne.s32.totalorder %s311_s2, %s426_s4  ;;  %p432_p2 = scmp.lt.s32.totalorder %s426_s4, %s426_s4 }
   0xc   :  { %400 = vmatprep.subr.bf16.mxu1 %v450_v4  ;;  %409 = vmatprep.subr.bf16.mxu0 %v450_v4 }
   0xd   :  { %p433_p3 = por %p432_p2, %p431_p1 }
   0xf   :  { %402 = vmatpush3.bf16.msra.mxu1 %v401_v19  ;;  %411 = vmatpush3.bf16.msra.mxu0 %v410_v32  ;;  %p434_p4 = pnand %p433_p3, %p427_p0 }
  0x10   :  { %403 = vmatprep.subr.bf16.mxu1 %v450_v4  ;;  %412 = vmatprep.subr.bf16.mxu0 %v450_v4 }
  0x13   :  { %405 = vmatpush3.bf16.msra.mxu1 %v404_v22  ;;  %414 = vmatpush3.bf16.msra.mxu0 %v413_v35 }
  0x14   :  { %415 = vmatprep.subr.bf16.mxu0 %v450_v4 }
  0x17   :  { %417 = vmatpush3.bf16.msra.mxu0 %v416_v38 }
  0x84   :  { %v116_v23 = vpop.permute.xlu0 %115 }
  0xdb   :  { %v108_v24 = vpop.f32.mrb[0].mxu0 }
  0xdc   :  { %v118_v25 = vmul.f32 %v116_v23, %v108_v24  ;;  %v352_v26 = vpop.f32.mrb[1].mxu0 }
  0xde   :  { %370 = vmatmul.mubr.msk.f32.vlgmr.msra.gmra.mrb[0].mxu1 %vm134_vm3, %v118_v25 }
 0x1b1   :  { %v204_v40 = vpop.f32.mrb[0].mxu1 }
 0x1b2   :  { %v205_v41 = vadd.f32 %v320_v39, %v204_v40  ;;  %v371_v42 = vpop.f32.mrb[1].mxu1 }
 0x1b4   :  { %v209_v43 = vmin.f32 %v205_v41, 0.0  ;;  %vm208_vm4 = vcmp.gt.f32.partialorder %v205_v41, 0.0 }
 0x1b6   :  { %v210_v44 = vmul.f32 1.442695, %v209_v43 }
 0x1b8   :  { %424 = vpow2.f32 %v210_v44 }
 0x1c2   :  { %v425_v45 = vpop.eup %424 }
 0x1c3   :  { %v322_v46 = vadd.f32 -1.0, %v425_v45 }
 0x1c5   :  { %v213_v47 = vsel %vm208_vm4, %v205_v41, %v322_v46 }
 0x1c6   :  { %389 = vmatmul.mubr.msk.f32.vlgmr.msra.gmra.mrb[2].mxu0 %vm134_vm3, %v213_v47 }
 0x299   :  { %v298_v49 = vpop.f32.mrb[2].mxu0 }
 0x29a   :  { %v299_v50 = vadd.f32 %v323_v48, %v298_v49  ;;  %v390_v51 = vpop.f32.mrb[3].mxu0 }
 0x29c   :  { %303 = vst.msk [vmem:[#allocation2] sm:$0x3] %vm302_vm5, %v299_v50 }
 0x29d   :  { %437 = shalt.err (!%p434_p4)
}
 0x29e   :  { %s438_s18 = scalar_lea.hbm %s585_s7, 32 }
 0x29f   :  { %p439_p5 = scmp.ne.s32.totalorder %s585_s7, %s438_s18  ;;  %p442_p6 = scmp.lt.u32.totalorder %s438_s18, %s585_s7 }
 0x2a1   :  { %p444_p7 = pnand %p442_p6, %p439_p5 }
 0x2a3   :  { %447 = shalt.err (!%p444_p7)
}
 0x2a4   :  { %313 = dma.vmem_to_hbm [thread:$0]  %s311_s2, 32, %s585_s7, [#allocation3]  }
 0x2a5   :  { %448 = dma.done.wait [#allocation3], 32  }
 0x2a6   :  { %449 = vsyncadd [#allocation3], 4294967264 }
 0x2a7   :  { %317 = vsyncpa [#allocation3], 1 }

// kernel: gcn_forward.3
= control target key start
LH: loop header
LB: loop body
LE: loop exit
PB: predicated region body
PF: predicated region fallthrough
CT: control target
= control target key end

     0   :  { %s5286_s17 = smov 0   ;;  %s7413_s0 = inlined_call_operand.vmem [shape: f32[16,9], index: 0, kind: input, shape index: {}]   ;;  %s7414_s1 = inlined_call_operand.vmem [shape: f32[256,1], index: 1, kind: input, shape index: {}]   ;;  %s7415_s2 = inlined_call_operand.vmem [shape: s32[256,1], index: 2, kind: input, shape index: {}]   ;;  %s7416_s3 = inlined_call_operand.vmem [shape: s32[1,256], index: 3, kind: input, shape index: {}]   ;;  %s7417_s4 = inlined_call_operand.vmem [shape: f32[1,16], index: 4, kind: input, shape index: {}]   ;;  %s7418_s5 = inlined_call_operand.vmem [shape: f32[1,16], index: 5, kind: input, shape index: {}]   ;;  %s7419_s6 = inlined_call_operand.vmem [shape: f32[16,9,32], index: 6, kind: input, shape index: {}]   ;;  %s7420_s7 = inlined_call_operand.vmem [shape: f32[9,32], index: 7, kind: input, shape index: {}]   ;;  %s7421_s8 = inlined_call_operand.vmem [shape: f32[9,32], index: 8, kind: input, shape index: {}]   ;;  %s7422_s9 = inlined_call_operand.vmem [shape: f32[1,32], index: 9, kind: input, shape index: {}]   ;;  %s7423_s10 = inlined_call_operand.vmem [shape: f32[16,1], index: 10, kind: input, shape index: {}]   ;;  %s7424_s11 = inlined_call_operand.vmem [shape: f32[16,32], index: 11, kind: output, shape index: {}]  }
   0x1 LB: > { %s5292_s18 = sadd.s32 4294967295, %s5201_s17   ;;  %p4392_p0 = scmp.ge.s32.totalorder %s5201_s17, 1  ;;  %s5201_s17 = sphi %s5286_s17, %s21_s17  }
   0x2   : > { %p352_p1 = scmp.lt.s32.totalorder %s5201_s17, 3 }
   0x4   : > { %p353_p2 = pnand %p4392_p0, %p352_p1 }
   0x6   : > { %356 = sbr.rel (%p353_p2) target bundleno = 1185 (0x4a1), region = 64 }
   0xd   : > { %s4393_s19 = sshll.u32 %s5292_s18, 4  ;;  %p407_p3 = scmp.lt.s32.totalorder %s5292_s18, 1 }
   0xe   : > { %p396_p4 = scmp.lt.s32.totalorder %s4393_s19, 31  ;;  %p4397_p5 = scmp.ne.s32.totalorder %s5292_s18, 0 }
   0xf   : > { %s5299_s20 = scalar_select %p407_p3, %s5292_s18, 1 }
  0x10   : > { %s7792_s19 = smov (!%p396_p4, %s4393_s19), 31  ;;  %414 = sbr.rel (%p4397_p5) target bundleno = 23 (0x17), region = 68 }
  0x11   : > { %s409_s23 = scalar_lea.vmem %s7416_s3, %s5299_s20  ;;  %s4394_s24 = sshll.u32 %s7792_s19, 3  ;;  %vm415_vm0 = vcmask (!%p4397_p5), 261120   ;;  %v5203_v0 = vmov (!%p4397_p5), 0.0  }
  0x12   : > { %s5308_s27 = scalar_lea.vmem %s7414_s1, %s4394_s24  ;;  %s5313_s30 = scalar_lea.vmem %s7415_s2, %s4394_s24  ;;  %416 = vst.msk [vmem:[%s7424_s11] sm:$0xff] (!%p4397_p5), %vm415_vm0, %v5203_v0  ;;  %417 = vst.msk [vmem:[%s7424_s11 + $0x8] sm:$0xff] (!%p4397_p5), %vm415_vm0, %v5203_v0 }
  0x17 PF: > { %v420_v1 = vld [vmem:[%s5308_s27 + $0x10] sm:$0xff]  ;;  %v418_v2 = vld [vmem:[%s5308_s27] sm:$0xff]  ;;  %v5204_v3 = vmov 0   ;;  %v421_v4 = vld [vmem:[%s5308_s27 + $0x18] sm:$0xff]  ;;  %vm685_vm3 = vcmask 130048   ;;  %s4544_s19 = sshll.u32 %s5292_s18, 7 }
  0x18   : > { %5121 = vset.pattern.permute.xlu1 %v5204_v3  ;;  %5120 = vset.pattern.permute.xlu0 %v5204_v3  ;;  %v419_v5 = vld [vmem:[%s5308_s27 + $0x8] sm:$0xff]  ;;  %v422_v7 = vld [vmem:[%s5308_s27 + $0x20] sm:$0xff]  ;;  %v425_v8 = vld [vmem:[%s5308_s27 + $0x38] sm:$0xff]  ;;  %p4548_p6 = scmp.ne.s32.totalorder %s5292_s18, 1 }
  0x19   : > { %447 = vperm.xlu1 %5121, %v420_v1   ;;  %437 = vperm.xlu0 %5120, %v418_v2   ;;  %v423_v6 = vld [vmem:[%s5308_s27 + $0x28] sm:$0xff]  ;;  %v424_v9 = vld [vmem:[%s5308_s27 + $0x30] sm:$0xff]  ;;  %v426_v11 = vld [vmem:[%s5308_s27 + $0x40] sm:$0xff] }
  0x1a   : > { %v427_v10 = vld [vmem:[%s5308_s27 + $0x48] sm:$0xff]  ;;  %v429_v12 = vld [vmem:[%s5308_s27 + $0x58] sm:$0xff]  ;;  %v428_v13 = vld [vmem:[%s5308_s27 + $0x50] sm:$0xff] }
  0x1b   : > { %v431_v14 = vld [vmem:[%s5308_s27 + $0x68] sm:$0xff]  ;;  %v430_v15 = vld [vmem:[%s5308_s27 + $0x60] sm:$0xff]  ;;  %v433_v16 = vld [vmem:[%s5308_s27 + $0x78] sm:$0xff] }
  0x1c   : > { %v432_v17 = vld [vmem:[%s5308_s27 + $0x70] sm:$0xff]  ;;  %v577_v18 = vld [vmem:[%s5313_s30 + $0x8] sm:$0xff]  ;;  %v576_v19 = vld [vmem:[%s5313_s30] sm:$0xff] }
  0x1d   : > { %452 = vperm.xlu1 %5121, %v421_v4   ;;  %442 = vperm.xlu0 %5120, %v419_v5   ;;  %v579_v20 = vld [vmem:[%s5313_s30 + $0x18] sm:$0xff]  ;;  %v578_v21 = vld [vmem:[%s5313_s30 + $0x10] sm:$0xff]  ;;  %v682_v22 = vld [vmem:[%s7413_s0] sm:$0xff] }
  0x1e   : > { %v683_v23 = vld [vmem:[%s7413_s0 + $0x8] sm:$0xff]  ;;  %v580_v26 = vld [vmem:[%s5313_s30 + $0x20] sm:$0xff]  ;;  %v583_v27 = vld [vmem:[%s5313_s30 + $0x38] sm:$0xff] }
  0x1f   : > { %v684_v24 = vpack.c.bf16 %v683_v23, %v682_v22  ;;  %v581_v25 = vld [vmem:[%s5313_s30 + $0x28] sm:$0xff]  ;;  %v582_v28 = vld [vmem:[%s5313_s30 + $0x30] sm:$0xff]  ;;  %v584_v30 = vld [vmem:[%s5313_s30 + $0x40] sm:$0xff]  ;;  %v7425_v22 = vlaneseq }
  0x20   : > { %v585_v29 = vld [vmem:[%s5313_s30 + $0x48] sm:$0xff]  ;;  %v587_v31 = vld [vmem:[%s5313_s30 + $0x58] sm:$0xff]  ;;  %v586_v32 = vld [vmem:[%s5313_s30 + $0x50] sm:$0xff] }
  0x21   : > { %462 = vperm.xlu1 %5121, %v423_v6   ;;  %457 = vperm.xlu0 %5120, %v422_v7   ;;  %v589_v33 = vld [vmem:[%s5313_s30 + $0x68] sm:$0xff]  ;;  %v588_v34 = vld [vmem:[%s5313_s30 + $0x60] sm:$0xff]  ;;  %v591_v35 = vld [vmem:[%s5313_s30 + $0x78] sm:$0xff] }
  0x22   : > { %4732 = vmatprep.subr.bf16.mxu0 %v684_v24  ;;  %v590_v36 = vld [vmem:[%s5313_s30 + $0x70] sm:$0xff]  ;;  %v5363_v37 = vld [vmem:[%s7417_s4] ss:$0 sm:$0xff] }
  0x23   : > { %4733 = vmatpush3.bf16.msra.mxu0 %v684_v24  ;;  %v5368_v38 = vld [vmem:[%s7418_s5] ss:$0 sm:$0xff] }
  0x25   : > { %472 = vperm.xlu1 %5121, %v425_v8   ;;  %467 = vperm.xlu0 %5120, %v424_v9  }
  0x29   : > { %482 = vperm.xlu1 %5121, %v427_v10   ;;  %477 = vperm.xlu0 %5120, %v426_v11  }
  0x2d   : > { %492 = vperm.xlu1 %5121, %v429_v12   ;;  %487 = vperm.xlu0 %5120, %v428_v13  }
  0x31   : > { %502 = vperm.xlu1 %5121, %v431_v14   ;;  %497 = vperm.xlu0 %5120, %v430_v15  }
  0x35   : > { %512 = vperm.xlu1 %5121, %v433_v16   ;;  %507 = vperm.xlu0 %5120, %v432_v17  }
  0x39   : > { %598 = vperm.xlu1 %5121, %v577_v18   ;;  %595 = vperm.xlu0 %5120, %v576_v19  }
  0x3d   : > { %604 = vperm.xlu1 %5121, %v579_v20   ;;  %601 = vperm.xlu0 %5120, %v578_v21  }
  0x41   : > { %610 = vperm.xlu1 %5121, %v581_v25   ;;  %607 = vperm.xlu0 %5120, %v580_v26  }
  0x45   : > { %616 = vperm.xlu1 %5121, %v583_v27   ;;  %613 = vperm.xlu0 %5120, %v582_v28  }
  0x49   : > { %622 = vperm.xlu1 %5121, %v585_v29   ;;  %619 = vperm.xlu0 %5120, %v584_v30  }
  0x4d   : > { %628 = vperm.xlu1 %5121, %v587_v31   ;;  %625 = vperm.xlu0 %5120, %v586_v32   ;;  %v5432_v31 = vand.u32 127, %v7425_v22 }
  0x4f   : > { %7447 = vst [vmem:[#allocation2_spill] sm:$0xff] %v5432_v31 }
  0x51   : > { %634 = vperm.xlu1 %5121, %v589_v33   ;;  %631 = vperm.xlu0 %5120, %v588_v34  }
  0x55   : > { %640 = vperm.xlu1 %5121, %v591_v35   ;;  %637 = vperm.xlu0 %5120, %v590_v36  }
  0x98   : > { %v448_v39 = vpop.permute.xlu1 %447  ;;  %v438_v40 = vpop.permute.xlu0 %437 }
  0x99   : > { %v523_v41 = vmul.f32 %v5363_v37, %v448_v39  ;;  %v521_v42 = vmul.f32 %v5363_v37, %v438_v40 }
  0x9b   : > { %v546_v43 = vadd.f32 %v5368_v38, %v523_v41  ;;  %v544_v44 = vadd.f32 %v5368_v38, %v521_v42 }
  0x9c   : > { %v453_v45 = vpop.permute.xlu1 %452  ;;  %v443_v46 = vpop.permute.xlu0 %442 }
  0x9d   : > { %v5374_v47 = vmax.f32 %v544_v44, 0.0  ;;  %v524_v48 = vmul.f32 %v5363_v37, %v453_v45  ;;  %v522_v49 = vmul.f32 %v5363_v37, %v443_v46  ;;  %v5378_v50 = vmax.f32 %v546_v43, 0.0 }
  0x9e   : > { %v7426_v44 = vmov 0.0  }
  0x9f   : > { %v545_v51 = vadd.f32 %v5368_v38, %v522_v49  ;;  %997 = vperm.xlu0 %5120, %v5374_v47   ;;  %v547_v54 = vadd.f32 %v5368_v38, %v524_v48 }
  0xa0   : > { %v463_v52 = vpop.permute.xlu1 %462  ;;  %v458_v53 = vpop.permute.xlu0 %457 }
  0xa1   : > { %v5383_v55 = vmax.f32 %v545_v51, 0.0  ;;  %v526_v56 = vmul.f32 %v5363_v37, %v463_v52  ;;  %v525_v57 = vmul.f32 %v5363_v37, %v458_v53  ;;  %v5391_v62 = vmax.f32 %v547_v54, 0.0 }
  0xa2   : > { %v5206_v54 = vmov 1  }
  0xa3   : > { %v548_v58 = vadd.f32 %v5368_v38, %v525_v57  ;;  %1007 = vperm.xlu0 %5120, %v5378_v50   ;;  %1002 = vperm.xlu1 %5121, %v5383_v55   ;;  %v549_v59 = vadd.f32 %v5368_v38, %v526_v56 }
  0xa4   : > { %v473_v60 = vpop.permute.xlu1 %472  ;;  %v468_v61 = vpop.permute.xlu0 %467 }
  0xa5   : > { %v5393_v63 = vmax.f32 %v548_v58, 0.0  ;;  %v528_v0 = vmul.f32 %v5363_v37, %v473_v60  ;;  %v527_v1 = vmul.f32 %v5363_v37, %v468_v61  ;;  %v5400_v3 = vmax.f32 %v549_v59, 0.0 }
  0xa7   : > { %v550_v2 = vadd.f32 %v5368_v38, %v527_v1  ;;  %1012 = vperm.xlu1 %5121, %v5391_v62   ;;  %1017 = vperm.xlu0 %5120, %v5393_v63   ;;  %v551_v6 = vadd.f32 %v5368_v38, %v528_v0 }
  0xa8   : > { %v483_v4 = vpop.permute.xlu1 %482  ;;  %v478_v5 = vpop.permute.xlu0 %477 }
  0xa9   : > { %v5403_v7 = vmax.f32 %v550_v2, 0.0  ;;  %v530_v8 = vmul.f32 %v5363_v37, %v483_v4  ;;  %v529_v9 = vmul.f32 %v5363_v37, %v478_v5  ;;  %v5411_v14 = vmax.f32 %v551_v6, 0.0 }
  0xab   : > { %v552_v10 = vadd.f32 %v5368_v38, %v529_v9  ;;  %1022 = vperm.xlu1 %5121, %v5400_v3   ;;  %1027 = vperm.xlu0 %5120, %v5403_v7   ;;  %v553_v11 = vadd.f32 %v5368_v38, %v530_v8 }
  0xac   : > { %v493_v12 = vpop.permute.xlu1 %492  ;;  %v488_v13 = vpop.permute.xlu0 %487 }
  0xad   : > { %v5413_v15 = vmax.f32 %v552_v10, 0.0  ;;  %v532_v16 = vmul.f32 %v5363_v37, %v493_v12  ;;  %v531_v17 = vmul.f32 %v5363_v37, %v488_v13  ;;  %v5420_v19 = vmax.f32 %v553_v11, 0.0 }
  0xaf   : > { %v554_v18 = vadd.f32 %v5368_v38, %v531_v17  ;;  %1032 = vperm.xlu1 %5121, %v5411_v14   ;;  %1037 = vperm.xlu0 %5120, %v5413_v15   ;;  %v555_v23 = vadd.f32 %v5368_v38, %v532_v16 }
  0xb0   : > { %v503_v20 = vpop.permute.xlu1 %502  ;;  %v498_v21 = vpop.permute.xlu0 %497 }
  0xb1   : > { %v5423_v24 = vmax.f32 %v554_v18, 0.0  ;;  %v534_v25 = vmul.f32 %v5363_v37, %v503_v20  ;;  %v533_v26 = vmul.f32 %v5363_v37, %v498_v21  ;;  %v5434_v32 = vmax.f32 %v555_v23, 0.0 }
  0xb3   : > { %v556_v27 = vadd.f32 %v5368_v38, %v533_v26  ;;  %1042 = vperm.xlu1 %5121, %v5420_v19   ;;  %1047 = vperm.xlu0 %5120, %v5423_v24   ;;  %v557_v28 = vadd.f32 %v5368_v38, %v534_v25  ;;  %7448 = vst [vmem:[#allocation3_spill] sm:$0xff] %v5434_v32 }
  0xb4   : > { %v513_v29 = vpop.permute.xlu1 %512  ;;  %v508_v30 = vpop.permute.xlu0 %507 }
  0xb5   : > { %v5436_v33 = vmax.f32 %v556_v27, 0.0  ;;  %v536_v34 = vmul.f32 %v5363_v37, %v513_v29  ;;  %v535_v35 = vmul.f32 %v5363_v37, %v508_v30  ;;  %v5443_v39 = vmax.f32 %v557_v28, 0.0 }
  0xb7   : > { %v558_v36 = vadd.f32 %v5368_v38, %v535_v35  ;;  %1052 = vperm.xlu1 %5121, %v5434_v32   ;;  %1057 = vperm.xlu0 %5120, %v5436_v33   ;;  %v559_v42 = vadd.f32 %v5368_v38, %v536_v34  ;;  %v5207_v34 = vmov 2   ;;  %v5208_v35 = vmov 3  }
  0xb8   : > { %v599_v40 = vpop.permute.xlu1 %598  ;;  %v596_v41 = vpop.permute.xlu0 %595 }
  0xb9   : > { %v5446_v43 = vmax.f32 %v558_v36, 0.0  ;;  %vm643_vm1 = vcmp.eq.s32.totalorder %v5432_v31, %v599_v40  ;;  %vm642_vm2 = vcmp.eq.s32.totalorder %v5432_v31, %v596_v41  ;;  %v5454_v38 = vmax.f32 %v559_v42, 0.0  ;;  %v815_v36 = vld [vmem:[%s7419_s6] sm:$0xff]  ;;  %v816_v40 = vld [vmem:[%s7419_s6 + $0x8] sm:$0x1] }
  0xba   : > { %v658_v37 = vsel %vm642_vm2, 1.0, %v7426_v44  ;;  %v659_v45 = vsel %vm643_vm1, 1.0, %v7426_v44  ;;  %vm891_vm2 = vcmask 1043456   ;;  %v863_v41 = vld [vmem:[%s7420_s7] sm:$0xff]  ;;  %v847_v42 = vpack.c.bf16 %v816_v40, %v815_v36 }
  0xbb   : > { %7449 = vst [vmem:[#allocation4_spill] sm:$0xff] %v5446_v43  ;;  %1062 = vperm.xlu1 %5121, %v5443_v39   ;;  %1067 = vperm.xlu0 %5120, %v5446_v43   ;;  %v674_v46 = vpack.c.bf16 %v659_v45, %v658_v37  ;;  %v5209_v37 = vmov 65535  }
  0xbc   : > { %v605_v48 = vpop.permute.xlu1 %604  ;;  %v602_v49 = vpop.permute.xlu0 %601  ;;  %v893_v45 = vsel %vm891_vm2, 4294967295, %v5209_v37 }
  0xbd   : > { %vm645_vm4 = vcmp.eq.s32.totalorder %v5432_v31, %v605_v48  ;;  %vm644_vm5 = vcmp.eq.s32.totalorder %v5432_v31, %v602_v49  ;;  %4734 = vmatprep.mubr.msk.bf16.mxu0 %vm685_vm3, %v674_v46  ;;  %v864_v46 = vld [vmem:[%s7420_s7 + $0x8] sm:$0x1] }
  0xbe   : > { %v661_v51 = vsel %vm645_vm4, 1.0, %v7426_v44  ;;  %v660_v52 = vsel %vm644_vm5, 1.0, %v7426_v44  ;;  %v865_v49 = vpack.c.bf16 %v864_v46, %v863_v41  ;;  %vm866_vm4 = vcmask 72704  }
  0xbf   : > { %v675_v53 = vpack.c.bf16 %v661_v51, %v660_v52  ;;  %1072 = vperm.xlu1 %5121, %v5454_v38   ;;  %5122 = vset.pattern.permute.xlu0 %v5206_v54  ;;  %vm5222_vm5 = vmmov 0  }
  0xc0   : > { %v611_v56 = vpop.permute.xlu1 %610  ;;  %1292 = vperm.xlu0 %5122, %v5374_v47   ;;  %v608_v57 = vpop.permute.xlu0 %607 }
  0xc1   : > { %vm647_vm6 = vcmp.eq.s32.totalorder %v5432_v31, %v611_v56  ;;  %vm646_vm7 = vcmp.eq.s32.totalorder %v5432_v31, %v608_v57  ;;  %4735 = vmatmul.mubr.msk.bf16.vlgmr.msra.gmra.mrb[0].mxu0 %vm685_vm3, %v675_v53  ;;  %v5210_v53 = vmov 4  }
  0xc2   : > { %v663_v58 = vsel %vm647_vm6, 1.0, %v7426_v44  ;;  %v662_v59 = vsel %vm646_vm7, 1.0, %v7426_v44 }
  0xc3   : > { %v676_v60 = vpack.c.bf16 %v663_v58, %v662_v59  ;;  %5123 = vset.pattern.permute.xlu1 %v5206_v54 }
  0xc4   : > { %v617_v61 = vpop.permute.xlu1 %616  ;;  %1296 = vperm.xlu1 %5123, %v5383_v55   ;;  %1304 = vperm.xlu0 %5122, %v5391_v62   ;;  %v614_v0 = vpop.permute.xlu0 %613 }
  0xc5   : > { %vm649_vm8 = vcmp.eq.s32.totalorder %v5432_v31, %v617_v61  ;;  %vm648_vm9 = vcmp.eq.s32.totalorder %v5432_v31, %v614_v0  ;;  %4738 = vmatprep.mubr.msk.bf16.mxu0 %vm685_vm3, %v676_v60  ;;  %v817_v60 = vld [vmem:[%s7419_s6 + $0x10] sm:$0xff]  ;;  %v818_v61 = vld [vmem:[%s7419_s6 + $0x18] sm:$0x1] }
  0xc6   : > { %v665_v1 = vsel %vm649_vm8, 1.0, %v7426_v44  ;;  %v664_v2 = vsel %vm648_vm9, 1.0, %v7426_v44  ;;  %v848_v0 = vpack.c.bf16 %v818_v61, %v817_v60 }
  0xc7   : > { %v677_v4 = vpack.c.bf16 %v665_v1, %v664_v2 }
  0xc8   : > { %v623_v5 = vpop.permute.xlu1 %622  ;;  %1300 = vperm.xlu1 %5123, %v5378_v50   ;;  %1312 = vperm.xlu0 %5122, %v5400_v3   ;;  %v620_v6 = vpop.permute.xlu0 %619 }
  0xc9   : > { %vm651_vm10 = vcmp.eq.s32.totalorder %v5432_v31, %v623_v5  ;;  %vm650_vm11 = vcmp.eq.s32.totalorder %v5432_v31, %v620_v6  ;;  %4739 = vmatmul.mubr.msk.bf16.gmra.mrb[4].mxu0 %vm685_vm3, %v677_v4 }
  0xca   : > { %v667_v8 = vsel %vm651_vm10, 1.0, %v7426_v44  ;;  %v666_v9 = vsel %vm650_vm11, 1.0, %v7426_v44 }
  0xcb   : > { %v678_v10 = vpack.c.bf16 %v667_v8, %v666_v9 }
  0xcc   : > { %v629_v11 = vpop.permute.xlu1 %628  ;;  %1308 = vperm.xlu1 %5123, %v5393_v63   ;;  %1320 = vperm.xlu0 %5122, %v5411_v14   ;;  %v626_v12 = vpop.permute.xlu0 %625 }
  0xcd   : > { %vm653_vm12 = vcmp.eq.s32.totalorder %v5432_v31, %v629_v11  ;;  %vm652_vm13 = vcmp.eq.s32.totalorder %v5432_v31, %v626_v12  ;;  %4742 = vmatprep.mubr.msk.bf16.mxu0 %vm685_vm3, %v678_v10  ;;  %v819_v10 = vld [vmem:[%s7419_s6 + $0x20] sm:$0xff]  ;;  %v820_v11 = vld [vmem:[%s7419_s6 + $0x28] sm:$0x1] }
  0xce   : > { %v669_v13 = vsel %vm653_vm12, 1.0, %v7426_v44  ;;  %v668_v16 = vsel %vm652_vm13, 1.0, %v7426_v44  ;;  %v849_v12 = vpack.c.bf16 %v820_v11, %v819_v10  ;;  %vm4203_vm12 = vcmask 261120  }
  0xcf   : > { %v679_v17 = vpack.c.bf16 %v669_v13, %v668_v16  ;;  %vm4236_vm13 = vcmask (!%p4548_p6), 1040384  }
  0xd0   : > { %v635_v18 = vpop.permute.xlu1 %634  ;;  %1316 = vperm.xlu1 %5123, %v5403_v7   ;;  %1328 = vperm.xlu0 %5122, %v5420_v19   ;;  %v632_v20 = vpop.permute.xlu0 %631 }
  0xd1   : > { %vm655_vm14 = vcmp.eq.s32.totalorder %v5432_v31, %v635_v18  ;;  %vm654_vm15 = vcmp.eq.s32.totalorder %v5432_v31, %v632_v20  ;;  %4743 = vmatmul.mubr.msk.bf16.gmra.mrb[8].mxu0 %vm685_vm3, %v679_v17 }
  0xd2   : > { %v671_v21 = vsel %vm655_vm14, 1.0, %v7426_v44  ;;  %v670_v23 = vsel %vm654_vm15, 1.0, %v7426_v44  ;;  %vm5224_vm14 = vmmov (!%p4548_p6), 1  }
  0xd3   : > { %v680_v25 = vpack.c.bf16 %v671_v21, %v670_v23  ;;  %v5211_v21 = vmov 5   ;;  %vm5084_vm15 = vmpackc.low (!%p4548_p6), %vm4236_vm13, %vm5224_vm14 }
  0xd4   : > { %v641_v26 = vpop.permute.xlu1 %640  ;;  %1324 = vperm.xlu1 %5123, %v5413_v15   ;;  %1336 = vperm.xlu0 %5122, %v5434_v32   ;;  %v638_v27 = vpop.permute.xlu0 %637 }
  0xd5   : > { %vm657_vm0 = vcmp.eq.s32.totalorder %v5432_v31, %v641_v26  ;;  %vm656_vm1 = vcmp.eq.s32.totalorder %v5432_v31, %v638_v27  ;;  %4746 = vmatprep.mubr.msk.bf16.mxu0 %vm685_vm3, %v680_v25 }
  0xd6   : > { %v673_v28 = vsel %vm657_vm0, 1.0, %v7426_v44  ;;  %v672_v29 = vsel %vm656_vm1, 1.0, %v7426_v44 }
  0xd7   : > { %v681_v30 = vpack.c.bf16 %v673_v28, %v672_v29 }
  0xd8   : > { %1332 = vperm.xlu1 %5123, %v5423_v24   ;;  %1344 = vperm.xlu0 %5122, %v5443_v39  }
  0xd9   : > { %4747 = vmatmul.mubr.msk.bf16.gmra.mrb[12].mxu0 %vm685_vm3, %v681_v30  ;;  %vm892_vm3 = vcmask 1044480  }
  0xda   : > { %v5546_v48 = vsel %vm892_vm3, %v893_v45, 0 }
  0xdb   : > { %v896_v51 = vand.u32 %v5546_v48, %v847_v42  ;;  %v1092_v52 = vand.u32 %v5546_v48, %v865_v49  ;;  %v5583_v4 = vand.u32 %v5546_v48, %v848_v0  ;;  %v5611_v17 = vand.u32 %v5546_v48, %v849_v12 }
  0xdc   : > { %1340 = vperm.xlu1 %5123, %v5436_v33   ;;  %1352 = vperm.xlu0 %5122, %v5454_v38   ;;  %v5212_v49 = vmov 6  }
  0xdd   : > { %4750 = vmatprep.subr.bf16.mxu1 %v896_v51  ;;  %4768 = vmatprep.subr.bf16.mxu0 %v1092_v52 }
  0xde   : > { %4751 = vmatpush3.bf16.msra.mxu1 %v896_v51  ;;  %4769 = vmatpush3.bf16.msra.mxu0 %v1092_v52 }
  0xdf   : > { %4786 = vmatprep.subr.bf16.mxu1 %v5583_v4  ;;  %4804 = vmatprep.subr.bf16.mxu0 %v5611_v17 }
  0xe0   : > { %1348 = vperm.xlu1 %5123, %v5446_v43   ;;  %5125 = vset.pattern.permute.xlu0 %v5207_v34 }
  0xe1   : > { %1492 = vperm.xlu0 %5125, %v5383_v55  }
  0xe4   : > { %5124 = vset.pattern.permute.xlu1 %v5207_v34 }
  0xe5   : > { %1488 = vperm.xlu1 %5124, %v5374_v47   ;;  %1504 = vperm.xlu0 %5125, %v5393_v63  }
  0xe9   : > { %1496 = vperm.xlu1 %5124, %v5378_v50   ;;  %1512 = vperm.xlu0 %5125, %v5403_v7  }
  0xed   : > { %1500 = vperm.xlu1 %5124, %v5391_v62   ;;  %1520 = vperm.xlu0 %5125, %v5413_v15  }
  0xf1   : > { %1508 = vperm.xlu1 %5124, %v5400_v3   ;;  %1528 = vperm.xlu0 %5125, %v5423_v24  }
  0xf5   : > { %1516 = vperm.xlu1 %5124, %v5411_v14   ;;  %1536 = vperm.xlu0 %5125, %v5436_v33  }
  0xf9   : > { %1524 = vperm.xlu1 %5124, %v5420_v19   ;;  %1544 = vperm.xlu0 %5125, %v5446_v43  }
  0xfd   : > { %1532 = vperm.xlu1 %5124, %v5434_v32   ;;  %5126 = vset.pattern.permute.xlu0 %v5208_v35 }
  0xfe   : > { %1684 = vperm.xlu0 %5126, %v5374_v47  }
 0x101   : > { %1540 = vperm.xlu1 %5124, %v5443_v39  }
 0x102   : > { %1696 = vperm.xlu0 %5126, %v5391_v62  }
 0x105   : > { %1548 = vperm.xlu1 %5124, %v5454_v38  }
 0x106   : > { %1704 = vperm.xlu0 %5126, %v5400_v3  }
 0x109   : > { %5127 = vset.pattern.permute.xlu1 %v5208_v35 }
 0x10a   : > { %1688 = vperm.xlu1 %5127, %v5383_v55   ;;  %1712 = vperm.xlu0 %5126, %v5411_v14  }
 0x10e   : > { %1692 = vperm.xlu1 %5127, %v5378_v50   ;;  %1720 = vperm.xlu0 %5126, %v5420_v19  }
 0x112   : > { %1700 = vperm.xlu1 %5127, %v5393_v63   ;;  %1728 = vperm.xlu0 %5126, %v5434_v32  }
 0x116   : > { %1708 = vperm.xlu1 %5127, %v5403_v7   ;;  %1736 = vperm.xlu0 %5126, %v5443_v39  }
 0x11a   : > { %1716 = vperm.xlu1 %5127, %v5413_v15   ;;  %1744 = vperm.xlu0 %5126, %v5454_v38  }
 0x11e   : > { %1724 = vperm.xlu1 %5127, %v5423_v24   ;;  %5129 = vset.pattern.permute.xlu0 %v5210_v53  ;;  %v5555_v54 = vpop.permute.xlu0 %997 }
 0x11f   : > { %1884 = vperm.xlu0 %5129, %v5383_v55  }
 0x122   : > { %v5558_v56 = vpop.permute.xlu1 %1002  ;;  %1732 = vperm.xlu1 %5127, %v5436_v33   ;;  %v5561_v57 = vpop.permute.xlu0 %1007 }
 0x123   : > { %1896 = vperm.xlu0 %5129, %v5393_v63  }
 0x126   : > { %v5564_v58 = vpop.permute.xlu1 %1012  ;;  %1740 = vperm.xlu1 %5127, %v5446_v43   ;;  %v5567_v59 = vpop.permute.xlu0 %1017 }
 0x127   : > { %1904 = vperm.xlu0 %5129, %v5403_v7  }
 0x12a   : > { %v5576_v1 = vpop.permute.xlu1 %1022  ;;  %5128 = vset.pattern.permute.xlu1 %v5210_v53  ;;  %v5578_v2 = vpop.permute.xlu0 %1027 }
 0x12b   : > { %1880 = vperm.xlu1 %5128, %v5374_v47   ;;  %1912 = vperm.xlu0 %5129, %v5413_v15  }
 0x12e   : > { %v5586_v5 = vpop.permute.xlu1 %1032  ;;  %v5588_v6 = vpop.permute.xlu0 %1037 }
 0x12f   : > { %1888 = vperm.xlu1 %5128, %v5378_v50   ;;  %1920 = vperm.xlu0 %5129, %v5423_v24  }
 0x132   : > { %v5592_v8 = vpop.permute.xlu1 %1042  ;;  %v5594_v9 = vpop.permute.xlu0 %1047 }
 0x133   : > { %1892 = vperm.xlu1 %5128, %v5391_v62   ;;  %1928 = vperm.xlu0 %5129, %v5436_v33  }
 0x136   : > { %v5604_v13 = vpop.permute.xlu1 %1052  ;;  %v5606_v16 = vpop.permute.xlu0 %1057 }
 0x137   : > { %1900 = vperm.xlu1 %5128, %v5400_v3   ;;  %1936 = vperm.xlu0 %5129, %v5446_v43  }
 0x13a   : > { %v5614_v18 = vpop.permute.xlu1 %1062  ;;  %v5616_v20 = vpop.permute.xlu0 %1067 }
 0x13b   : > { %1908 = vperm.xlu1 %5128, %v5411_v14   ;;  %5130 = vset.pattern.permute.xlu0 %v5211_v21 }
 0x13c   : > { %2076 = vperm.xlu0 %5130, %v5374_v47  }
 0x13e   : > { %v5620_v23 = vpop.permute.xlu1 %1072 }
 0x13f   : > { %1916 = vperm.xlu1 %5128, %v5420_v19   ;;  %v5623_v25 = vpop.permute.xlu0 %1292 }
 0x140   : > { %2088 = vperm.xlu0 %5130, %v5391_v62  }
 0x143   : > { %v5626_v26 = vpop.permute.xlu1 %1296  ;;  %1924 = vperm.xlu1 %5128, %v5434_v32   ;;  %v5629_v27 = vpop.permute.xlu0 %1304 }
 0x144   : > { %2096 = vperm.xlu0 %5130, %v5400_v3  }
 0x147   : > { %v5632_v28 = vpop.permute.xlu1 %1300  ;;  %1932 = vperm.xlu1 %5128, %v5443_v39   ;;  %v5635_v29 = vpop.permute.xlu0 %1312 }
 0x148   : > { %7450 = vst [vmem:[#allocation5_spill] sm:$0xff] %v5635_v29  ;;  %2104 = vperm.xlu0 %5130, %v5411_v14  }
 0x14b   : > { %v5638_v30 = vpop.permute.xlu1 %1308  ;;  %1940 = vperm.xlu1 %5128, %v5454_v38   ;;  %v5641_v34 = vpop.permute.xlu0 %1320 }
 0x14c   : > { %7451 = vst [vmem:[#allocation6_spill] sm:$0xff] %v5638_v30  ;;  %7452 = vst [vmem:[#allocation7_spill] sm:$0xff] %v5641_v34  ;;  %2112 = vperm.xlu0 %5130, %v5420_v19   ;;  %v7430_v34 = vmov 9  }
 0x14f   : > { %v5644_v35 = vpop.permute.xlu1 %1316  ;;  %5131 = vset.pattern.permute.xlu1 %v5211_v21  ;;  %v5646_v36 = vpop.permute.xlu0 %1328 }
 0x150   : > { %7453 = vst [vmem:[#allocation8_spill] sm:$0xff] %v5646_v36  ;;  %2080 = vperm.xlu1 %5131, %v5383_v55   ;;  %2120 = vperm.xlu0 %5130, %v5434_v32  }
 0x153   : > { %v5650_v40 = vpop.permute.xlu1 %1324  ;;  %v5652_v41 = vpop.permute.xlu0 %1336 }
 0x154   : > { %7454 = vst [vmem:[#allocation9_spill] sm:$0xff] %v5650_v40  ;;  %7455 = vst [vmem:[#allocation10_spill] sm:$0xff] %v5652_v41  ;;  %2084 = vperm.xlu1 %5131, %v5378_v50   ;;  %2128 = vperm.xlu0 %5130, %v5443_v39  }
 0x157   : > { %v5656_v42 = vpop.permute.xlu1 %1332  ;;  %v5658_v37 = vpop.permute.xlu0 %1344 }
 0x158   : > { %7456 = vst [vmem:[#allocation11_spill] sm:$0xff] %v5656_v42  ;;  %7457 = vst [vmem:[#allocation12_spill] sm:$0xff] %v5658_v37  ;;  %2092 = vperm.xlu1 %5131, %v5393_v63   ;;  %2136 = vperm.xlu0 %5130, %v5454_v38  }
 0x15b   : > { %v5662_v45 = vpop.permute.xlu1 %1340  ;;  %v5664_v46 = vpop.permute.xlu0 %1352 }
 0x15c   : > { %7458 = vst [vmem:[#allocation13_spill] sm:$0xff] %v5662_v45  ;;  %7459 = vst [vmem:[#allocation14_spill] sm:$0xff] %v5664_v46  ;;  %2100 = vperm.xlu1 %5131, %v5403_v7   ;;  %5133 = vset.pattern.permute.xlu0 %v5212_v49 }
 0x15d   : > { %2276 = vperm.xlu0 %5133, %v5383_v55  }
 0x15f   : > { %v5668_v51 = vpop.permute.xlu1 %1348 }
 0x160   : > { %7460 = vst [vmem:[#allocation15_spill] sm:$0xff] %v5668_v51  ;;  %2108 = vperm.xlu1 %5131, %v5413_v15   ;;  %v5671_v52 = vpop.permute.xlu0 %1492 }
 0x161   : > { %2288 = vperm.xlu0 %5133, %v5393_v63  }
 0x164   : > { %2116 = vperm.xlu1 %5131, %v5423_v24   ;;  %v5675_v53 = vpop.permute.xlu1 %1488  ;;  %v5677_v60 = vpop.permute.xlu0 %1504 }
 0x165   : > { %7461 = vst [vmem:[#allocation16_spill] sm:$0xff] %v5677_v60  ;;  %2296 = vperm.xlu0 %5133, %v5403_v7  }
 0x168   : > { %2124 = vperm.xlu1 %5131, %v5436_v33   ;;  %v5681_v61 = vpop.permute.xlu1 %1496  ;;  %v5683_v0 = vpop.permute.xlu0 %1512 }
 0x169   : > { %7462 = vst [vmem:[#allocation17_spill] sm:$0xff] %v5683_v0  ;;  %2304 = vperm.xlu0 %5133, %v5413_v15  }
 0x16c   : > { %2132 = vperm.xlu1 %5131, %v5446_v43   ;;  %v5687_v10 = vpop.permute.xlu1 %1500  ;;  %v5689_v11 = vpop.permute.xlu0 %1520 }
 0x16d   : > { %7463 = vst [vmem:[#allocation18_spill] sm:$0xff] %v5689_v11  ;;  %2312 = vperm.xlu0 %5133, %v5423_v24  }
 0x170   : > { %5132 = vset.pattern.permute.xlu1 %v5212_v49  ;;  %v5692_v12 = vpop.permute.xlu1 %1508  ;;  %v5694_v21 = vpop.permute.xlu0 %1528  ;;  %v5213_v49 = vmov 7  }
 0x171   : > { %7464 = vst [vmem:[#allocation19_spill] sm:$0xff] %v5692_v12  ;;  %7465 = vst [vmem:[#allocation20_spill] sm:$0xff] %v5694_v21  ;;  %2272 = vperm.xlu1 %5132, %v5374_v47   ;;  %2320 = vperm.xlu0 %5133, %v5436_v33  }
 0x174   : > { %v5698_v22 = vpop.permute.xlu1 %1516  ;;  %v5700_v44 = vpop.permute.xlu0 %1536 }
 0x175   : > { %7466 = vst [vmem:[#allocation21_spill] sm:$0xff] %v5698_v22  ;;  %7467 = vst [vmem:[#allocation22_spill] sm:$0xff] %v5700_v44  ;;  %2280 = vperm.xlu1 %5132, %v5378_v50   ;;  %2328 = vperm.xlu0 %5133, %v5446_v43  }
 0x178   : > { %v5704_v31 = vpop.permute.xlu1 %1524  ;;  %v5706_v37 = vpop.permute.xlu0 %1544 }
 0x179   : > { %7468 = vst [vmem:[#allocation23_spill] sm:$0xff] %v5704_v31  ;;  %7469 = vst [vmem:[#allocation24_spill] sm:$0xff] %v5706_v37  ;;  %2284 = vperm.xlu1 %5132, %v5391_v62   ;;  %5134 = vset.pattern.permute.xlu0 %v5213_v49 }
 0x17a   : > { %2468 = vperm.xlu0 %5134, %v5374_v47  }
 0x17c   : > { %v5710_v46 = vpop.permute.xlu1 %1532 }
 0x17d   : > { %7470 = vst [vmem:[#allocation25_spill] sm:$0xff] %v5710_v46  ;;  %2292 = vperm.xlu1 %5132, %v5400_v3   ;;  %v5713_v45 = vpop.permute.xlu0 %1684 }
 0x17e   : > { %7471 = vst [vmem:[#allocation26_spill] sm:$0xff] %v5713_v45  ;;  %2480 = vperm.xlu0 %5134, %v5391_v62  }
 0x180   : > { %v5716_v44 = vpop.permute.xlu1 %1540 }
 0x181   : > { %7472 = vst [vmem:[#allocation27_spill] sm:$0xff] %v5716_v44  ;;  %2300 = vperm.xlu1 %5132, %v5411_v14   ;;  %v5719_v51 = vpop.permute.xlu0 %1696 }
 0x182   : > { %7473 = vst [vmem:[#allocation28_spill] sm:$0xff] %v5719_v51  ;;  %2488 = vperm.xlu0 %5134, %v5400_v3  }
 0x184   : > { %v5722_v37 = vpop.permute.xlu1 %1548 }
 0x185   : > { %7474 = vst [vmem:[#allocation29_spill] sm:$0xff] %v5722_v37  ;;  %2308 = vperm.xlu1 %5132, %v5420_v19   ;;  %v5725_v31 = vpop.permute.xlu0 %1704 }
 0x186   : > { %7475 = vst [vmem:[#allocation30_spill] sm:$0xff] %v5725_v31  ;;  %2496 = vperm.xlu0 %5134, %v5411_v14  }
 0x189   : > { %2316 = vperm.xlu1 %5132, %v5434_v32   ;;  %v5729_v45 = vpop.permute.xlu1 %1688  ;;  %v5731_v36 = vpop.permute.xlu0 %1712 }
 0x18a   : > { %7476 = vst [vmem:[#allocation31_spill] sm:$0xff] %v5729_v45  ;;  %7477 = vst [vmem:[#allocation32_spill] sm:$0xff] %v5731_v36  ;;  %2504 = vperm.xlu0 %5134, %v5420_v19   ;;  %v821_v36 = vld [vmem:[%s7419_s6 + $0x30] sm:$0xff] }
 0x18d   : > { %2324 = vperm.xlu1 %5132, %v5443_v39   ;;  %v5735_v51 = vpop.permute.xlu1 %1692  ;;  %v5737_v44 = vpop.permute.xlu0 %1720 }
 0x18e   : > { %7478 = vst [vmem:[#allocation33_spill] sm:$0xff] %v5735_v51  ;;  %7479 = vst [vmem:[#allocation34_spill] sm:$0xff] %v5737_v44  ;;  %2512 = vperm.xlu0 %5134, %v5434_v32   ;;  %v822_v51 = vld [vmem:[%s7419_s6 + $0x38] sm:$0x1]  ;;  %v823_v44 = vld [vmem:[%s7419_s6 + $0x40] sm:$0xff] }
 0x18f   : > { %v850_v42 = vpack.c.bf16 %v822_v51, %v821_v36 }
 0x191   : > { %2332 = vperm.xlu1 %5132, %v5454_v38   ;;  %v5741_v31 = vpop.permute.xlu1 %1700  ;;  %v5743_v37 = vpop.permute.xlu0 %1728  ;;  %v5779_v36 = vand.u32 %v5546_v48, %v850_v42 }
 0x192   : > { %7480 = vst [vmem:[#allocation35_spill] sm:$0xff] %v5741_v31  ;;  %7481 = vst [vmem:[#allocation36_spill] sm:$0xff] %v5743_v37  ;;  %2520 = vperm.xlu0 %5134, %v5443_v39   ;;  %v824_v31 = vld [vmem:[%s7419_s6 + $0x48] sm:$0x1] }
 0x193   : > { %v851_v12 = vpack.c.bf16 %v824_v31, %v823_v44 }
 0x194   : > { %v4736_v45 = vpop.f32.mrb[0].mxu0 }
 0x195   : > { %5135 = vset.pattern.permute.xlu1 %v5213_v49  ;;  %v5758_v37 = vpop.permute.xlu1 %1708  ;;  %v744_v46 = vpop.f32.mrb[1].mxu0  ;;  %v5782_v31 = vand.u32 %v5546_v48, %v851_v12 }
 0x196   : > { %7482 = vst [vmem:[#allocation37_spill] sm:$0xff] %v5758_v37  ;;  %v5760_v11 = vpop.permute.xlu0 %1736  ;;  %2472 = vperm.xlu1 %5135, %v5383_v55   ;;  %v4737_v41 = vpop.f32.mrb[2].mxu0  ;;  %2528 = vperm.xlu0 %5134, %v5454_v38  }
 0x197   : > { %7483 = vst [vmem:[#allocation38_spill] sm:$0xff] %v5760_v11  ;;  %v5764_v21 = vpack.c.bf16 %v4737_v41, %v4736_v45  ;;  %v747_v40 = vpop.f32.mrb[3].mxu0  ;;  %v7429_v41 = vmov 8  }
 0x198   : > { %v5766_v29 = vpack.c.bf16 %v747_v40, %v744_v46 }
 0x199   : > { %v5768_v22 = vpop.permute.xlu1 %1716 }
 0x19a   : > { %7484 = vst [vmem:[#allocation39_spill] sm:$0xff] %v5768_v22  ;;  %v5770_v49 = vpop.permute.xlu0 %1744  ;;  %2476 = vperm.xlu1 %5135, %v5378_v50   ;;  %4752 = vmatprep.mubr.msk.bf16.mxu1 %vm866_vm4, %v5766_v29 }
 0x19b   : > { %7485 = vst [vmem:[#allocation40_spill] sm:$0xff] %v5770_v49  ;;  %4770 = vmatprep.mubr.msk.bf16.mxu0 %vm866_vm4, %v5766_v29  ;;  %5137 = vset.pattern.permute.xlu0 %v7429_v41 }
 0x19c   : > { %4753 = vmatmul.mubr.msk.bf16.vlgmr.msra.gmra.mrb[0].mxu1 %vm866_vm4, %v5764_v21  ;;  %4771 = vmatmul.mubr.msk.bf16.vlgmr.msra.gmra.mrb[16].mxu0 %vm866_vm4, %v5764_v21  ;;  %v4740_v44 = vpop.f32.mrb[4].mxu0 }
 0x19d   : > { %2668 = vperm.xlu0 %5137, %v5383_v55   ;;  %v5789_v40 = vpop.permute.xlu1 %1724  ;;  %v760_v45 = vpop.f32.mrb[5].mxu0  ;;  %4787 = vmatpush3.bf16.msra.mxu1 %v5583_v4 }
 0x19e   : > { %7486 = vst [vmem:[#allocation41_spill] sm:$0xff] %v5789_v40  ;;  %2484 = vperm.xlu1 %5135, %v5393_v63   ;;  %v4741_v42 = vpop.f32.mrb[6].mxu0  ;;  %v5793_v46 = vpop.permute.xlu0 %1884  ;;  %4805 = vmatpush3.bf16.msra.mxu0 %v5611_v17 }
 0x19f   : > { %7487 = vst [vmem:[#allocation42_spill] sm:$0xff] %v5793_v46  ;;  %v5796_v51 = vpack.c.bf16 %v4741_v42, %v4740_v44  ;;  %v763_v12 = vpop.f32.mrb[7].mxu0  ;;  %4822 = vmatprep.subr.bf16.mxu1 %v5779_v36  ;;  %4840 = vmatprep.subr.bf16.mxu0 %v5782_v31 }
 0x1a0   : > { %v5800_v41 = vpack.c.bf16 %v763_v12, %v760_v45 }
 0x1a1   : > { %2680 = vperm.xlu0 %5137, %v5393_v63   ;;  %v5803_v11 = vpop.permute.xlu1 %1732 }
 0x1a2   : > { %7488 = vst [vmem:[#allocation43_spill] sm:$0xff] %v5803_v11  ;;  %2492 = vperm.xlu1 %5135, %v5403_v7   ;;  %4756 = vmatprep.mubr.msk.bf16.mxu1 %vm866_vm4, %v5800_v41  ;;  %v5808_v4 = vpop.permute.xlu0 %1896 }
 0x1a3   : > { %7489 = vst [vmem:[#allocation44_spill] sm:$0xff] %v5808_v4  ;;  %4774 = vmatprep.mubr.msk.bf16.mxu0 %vm866_vm4, %v5800_v41 }
 0x1a4   : > { %4757 = vmatmul.mubr.msk.bf16.gmra.mrb[4].mxu1 %vm866_vm4, %v5796_v51  ;;  %4775 = vmatmul.mubr.msk.bf16.gmra.mrb[20].mxu0 %vm866_vm4, %v5796_v51  ;;  %v4744_v17 = vpop.f32.mrb[8].mxu0 }
 0x1a5   : > { %2688 = vperm.xlu0 %5137, %v5403_v7   ;;  %v5817_v44 = vpop.permute.xlu1 %1740  ;;  %v776_v45 = vpop.f32.mrb[9].mxu0 }
 0x1a6   : > { %7490 = vst [vmem:[#allocation45_spill] sm:$0xff] %v5817_v44  ;;  %2500 = vperm.xlu1 %5135, %v5413_v15   ;;  %v4745_v42 = vpop.f32.mrb[10].mxu0  ;;  %v5820_v12 = vpop.permute.xlu0 %1904 }
 0x1a7   : > { %7491 = vst [vmem:[#allocation46_spill] sm:$0xff] %v5820_v12  ;;  %v5822_v49 = vpack.c.bf16 %v4745_v42, %v4744_v17  ;;  %v779_v11 = vpop.f32.mrb[11].mxu0 }
 0x1a8   : > { %v5824_v22 = vpack.c.bf16 %v779_v11, %v776_v45 }
 0x1a9   : > { %2696 = vperm.xlu0 %5137, %v5413_v15  }
 0x1aa   : > { %2508 = vperm.xlu1 %5135, %v5423_v24   ;;  %v5828_v40 = vpop.permute.xlu1 %1880  ;;  %4760 = vmatprep.mubr.msk.bf16.mxu1 %vm866_vm4, %v5824_v22  ;;  %v5832_v44 = vpop.permute.xlu0 %1912 }
 0x1ab   : > { %7492 = vst [vmem:[#allocation47_spill] sm:$0xff] %v5828_v40  ;;  %7493 = vst [vmem:[#allocation48_spill] sm:$0xff] %v5832_v44  ;;  %4778 = vmatprep.mubr.msk.bf16.mxu0 %vm866_vm4, %v5824_v22 }
 0x1ac   : > { %4761 = vmatmul.mubr.msk.bf16.gmra.mrb[8].mxu1 %vm866_vm4, %v5822_v49  ;;  %4779 = vmatmul.mubr.msk.bf16.gmra.mrb[24].mxu0 %vm866_vm4, %v5822_v49  ;;  %v4748_v11 = vpop.f32.mrb[12].mxu0 }
 0x1ad   : > { %2704 = vperm.xlu0 %5137, %v5423_v24   ;;  %v792_v17 = vpop.f32.mrb[13].mxu0 }
 0x1ae   : > { %2516 = vperm.xlu1 %5135, %v5436_v33   ;;  %v5842_v45 = vpop.permute.xlu1 %1888  ;;  %v4749_v42 = vpop.f32.mrb[14].mxu0 }
 0x1af   : > { %7494 = vst [vmem:[#allocation49_spill] sm:$0xff] %v5842_v45  ;;  %v5844_v4 = vpack.c.bf16 %v4749_v42, %v4748_v11  ;;  %v5846_v44 = vpop.permute.xlu0 %1920  ;;  %v795_v12 = vpop.f32.mrb[15].mxu0  ;;  %v826_v11 = vld [vmem:[%s7419_s6 + $0x58] sm:$0x1]  ;;  %v828_v42 = vld [vmem:[%s7419_s6 + $0x68] sm:$0x1] }
 0x1b0   : > { %7495 = vst [vmem:[#allocation50_spill] sm:$0xff] %v5846_v44  ;;  %v5848_v37 = vpack.c.bf16 %v795_v12, %v792_v17  ;;  %v825_v12 = vld [vmem:[%s7419_s6 + $0x50] sm:$0xff]  ;;  %v827_v17 = vld [vmem:[%s7419_s6 + $0x60] sm:$0xff] }
 0x1b1   : > { %2712 = vperm.xlu0 %5137, %v5436_v33   ;;  %v852_v45 = vpack.c.bf16 %v826_v11, %v825_v12  ;;  %v853_v60 = vpack.c.bf16 %v828_v42, %v827_v17 }
 0x1b2   : > { %2524 = vperm.xlu1 %5135, %v5446_v43   ;;  %v5852_v46 = vpop.permute.xlu1 %1892  ;;  %4764 = vmatprep.mubr.msk.bf16.mxu1 %vm866_vm4, %v5848_v37 }
 0x1b3   : > { %7496 = vst [vmem:[#allocation51_spill] sm:$0xff] %v5852_v46  ;;  %4782 = vmatprep.mubr.msk.bf16.mxu0 %vm866_vm4, %v5848_v37  ;;  %v5858_v40 = vpop.permute.xlu0 %1928  ;;  %v5902_v12 = vand.u32 %v5546_v48, %v853_v60 }
 0x1b4   : > { %7497 = vst [vmem:[#allocation52_spill] sm:$0xff] %v5858_v40  ;;  %4765 = vmatmul.mubr.msk.bf16.gmra.mrb[12].mxu1 %vm866_vm4, %v5844_v4  ;;  %4783 = vmatmul.mubr.msk.bf16.gmra.mrb[28].mxu0 %vm866_vm4, %v5844_v4  ;;  %v7498_v40 = vmov 8  }
 0x1b5   : > { %2720 = vperm.xlu0 %5137, %v5446_v43   ;;  %4788 = vmatprep.mubr.msk.bf16.mxu1 %vm866_vm4, %v5766_v29 }
 0x1b6   : > { %4806 = vmatprep.mubr.msk.bf16.mxu0 %vm866_vm4, %v5766_v29  ;;  %5136 = vset.pattern.permute.xlu1 %v7498_v40  ;;  %v5882_v44 = vpop.permute.xlu1 %1900  ;;  %v5899_v40 = vand.u32 %v5546_v48, %v852_v45 }
 0x1b7   : > { %7499 = vst [vmem:[#allocation53_spill] sm:$0xff] %v5882_v44  ;;  %v5884_v46 = vpop.permute.xlu0 %1936  ;;  %2664 = vperm.xlu1 %5136, %v5374_v47  }
 0x1b8   : > { %7500 = vst [vmem:[#allocation54_spill] sm:$0xff] %v5884_v46 }
 0x1b9   : > { %5138 = vset.pattern.permute.xlu0 %v7430_v34 }
 0x1ba   : > { %2860 = vperm.xlu0 %5138, %v5374_v47   ;;  %v5889_v0 = vpop.permute.xlu1 %1908 }
 0x1bb   : > { %7501 = vst [vmem:[#allocation55_spill] sm:$0xff] %v5889_v0  ;;  %2672 = vperm.xlu1 %5136, %v5378_v50   ;;  %v5892_v30 = vpop.permute.xlu0 %2076  ;;  %v7567_v0 = vmov 14  }
 0x1bc   : > { %7502 = vst [vmem:[#allocation56_spill] sm:$0xff] %v5892_v30  ;;  %4789 = vmatmul.mubr.msk.bf16.vlgmr.msra.gmra.mrb[16].mxu1 %vm866_vm4, %v5764_v21  ;;  %4807 = vmatmul.mubr.msk.bf16.vlgmr.msra.gmra.mrb[32].mxu0 %vm866_vm4, %v5764_v21  ;;  %v832_v30 = vld [vmem:[%s7419_s6 + $0x88] sm:$0x1] }
 0x1bd   : > { %4792 = vmatprep.mubr.msk.bf16.mxu1 %vm866_vm4, %v5800_v41  ;;  %4810 = vmatprep.mubr.msk.bf16.mxu0 %vm866_vm4, %v5800_v41 }
 0x1be   : > { %2872 = vperm.xlu0 %5138, %v5391_v62   ;;  %v5909_v11 = vpop.permute.xlu1 %1916  ;;  %4823 = vmatpush3.bf16.msra.mxu1 %v5779_v36 }
 0x1bf   : > { %7503 = vst [vmem:[#allocation57_spill] sm:$0xff] %v5909_v11  ;;  %2676 = vperm.xlu1 %5136, %v5391_v62   ;;  %v5913_v17 = vpop.permute.xlu0 %2088  ;;  %4841 = vmatpush3.bf16.msra.mxu0 %v5782_v31  ;;  %v7431_v11 = vmov 10  }
 0x1c0   : > { %7504 = vst [vmem:[#allocation58_spill] sm:$0xff] %v5913_v17  ;;  %4858 = vmatprep.subr.bf16.mxu1 %v5899_v40  ;;  %4876 = vmatprep.subr.bf16.mxu0 %v5902_v12 }
 0x1c2   : > { %2880 = vperm.xlu0 %5138, %v5400_v3   ;;  %v5919_v60 = vpop.permute.xlu1 %1924 }
 0x1c3   : > { %7505 = vst [vmem:[#allocation59_spill] sm:$0xff] %v5919_v60  ;;  %2684 = vperm.xlu1 %5136, %v5400_v3   ;;  %v5922_v45 = vpop.permute.xlu0 %2096  ;;  %v7517_v60 = vmov 9  }
 0x1c4   : > { %7506 = vst [vmem:[#allocation60_spill] sm:$0xff] %v5922_v45  ;;  %4793 = vmatmul.mubr.msk.bf16.gmra.mrb[20].mxu1 %vm866_vm4, %v5796_v51  ;;  %4811 = vmatmul.mubr.msk.bf16.gmra.mrb[36].mxu0 %vm866_vm4, %v5796_v51 }
 0x1c5   : > { %4796 = vmatprep.mubr.msk.bf16.mxu1 %vm866_vm4, %v5824_v22  ;;  %4814 = vmatprep.mubr.msk.bf16.mxu0 %vm866_vm4, %v5824_v22 }
 0x1c6   : > { %2888 = vperm.xlu0 %5138, %v5411_v14   ;;  %v5933_v36 = vpop.permute.xlu1 %1932 }
 0x1c7   : > { %7507 = vst [vmem:[#allocation61_spill] sm:$0xff] %v5933_v36  ;;  %2692 = vperm.xlu1 %5136, %v5411_v14   ;;  %v5936_v31 = vpop.permute.xlu0 %2104 }
 0x1c8   : > { %7508 = vst [vmem:[#allocation62_spill] sm:$0xff] %v5936_v31 }
 0x1ca   : > { %2896 = vperm.xlu0 %5138, %v5420_v19   ;;  %v5939_v42 = vpop.permute.xlu1 %1940 }
 0x1cb   : > { %7509 = vst [vmem:[#allocation63_spill] sm:$0xff] %v5939_v42  ;;  %2700 = vperm.xlu1 %5136, %v5420_v19   ;;  %v5942_v34 = vpop.permute.xlu0 %2112 }
 0x1cc   : > { %7510 = vst [vmem:[#allocation64_spill] sm:$0xff] %v5942_v34  ;;  %4797 = vmatmul.mubr.msk.bf16.gmra.mrb[24].mxu1 %vm866_vm4, %v5822_v49  ;;  %4815 = vmatmul.mubr.msk.bf16.gmra.mrb[40].mxu0 %vm866_vm4, %v5822_v49 }
 0x1cd   : > { %4800 = vmatprep.mubr.msk.bf16.mxu1 %vm866_vm4, %v5848_v37  ;;  %4818 = vmatprep.mubr.msk.bf16.mxu0 %vm866_vm4, %v5848_v37 }
 0x1ce   : > { %2904 = vperm.xlu0 %5138, %v5434_v32  }
 0x1cf   : > { %2708 = vperm.xlu1 %5136, %v5434_v32   ;;  %v5954_v45 = vpop.permute.xlu1 %2080  ;;  %v5956_v31 = vpop.permute.xlu0 %2120 }
 0x1d0   : > { %7511 = vst [vmem:[#allocation65_spill] sm:$0xff] %v5954_v45  ;;  %7512 = vst [vmem:[#allocation66_spill] sm:$0xff] %v5956_v31  ;;  %v829_v45 = vld [vmem:[%s7419_s6 + $0x70] sm:$0xff]  ;;  %v831_v31 = vld [vmem:[%s7419_s6 + $0x80] sm:$0xff] }
 0x1d1   : > { %v855_v46 = vpack.c.bf16 %v832_v30, %v831_v31 }
 0x1d2   : > { %2912 = vperm.xlu0 %5138, %v5443_v39  }
 0x1d3   : > { %2716 = vperm.xlu1 %5136, %v5443_v39   ;;  %v5960_v34 = vpop.permute.xlu1 %2084  ;;  %v5962_v17 = vpop.permute.xlu0 %2128  ;;  %v6005_v30 = vand.u32 %v5546_v48, %v855_v46 }
 0x1d4   : > { %7513 = vst [vmem:[#allocation67_spill] sm:$0xff] %v5960_v34  ;;  %7514 = vst [vmem:[#allocation68_spill] sm:$0xff] %v5962_v17  ;;  %4801 = vmatmul.mubr.msk.bf16.gmra.mrb[28].mxu1 %vm866_vm4, %v5844_v4  ;;  %4819 = vmatmul.mubr.msk.bf16.gmra.mrb[44].mxu0 %vm866_vm4, %v5844_v4  ;;  %v830_v17 = vld [vmem:[%s7419_s6 + $0x78] sm:$0x1] }
 0x1d5   : > { %4824 = vmatprep.mubr.msk.bf16.mxu1 %vm866_vm4, %v5766_v29  ;;  %4842 = vmatprep.mubr.msk.bf16.mxu0 %vm866_vm4, %v5766_v29  ;;  %v854_v42 = vpack.c.bf16 %v830_v17, %v829_v45 }
 0x1d6   : > { %2920 = vperm.xlu0 %5138, %v5454_v38  }
 0x1d7   : > { %2724 = vperm.xlu1 %5136, %v5454_v38   ;;  %v5986_v34 = vpop.permute.xlu1 %2092  ;;  %v5988_v36 = vpop.permute.xlu0 %2136  ;;  %v6002_v17 = vand.u32 %v5546_v48, %v854_v42 }
 0x1d8   : > { %7515 = vst [vmem:[#allocation69_spill] sm:$0xff] %v5986_v34  ;;  %7516 = vst [vmem:[#allocation70_spill] sm:$0xff] %v5988_v36 }
 0x1da   : > { %5141 = vset.pattern.permute.xlu0 %v7431_v11 }
 0x1db   : > { %3060 = vperm.xlu0 %5141, %v5383_v55   ;;  %5139 = vset.pattern.permute.xlu1 %v7517_v60  ;;  %v5993_v44 = vpop.permute.xlu1 %2100 }
 0x1dc   : > { %7518 = vst [vmem:[#allocation71_spill] sm:$0xff] %v5993_v44  ;;  %4825 = vmatmul.mubr.msk.bf16.vlgmr.msra.gmra.mrb[32].mxu1 %vm866_vm4, %v5764_v21  ;;  %4843 = vmatmul.mubr.msk.bf16.vlgmr.msra.gmra.mrb[48].mxu0 %vm866_vm4, %v5764_v21  ;;  %v5999_v34 = vpop.permute.xlu0 %2276 }
 0x1dd   : > { %7519 = vst [vmem:[#allocation72_spill] sm:$0xff] %v5999_v34  ;;  %2864 = vperm.xlu1 %5139, %v5383_v55   ;;  %4828 = vmatprep.mubr.msk.bf16.mxu1 %vm866_vm4, %v5800_v41 }
 0x1de   : > { %4846 = vmatprep.mubr.msk.bf16.mxu0 %vm866_vm4, %v5800_v41  ;;  %4859 = vmatpush3.bf16.msra.mxu1 %v5899_v40 }
 0x1df   : > { %3072 = vperm.xlu0 %5141, %v5393_v63   ;;  %v6014_v60 = vpop.permute.xlu1 %2108  ;;  %4877 = vmatpush3.bf16.msra.mxu0 %v5902_v12 }
 0x1e0   : > { %7520 = vst [vmem:[#allocation73_spill] sm:$0xff] %v6014_v60  ;;  %v6017_v45 = vpop.permute.xlu0 %2288  ;;  %4894 = vmatprep.subr.bf16.mxu1 %v6002_v17  ;;  %4912 = vmatprep.subr.bf16.mxu0 %v6005_v30  ;;  %v836_v60 = vld [vmem:[%s7419_s6 + $0xa8] sm:$0x1] }
 0x1e1   : > { %7521 = vst [vmem:[#allocation74_spill] sm:$0xff] %v6017_v45  ;;  %2868 = vperm.xlu1 %5139, %v5378_v50  }
 0x1e3   : > { %3080 = vperm.xlu0 %5141, %v5403_v7   ;;  %v6023_v46 = vpop.permute.xlu1 %2116 }
 0x1e4   : > { %7522 = vst [vmem:[#allocation75_spill] sm:$0xff] %v6023_v46  ;;  %4829 = vmatmul.mubr.msk.bf16.gmra.mrb[36].mxu1 %vm866_vm4, %v5796_v51  ;;  %4847 = vmatmul.mubr.msk.bf16.gmra.mrb[52].mxu0 %vm866_vm4, %v5796_v51  ;;  %v6029_v40 = vpop.permute.xlu0 %2296  ;;  %v7433_v46 = vmov 14  }
 0x1e5   : > { %7523 = vst [vmem:[#allocation76_spill] sm:$0xff] %v6029_v40  ;;  %2876 = vperm.xlu1 %5139, %v5393_v63   ;;  %4832 = vmatprep.mubr.msk.bf16.mxu1 %vm866_vm4, %v5824_v22 }
 0x1e6   : > { %4850 = vmatprep.mubr.msk.bf16.mxu0 %vm866_vm4, %v5824_v22 }
 0x1e7   : > { %3088 = vperm.xlu0 %5141, %v5413_v15   ;;  %v6037_v12 = vpop.permute.xlu1 %2124 }
 0x1e8   : > { %7524 = vst [vmem:[#allocation77_spill] sm:$0xff] %v6037_v12  ;;  %v6039_v31 = vpop.permute.xlu0 %2304 }
 0x1e9   : > { %7525 = vst [vmem:[#allocation78_spill] sm:$0xff] %v6039_v31  ;;  %2884 = vperm.xlu1 %5139, %v5403_v7  }
 0x1eb   : > { %3096 = vperm.xlu0 %5141, %v5423_v24   ;;  %v6043_v42 = vpop.permute.xlu1 %2132 }
 0x1ec   : > { %7526 = vst [vmem:[#allocation79_spill] sm:$0xff] %v6043_v42  ;;  %4833 = vmatmul.mubr.msk.bf16.gmra.mrb[40].mxu1 %vm866_vm4, %v5822_v49  ;;  %4851 = vmatmul.mubr.msk.bf16.gmra.mrb[56].mxu0 %vm866_vm4, %v5822_v49  ;;  %v6049_v11 = vpop.permute.xlu0 %2312 }
 0x1ed   : > { %7527 = vst [vmem:[#allocation80_spill] sm:$0xff] %v6049_v11  ;;  %2892 = vperm.xlu1 %5139, %v5413_v15   ;;  %4836 = vmatprep.mubr.msk.bf16.mxu1 %vm866_vm4, %v5848_v37  ;;  %v834_v11 = vld [vmem:[%s7419_s6 + $0x98] sm:$0x1] }
 0x1ee   : > { %4854 = vmatprep.mubr.msk.bf16.mxu0 %vm866_vm4, %v5848_v37 }
 0x1ef   : > { %3104 = vperm.xlu0 %5141, %v5436_v33  }
 0x1f0   : > { %v6057_v36 = vpop.permute.xlu1 %2272  ;;  %v6059_v12 = vpop.permute.xlu0 %2320 }
 0x1f1   : > { %7528 = vst [vmem:[#allocation81_spill] sm:$0xff] %v6057_v36  ;;  %7529 = vst [vmem:[#allocation82_spill] sm:$0xff] %v6059_v12  ;;  %2900 = vperm.xlu1 %5139, %v5423_v24   ;;  %v833_v12 = vld [vmem:[%s7419_s6 + $0x90] sm:$0xff] }
 0x1f2   : > { %v856_v44 = vpack.c.bf16 %v834_v11, %v833_v12 }
 0x1f3   : > { %3112 = vperm.xlu0 %5141, %v5446_v43  }
 0x1f4   : > { %4837 = vmatmul.mubr.msk.bf16.gmra.mrb[44].mxu1 %vm866_vm4, %v5844_v4  ;;  %4855 = vmatmul.mubr.msk.bf16.gmra.mrb[60].mxu0 %vm866_vm4, %v5844_v4  ;;  %v6067_v42 = vpop.permute.xlu1 %2280  ;;  %v6069_v31 = vpop.permute.xlu0 %2328 }
 0x1f5   : > { %7530 = vst [vmem:[#allocation83_spill] sm:$0xff] %v6067_v42  ;;  %7531 = vst [vmem:[#allocation84_spill] sm:$0xff] %v6069_v31  ;;  %2908 = vperm.xlu1 %5139, %v5436_v33   ;;  %4860 = vmatprep.mubr.msk.bf16.mxu1 %vm866_vm4, %v5766_v29  ;;  %v835_v31 = vld [vmem:[%s7419_s6 + $0xa0] sm:$0xff] }
 0x1f6   : > { %4878 = vmatprep.mubr.msk.bf16.mxu0 %vm866_vm4, %v5766_v29  ;;  %v857_v34 = vpack.c.bf16 %v836_v60, %v835_v31 }
 0x1f7   : > { %5153 = vset.pattern.permute.xlu0 %v7433_v46  ;;  %v7535_v46 = vmov 10  }
 0x1f8   : > { %3852 = vperm.xlu0 %5153, %v5391_v62   ;;  %v6090_v45 = vpop.permute.xlu1 %2284  ;;  %v6109_v11 = vand.u32 %v5546_v48, %v857_v34  ;;  %v7435_v34 = vmov 11  }
 0x1f9   : > { %7532 = vst [vmem:[#allocation85_spill] sm:$0xff] %v6090_v45  ;;  %2916 = vperm.xlu1 %5139, %v5446_v43   ;;  %v6093_v40 = vpop.permute.xlu0 %2468  ;;  %v6106_v45 = vand.u32 %v5546_v48, %v856_v44 }
 0x1fa   : > { %7533 = vst [vmem:[#allocation86_spill] sm:$0xff] %v6093_v40  ;;  %v838_v40 = vld [vmem:[%s7419_s6 + $0xb8] sm:$0x1] }
 0x1fc   : > { %3856 = vperm.xlu0 %5153, %v5393_v63   ;;  %4861 = vmatmul.mubr.msk.bf16.vlgmr.msra.gmra.mrb[48].mxu1 %vm866_vm4, %v5764_v21  ;;  %v6098_v36 = vpop.permute.xlu1 %2292 }
 0x1fd   : > { %7534 = vst [vmem:[#allocation87_spill] sm:$0xff] %v6098_v36  ;;  %4879 = vmatmul.mubr.msk.bf16.vlgmr.msra.gmra.mrb[64].mxu0 %vm866_vm4, %v5764_v21  ;;  %5140 = vset.pattern.permute.xlu1 %v7535_v46  ;;  %v6103_v42 = vpop.permute.xlu0 %2480  ;;  %v7439_v36 = vmov 13  }
 0x1fe   : > { %7536 = vst [vmem:[#allocation88_spill] sm:$0xff] %v6103_v42  ;;  %4864 = vmatprep.mubr.msk.bf16.mxu1 %vm866_vm4, %v5800_v41  ;;  %4882 = vmatprep.mubr.msk.bf16.mxu0 %vm866_vm4, %v5800_v41 }
 0x1ff   : > { %3056 = vperm.xlu1 %5140, %v5374_v47   ;;  %4895 = vmatpush3.bf16.msra.mxu1 %v6002_v17 }
 0x200   : > { %3876 = vperm.xlu0 %5153, %v5420_v19   ;;  %v6118_v60 = vpop.permute.xlu1 %2300  ;;  %4913 = vmatpush3.bf16.msra.mxu0 %v6005_v30 }
 0x201   : > { %7537 = vst [vmem:[#allocation89_spill] sm:$0xff] %v6118_v60  ;;  %v6121_v44 = vpop.permute.xlu0 %2488  ;;  %4930 = vmatprep.subr.bf16.mxu1 %v6106_v45  ;;  %4948 = vmatprep.subr.bf16.mxu0 %v6109_v11 }
 0x202   : > { %7538 = vst [vmem:[#allocation90_spill] sm:$0xff] %v6121_v44 }
 0x203   : > { %3064 = vperm.xlu1 %5140, %v5378_v50  }
 0x204   : > { %5169 = vset.pattern.permute.xlu0 %v7435_v34  ;;  %4865 = vmatmul.mubr.msk.bf16.gmra.mrb[52].mxu1 %vm866_vm4, %v5796_v51  ;;  %v6129_v17 = vpop.permute.xlu1 %2308 }
 0x205   : > { %7539 = vst [vmem:[#allocation91_spill] sm:$0xff] %v6129_v17  ;;  %4883 = vmatmul.mubr.msk.bf16.gmra.mrb[68].mxu0 %vm866_vm4, %v5796_v51  ;;  %3256 = vperm.xlu0 %5169, %v5383_v55   ;;  %v6134_v30 = vpop.permute.xlu0 %2496 }
 0x206   : > { %7540 = vst [vmem:[#allocation92_spill] sm:$0xff] %v6134_v30  ;;  %4868 = vmatprep.mubr.msk.bf16.mxu1 %vm866_vm4, %v5824_v22  ;;  %4886 = vmatprep.mubr.msk.bf16.mxu0 %vm866_vm4, %v5824_v22 }
 0x207   : > { %3068 = vperm.xlu1 %5140, %v5391_v62  }
 0x208   : > { %v6141_v12 = vpop.permute.xlu1 %2316 }
 0x209   : > { %7541 = vst [vmem:[#allocation93_spill] sm:$0xff] %v6141_v12  ;;  %3260 = vperm.xlu0 %5169, %v5378_v50   ;;  %v6144_v31 = vpop.permute.xlu0 %2504 }
 0x20a   : > { %7542 = vst [vmem:[#allocation94_spill] sm:$0xff] %v6144_v31 }
 0x20b   : > { %3076 = vperm.xlu1 %5140, %v5400_v3  }
 0x20c   : > { %4869 = vmatmul.mubr.msk.bf16.gmra.mrb[56].mxu1 %vm866_vm4, %v5822_v49  ;;  %v6149_v34 = vpop.permute.xlu1 %2324 }
 0x20d   : > { %7543 = vst [vmem:[#allocation95_spill] sm:$0xff] %v6149_v34  ;;  %4887 = vmatmul.mubr.msk.bf16.gmra.mrb[72].mxu0 %vm866_vm4, %v5822_v49  ;;  %3268 = vperm.xlu0 %5169, %v5393_v63   ;;  %v6154_v44 = vpop.permute.xlu0 %2512  ;;  %v840_v34 = vld [vmem:[%s7419_s6 + $0xc8] sm:$0x1] }
 0x20e   : > { %7544 = vst [vmem:[#allocation96_spill] sm:$0xff] %v6154_v44  ;;  %4872 = vmatprep.mubr.msk.bf16.mxu1 %vm866_vm4, %v5848_v37  ;;  %4890 = vmatprep.mubr.msk.bf16.mxu0 %vm866_vm4, %v5848_v37 }
 0x20f   : > { %3084 = vperm.xlu1 %5140, %v5411_v14  }
 0x210   : > { %v6161_v31 = vpop.permute.xlu1 %2332 }
 0x211   : > { %7545 = vst [vmem:[#allocation97_spill] sm:$0xff] %v6161_v31  ;;  %3288 = vperm.xlu0 %5169, %v5420_v19   ;;  %v6164_v30 = vpop.permute.xlu0 %2520 }
 0x212   : > { %7546 = vst [vmem:[#allocation98_spill] sm:$0xff] %v6164_v30  ;;  %v837_v30 = vld [vmem:[%s7419_s6 + $0xb0] sm:$0xff] }
 0x213   : > { %3092 = vperm.xlu1 %5140, %v5420_v19   ;;  %v858_v31 = vpack.c.bf16 %v838_v40, %v837_v30 }
 0x214   : > { %4873 = vmatmul.mubr.msk.bf16.gmra.mrb[60].mxu1 %vm866_vm4, %v5844_v4 }
 0x215   : > { %4891 = vmatmul.mubr.msk.bf16.gmra.mrb[76].mxu0 %vm866_vm4, %v5844_v4  ;;  %3292 = vperm.xlu0 %5169, %v5423_v24   ;;  %v6172_v44 = vpop.permute.xlu1 %2472  ;;  %v6178_v42 = vpop.permute.xlu0 %2528  ;;  %v6207_v46 = vand.u32 %v5546_v48, %v858_v31 }
 0x216   : > { %7547 = vst [vmem:[#allocation99_spill] sm:$0xff] %v6172_v44  ;;  %4896 = vmatprep.mubr.msk.bf16.mxu1 %vm866_vm4, %v5766_v29  ;;  %4914 = vmatprep.mubr.msk.bf16.mxu0 %vm866_vm4, %v5766_v29  ;;  %7548 = vst [vmem:[#allocation100_spill] sm:$0xff] %v6178_v42  ;;  %v839_v44 = vld [vmem:[%s7419_s6 + $0xc0] sm:$0xff] }
 0x217   : > { %3100 = vperm.xlu1 %5140, %v5434_v32   ;;  %v859_v17 = vpack.c.bf16 %v840_v34, %v839_v44  ;;  %v7552_v44 = vmov 11  }
 0x219   : > { %3308 = vperm.xlu0 %5169, %v5446_v43   ;;  %v6194_v42 = vpop.permute.xlu1 %2476  ;;  %v6214_v40 = vand.u32 %v5546_v48, %v859_v17  ;;  %v7437_v17 = vmov 12  }
 0x21a   : > { %7549 = vst [vmem:[#allocation101_spill] sm:$0xff] %v6194_v42 }
 0x21b   : > { %3108 = vperm.xlu1 %5140, %v5443_v39  }
 0x21c   : > { %v6197_v12 = vpop.permute.xlu0 %2668  ;;  %4897 = vmatmul.mubr.msk.bf16.vlgmr.msra.gmra.mrb[64].mxu1 %vm866_vm4, %v5764_v21 }
 0x21d   : > { %7550 = vst [vmem:[#allocation102_spill] sm:$0xff] %v6197_v12  ;;  %4915 = vmatmul.mubr.msk.bf16.vlgmr.msra.gmra.mrb[80].mxu0 %vm866_vm4, %v5764_v21  ;;  %5176 = vset.pattern.permute.xlu0 %v7439_v36  ;;  %v6204_v60 = vpop.permute.xlu1 %2484 }
 0x21e   : > { %7551 = vst [vmem:[#allocation103_spill] sm:$0xff] %v6204_v60  ;;  %4900 = vmatprep.mubr.msk.bf16.mxu1 %vm866_vm4, %v5800_v41  ;;  %4918 = vmatprep.mubr.msk.bf16.mxu0 %vm866_vm4, %v5800_v41  ;;  %v844_v60 = vld [vmem:[%s7419_s6 + $0xe8] sm:$0x1] }
 0x21f   : > { %3644 = vperm.xlu0 %5176, %v5374_v47   ;;  %5142 = vset.pattern.permute.xlu1 %v7552_v44 }
 0x220   : > { %3252 = vperm.xlu1 %5142, %v5374_v47   ;;  %v6219_v34 = vpop.permute.xlu0 %2680  ;;  %4931 = vmatpush3.bf16.msra.mxu1 %v6106_v45 }
 0x221   : > { %7553 = vst [vmem:[#allocation104_spill] sm:$0xff] %v6219_v34  ;;  %v6222_v30 = vpop.permute.xlu1 %2492  ;;  %4949 = vmatpush3.bf16.msra.mxu0 %v6109_v11  ;;  %4966 = vmatprep.subr.bf16.mxu1 %v6207_v46  ;;  %v7565_v34 = vmov 12  }
 0x222   : > { %7554 = vst [vmem:[#allocation105_spill] sm:$0xff] %v6222_v30  ;;  %4984 = vmatprep.subr.bf16.mxu0 %v6214_v40 }
 0x223   : > { %3656 = vperm.xlu0 %5176, %v5391_v62  }
 0x224   : > { %5143 = vset.pattern.permute.xlu1 %v7437_v17  ;;  %v6229_v31 = vpop.permute.xlu0 %2688  ;;  %4901 = vmatmul.mubr.msk.bf16.gmra.mrb[68].mxu1 %vm866_vm4, %v5796_v51 }
 0x225   : > { %7555 = vst [vmem:[#allocation106_spill] sm:$0xff] %v6229_v31  ;;  %3448 = vperm.xlu1 %5143, %v5374_v47   ;;  %4919 = vmatmul.mubr.msk.bf16.gmra.mrb[84].mxu0 %vm866_vm4, %v5796_v51  ;;  %v6236_v45 = vpop.permute.xlu1 %2500  ;;  %v843_v31 = vld [vmem:[%s7419_s6 + $0xe0] sm:$0xff] }
 0x226   : > { %7556 = vst [vmem:[#allocation107_spill] sm:$0xff] %v6236_v45  ;;  %4904 = vmatprep.mubr.msk.bf16.mxu1 %vm866_vm4, %v5824_v22  ;;  %4922 = vmatprep.mubr.msk.bf16.mxu0 %vm866_vm4, %v5824_v22  ;;  %v861_v42 = vpack.c.bf16 %v844_v60, %v843_v31 }
 0x227   : > { %3660 = vperm.xlu0 %5176, %v5393_v63  }
 0x228   : > { %v6243_v11 = vpop.permute.xlu0 %2696  ;;  %v3740_v60 = vand.u32 %v5546_v48, %v861_v42 }
 0x229   : > { %7557 = vst [vmem:[#allocation108_spill] sm:$0xff] %v6243_v11  ;;  %3452 = vperm.xlu1 %5143, %v5383_v55   ;;  %v6246_v17 = vpop.permute.xlu1 %2508 }
 0x22a   : > { %7558 = vst [vmem:[#allocation109_spill] sm:$0xff] %v6246_v17  ;;  %v7563_v17 = vmov 13  }
 0x22b   : > { %3680 = vperm.xlu0 %5176, %v5420_v19  }
 0x22c   : > { %v6249_v36 = vpop.permute.xlu0 %2704  ;;  %4905 = vmatmul.mubr.msk.bf16.gmra.mrb[72].mxu1 %vm866_vm4, %v5822_v49 }
 0x22d   : > { %7559 = vst [vmem:[#allocation110_spill] sm:$0xff] %v6249_v36  ;;  %5144 = vset.pattern.permute.xlu1 %v7552_v44  ;;  %4923 = vmatmul.mubr.msk.bf16.gmra.mrb[88].mxu0 %vm866_vm4, %v5822_v49  ;;  %v6256_v45 = vpop.permute.xlu1 %2516 }
 0x22e   : > { %7560 = vst [vmem:[#allocation111_spill] sm:$0xff] %v6256_v45  ;;  %3264 = vperm.xlu1 %5144, %v5391_v62   ;;  %4908 = vmatprep.mubr.msk.bf16.mxu1 %vm866_vm4, %v5848_v37 }
 0x22f   : > { %4926 = vmatprep.mubr.msk.bf16.mxu0 %vm866_vm4, %v5848_v37  ;;  %3684 = vperm.xlu0 %5176, %v5423_v24  }
 0x230   : > { %v6266_v36 = vpop.permute.xlu0 %2712 }
 0x231   : > { %v6264_v11 = vpop.permute.xlu1 %2524  ;;  %7562 = vst [vmem:[#allocation113_spill] sm:$0xff] %v6266_v36  ;;  %v841_v36 = vld [vmem:[%s7419_s6 + $0xd0] sm:$0xff] }
 0x232   : > { %7561 = vst [vmem:[#allocation112_spill] sm:$0xff] %v6264_v11  ;;  %5145 = vset.pattern.permute.xlu1 %v7563_v17  ;;  %v842_v11 = vld [vmem:[%s7419_s6 + $0xd8] sm:$0x1] }
 0x233   : > { %3696 = vperm.xlu0 %5176, %v5443_v39   ;;  %3648 = vperm.xlu1 %5145, %v5383_v55   ;;  %v860_v12 = vpack.c.bf16 %v842_v11, %v841_v36 }
 0x234   : > { %4909 = vmatmul.mubr.msk.bf16.gmra.mrb[76].mxu1 %vm866_vm4, %v5844_v4  ;;  %v6295_v30 = vpop.permute.xlu0 %2720 }
 0x235   : > { %4927 = vmatmul.mubr.msk.bf16.gmra.mrb[92].mxu0 %vm866_vm4, %v5844_v4  ;;  %4932 = vmatprep.mubr.msk.bf16.mxu1 %vm866_vm4, %v5766_v29  ;;  %7566 = vst [vmem:[#allocation115_spill] sm:$0xff] %v6295_v30  ;;  %v6307_v32 = vand.u32 %v5546_v48, %v860_v12 }
 0x236   : > { %4950 = vmatprep.mubr.msk.bf16.mxu0 %vm866_vm4, %v5766_v29  ;;  %v6279_v45 = vpop.permute.xlu1 %2664 }
 0x237   : > { %7564 = vst [vmem:[#allocation114_spill] sm:$0xff] %v6279_v45  ;;  %5179 = vset.pattern.permute.xlu0 %v7565_v34  ;;  %5146 = vset.pattern.permute.xlu1 %v7565_v34 }
 0x238   : > { %3460 = vperm.xlu0 %5179, %v5391_v62   ;;  %3456 = vperm.xlu1 %5146, %v5378_v50  }
 0x239   : > { %v6309_v30 = vpop.permute.xlu0 %2860 }
 0x23a   : > { %v6299_v45 = vpop.permute.xlu1 %2672  ;;  %7568 = vst [vmem:[#allocation116_spill] sm:$0xff] %v6309_v30 }
 0x23c   : > { %3464 = vperm.xlu0 %5179, %v5393_v63   ;;  %5147 = vset.pattern.permute.xlu1 %v7567_v0 }
 0x23d   : > { %3840 = vperm.xlu1 %5147, %v5374_v47   ;;  %4933 = vmatmul.mubr.msk.bf16.vlgmr.msra.gmra.mrb[80].mxu1 %vm866_vm4, %v5764_v21  ;;  %v6327_v31 = vpop.permute.xlu0 %2872 }
 0x23e   : > { %4951 = vmatmul.mubr.msk.bf16.vlgmr.msra.gmra.mrb[96].mxu0 %vm866_vm4, %v5764_v21  ;;  %4936 = vmatprep.mubr.msk.bf16.mxu1 %vm866_vm4, %v5800_v41  ;;  %v6315_v36 = vpop.permute.xlu1 %2676  ;;  %7570 = vst [vmem:[#allocation118_spill] sm:$0xff] %v6327_v31 }
 0x23f   : > { %4954 = vmatprep.mubr.msk.bf16.mxu0 %vm866_vm4, %v5800_v41  ;;  %4967 = vmatpush3.bf16.msra.mxu1 %v6207_v46 }
 0x240   : > { %3484 = vperm.xlu0 %5179, %v5420_v19   ;;  %4985 = vmatpush3.bf16.msra.mxu0 %v6214_v40 }
 0x241   : > { %3844 = vperm.xlu1 %5147, %v5383_v55   ;;  %5002 = vmatprep.subr.bf16.mxu1 %v6307_v32  ;;  %v6343_v42 = vpop.permute.xlu0 %2880 }
 0x242   : > { %v6325_v12 = vpop.permute.xlu1 %2684  ;;  %5020 = vmatprep.subr.bf16.mxu0 %v3740_v60  ;;  %7572 = vst [vmem:[#allocation120_spill] sm:$0xff] %v6343_v42  ;;  %v7445_v42 = vmov 15  }
 0x243   : > { %7569 = vst [vmem:[#allocation117_spill] sm:$0xff] %v6325_v12 }
 0x244   : > { %3488 = vperm.xlu0 %5179, %v5423_v24  }
 0x245   : > { %5148 = vset.pattern.permute.xlu1 %v7552_v44  ;;  %4937 = vmatmul.mubr.msk.bf16.gmra.mrb[84].mxu1 %vm866_vm4, %v5796_v51  ;;  %v6361_v31 = vpop.permute.xlu0 %2888 }
 0x246   : > { %4955 = vmatmul.mubr.msk.bf16.gmra.mrb[100].mxu0 %vm866_vm4, %v5796_v51  ;;  %3272 = vperm.xlu1 %5148, %v5400_v3   ;;  %v6336_v46 = vpop.permute.xlu1 %2692  ;;  %7575 = vst [vmem:[#allocation123_spill] sm:$0xff] %v6361_v31 }
 0x247   : > { %7571 = vst [vmem:[#allocation119_spill] sm:$0xff] %v6336_v46  ;;  %4940 = vmatprep.mubr.msk.bf16.mxu1 %vm866_vm4, %v5824_v22  ;;  %4958 = vmatprep.mubr.msk.bf16.mxu0 %vm866_vm4, %v5824_v22 }
 0x248   : > { %3500 = vperm.xlu0 %5179, %v5443_v39  }
 0x24a   : > { %5149 = vset.pattern.permute.xlu1 %v7563_v17  ;;  %v6346_v40 = vpop.permute.xlu1 %2700 }
 0x24b   : > { %7573 = vst [vmem:[#allocation121_spill] sm:$0xff] %v6346_v40  ;;  %3652 = vperm.xlu1 %5149, %v5378_v50  }
 0x24c   : > { %3504 = vperm.xlu0 %5179, %v5446_v43   ;;  %v6372_v43 = vpop.permute.xlu0 %2896 }
 0x24d   : > { %4941 = vmatmul.mubr.msk.bf16.gmra.mrb[88].mxu1 %vm866_vm4, %v5822_v49  ;;  %7577 = vst [vmem:[#allocation125_spill] sm:$0xff] %v6372_v43 }
 0x24e   : > { %4959 = vmatmul.mubr.msk.bf16.gmra.mrb[104].mxu0 %vm866_vm4, %v5822_v49  ;;  %4944 = vmatprep.mubr.msk.bf16.mxu1 %vm866_vm4, %v5848_v37  ;;  %v6356_v11 = vpop.permute.xlu1 %2708 }
 0x24f   : > { %7574 = vst [vmem:[#allocation122_spill] sm:$0xff] %v6356_v11  ;;  %4962 = vmatprep.mubr.msk.bf16.mxu0 %vm866_vm4, %v5848_v37  ;;  %5150 = vset.pattern.permute.xlu1 %v7445_v42 }
 0x250   : > { %5181 = vset.pattern.permute.xlu0 %v7445_v42  ;;  %4036 = vperm.xlu1 %5150, %v5374_v47   ;;  %v6391_v42 = vpop.permute.xlu0 %2904 }
 0x251   : > { %4048 = vperm.xlu0 %5181, %v5391_v62   ;;  %v846_v62 = vld [vmem:[%s7419_s6 + $0xf8] sm:$0x1]  ;;  %7579 = vst [vmem:[#allocation127_spill] sm:$0xff] %v6391_v42 }
 0x252   : > { %v6366_v30 = vpop.permute.xlu1 %2716 }
 0x253   : > { %7576 = vst [vmem:[#allocation124_spill] sm:$0xff] %v6366_v30 }
 0x254   : > { %4040 = vperm.xlu1 %5150, %v5383_v55   ;;  %v845_v55 = vld [vmem:[%s7419_s6 + $0xf0] sm:$0xff] }
 0x255   : > { %4052 = vperm.xlu0 %5181, %v5393_v63   ;;  %4945 = vmatmul.mubr.msk.bf16.gmra.mrb[92].mxu1 %vm866_vm4, %v5844_v4  ;;  %v862_v63 = vpack.c.bf16 %v846_v62, %v845_v55  ;;  %v6413_v55 = vpop.permute.xlu0 %2912 }
 0x256   : > { %4963 = vmatmul.mubr.msk.bf16.gmra.mrb[108].mxu0 %vm866_vm4, %v5844_v4  ;;  %4968 = vmatprep.mubr.msk.bf16.mxu1 %vm866_vm4, %v5766_v29  ;;  %v6378_v47 = vpop.permute.xlu1 %2724  ;;  %7582 = vst [vmem:[#allocation130_spill] sm:$0xff] %v6413_v55 }
 0x257   : > { %7578 = vst [vmem:[#allocation126_spill] sm:$0xff] %v6378_v47  ;;  %4986 = vmatprep.mubr.msk.bf16.mxu0 %vm866_vm4, %v5766_v29  ;;  %v6402_v31 = vand.u32 %v5546_v48, %v862_v63  ;;  %v7583_v48 = vmov 0.0   ;;  %v7587_v63 = vmov 15  }
 0x258   : > { %5151 = vset.pattern.permute.xlu1 %v7565_v34 }
 0x259   : > { %4072 = vperm.xlu0 %5181, %v5420_v19   ;;  %3468 = vperm.xlu1 %5151, %v5400_v3  }
 0x25c   : > { %v6393_v43 = vpop.permute.xlu1 %2864 }
 0x25d   : > { %7580 = vst [vmem:[#allocation128_spill] sm:$0xff] %v6393_v43  ;;  %4084 = vperm.xlu0 %5181, %v5436_v33   ;;  %5152 = vset.pattern.permute.xlu1 %v7567_v0 }
 0x25e   : > { %4969 = vmatmul.mubr.msk.bf16.vlgmr.msra.gmra.mrb[96].mxu1 %vm866_vm4, %v5764_v21  ;;  %4987 = vmatmul.mubr.msk.bf16.vlgmr.msra.gmra.mrb[112].mxu0 %vm866_vm4, %v5764_v21 }
 0x25f   : > { %3848 = vperm.xlu1 %5152, %v5378_v50   ;;  %4972 = vmatprep.mubr.msk.bf16.mxu1 %vm866_vm4, %v5800_v41 }
 0x260   : > { %4990 = vmatprep.mubr.msk.bf16.mxu0 %vm866_vm4, %v5800_v41  ;;  %v6409_v19 = vpop.permute.xlu1 %2868  ;;  %5003 = vmatpush3.bf16.msra.mxu1 %v6307_v32  ;;  %v6429_v32 = vpop.permute.xlu0 %2920 }
 0x261   : > { %7581 = vst [vmem:[#allocation129_spill] sm:$0xff] %v6409_v19  ;;  %5185 = vset.pattern.permute.xlu0 %v7567_v0  ;;  %5021 = vmatpush3.bf16.msra.mxu0 %v3740_v60  ;;  %7585 = vst [vmem:[#allocation132_spill] sm:$0xff] %v6429_v32 }
 0x262   : > { %3892 = vperm.xlu0 %5185, %v5443_v39   ;;  %5038 = vmatprep.subr.bf16.mxu1 %v6402_v31 }
 0x263   : > { %5154 = vset.pattern.permute.xlu1 %v7552_v44  ;;  %5056 = vmatprep.subr.bf16.mxu0 %v7583_v48 }
 0x264   : > { %3276 = vperm.xlu1 %5154, %v5403_v7   ;;  %v6420_v62 = vpop.permute.xlu1 %2876  ;;  %v6441_v48 = vpop.permute.xlu0 %3060 }
 0x265   : > { %7584 = vst [vmem:[#allocation131_spill] sm:$0xff] %v6420_v62  ;;  %7589 = vst [vmem:[#allocation135_spill] sm:$0xff] %v6441_v48 }
 0x266   : > { %4973 = vmatmul.mubr.msk.bf16.gmra.mrb[100].mxu1 %vm866_vm4, %v5796_v51  ;;  %4991 = vmatmul.mubr.msk.bf16.gmra.mrb[116].mxu0 %vm866_vm4, %v5796_v51 }
 0x267   : > { %3900 = vperm.xlu0 %5185, %v5454_v38   ;;  %4976 = vmatprep.mubr.msk.bf16.mxu1 %vm866_vm4, %v5824_v22 }
 0x268   : > { %4994 = vmatprep.mubr.msk.bf16.mxu0 %vm866_vm4, %v5824_v22  ;;  %3280 = vperm.xlu1 %5154, %v5411_v14   ;;  %v6434_v60 = vpop.permute.xlu1 %2884 }
 0x269   : > { %7586 = vst [vmem:[#allocation133_spill] sm:$0xff] %v6434_v60 }
 0x26b   : > { %5189 = vset.pattern.permute.xlu0 %v7587_v63 }
 0x26c   : > { %5155 = vset.pattern.permute.xlu1 %v7563_v17  ;;  %v6438_v55 = vpop.permute.xlu1 %2892 }
 0x26d   : > { %7588 = vst [vmem:[#allocation134_spill] sm:$0xff] %v6438_v55  ;;  %3664 = vperm.xlu1 %5155, %v5400_v3  }
 0x26e   : > { %4977 = vmatmul.mubr.msk.bf16.gmra.mrb[104].mxu1 %vm866_vm4, %v5822_v49  ;;  %4995 = vmatmul.mubr.msk.bf16.gmra.mrb[120].mxu0 %vm866_vm4, %v5822_v49 }
 0x26f   : > { %4980 = vmatprep.mubr.msk.bf16.mxu1 %vm866_vm4, %v5848_v37  ;;  %4998 = vmatprep.mubr.msk.bf16.mxu0 %vm866_vm4, %v5848_v37  ;;  %v4754_v32 = vpop.f32.mrb[0].mxu1  ;;  %v4772_v42 = vpop.f32.mrb[16].mxu0 }
 0x270   : > { %v1077_v55 = vmul.f32 %v4754_v32, %v5561_v57  ;;  %v6452_v62 = vpop.permute.xlu1 %2900  ;;  %v932_v60 = vpop.f32.mrb[1].mxu1 }
 0x271   : > { %7590 = vst [vmem:[#allocation136_spill] sm:$0xff] %v6452_v62  ;;  %5156 = vset.pattern.permute.xlu1 %v7587_v63  ;;  %v1075_v48 = vmul.f32 %v5555_v54, %v932_v60  ;;  %v1128_v43 = vpop.f32.mrb[17].mxu0  ;;  %v4755_v19 = vpop.f32.mrb[2].mxu1 }
 0x272   : > { %v6456_v30 = vadd.f32 %v4772_v42, %v1077_v55  ;;  %4044 = vperm.xlu1 %5156, %v5378_v50   ;;  %v1078_v47 = vmul.f32 %v4755_v19, %v5564_v58  ;;  %v4773_v40 = vpop.f32.mrb[18].mxu0  ;;  %v935_v12 = vpop.f32.mrb[3].mxu1 }
 0x273   : > { %v6460_v11 = vadd.f32 %v1128_v43, %v1075_v48  ;;  %v1131_v57 = vpop.f32.mrb[19].mxu0  ;;  %v1076_v62 = vmul.f32 %v5558_v56, %v935_v12  ;;  %v6472_v50 = vpop.permute.xlu0 %3072 }
 0x274   : > { %v6462_v32 = vadd.f32 %v4773_v40, %v1078_v47  ;;  %v6465_v46 = vpop.permute.xlu1 %2908  ;;  %7592 = vst [vmem:[#allocation138_spill] sm:$0xff] %v6472_v50 }
 0x275   : > { %7591 = vst [vmem:[#allocation137_spill] sm:$0xff] %v6465_v46  ;;  %v6467_v54 = vadd.f32 %v1131_v57, %v1076_v62 }
 0x276   : > { %5157 = vset.pattern.permute.xlu1 %v7565_v34  ;;  %4981 = vmatmul.mubr.msk.bf16.gmra.mrb[108].mxu1 %vm866_vm4, %v5844_v4 }
 0x277   : > { %4999 = vmatmul.mubr.msk.bf16.gmra.mrb[124].mxu0 %vm866_vm4, %v5844_v4  ;;  %3472 = vperm.xlu1 %5157, %v5403_v7   ;;  %v4758_v43 = vpop.f32.mrb[4].mxu1  ;;  %v4776_v58 = vpop.f32.mrb[20].mxu0 }
 0x278   : > { %5004 = vmatprep.mubr.msk.bf16.mxu1 %vm866_vm4, %v5766_v29  ;;  %5022 = vmatprep.mubr.msk.bf16.mxu0 %vm866_vm4, %v5766_v29  ;;  %v1081_v56 = vmul.f32 %v4758_v43, %v5578_v2  ;;  %v6482_v12 = vpop.permute.xlu1 %2916  ;;  %v948_v42 = vpop.f32.mrb[5].mxu1 }
 0x279   : > { %7593 = vst [vmem:[#allocation139_spill] sm:$0xff] %v6482_v12  ;;  %v1144_v40 = vpop.f32.mrb[21].mxu0  ;;  %v1079_v19 = vmul.f32 %v5567_v59, %v948_v42  ;;  %v4759_v55 = vpop.f32.mrb[6].mxu1 }
 0x27a   : > { %v6484_v47 = vadd.f32 %v4776_v58, %v1081_v56  ;;  %v4777_v48 = vpop.f32.mrb[22].mxu0  ;;  %v1082_v62 = vmul.f32 %v4759_v55, %v5586_v5  ;;  %v951_v60 = vpop.f32.mrb[7].mxu1 }
 0x27b   : > { %3476 = vperm.xlu1 %5157, %v5411_v14   ;;  %v1147_v57 = vpop.f32.mrb[23].mxu0  ;;  %v6489_v46 = vadd.f32 %v1144_v40, %v1079_v19  ;;  %v1080_v2 = vmul.f32 %v5576_v1, %v951_v60  ;;  %v6503_v58 = vpop.permute.xlu0 %3080 }
 0x27c   : > { %v6492_v43 = vadd.f32 %v4777_v48, %v1082_v62  ;;  %7594 = vst [vmem:[#allocation140_spill] sm:$0xff] %v6503_v58 }
 0x27d   : > { %v6494_v12 = vadd.f32 %v1147_v57, %v1080_v2 }
 0x27e   : > { %5005 = vmatmul.mubr.msk.bf16.vlgmr.msra.gmra.mrb[112].mxu1 %vm866_vm4, %v5764_v21  ;;  %v6498_v59 = vpop.permute.xlu1 %3056 }
 0x27f   : > { %5023 = vmatmul.mubr.msk.bf16.vlgmr.msra.gmra.mrb[128].mxu0 %vm866_vm4, %v5764_v21  ;;  %5158 = vset.pattern.permute.xlu1 %v7567_v0  ;;  %v4762_v5 = vpop.f32.mrb[8].mxu1  ;;  %v4780_v56 = vpop.f32.mrb[24].mxu0 }
 0x280   : > { %5008 = vmatprep.mubr.msk.bf16.mxu1 %vm866_vm4, %v5800_v41  ;;  %5026 = vmatprep.mubr.msk.bf16.mxu0 %vm866_vm4, %v5800_v41  ;;  %v1085_v1 = vmul.f32 %v4762_v5, %v5594_v9  ;;  %v964_v42 = vpop.f32.mrb[9].mxu1  ;;  %v1160_v19 = vpop.f32.mrb[25].mxu0 }
 0x281   : > { %3860 = vperm.xlu1 %5158, %v5400_v3   ;;  %v1083_v40 = vmul.f32 %v5588_v6, %v964_v42  ;;  %v4763_v55 = vpop.f32.mrb[10].mxu1  ;;  %5039 = vmatpush3.bf16.msra.mxu1 %v6402_v31  ;;  %v4781_v57 = vpop.f32.mrb[26].mxu0 }
 0x282   : > { %v6513_v48 = vadd.f32 %v4780_v56, %v1085_v1  ;;  %v6515_v62 = vpop.permute.xlu1 %3064  ;;  %v1086_v60 = vmul.f32 %v4763_v55, %v5604_v13  ;;  %v967_v50 = vpop.f32.mrb[11].mxu1 }
 0x283   : > { %v6518_v2 = vadd.f32 %v1160_v19, %v1083_v40  ;;  %v1163_v9 = vpop.f32.mrb[27].mxu0  ;;  %v1084_v58 = vmul.f32 %v5592_v8, %v967_v50  ;;  %v6535_v8 = vpop.permute.xlu0 %3088 }
 0x284   : > { %v6520_v5 = vadd.f32 %v4781_v57, %v1086_v60  ;;  %7596 = vst [vmem:[#allocation142_spill] sm:$0xff] %v6535_v8 }
 0x285   : > { %5159 = vset.pattern.permute.xlu1 %v7552_v44  ;;  %v6524_v6 = vadd.f32 %v1163_v9, %v1084_v58 }
 0x286   : > { %3284 = vperm.xlu1 %5159, %v5413_v15   ;;  %5009 = vmatmul.mubr.msk.bf16.gmra.mrb[116].mxu1 %vm866_vm4, %v5796_v51  ;;  %v6529_v31 = vpop.permute.xlu1 %3068 }
 0x287   : > { %7595 = vst [vmem:[#allocation141_spill] sm:$0xff] %v6529_v31  ;;  %5027 = vmatmul.mubr.msk.bf16.gmra.mrb[132].mxu0 %vm866_vm4, %v5796_v51  ;;  %5012 = vmatprep.mubr.msk.bf16.mxu1 %vm866_vm4, %v5824_v22  ;;  %v4766_v13 = vpop.f32.mrb[12].mxu1  ;;  %v4784_v56 = vpop.f32.mrb[28].mxu0 }
 0x288   : > { %5030 = vmatprep.mubr.msk.bf16.mxu0 %vm866_vm4, %v5824_v22  ;;  %v1089_v50 = vmul.f32 %v4766_v13, %v5616_v20  ;;  %v980_v58 = vpop.f32.mrb[13].mxu1  ;;  %v1176_v42 = vpop.f32.mrb[29].mxu0 }
 0x289   : > { %v1087_v1 = vmul.f32 %v5606_v16, %v980_v58  ;;  %v4767_v40 = vpop.f32.mrb[14].mxu1  ;;  %v4785_v57 = vpop.f32.mrb[30].mxu0 }
 0x28a   : > { %5160 = vset.pattern.permute.xlu1 %v7563_v17  ;;  %v6542_v19 = vadd.f32 %v4784_v56, %v1089_v50  ;;  %v6544_v55 = vpop.permute.xlu1 %3076  ;;  %v1090_v60 = vmul.f32 %v4767_v40, %v5620_v23  ;;  %v983_v8 = vpop.f32.mrb[15].mxu1 }
 0x28b   : > { %7597 = vst [vmem:[#allocation143_spill] sm:$0xff] %v6544_v55  ;;  %3668 = vperm.xlu1 %5160, %v5403_v7   ;;  %v6548_v9 = vadd.f32 %v1176_v42, %v1087_v1  ;;  %v1179_v20 = vpop.f32.mrb[31].mxu0  ;;  %v1088_v16 = vmul.f32 %v5614_v18, %v983_v8  ;;  %v6562_v1 = vpop.permute.xlu0 %3096 }
 0x28c   : > { %v6550_v13 = vadd.f32 %v4785_v57, %v1090_v60  ;;  %7599 = vst [vmem:[#allocation145_spill] sm:$0xff] %v6562_v1 }
 0x28d   : > { %v6553_v58 = vadd.f32 %v1179_v20, %v1088_v16 }
 0x28e   : > { %5013 = vmatmul.mubr.msk.bf16.gmra.mrb[120].mxu1 %vm866_vm4, %v5822_v49  ;;  %v6557_v56 = vpop.permute.xlu1 %3084 }
 0x28f   : > { %7598 = vst [vmem:[#allocation144_spill] sm:$0xff] %v6557_v56  ;;  %3672 = vperm.xlu1 %5160, %v5411_v14   ;;  %5031 = vmatmul.mubr.msk.bf16.gmra.mrb[136].mxu0 %vm866_vm4, %v5822_v49  ;;  %v4790_v23 = vpop.f32.mrb[16].mxu1  ;;  %v4808_v50 = vpop.f32.mrb[32].mxu0 }
 0x290   : > { %5016 = vmatprep.mubr.msk.bf16.mxu1 %vm866_vm4, %v5848_v37  ;;  %5034 = vmatprep.mubr.msk.bf16.mxu0 %vm866_vm4, %v5848_v37  ;;  %v1357_v18 = vmul.f32 %v4790_v23, %v5632_v28  ;;  %v1228_v8 = vpop.f32.mrb[17].mxu1  ;;  %v1424_v40 = vpop.f32.mrb[33].mxu0  ;;  %v1553_v20 = vmul.f32 %v4808_v50, %v5681_v61 }
 0x291   : > { %v1355_v42 = vmul.f32 %v5623_v25, %v1228_v8  ;;  %v4791_v60 = vpop.f32.mrb[18].mxu1  ;;  %v4809_v55 = vpop.f32.mrb[34].mxu0  ;;  %v1551_v28 = vmul.f32 %v5675_v53, %v1424_v40 }
 0x292   : > { %v1373_v57 = vadd.f32 %v1357_v18, %v6456_v30  ;;  %v6572_v16 = vpop.permute.xlu1 %3092  ;;  %v1358_v1 = vmul.f32 %v4791_v60, %v5629_v27  ;;  %v1231_v23 = vpop.f32.mrb[19].mxu1  ;;  %v1554_v61 = vmul.f32 %v4809_v55, %v5687_v10 }
 0x293   : > { %5161 = vset.pattern.permute.xlu1 %v7587_v63  ;;  %v1371_v56 = vadd.f32 %v1355_v42, %v6460_v11  ;;  %v1427_v31 = vpop.f32.mrb[35].mxu0  ;;  %v1356_v50 = vmul.f32 %v5626_v26, %v1231_v23  ;;  %v6598_v10 = vpop.permute.xlu0 %3104 }
 0x294   : > { %v6578_v25 = vadd.f32 %v1553_v20, %v1373_v57  ;;  %4056 = vperm.xlu1 %5161, %v5400_v3   ;;  %v1374_v30 = vadd.f32 %v1358_v1, %v6462_v32  ;;  %v1552_v53 = vmul.f32 %v5671_v52, %v1427_v31  ;;  %v7600_v31 = vld [vmem:[#allocation6_spill] sm:$0xff]  ;;  %v7602_v57 = vld [vmem:[#allocation7_spill] sm:$0xff] }
 0x295   : > { %v6584_v27 = vadd.f32 %v1551_v28, %v1371_v56  ;;  %v1372_v11 = vadd.f32 %v1356_v50, %v6467_v54 }
 0x296   : > { %v6586_v18 = vadd.f32 %v1554_v61, %v1374_v30  ;;  %5017 = vmatmul.mubr.msk.bf16.gmra.mrb[124].mxu1 %vm866_vm4, %v5844_v4  ;;  %v6592_v8 = vpop.permute.xlu1 %3100  ;;  %v7603_v30 = vld [vmem:[#allocation16_spill] sm:$0xff] }
 0x297   : > { %5035 = vmatmul.mubr.msk.bf16.gmra.mrb[140].mxu0 %vm866_vm4, %v5844_v4  ;;  %5040 = vmatprep.mubr.msk.bf16.mxu1 %vm866_vm4, %v5766_v29  ;;  %v4794_v3 = vpop.f32.mrb[20].mxu1  ;;  %v4812_v26 = vpop.f32.mrb[36].mxu0  ;;  %v6600_v32 = vadd.f32 %v1552_v53, %v1372_v11  ;;  %v7601_v29 = vld [vmem:[#allocation17_spill] sm:$0xff] }
 0x298   : > { %5162 = vset.pattern.permute.xlu1 %v7565_v34  ;;  %v1361_v52 = vmul.f32 %v4794_v3, %v5644_v35  ;;  %v1244_v54 = vpop.f32.mrb[21].mxu1  ;;  %v1440_v56 = vpop.f32.mrb[37].mxu0  ;;  %v1557_v40 = vmul.f32 %v4812_v26, %v7601_v29  ;;  %v7604_v3 = vld [vmem:[#allocation21_spill] sm:$0xff] }
 0x299   : > { %3480 = vperm.xlu1 %5162, %v5413_v15   ;;  %v1359_v55 = vmul.f32 %v7600_v31, %v1244_v54  ;;  %v4795_v1 = vpop.f32.mrb[22].mxu1  ;;  %v4813_v28 = vpop.f32.mrb[38].mxu0  ;;  %v1555_v35 = vmul.f32 %v7603_v30, %v1440_v56 }
 0x29a   : > { %v1377_v42 = vadd.f32 %v1361_v52, %v6484_v47  ;;  %v6608_v60 = vpop.permute.xlu1 %3108  ;;  %v1362_v20 = vmul.f32 %v4795_v1, %v7602_v57  ;;  %v1247_v61 = vpop.f32.mrb[23].mxu1  ;;  %v1558_v54 = vmul.f32 %v4813_v28, %v7604_v3  ;;  %v7605_v47 = vld [vmem:[#allocation5_spill] sm:$0xff] }
 0x29b   : > { %v1375_v23 = vadd.f32 %v1359_v55, %v6489_v46  ;;  %v1443_v50 = vpop.f32.mrb[39].mxu0  ;;  %v1360_v52 = vmul.f32 %v7605_v47, %v1247_v61  ;;  %v6621_v31 = vpop.permute.xlu0 %3112  ;;  %v7606_v55 = vld [vmem:[#allocation19_spill] sm:$0xff]  ;;  %v7610_v61 = vld [vmem:[#allocation20_spill] sm:$0xff]  ;;  %v7612_v47 = vld [vmem:[#allocation18_spill] sm:$0xff] }
 0x29c   : > { %v6613_v11 = vadd.f32 %v1557_v40, %v1377_v42  ;;  %v1378_v53 = vadd.f32 %v1362_v20, %v6492_v43  ;;  %v1556_v56 = vmul.f32 %v7606_v55, %v1443_v50  ;;  %v7608_v40 = vld [vmem:[#allocation11_spill] sm:$0xff] }
 0x29d   : > { %v6618_v26 = vadd.f32 %v1555_v35, %v1375_v23  ;;  %5163 = vset.pattern.permute.xlu1 %v7567_v0  ;;  %v1376_v46 = vadd.f32 %v1360_v52, %v6494_v12  ;;  %v7609_v12 = vld [vmem:[#allocation9_spill] sm:$0xff] }
 0x29e   : > { %v6623_v1 = vadd.f32 %v1558_v54, %v1378_v53  ;;  %3864 = vperm.xlu1 %5163, %v5403_v7   ;;  %5041 = vmatmul.mubr.msk.bf16.vlgmr.msra.gmra.mrb[128].mxu1 %vm866_vm4, %v5764_v21 }
 0x29f   : > { %5044 = vmatprep.mubr.msk.bf16.mxu1 %vm866_vm4, %v5800_v41  ;;  %v6632_v43 = vpop.permute.xlu1 %3252  ;;  %v4798_v42 = vpop.f32.mrb[24].mxu1  ;;  %v6634_v29 = vadd.f32 %v1556_v56, %v1376_v46  ;;  %v7611_v41 = vld [vmem:[#allocation10_spill] sm:$0xff] }
 0x2a0   : > { %7607 = vst [vmem:[#allocation6_spill] sm:$0xff] %v6632_v43  ;;  %v1365_v57 = vmul.f32 %v4798_v42, %v7608_v40  ;;  %v4816_v20 = vpop.f32.mrb[40].mxu0  ;;  %v1260_v28 = vpop.f32.mrb[25].mxu1  ;;  %v7613_v40 = vld [vmem:[#allocation25_spill] sm:$0xff] }
 0x2a1   : > { %v1363_v23 = vmul.f32 %v7609_v12, %v1260_v28  ;;  %v1456_v30 = vpop.f32.mrb[41].mxu0  ;;  %v4799_v35 = vpop.f32.mrb[26].mxu1  ;;  %v1561_v50 = vmul.f32 %v4816_v20, %v7610_v61  ;;  %v7614_v12 = vld [vmem:[#allocation8_spill] sm:$0xff] }
 0x2a2   : > { %3868 = vperm.xlu1 %5163, %v5411_v14   ;;  %v1381_v21 = vadd.f32 %v1365_v57, %v6513_v48  ;;  %v1366_v53 = vmul.f32 %v4799_v35, %v7611_v41  ;;  %v4817_v3 = vpop.f32.mrb[42].mxu0  ;;  %v1559_v52 = vmul.f32 %v7612_v47, %v1456_v30  ;;  %v1263_v46 = vpop.f32.mrb[27].mxu1 }
 0x2a3   : > { %v1379_v54 = vadd.f32 %v1363_v23, %v6518_v2  ;;  %v1459_v55 = vpop.f32.mrb[43].mxu0  ;;  %v1562_v28 = vmul.f32 %v4817_v3, %v7613_v40  ;;  %v1364_v43 = vmul.f32 %v7614_v12, %v1263_v46  ;;  %v6653_v20 = vpop.permute.xlu0 %3852  ;;  %v7616_v23 = vld [vmem:[#allocation23_spill] sm:$0xff]  ;;  %v7619_v3 = vld [vmem:[#allocation13_spill] sm:$0xff]  ;;  %v7620_v46 = vld [vmem:[#allocation24_spill] sm:$0xff] }
 0x2a4   : > { %v6644_v56 = vadd.f32 %v1561_v50, %v1381_v21  ;;  %v1382_v42 = vadd.f32 %v1366_v53, %v6520_v5  ;;  %v6649_v48 = vpop.permute.xlu1 %3448  ;;  %7615 = vst [vmem:[#allocation17_spill] sm:$0xff] %v6653_v20  ;;  %v1560_v30 = vmul.f32 %v7616_v23, %v1459_v55  ;;  %v7617_v5 = vld [vmem:[#allocation3_spill] sm:$0xff]  ;;  %v7622_v12 = vld [vmem:[#allocation22_spill] sm:$0xff] }
 0x2a5   : > { %v6651_v57 = vadd.f32 %v1559_v52, %v1379_v54  ;;  %v1380_v2 = vadd.f32 %v1364_v43, %v6524_v6  ;;  %v7618_v53 = vld [vmem:[#allocation15_spill] sm:$0xff] }
 0x2a6   : > { %v6655_v35 = vadd.f32 %v1562_v28, %v1382_v42  ;;  %5164 = vset.pattern.permute.xlu1 %v7552_v44  ;;  %5045 = vmatmul.mubr.msk.bf16.gmra.mrb[132].mxu1 %vm866_vm4, %v5796_v51  ;;  %v7621_v42 = vld [vmem:[#allocation14_spill] sm:$0xff] }
 0x2a7   : > { %3296 = vperm.xlu1 %5164, %v7617_v5   ;;  %5048 = vmatprep.mubr.msk.bf16.mxu1 %vm866_vm4, %v5824_v22  ;;  %v4802_v21 = vpop.f32.mrb[28].mxu1  ;;  %v4820_v61 = vpop.f32.mrb[44].mxu0  ;;  %v6665_v50 = vadd.f32 %v1560_v30, %v1380_v2 }
 0x2a8   : > { %v6667_v41 = vpop.permute.xlu1 %3452  ;;  %v1369_v6 = vmul.f32 %v4802_v21, %v7618_v53  ;;  %v1276_v43 = vpop.f32.mrb[29].mxu1  ;;  %v1565_v55 = vmul.f32 %v4820_v61, %v7620_v46  ;;  %v7624_v61 = vld [vmem:[#allocation12_spill] sm:$0xff] }
 0x2a9   : > { %v1367_v54 = vmul.f32 %v7619_v3, %v1276_v43  ;;  %v1472_v47 = vpop.f32.mrb[45].mxu0  ;;  %v4803_v52 = vpop.f32.mrb[30].mxu1 }
 0x2aa   : > { %v1385_v51 = vadd.f32 %v1369_v6, %v6542_v19  ;;  %v1370_v40 = vmul.f32 %v4803_v52, %v7621_v42  ;;  %v4821_v22 = vpop.f32.mrb[46].mxu0  ;;  %v1563_v2 = vmul.f32 %v7622_v12, %v1472_v47  ;;  %v1279_v23 = vpop.f32.mrb[31].mxu1  ;;  %v7623_v19 = vld [vmem:[#allocation29_spill] sm:$0xff]  ;;  %v7626_v47 = vld [vmem:[#allocation27_spill] sm:$0xff] }
 0x2ab   : > { %5165 = vset.pattern.permute.xlu1 %v7563_v17  ;;  %v1383_v28 = vadd.f32 %v1367_v54, %v6548_v9  ;;  %v1475_v30 = vpop.f32.mrb[47].mxu0  ;;  %v1566_v6 = vmul.f32 %v4821_v22, %v7623_v19  ;;  %v1368_v43 = vmul.f32 %v7624_v61, %v1279_v23  ;;  %v6687_v46 = vpop.permute.xlu0 %3856 }
 0x2ac   : > { %v6677_v21 = vadd.f32 %v1565_v55, %v1385_v51  ;;  %3676 = vperm.xlu1 %5165, %v5413_v15   ;;  %v1386_v53 = vadd.f32 %v1370_v40, %v6550_v13  ;;  %7625 = vst [vmem:[#allocation7_spill] sm:$0xff] %v6687_v46  ;;  %v1564_v51 = vmul.f32 %v7626_v47, %v1475_v30  ;;  %v7627_v40 = vld [vmem:[#allocation33_spill] sm:$0xff]  ;;  %v7634_v46 = vld [vmem:[#allocation31_spill] sm:$0xff] }
 0x2ad   : > { %v6683_v3 = vadd.f32 %v1563_v2, %v1383_v28  ;;  %v6685_v52 = vpop.permute.xlu1 %3264  ;;  %v1384_v54 = vadd.f32 %v1368_v43, %v6553_v58  ;;  %v7628_v58 = vld [vmem:[#allocation26_spill] sm:$0xff] }
 0x2ae   : > { %v6689_v9 = vadd.f32 %v1566_v6, %v1386_v53  ;;  %5049 = vmatmul.mubr.msk.bf16.gmra.mrb[136].mxu1 %vm866_vm4, %v5822_v49  ;;  %v7629_v53 = vld [vmem:[#allocation49_spill] sm:$0xff]  ;;  %v7631_v6 = vld [vmem:[#allocation28_spill] sm:$0xff] }
 0x2af   : > { %5052 = vmatprep.mubr.msk.bf16.mxu1 %vm866_vm4, %v5848_v37  ;;  %v4826_v13 = vpop.f32.mrb[32].mxu1  ;;  %v4844_v55 = vpop.f32.mrb[48].mxu0  ;;  %v6697_v42 = vadd.f32 %v1564_v51, %v1384_v54  ;;  %v7632_v54 = vld [vmem:[#allocation47_spill] sm:$0xff] }
 0x2b0   : > { %5166 = vset.pattern.permute.xlu1 %v7587_v63  ;;  %v1749_v22 = vmul.f32 %v4826_v13, %v7627_v40  ;;  %v1620_v28 = vpop.f32.mrb[33].mxu1  ;;  %v1816_v12 = vpop.f32.mrb[49].mxu0  ;;  %v1945_v37 = vmul.f32 %v4844_v55, %v7629_v53 }
 0x2b1   : > { %4060 = vperm.xlu1 %5166, %v5403_v7   ;;  %v1747_v2 = vmul.f32 %v7628_v58, %v1620_v28  ;;  %v4827_v23 = vpop.f32.mrb[34].mxu1  ;;  %v4845_v30 = vpop.f32.mrb[50].mxu0  ;;  %v1943_v47 = vmul.f32 %v7632_v54, %v1816_v12  ;;  %v7633_v28 = vld [vmem:[#allocation51_spill] sm:$0xff] }
 0x2b2   : > { %v1765_v49 = vadd.f32 %v1749_v22, %v6578_v25  ;;  %v6705_v19 = vpop.permute.xlu1 %3648  ;;  %v1750_v61 = vmul.f32 %v4827_v23, %v7631_v6  ;;  %v1623_v51 = vpop.f32.mrb[35].mxu1  ;;  %v1946_v58 = vmul.f32 %v4845_v30, %v7633_v28 }
 0x2b3   : > { %7630 = vst [vmem:[#allocation16_spill] sm:$0xff] %v6705_v19  ;;  %v1763_v43 = vadd.f32 %v1747_v2, %v6584_v27  ;;  %v1819_v13 = vpop.f32.mrb[51].mxu0  ;;  %v1748_v25 = vmul.f32 %v7634_v46, %v1623_v51  ;;  %v7635_v2 = vld [vmem:[#allocation42_spill] sm:$0xff]  ;;  %v6724_v23 = vpop.permute.xlu0 %3876 }
 0x2b4   : > { %v6710_v40 = vadd.f32 %v1945_v37, %v1765_v49  ;;  %v1766_v7 = vadd.f32 %v1750_v61, %v6586_v18  ;;  %v1944_v12 = vmul.f32 %v7635_v2, %v1819_v13  ;;  %7636 = vst [vmem:[#allocation21_spill] sm:$0xff] %v6724_v23  ;;  %v7640_v13 = vld [vmem:[#allocation32_spill] sm:$0xff]  ;;  %v7642_v2 = vld [vmem:[#allocation30_spill] sm:$0xff] }
 0x2b5   : > { %v6715_v22 = vadd.f32 %v1943_v47, %v1763_v43  ;;  %4064 = vperm.xlu1 %5166, %v5411_v14   ;;  %v1764_v27 = vadd.f32 %v1748_v25, %v6600_v32  ;;  %v7637_v14 = vld [vmem:[#allocation37_spill] sm:$0xff]  ;;  %v7638_v32 = vld [vmem:[#allocation35_spill] sm:$0xff]  ;;  %v7639_v47 = vld [vmem:[#allocation46_spill] sm:$0xff] }
 0x2b6   : > { %v6718_v55 = vadd.f32 %v1946_v58, %v1766_v7  ;;  %5053 = vmatmul.mubr.msk.bf16.gmra.mrb[140].mxu1 %vm866_vm4, %v5844_v4  ;;  %v7641_v25 = vld [vmem:[#allocation44_spill] sm:$0xff] }
 0x2b7   : > { %v6726_v18 = vpop.permute.xlu1 %3456  ;;  %v6728_v30 = vadd.f32 %v1944_v12, %v1764_v27  ;;  %v4830_v46 = vpop.f32.mrb[36].mxu1 }
 0x2b8   : > { %v4848_v49 = vpop.f32.mrb[52].mxu0  ;;  %v1753_v53 = vmul.f32 %v4830_v46, %v7637_v14  ;;  %v1636_v37 = vpop.f32.mrb[37].mxu1 }
 0x2b9   : > { %5167 = vset.pattern.permute.xlu1 %v7565_v34  ;;  %v1832_v6 = vpop.f32.mrb[53].mxu0  ;;  %v1751_v61 = vmul.f32 %v7638_v32, %v1636_v37  ;;  %v4831_v43 = vpop.f32.mrb[38].mxu1  ;;  %v1949_v51 = vmul.f32 %v4848_v49, %v7639_v47  ;;  %v7644_v32 = vld [vmem:[#allocation55_spill] sm:$0xff] }
 0x2ba   : > { %3492 = vperm.xlu1 %5167, %v7617_v5   ;;  %v4849_v4 = vpop.f32.mrb[54].mxu0  ;;  %v1769_v54 = vadd.f32 %v1753_v53, %v6613_v11  ;;  %v1754_v7 = vmul.f32 %v4831_v43, %v7640_v13  ;;  %v1639_v28 = vpop.f32.mrb[39].mxu1  ;;  %v1947_v27 = vmul.f32 %v7641_v25, %v1832_v6  ;;  %v7645_v43 = vld [vmem:[#allocation53_spill] sm:$0xff] }
 0x2bb   : > { %v1767_v58 = vadd.f32 %v1751_v61, %v6618_v26  ;;  %v1752_v12 = vmul.f32 %v7642_v2, %v1639_v28  ;;  %v1835_v46 = vpop.f32.mrb[55].mxu0  ;;  %v1950_v11 = vmul.f32 %v4849_v4, %v7644_v32  ;;  %v6751_v26 = vpop.permute.xlu0 %3256  ;;  %v7647_v4 = vld [vmem:[#allocation41_spill] sm:$0xff] }
 0x2bc   : > { %v6740_v14 = vpop.permute.xlu1 %3840  ;;  %v6742_v23 = vadd.f32 %v1949_v51, %v1769_v54  ;;  %v1770_v37 = vadd.f32 %v1754_v7, %v6623_v1  ;;  %v1948_v47 = vmul.f32 %v7645_v43, %v1835_v46 }
 0x2bd   : > { %7643 = vst [vmem:[#allocation5_spill] sm:$0xff] %v6740_v14  ;;  %v6746_v53 = vadd.f32 %v1947_v27, %v1767_v58  ;;  %v1768_v49 = vadd.f32 %v1752_v12, %v6634_v29  ;;  %v7648_v58 = vld [vmem:[#allocation50_spill] sm:$0xff]  ;;  %v7649_v27 = vld [vmem:[#allocation39_spill] sm:$0xff] }
 0x2be   : > { %5168 = vset.pattern.permute.xlu1 %v7567_v0  ;;  %v6753_v6 = vadd.f32 %v1950_v11, %v1770_v37  ;;  %v7650_v37 = vld [vmem:[#allocation36_spill] sm:$0xff] }
 0x2bf   : > { %3872 = vperm.xlu1 %5168, %v5413_v15   ;;  %v4834_v61 = vpop.f32.mrb[40].mxu1  ;;  %v6756_v54 = vadd.f32 %v1948_v47, %v1768_v49  ;;  %v4852_v13 = vpop.f32.mrb[56].mxu0  ;;  %v7651_v47 = vld [vmem:[#allocation48_spill] sm:$0xff] }
 0x2c0   : > { %v6758_v1 = vpop.permute.xlu1 %3844  ;;  %v1757_v51 = vmul.f32 %v4834_v61, %v7647_v4  ;;  %v1652_v7 = vpop.f32.mrb[41].mxu1  ;;  %v1953_v25 = vmul.f32 %v4852_v13, %v7648_v58 }
 0x2c1   : > { %7646 = vst [vmem:[#allocation19_spill] sm:$0xff] %v6758_v1  ;;  %v1848_v29 = vpop.f32.mrb[57].mxu0  ;;  %v1755_v2 = vmul.f32 %v7649_v27, %v1652_v7  ;;  %v4835_v12 = vpop.f32.mrb[42].mxu1  ;;  %v7653_v7 = vld [vmem:[#allocation59_spill] sm:$0xff] }
 0x2c2   : > { %v1773_v28 = vadd.f32 %v1757_v51, %v6644_v56  ;;  %v4853_v46 = vpop.f32.mrb[58].mxu0  ;;  %v1758_v32 = vmul.f32 %v4835_v12, %v7650_v37  ;;  %v1655_v11 = vpop.f32.mrb[43].mxu1  ;;  %v1951_v61 = vmul.f32 %v7651_v47, %v1848_v29  ;;  %v7652_v56 = vld [vmem:[#allocation34_spill] sm:$0xff]  ;;  %v7657_v47 = vld [vmem:[#allocation43_spill] sm:$0xff] }
 0x2c3   : > { %5170 = vset.pattern.permute.xlu1 %v7552_v44  ;;  %v1771_v43 = vadd.f32 %v1755_v2, %v6651_v57  ;;  %v1756_v4 = vmul.f32 %v7652_v56, %v1655_v11  ;;  %v1851_v51 = vpop.f32.mrb[59].mxu0  ;;  %v1954_v58 = vmul.f32 %v4853_v46, %v7653_v7  ;;  %v6780_v57 = vpop.permute.xlu0 %3260 }
 0x2c4   : > { %v6766_v49 = vadd.f32 %v1953_v25, %v1773_v28  ;;  %3300 = vperm.xlu1 %5170, %v5436_v33   ;;  %v1774_v13 = vadd.f32 %v1758_v32, %v6655_v35  ;;  %v7655_v25 = vld [vmem:[#allocation57_spill] sm:$0xff] }
 0x2c5   : > { %v6774_v27 = vpop.permute.xlu1 %3272  ;;  %v6776_v1 = vadd.f32 %v1951_v61, %v1771_v43  ;;  %v1772_v28 = vadd.f32 %v1756_v4, %v6665_v50  ;;  %v1952_v12 = vmul.f32 %v7655_v25, %v1851_v51  ;;  %v7656_v35 = vld [vmem:[#allocation45_spill] sm:$0xff]  ;;  %v7658_v4 = vld [vmem:[#allocation54_spill] sm:$0xff] }
 0x2c6   : > { %7654 = vst [vmem:[#allocation11_spill] sm:$0xff] %v6774_v27  ;;  %v6782_v29 = vadd.f32 %v1954_v58, %v1774_v13  ;;  %v7660_v13 = vld [vmem:[#allocation40_spill] sm:$0xff]  ;;  %v7704_v27 = vld [vmem:[#allocation97_spill] sm:$0xff] }
 0x2c7   : > { %v4838_v2 = vpop.f32.mrb[44].mxu1  ;;  %v6784_v37 = vadd.f32 %v1952_v12, %v1772_v28  ;;  %v4856_v46 = vpop.f32.mrb[60].mxu0  ;;  %v7661_v12 = vld [vmem:[#allocation52_spill] sm:$0xff] }
 0x2c8   : > { %3304 = vperm.xlu1 %5170, %v5443_v39   ;;  %v1761_v32 = vmul.f32 %v4838_v2, %v7656_v35  ;;  %v1668_v11 = vpop.f32.mrb[45].mxu1  ;;  %v1864_v61 = vpop.f32.mrb[61].mxu0  ;;  %v1957_v51 = vmul.f32 %v4856_v46, %v7658_v4 }
 0x2c9   : > { %v1759_v43 = vmul.f32 %v7657_v47, %v1668_v11  ;;  %v4839_v56 = vpop.f32.mrb[46].mxu1  ;;  %v4857_v28 = vpop.f32.mrb[62].mxu0  ;;  %v1955_v20 = vmul.f32 %v7661_v12, %v1864_v61  ;;  %v7662_v47 = vld [vmem:[#allocation63_spill] sm:$0xff] }
 0x2ca   : > { %v1777_v50 = vadd.f32 %v1761_v32, %v6677_v21  ;;  %v6791_v7 = vpop.permute.xlu1 %3652  ;;  %v1762_v58 = vmul.f32 %v4839_v56, %v7660_v13  ;;  %v1671_v2 = vpop.f32.mrb[47].mxu1  ;;  %v1958_v21 = vmul.f32 %v4857_v28, %v7662_v47  ;;  %v7663_v32 = vld [vmem:[#allocation38_spill] sm:$0xff]  ;;  %v7668_v47 = vld [vmem:[#allocation56_spill] sm:$0xff] }
 0x2cb   : > { %7659 = vst [vmem:[#allocation9_spill] sm:$0xff] %v6791_v7  ;;  %v1775_v25 = vadd.f32 %v1759_v43, %v6683_v3  ;;  %v1760_v46 = vmul.f32 %v7663_v32, %v1671_v2  ;;  %v1867_v4 = vpop.f32.mrb[63].mxu0  ;;  %v7664_v43 = vld [vmem:[#allocation61_spill] sm:$0xff]  ;;  %v6811_v13 = vpop.permute.xlu0 %3268  ;;  %v7667_v2 = vld [vmem:[#allocation83_spill] sm:$0xff] }
 0x2cc   : > { %v6796_v35 = vadd.f32 %v1957_v51, %v1777_v50  ;;  %5171 = vset.pattern.permute.xlu1 %v7563_v17  ;;  %v1778_v11 = vadd.f32 %v1762_v58, %v6689_v9  ;;  %v1956_v61 = vmul.f32 %v7664_v43, %v1867_v4  ;;  %v7666_v58 = vld [vmem:[#allocation67_spill] sm:$0xff]  ;;  %v7669_v4 = vld [vmem:[#allocation58_spill] sm:$0xff] }
 0x2cd   : > { %v6802_v19 = vadd.f32 %v1955_v20, %v1775_v25  ;;  %3688 = vperm.xlu1 %5171, %v7617_v5   ;;  %v1776_v3 = vadd.f32 %v1760_v46, %v6697_v42 }
 0x2ce   : > { %v6805_v56 = vadd.f32 %v1958_v21, %v1778_v11 }
 0x2cf   : > { %v6809_v50 = vpop.permute.xlu1 %4036  ;;  %v4862_v51 = vpop.f32.mrb[48].mxu1  ;;  %v6813_v9 = vadd.f32 %v1956_v61, %v1776_v3 }
 0x2d0   : > { %7665 = vst [vmem:[#allocation20_spill] sm:$0xff] %v6809_v50  ;;  %v2141_v28 = vmul.f32 %v4862_v51, %v7666_v58  ;;  %v4880_v12 = vpop.f32.mrb[64].mxu0  ;;  %v2012_v20 = vpop.f32.mrb[49].mxu1  ;;  %v7671_v50 = vld [vmem:[#allocation81_spill] sm:$0xff] }
 0x2d1   : > { %5172 = vset.pattern.permute.xlu1 %v7587_v63  ;;  %v2208_v25 = vpop.f32.mrb[65].mxu0  ;;  %v2337_v11 = vmul.f32 %v4880_v12, %v7667_v2  ;;  %v2139_v21 = vmul.f32 %v7668_v47, %v2012_v20  ;;  %v4863_v32 = vpop.f32.mrb[50].mxu1  ;;  %v7673_v12 = vld [vmem:[#allocation85_spill] sm:$0xff] }
 0x2d2   : > { %4068 = vperm.xlu1 %5172, %v5413_v15   ;;  %v2157_v42 = vadd.f32 %v2141_v28, %v6710_v40  ;;  %v4881_v46 = vpop.f32.mrb[66].mxu0  ;;  %v2142_v3 = vmul.f32 %v4863_v32, %v7669_v4  ;;  %v2015_v61 = vpop.f32.mrb[51].mxu1  ;;  %v2335_v14 = vmul.f32 %v7671_v50, %v2208_v25  ;;  %v7672_v15 = vld [vmem:[#allocation65_spill] sm:$0xff]  ;;  %v7674_v32 = vld [vmem:[#allocation72_spill] sm:$0xff] }
 0x2d3   : > { %v6822_v43 = vpop.permute.xlu1 %4040  ;;  %v2155_v58 = vadd.f32 %v2139_v21, %v6715_v22  ;;  %v2140_v7 = vmul.f32 %v7672_v15, %v2015_v61  ;;  %v2211_v40 = vpop.f32.mrb[67].mxu0  ;;  %v2338_v20 = vmul.f32 %v4881_v46, %v7673_v12 }
 0x2d4   : > { %7670 = vst [vmem:[#allocation10_spill] sm:$0xff] %v6822_v43  ;;  %v6824_v51 = vadd.f32 %v2337_v11, %v2157_v42  ;;  %v2158_v28 = vadd.f32 %v2142_v3, %v6718_v55  ;;  %v2336_v4 = vmul.f32 %v7674_v32, %v2211_v40  ;;  %v7675_v43 = vmov 10   ;;  %v6839_v50 = vpop.permute.xlu0 %3288  ;;  %v7678_v11 = vld [vmem:[#allocation71_spill] sm:$0xff]  ;;  %v7681_v40 = vld [vmem:[#allocation62_spill] sm:$0xff] }
 0x2d5   : > { %v6831_v2 = vadd.f32 %v2335_v14, %v2155_v58  ;;  %v2156_v47 = vadd.f32 %v2140_v7, %v6728_v30  ;;  %7676 = vst [vmem:[#allocation18_spill] sm:$0xff] %v6839_v50  ;;  %v7679_v7 = vld [vmem:[#allocation76_spill] sm:$0xff] }
 0x2d6   : > { %5173 = vset.pattern.permute.xlu1 %v7675_v43  ;;  %v6836_v42 = vadd.f32 %v2338_v20, %v2158_v28  ;;  %v7680_v43 = vld [vmem:[#allocation69_spill] sm:$0xff] }
 0x2d7   : > { %3116 = vperm.xlu1 %5173, %v5454_v38   ;;  %v4866_v22 = vpop.f32.mrb[52].mxu1  ;;  %v6841_v25 = vadd.f32 %v2336_v4, %v2156_v47  ;;  %v7682_v4 = vld [vmem:[#allocation74_spill] sm:$0xff] }
 0x2d8   : > { %v6843_v55 = vpop.permute.xlu1 %3468  ;;  %v2145_v14 = vmul.f32 %v4866_v22, %v7678_v11  ;;  %v4884_v21 = vpop.f32.mrb[68].mxu0 }
 0x2d9   : > { %7677 = vst [vmem:[#allocation25_spill] sm:$0xff] %v6843_v55  ;;  %v2028_v46 = vpop.f32.mrb[53].mxu1  ;;  %v2341_v3 = vmul.f32 %v4884_v21, %v7679_v7  ;;  %v2224_v58 = vpop.f32.mrb[69].mxu0 }
 0x2da   : > { %v2161_v30 = vadd.f32 %v2145_v14, %v6742_v23  ;;  %v2143_v61 = vmul.f32 %v7680_v43, %v2028_v46  ;;  %v4867_v15 = vpop.f32.mrb[54].mxu1  ;;  %v4885_v12 = vpop.f32.mrb[70].mxu0  ;;  %v2339_v22 = vmul.f32 %v7682_v4, %v2224_v58  ;;  %v7683_v23 = vld [vmem:[#allocation60_spill] sm:$0xff]  ;;  %v7684_v46 = vld [vmem:[#allocation89_spill] sm:$0xff] }
 0x2db   : > { %5174 = vset.pattern.permute.xlu1 %v7565_v34  ;;  %v2146_v28 = vmul.f32 %v4867_v15, %v7681_v40  ;;  %v2031_v20 = vpop.f32.mrb[55].mxu1  ;;  %v2227_v14 = vpop.f32.mrb[71].mxu0  ;;  %v2342_v7 = vmul.f32 %v4885_v12, %v7684_v46  ;;  %v7685_v40 = vld [vmem:[#allocation87_spill] sm:$0xff] }
 0x2dc   : > { %v6851_v47 = vadd.f32 %v2341_v3, %v2161_v30  ;;  %v2159_v32 = vadd.f32 %v2143_v61, %v6746_v53  ;;  %3496 = vperm.xlu1 %5174, %v5436_v33   ;;  %v2144_v11 = vmul.f32 %v7683_v23, %v2031_v20  ;;  %v2340_v30 = vmul.f32 %v7685_v40, %v2227_v14  ;;  %v6865_v53 = vpop.permute.xlu0 %3292 }
 0x2dd   : > { %v2162_v21 = vadd.f32 %v2146_v28, %v6753_v6  ;;  %7687 = vst [vmem:[#allocation23_spill] sm:$0xff] %v6865_v53  ;;  %v7688_v6 = vld [vmem:[#allocation75_spill] sm:$0xff]  ;;  %v7693_v53 = vld [vmem:[#allocation64_spill] sm:$0xff] }
 0x2de   : > { %v6859_v43 = vadd.f32 %v2339_v22, %v2159_v32  ;;  %v2160_v15 = vadd.f32 %v2144_v11, %v6756_v54  ;;  %v6863_v3 = vpop.permute.xlu1 %3848  ;;  %v7689_v54 = vld [vmem:[#allocation73_spill] sm:$0xff]  ;;  %v7690_v11 = vld [vmem:[#allocation80_spill] sm:$0xff] }
 0x2df   : > { %7686 = vst [vmem:[#allocation8_spill] sm:$0xff] %v6863_v3  ;;  %v6867_v61 = vadd.f32 %v2342_v7, %v2162_v21  ;;  %v4870_v58 = vpop.f32.mrb[56].mxu1 }
 0x2e0   : > { %v6869_v4 = vadd.f32 %v2340_v30, %v2160_v15  ;;  %5175 = vset.pattern.permute.xlu1 %v7567_v0  ;;  %v2149_v28 = vmul.f32 %v4870_v58, %v7688_v6  ;;  %v4888_v12 = vpop.f32.mrb[72].mxu0  ;;  %v2044_v20 = vpop.f32.mrb[57].mxu1  ;;  %v7691_v15 = vld [vmem:[#allocation78_spill] sm:$0xff] }
 0x2e1   : > { %3880 = vperm.xlu1 %5175, %v5423_v24   ;;  %v2147_v32 = vmul.f32 %v7689_v54, %v2044_v20  ;;  %v2240_v22 = vpop.f32.mrb[73].mxu0  ;;  %v2345_v14 = vmul.f32 %v4888_v12, %v7690_v11  ;;  %v4871_v21 = vpop.f32.mrb[58].mxu1  ;;  %v7692_v58 = vld [vmem:[#allocation66_spill] sm:$0xff] }
 0x2e2   : > { %v2165_v23 = vadd.f32 %v2149_v28, %v6766_v49  ;;  %v4889_v46 = vpop.f32.mrb[74].mxu0  ;;  %v2343_v40 = vmul.f32 %v7691_v15, %v2240_v22  ;;  %v2150_v6 = vmul.f32 %v4871_v21, %v7692_v58  ;;  %v2047_v3 = vpop.f32.mrb[59].mxu1  ;;  %v7694_v28 = vld [vmem:[#allocation93_spill] sm:$0xff]  ;;  %v7696_v22 = vld [vmem:[#allocation91_spill] sm:$0xff] }
 0x2e3   : > { %v2163_v7 = vadd.f32 %v2147_v32, %v6776_v1  ;;  %v6879_v30 = vpop.permute.xlu1 %3276  ;;  %v2148_v20 = vmul.f32 %v7693_v53, %v2047_v3  ;;  %v2243_v54 = vpop.f32.mrb[75].mxu0  ;;  %v2346_v12 = vmul.f32 %v4889_v46, %v7694_v28  ;;  %v7699_v46 = vld [vmem:[#allocation77_spill] sm:$0xff] }
 0x2e4   : > { %v6882_v50 = vadd.f32 %v2345_v14, %v2165_v23  ;;  %v2166_v49 = vadd.f32 %v2150_v6, %v6782_v29  ;;  %v6890_v1 = vpop.permute.xlu0 %3308  ;;  %v2344_v11 = vmul.f32 %v7696_v22, %v2243_v54  ;;  %v7698_v14 = vld [vmem:[#allocation79_spill] sm:$0xff] }
 0x2e5   : > { %v6885_v55 = vadd.f32 %v2343_v40, %v2163_v7  ;;  %3884 = vperm.xlu1 %5175, %v7617_v5   ;;  %7695 = vst [vmem:[#allocation3_spill] sm:$0xff] %v6890_v1  ;;  %v2164_v32 = vadd.f32 %v2148_v20, %v6784_v37  ;;  %v7700_v20 = vld [vmem:[#allocation84_spill] sm:$0xff] }
 0x2e6   : > { %v6894_v21 = vadd.f32 %v2346_v12, %v2166_v49  ;;  %v7701_v49 = vld [vmem:[#allocation70_spill] sm:$0xff] }
 0x2e7   : > { %v6896_v23 = vpop.permute.xlu1 %3280  ;;  %v4874_v3 = vpop.f32.mrb[60].mxu1  ;;  %v6898_v53 = vadd.f32 %v2344_v11, %v2164_v32  ;;  %v7702_v11 = vld [vmem:[#allocation82_spill] sm:$0xff] }
 0x2e8   : > { %7697 = vst [vmem:[#allocation15_spill] sm:$0xff] %v6896_v23  ;;  %v2153_v7 = vmul.f32 %v4874_v3, %v7698_v14  ;;  %v4892_v29 = vpop.f32.mrb[76].mxu0  ;;  %v2060_v15 = vpop.f32.mrb[61].mxu1  ;;  %v7703_v14 = vld [vmem:[#allocation68_spill] sm:$0xff] }
 0x2e9   : > { %5177 = vset.pattern.permute.xlu1 %v7552_v44  ;;  %v2151_v40 = vmul.f32 %v7699_v46, %v2060_v15  ;;  %v2256_v58 = vpop.f32.mrb[77].mxu0  ;;  %v4875_v6 = vpop.f32.mrb[62].mxu1  ;;  %v2349_v54 = vmul.f32 %v4892_v29, %v7700_v20 }
 0x2ea   : > { %3312 = vperm.xlu1 %5177, %v5454_v38   ;;  %v2169_v37 = vadd.f32 %v2153_v7, %v6796_v35  ;;  %v2154_v28 = vmul.f32 %v4875_v6, %v7701_v49  ;;  %v4893_v12 = vpop.f32.mrb[78].mxu0  ;;  %v2063_v32 = vpop.f32.mrb[63].mxu1  ;;  %v2347_v3 = vmul.f32 %v7702_v11, %v2256_v58  ;;  %v7705_v6 = vld [vmem:[#allocation95_spill] sm:$0xff] }
 0x2eb   : > { %v2167_v22 = vadd.f32 %v2151_v40, %v6802_v19  ;;  %v2152_v44 = vmul.f32 %v7703_v14, %v2063_v32  ;;  %v2259_v1 = vpop.f32.mrb[79].mxu0  ;;  %v2350_v23 = vmul.f32 %v4893_v12, %v7704_v27  ;;  %v6923_v40 = vpop.permute.xlu0 %3644  ;;  %v7706_v27 = vld [vmem:[#allocation101_spill] sm:$0xff]  ;;  %v7709_v14 = vld [vmem:[#allocation114_spill] sm:$0xff] }
 0x2ec   : > { %v6910_v15 = vadd.f32 %v2349_v54, %v2169_v37  ;;  %v2170_v46 = vadd.f32 %v2154_v28, %v6805_v56  ;;  %v6914_v35 = vpop.permute.xlu1 %3664  ;;  %v2348_v20 = vmul.f32 %v7705_v6, %v2259_v1 }
 0x2ed   : > { %v6916_v7 = vadd.f32 %v2347_v3, %v2167_v22  ;;  %v2168_v29 = vadd.f32 %v2152_v44, %v6813_v9  ;;  %v7708_v9 = vld [vmem:[#allocation86_spill] sm:$0xff] }
 0x2ee   : > { %v6920_v19 = vadd.f32 %v2350_v23, %v2170_v46  ;;  %5178 = vset.pattern.permute.xlu1 %v7563_v17  ;;  %v7710_v46 = vld [vmem:[#allocation88_spill] sm:$0xff] }
 0x2ef   : > { %v6925_v58 = vadd.f32 %v2348_v20, %v2168_v29  ;;  %3692 = vperm.xlu1 %5178, %v5436_v33   ;;  %v4898_v56 = vpop.f32.mrb[64].mxu1 }
 0x2f0   : > { %v2533_v37 = vmul.f32 %v4898_v56, %v7706_v27  ;;  %v4916_v54 = vpop.f32.mrb[80].mxu0  ;;  %v2404_v49 = vpop.f32.mrb[65].mxu1  ;;  %v7711_v27 = vld [vmem:[#allocation99_spill] sm:$0xff] }
 0x2f1   : > { %v6929_v28 = vpop.permute.xlu1 %4044  ;;  %v2531_v12 = vmul.f32 %v7708_v9, %v2404_v49  ;;  %v2600_v1 = vpop.f32.mrb[81].mxu0  ;;  %v2729_v32 = vmul.f32 %v4916_v54, %v6299_v45  ;;  %v7712_v49 = vld [vmem:[#allocation102_spill] sm:$0xff] }
 0x2f2   : > { %7707 = vst [vmem:[#allocation13_spill] sm:$0xff] %v6929_v28  ;;  %v2549_v23 = vadd.f32 %v2533_v37, %v6824_v51  ;;  %v4899_v22 = vpop.f32.mrb[66].mxu1  ;;  %v4917_v11 = vpop.f32.mrb[82].mxu0  ;;  %v2727_v44 = vmul.f32 %v7709_v14, %v2600_v1  ;;  %v7727_v28 = vld [vmem:[#allocation94_spill] sm:$0xff] }
 0x2f3   : > { %5180 = vset.pattern.permute.xlu1 %v7587_v63  ;;  %v2547_v3 = vadd.f32 %v2531_v12, %v6831_v2  ;;  %v2534_v29 = vmul.f32 %v4899_v22, %v7710_v46  ;;  %v2407_v6 = vpop.f32.mrb[67].mxu1  ;;  %v2603_v20 = vpop.f32.mrb[83].mxu0  ;;  %v2730_v54 = vmul.f32 %v4917_v11, %v6315_v36  ;;  %v7713_v22 = vld [vmem:[#allocation105_spill] sm:$0xff]  ;;  %v7714_v36 = vld [vmem:[#allocation103_spill] sm:$0xff] }
 0x2f4   : > { %v6938_v56 = vadd.f32 %v2729_v32, %v2549_v23  ;;  %4076 = vperm.xlu1 %5180, %v5423_v24   ;;  %v2532_v51 = vmul.f32 %v7711_v27, %v2407_v6  ;;  %v2728_v9 = vmul.f32 %v7712_v49, %v2603_v20  ;;  %v6950_v1 = vpop.permute.xlu0 %3656  ;;  %v7716_v27 = vld [vmem:[#allocation92_spill] sm:$0xff] }
 0x2f5   : > { %v6942_v37 = vadd.f32 %v2727_v44, %v2547_v3  ;;  %v2550_v45 = vadd.f32 %v2534_v29, %v6836_v42  ;;  %v7715_v29 = vld [vmem:[#allocation106_spill] sm:$0xff] }
 0x2f6   : > { %v2548_v2 = vadd.f32 %v2532_v51, %v6841_v25  ;;  %v6948_v12 = vpop.permute.xlu1 %3472 }
 0x2f7   : > { %v6952_v23 = vadd.f32 %v2730_v54, %v2550_v45  ;;  %v4902_v32 = vpop.f32.mrb[68].mxu1 }
 0x2f8   : > { %v6954_v24 = vadd.f32 %v2728_v9, %v2548_v2  ;;  %4080 = vperm.xlu1 %5180, %v7617_v5   ;;  %v2537_v3 = vmul.f32 %v4902_v32, %v7713_v22  ;;  %v4920_v42 = vpop.f32.mrb[84].mxu0  ;;  %v2420_v14 = vpop.f32.mrb[69].mxu1  ;;  %v7717_v5 = vld [vmem:[#allocation104_spill] sm:$0xff] }
 0x2f9   : > { %v2535_v11 = vmul.f32 %v7714_v36, %v2420_v14  ;;  %v2616_v25 = vpop.f32.mrb[85].mxu0  ;;  %v4903_v44 = vpop.f32.mrb[70].mxu1  ;;  %v2733_v6 = vmul.f32 %v4920_v42, %v7715_v29  ;;  %v7719_v42 = vld [vmem:[#allocation90_spill] sm:$0xff] }
 0x2fa   : > { %v2553_v46 = vadd.f32 %v2537_v3, %v6851_v47  ;;  %v6961_v20 = vpop.permute.xlu1 %3476  ;;  %v2538_v51 = vmul.f32 %v4903_v44, %v7716_v27  ;;  %v4921_v45 = vpop.f32.mrb[86].mxu0  ;;  %v2731_v2 = vmul.f32 %v7717_v5, %v2616_v25  ;;  %v7718_v47 = vld [vmem:[#allocation119_spill] sm:$0xff]  ;;  %v7723_v5 = vld [vmem:[#allocation110_spill] sm:$0xff] }
 0x2fb   : > { %v2551_v54 = vadd.f32 %v2535_v11, %v6859_v43  ;;  %v2423_v49 = vpop.f32.mrb[71].mxu1  ;;  %v2619_v9 = vpop.f32.mrb[87].mxu0  ;;  %v2734_v3 = vmul.f32 %v4921_v45, %v7718_v47  ;;  %v7720_v11 = vld [vmem:[#allocation117_spill] sm:$0xff] }
 0x2fc   : > { %v6966_v32 = vadd.f32 %v2733_v6, %v2553_v46  ;;  %5182 = vset.pattern.permute.xlu1 %v7565_v34  ;;  %v2554_v22 = vadd.f32 %v2538_v51, %v6867_v61  ;;  %v2536_v14 = vmul.f32 %v7719_v42, %v2423_v49  ;;  %v2732_v25 = vmul.f32 %v7720_v11, %v2619_v9  ;;  %v6979_v46 = vpop.permute.xlu0 %3660  ;;  %v7722_v6 = vld [vmem:[#allocation109_spill] sm:$0xff]  ;;  %v7724_v49 = vld [vmem:[#allocation107_spill] sm:$0xff] }
 0x2fd   : > { %v6972_v36 = vadd.f32 %v2731_v2, %v2551_v54  ;;  %3508 = vperm.xlu1 %5182, %v5454_v38  }
 0x2fe   : > { %v6975_v44 = vadd.f32 %v2734_v3, %v2554_v22  ;;  %v2552_v43 = vadd.f32 %v2536_v14, %v6869_v4  ;;  %v7725_v3 = vld [vmem:[#allocation96_spill] sm:$0xff] }
 0x2ff   : > { %v4906_v29 = vpop.f32.mrb[72].mxu1 }
 0x300   : > { %v6981_v34 = vadd.f32 %v2732_v25, %v2552_v43  ;;  %v6983_v61 = vpop.permute.xlu1 %3860  ;;  %v2541_v27 = vmul.f32 %v4906_v29, %v7722_v6  ;;  %v4924_v51 = vpop.f32.mrb[88].mxu0  ;;  %v7726_v29 = vld [vmem:[#allocation108_spill] sm:$0xff] }
 0x301   : > { %7721 = vst [vmem:[#allocation24_spill] sm:$0xff] %v6983_v61  ;;  %5183 = vset.pattern.permute.xlu1 %v7567_v0  ;;  %v2436_v45 = vpop.f32.mrb[73].mxu1  ;;  %v2632_v54 = vpop.f32.mrb[89].mxu0  ;;  %v2737_v2 = vmul.f32 %v4924_v51, %v7723_v5 }
 0x302   : > { %3888 = vperm.xlu1 %5183, %v5436_v33   ;;  %v2557_v4 = vadd.f32 %v2541_v27, %v6882_v50  ;;  %v2539_v9 = vmul.f32 %v7724_v49, %v2436_v45  ;;  %v4907_v22 = vpop.f32.mrb[74].mxu1  ;;  %v4925_v47 = vpop.f32.mrb[90].mxu0  ;;  %v2735_v6 = vmul.f32 %v7726_v29, %v2632_v54  ;;  %v7728_v27 = vld [vmem:[#allocation122_spill] sm:$0xff]  ;;  %v7731_v54 = vld [vmem:[#allocation4_spill] sm:$0xff] }
 0x303   : > { %v2542_v42 = vmul.f32 %v4907_v22, %v7725_v3  ;;  %v2439_v14 = vpop.f32.mrb[75].mxu1  ;;  %v2635_v43 = vpop.f32.mrb[91].mxu0  ;;  %v2738_v51 = vmul.f32 %v4925_v47, %v7728_v27  ;;  %v7729_v22 = vld [vmem:[#allocation121_spill] sm:$0xff] }
 0x304   : > { %v6992_v11 = vadd.f32 %v2737_v2, %v2557_v4  ;;  %v2555_v25 = vadd.f32 %v2539_v9, %v6885_v55  ;;  %v2540_v33 = vmul.f32 %v7727_v28, %v2439_v14  ;;  %v2736_v3 = vmul.f32 %v7729_v22, %v2635_v43  ;;  %v7006_v4 = vpop.permute.xlu0 %3680  ;;  %v7732_v2 = vld [vmem:[#allocation112_spill] sm:$0xff]  ;;  %v7733_v14 = vld [vmem:[#allocation111_spill] sm:$0xff]  ;;  %v7736_v22 = vld [vmem:[#allocation113_spill] sm:$0xff] }
 0x305   : > { %v2558_v50 = vadd.f32 %v2542_v42, %v6894_v21  ;;  %v6999_v5 = vpop.permute.xlu1 %3284  ;;  %7730 = vst [vmem:[#allocation14_spill] sm:$0xff] %v7006_v4  ;;  %v7737_v4 = vld [vmem:[#allocation126_spill] sm:$0xff] }
 0x306   : > { %v7001_v45 = vadd.f32 %v2735_v6, %v2555_v25  ;;  %v2556_v49 = vadd.f32 %v2540_v33, %v6898_v53  ;;  %5184 = vset.pattern.permute.xlu1 %v7563_v17  ;;  %v7734_v6 = vld [vmem:[#allocation115_spill] sm:$0xff] }
 0x307   : > { %v7008_v55 = vadd.f32 %v2738_v51, %v2558_v50  ;;  %3700 = vperm.xlu1 %5184, %v7731_v54   ;;  %v4910_v28 = vpop.f32.mrb[76].mxu1  ;;  %v7735_v50 = vld [vmem:[#allocation100_spill] sm:$0xff] }
 0x308   : > { %v7011_v21 = vadd.f32 %v2736_v3, %v2556_v49  ;;  %v2545_v9 = vmul.f32 %v4910_v28, %v7732_v2  ;;  %v4928_v47 = vpop.f32.mrb[92].mxu0  ;;  %v2452_v42 = vpop.f32.mrb[77].mxu1 }
 0x309   : > { %v2543_v25 = vmul.f32 %v7733_v14, %v2452_v42  ;;  %v2648_v53 = vpop.f32.mrb[93].mxu0  ;;  %v4911_v29 = vpop.f32.mrb[78].mxu1  ;;  %v2741_v33 = vmul.f32 %v4928_v47, %v7734_v6 }
 0x30a   : > { %v7015_v43 = vpop.permute.xlu1 %3668  ;;  %v2561_v17 = vadd.f32 %v2545_v9, %v6910_v15  ;;  %v2546_v27 = vmul.f32 %v4911_v29, %v7735_v50  ;;  %v4929_v51 = vpop.f32.mrb[94].mxu0  ;;  %v2739_v3 = vmul.f32 %v7736_v22, %v2648_v53  ;;  %v7738_v15 = vld [vmem:[#allocation98_spill] sm:$0xff]  ;;  %v7739_v50 = vld [vmem:[#allocation124_spill] sm:$0xff] }
 0x30b   : > { %3704 = vperm.xlu1 %5184, %v5454_v38   ;;  %v2559_v49 = vadd.f32 %v2543_v25, %v6916_v7  ;;  %v2455_v28 = vpop.f32.mrb[79].mxu1  ;;  %v2651_v2 = vpop.f32.mrb[95].mxu0  ;;  %v2742_v61 = vmul.f32 %v4929_v51, %v7737_v4  ;;  %v7740_v4 = vld [vmem:[#allocation129_spill] sm:$0xff]  ;;  %v7741_v51 = vld [vmem:[#allocation116_spill] sm:$0xff] }
 0x30c   : > { %v7023_v42 = vadd.f32 %v2741_v33, %v2561_v17  ;;  %v2562_v14 = vadd.f32 %v2546_v27, %v6920_v19  ;;  %v2544_v9 = vmul.f32 %v7738_v15, %v2455_v28  ;;  %v2740_v7 = vmul.f32 %v7739_v50, %v2651_v2  ;;  %v7037_v53 = vpop.permute.xlu0 %3684 }
 0x30d   : > { %v7028_v47 = vadd.f32 %v2739_v3, %v2559_v49 }
 0x30e   : > { %v7030_v29 = vadd.f32 %v2742_v61, %v2562_v14  ;;  %v2560_v6 = vadd.f32 %v2544_v9, %v6925_v58  ;;  %v7034_v25 = vpop.permute.xlu1 %3672  ;;  %v7743_v14 = vld [vmem:[#allocation118_spill] sm:$0xff] }
 0x30f   : > { %5186 = vset.pattern.permute.xlu1 %v7587_v63 }
 0x310   : > { %v7039_v17 = vadd.f32 %v2740_v7, %v2560_v6  ;;  %4088 = vperm.xlu1 %5186, %v5443_v39   ;;  %v4934_v19 = vpop.f32.mrb[80].mxu1 }
 0x311   : > { %v2925_v33 = vmul.f32 %v4934_v19, %v7740_v4  ;;  %v4952_v27 = vpop.f32.mrb[96].mxu0  ;;  %v2796_v61 = vpop.f32.mrb[81].mxu1 }
 0x312   : > { %v2923_v49 = vmul.f32 %v7741_v51, %v2796_v61  ;;  %v2992_v58 = vpop.f32.mrb[97].mxu0  ;;  %v4935_v22 = vpop.f32.mrb[82].mxu1  ;;  %v3121_v28 = vmul.f32 %v4952_v27, %v6515_v62  ;;  %v7745_v62 = vld [vmem:[#allocation128_spill] sm:$0xff] }
 0x313   : > { %v2941_v3 = vadd.f32 %v2925_v33, %v6938_v56  ;;  %v7046_v2 = vpop.permute.xlu1 %4056  ;;  %v2926_v15 = vmul.f32 %v4935_v22, %v7743_v14  ;;  %v4953_v9 = vpop.f32.mrb[98].mxu0  ;;  %v3119_v6 = vmul.f32 %v6498_v59, %v2992_v58  ;;  %v7744_v56 = vld [vmem:[#allocation141_spill] sm:$0xff]  ;;  %v7747_v59 = vld [vmem:[#allocation135_spill] sm:$0xff] }
 0x314   : > { %7742 = vst [vmem:[#allocation22_spill] sm:$0xff] %v7046_v2  ;;  %v2939_v39 = vadd.f32 %v2923_v49, %v6942_v37  ;;  %5187 = vset.pattern.permute.xlu1 %v7567_v0  ;;  %v2799_v50 = vpop.f32.mrb[83].mxu1  ;;  %v2995_v7 = vpop.f32.mrb[99].mxu0  ;;  %v3122_v33 = vmul.f32 %v4953_v9, %v7744_v56  ;;  %v7749_v9 = vld [vmem:[#allocation131_spill] sm:$0xff] }
 0x315   : > { %v7052_v19 = vadd.f32 %v3121_v28, %v2941_v3  ;;  %v2942_v4 = vadd.f32 %v2926_v15, %v6952_v23  ;;  %3896 = vperm.xlu1 %5187, %v7731_v54   ;;  %v2924_v27 = vmul.f32 %v7745_v62, %v2799_v50  ;;  %v7060_v51 = vpop.permute.xlu0 %3696  ;;  %v3120_v49 = vmul.f32 %v7747_v59, %v2995_v7  ;;  %v7748_v3 = vld [vmem:[#allocation133_spill] sm:$0xff]  ;;  %v7750_v7 = vld [vmem:[#allocation140_spill] sm:$0xff]  ;;  %v7751_v56 = vld [vmem:[#allocation123_spill] sm:$0xff] }
 0x316   : > { %v7058_v61 = vadd.f32 %v3119_v6, %v2939_v39  ;;  %7746 = vst [vmem:[#allocation29_spill] sm:$0xff] %v7060_v51 }
 0x317   : > { %v7062_v37 = vadd.f32 %v3122_v33, %v2942_v4  ;;  %v2940_v0 = vadd.f32 %v2924_v27, %v6954_v24 }
 0x318   : > { %v7066_v58 = vpop.permute.xlu1 %3480  ;;  %v4938_v22 = vpop.f32.mrb[84].mxu1 }
 0x319   : > { %v7068_v23 = vadd.f32 %v3120_v49, %v2940_v0  ;;  %5188 = vset.pattern.permute.xlu1 %v7587_v63  ;;  %v2929_v28 = vmul.f32 %v4938_v22, %v7748_v3  ;;  %v4956_v14 = vpop.f32.mrb[100].mxu0  ;;  %v2812_v15 = vpop.f32.mrb[85].mxu1  ;;  %v7752_v0 = vld [vmem:[#allocation138_spill] sm:$0xff]  ;;  %v7753_v49 = vld [vmem:[#allocation120_spill] sm:$0xff] }
 0x31a   : > { %4092 = vperm.xlu1 %5188, %v7731_v54   ;;  %v2927_v39 = vmul.f32 %v7749_v9, %v2812_v15  ;;  %v3008_v6 = vpop.f32.mrb[101].mxu0  ;;  %v4939_v50 = vpop.f32.mrb[86].mxu1  ;;  %v3125_v4 = vmul.f32 %v4956_v14, %v7750_v7  ;;  %v7754_v9 = vld [vmem:[#allocation144_spill] sm:$0xff] }
 0x31b   : > { %v2945_v24 = vadd.f32 %v2929_v28, %v6966_v32  ;;  %v2930_v33 = vmul.f32 %v4939_v50, %v7751_v56  ;;  %v4957_v62 = vpop.f32.mrb[102].mxu0  ;;  %v2815_v27 = vpop.f32.mrb[87].mxu1  ;;  %v3123_v59 = vmul.f32 %v7752_v0, %v3008_v6  ;;  %v7755_v50 = vld [vmem:[#allocation143_spill] sm:$0xff] }
 0x31c   : > { %v2943_v63 = vadd.f32 %v2927_v39, %v6972_v36  ;;  %v2928_v22 = vmul.f32 %v7753_v49, %v2815_v27  ;;  %v3011_v3 = vpop.f32.mrb[103].mxu0  ;;  %v3126_v2 = vmul.f32 %v4957_v62, %v7754_v9  ;;  %v7093_v39 = vpop.permute.xlu0 %3460 }
 0x31d   : > { %v7080_v54 = vadd.f32 %v3125_v4, %v2945_v24  ;;  %v2946_v15 = vadd.f32 %v2930_v33, %v6975_v44  ;;  %v7084_v32 = vpop.permute.xlu1 %3864  ;;  %v3124_v7 = vmul.f32 %v7755_v50, %v3011_v3  ;;  %v7756_v4 = vld [vmem:[#allocation136_spill] sm:$0xff] }
 0x31e   : > { %v7086_v28 = vadd.f32 %v3123_v59, %v2943_v63  ;;  %v2944_v14 = vadd.f32 %v2928_v22, %v6981_v34  ;;  %4096 = vperm.xlu1 %5188, %v5454_v38   ;;  %v7757_v63 = vld [vmem:[#allocation145_spill] sm:$0xff]  ;;  %v7758_v59 = vld [vmem:[#allocation134_spill] sm:$0xff]  ;;  %v7759_v22 = vld [vmem:[#allocation127_spill] sm:$0xff] }
 0x31f   : > { %v7091_v36 = vadd.f32 %v3126_v2, %v2946_v15 }
 0x320   : > { %v7095_v6 = vadd.f32 %v3124_v7, %v2944_v14  ;;  %v4942_v24 = vpop.f32.mrb[88].mxu1  ;;  %v7760_v7 = vld [vmem:[#allocation142_spill] sm:$0xff] }
 0x321   : > { %v7097_v44 = vpop.permute.xlu1 %3868  ;;  %v2933_v56 = vmul.f32 %v4942_v24, %v7756_v4  ;;  %v4960_v33 = vpop.f32.mrb[104].mxu0  ;;  %v7761_v4 = vld [vmem:[#allocation125_spill] sm:$0xff] }
 0x322   : > { %v2828_v62 = vpop.f32.mrb[89].mxu1  ;;  %v3024_v27 = vpop.f32.mrb[105].mxu0  ;;  %v3129_v0 = vmul.f32 %v4960_v33, %v7757_v63 }
 0x323   : > { %v2949_v34 = vadd.f32 %v2933_v56, %v6992_v11  ;;  %v2931_v38 = vmul.f32 %v7758_v59, %v2828_v62  ;;  %v4943_v2 = vpop.f32.mrb[90].mxu1  ;;  %v4961_v49 = vpop.f32.mrb[106].mxu0  ;;  %v3127_v24 = vmul.f32 %v7760_v7, %v3024_v27  ;;  %v7762_v11 = vmov 0.0  }
 0x324   : > { %v2934_v3 = vmul.f32 %v4943_v2, %v7759_v22  ;;  %v2831_v15 = vpop.f32.mrb[91].mxu1  ;;  %v3027_v9 = vpop.f32.mrb[107].mxu0  ;;  %5072 = vmatprep.mubr.msk.bf16.mxu0 %vm5222_vm5, %v7762_v11  ;;  %v3130_v33 = vmul.f32 %v4961_v49, %v6592_v8  ;;  %v7763_v2 = vld [vmem:[#allocation139_spill] sm:$0xff]  ;;  %v7764_v8 = vld [vmem:[#allocation137_spill] sm:$0xff] }
 0x325   : > { %v7104_v14 = vadd.f32 %v3129_v0, %v2949_v34  ;;  %v2947_v50 = vadd.f32 %v2931_v38, %v7001_v45  ;;  %v2932_v51 = vmul.f32 %v7761_v4, %v2831_v15  ;;  %v3128_v0 = vmul.f32 %v6572_v16, %v3027_v9  ;;  %v7118_v45 = vpop.permute.xlu0 %3464 }
 0x326   : > { %v2950_v56 = vadd.f32 %v2934_v3, %v7008_v55  ;;  %v7112_v62 = vpop.permute.xlu1 %3296 }
 0x327   : > { %v7114_v63 = vadd.f32 %v3127_v24, %v2947_v50  ;;  %v2948_v34 = vadd.f32 %v2932_v51, %v7011_v21  ;;  %v7765_v51 = vld [vmem:[#allocation132_spill] sm:$0xff] }
 0x328   : > { %v7120_v27 = vadd.f32 %v3130_v33, %v2950_v56  ;;  %v4946_v59 = vpop.f32.mrb[92].mxu1 }
 0x329   : > { %v7122_v38 = vadd.f32 %v3128_v0, %v2948_v34  ;;  %v2937_v22 = vmul.f32 %v4946_v59, %v7763_v2  ;;  %v4964_v55 = vpop.f32.mrb[108].mxu0  ;;  %v2844_v3 = vpop.f32.mrb[93].mxu1 }
 0x32a   : > { %v2935_v49 = vmul.f32 %v7764_v8, %v2844_v3  ;;  %v3040_v15 = vpop.f32.mrb[109].mxu0  ;;  %v4947_v50 = vpop.f32.mrb[94].mxu1  ;;  %v3133_v21 = vmul.f32 %v4964_v55, %v6621_v31 }
 0x32b   : > { %v2953_v7 = vadd.f32 %v2937_v22, %v7023_v42  ;;  %v7128_v16 = vpop.permute.xlu1 %3676  ;;  %v2938_v9 = vmul.f32 %v4947_v50, %v7765_v51  ;;  %v7131_v24 = vpop.f32.mrb[110].mxu0  ;;  %v3131_v56 = vmul.f32 %v6598_v10, %v3040_v15  ;;  %v7766_v42 = vld [vmem:[#allocation130_spill] sm:$0xff] }
 0x32c   : > { %v2951_v4 = vadd.f32 %v2935_v49, %v7028_v47  ;;  %v2847_v33 = vpop.f32.mrb[95].mxu1  ;;  %v3043_v34 = vpop.f32.mrb[111].mxu0 }
 0x32d   : > { %v7135_v0 = vadd.f32 %v3133_v21, %v2953_v7  ;;  %v7138_v59 = vadd.f32 %v2938_v9, %v7030_v29  ;;  %v2936_v2 = vmul.f32 %v7766_v42, %v2847_v33  ;;  %v3132_v55 = vmul.f32 %v6608_v60, %v3043_v34  ;;  %v7145_v3 = vpop.permute.xlu0 %3484  ;;  %v7767_v7 = vld [vmem:[#allocation6_spill] sm:$0xff] }
 0x32e   : > { %v7141_v31 = vadd.f32 %v3131_v56, %v2951_v4 }
 0x32f   : > { %v2952_v22 = vadd.f32 %v2936_v2, %v7039_v17 }
 0x330   : > { %v7147_v47 = vpop.permute.xlu1 %4060 }
 0x331   : > { %v7149_v10 = vadd.f32 %v3132_v55, %v2952_v22  ;;  %v4970_v8 = vpop.f32.mrb[96].mxu1  ;;  %v4988_v49 = vpop.f32.mrb[112].mxu0 }
 0x332   : > { %v3317_v15 = vmul.f32 %v4970_v8, %v6780_v57  ;;  %v3188_v29 = vpop.f32.mrb[97].mxu1  ;;  %v3384_v50 = vpop.f32.mrb[113].mxu0  ;;  %v3513_v60 = vmul.f32 %v4988_v49, %v6726_v18 }
 0x333   : > { %v3315_v21 = vmul.f32 %v7767_v7, %v3188_v29  ;;  %v4971_v51 = vpop.f32.mrb[98].mxu1  ;;  %v4989_v9 = vpop.f32.mrb[114].mxu0  ;;  %v3511_v42 = vmul.f32 %v6649_v48, %v3384_v50 }
 0x334   : > { %v3333_v17 = vadd.f32 %v3317_v15, %v7052_v19  ;;  %v7155_v4 = vpop.permute.xlu1 %4064  ;;  %v3318_v56 = vmul.f32 %v4971_v51, %v6685_v52  ;;  %v3191_v33 = vpop.f32.mrb[99].mxu1  ;;  %v3514_v19 = vmul.f32 %v4989_v9, %v7093_v39 }
 0x335   : > { %v3331_v34 = vadd.f32 %v3315_v21, %v7058_v61  ;;  %v3316_v57 = vmul.f32 %v6751_v26, %v3191_v33  ;;  %v3387_v2 = vpop.f32.mrb[115].mxu0  ;;  %v3489_v49 = vpop.permute.xlu0 %3488 }
 0x336   : > { %v7161_v22 = vadd.f32 %v3513_v60, %v3333_v17  ;;  %v3334_v55 = vadd.f32 %v3318_v56, %v7062_v37  ;;  %v3512_v52 = vmul.f32 %v6667_v41, %v3387_v2  ;;  %v7768_v41 = vld [vmem:[#allocation15_spill] sm:$0xff] }
 0x337   : > { %v7165_v8 = vadd.f32 %v3511_v42, %v3331_v34  ;;  %v3332_v18 = vadd.f32 %v3316_v57, %v7068_v23  ;;  %v7769_v34 = vld [vmem:[#allocation11_spill] sm:$0xff] }
 0x338   : > { %v7169_v15 = vadd.f32 %v3514_v19, %v3334_v55  ;;  %v7770_v19 = vld [vmem:[#allocation25_spill] sm:$0xff] }
 0x339   : > { %v7171_v61 = vadd.f32 %v3512_v52, %v3332_v18  ;;  %v3493_v48 = vpop.permute.xlu1 %3492  ;;  %v4974_v26 = vpop.f32.mrb[100].mxu1 }
 0x33a   : > { %v3321_v29 = vmul.f32 %v4974_v26, %v6879_v30  ;;  %v4992_v50 = vpop.f32.mrb[116].mxu0  ;;  %v3204_v7 = vpop.f32.mrb[101].mxu1 }
 0x33b   : > { %v3319_v37 = vmul.f32 %v6811_v13, %v3204_v7  ;;  %v3400_v39 = vpop.f32.mrb[117].mxu0  ;;  %v4975_v21 = vpop.f32.mrb[102].mxu1  ;;  %v3517_v23 = vmul.f32 %v4992_v50, %v6948_v12 }
 0x33c   : > { %v3337_v51 = vadd.f32 %v3321_v29, %v7080_v54  ;;  %v3322_v9 = vmul.f32 %v4975_v21, %v7768_v41  ;;  %v4993_v17 = vpop.f32.mrb[118].mxu0  ;;  %v3207_v60 = vpop.f32.mrb[103].mxu1  ;;  %v3515_v33 = vmul.f32 %v7118_v45, %v3400_v39  ;;  %v7771_v29 = vld [vmem:[#allocation23_spill] sm:$0xff] }
 0x33d   : > { %v3335_v56 = vadd.f32 %v3319_v37, %v7086_v28  ;;  %v3518_v30 = vmul.f32 %v4993_v17, %v6961_v20  ;;  %v3320_v42 = vmul.f32 %v7769_v34, %v3207_v60  ;;  %v3403_v57 = vpop.f32.mrb[119].mxu0  ;;  %v3501_v28 = vpop.permute.xlu0 %3500 }
 0x33e   : > { %v7182_v13 = vadd.f32 %v3517_v23, %v3337_v51  ;;  %v3338_v2 = vadd.f32 %v3322_v9, %v7091_v36  ;;  %v7185_v54 = vpop.permute.xlu1 %3872  ;;  %v3516_v18 = vmul.f32 %v7770_v19, %v3403_v57  ;;  %v7773_v19 = vld [vmem:[#allocation3_spill] sm:$0xff] }
 0x33f   : > { %v7187_v12 = vadd.f32 %v3515_v33, %v3335_v56  ;;  %v3336_v55 = vadd.f32 %v3320_v42, %v7095_v6  ;;  %v7772_v56 = vld [vmem:[#allocation18_spill] sm:$0xff] }
 0x340   : > { %v7191_v52 = vadd.f32 %v3518_v30, %v3338_v2 }
 0x341   : > { %v7193_v45 = vadd.f32 %v3516_v18, %v3336_v55  ;;  %v4978_v20 = vpop.f32.mrb[104].mxu1  ;;  %v4996_v26 = vpop.f32.mrb[120].mxu0 }
 0x342   : > { %v3325_v50 = vmul.f32 %v4978_v20, %v7771_v29  ;;  %v3220_v7 = vpop.f32.mrb[105].mxu1  ;;  %v3416_v37 = vpop.f32.mrb[121].mxu0  ;;  %v3521_v23 = vmul.f32 %v4996_v26, %v3489_v49 }
 0x343   : > { %v3301_v36 = vpop.permute.xlu1 %3300  ;;  %v3323_v39 = vmul.f32 %v6999_v5, %v3220_v7  ;;  %v3519_v21 = vmul.f32 %v7066_v58, %v3416_v37  ;;  %v4979_v51 = vpop.f32.mrb[106].mxu1 }
 0x344   : > { %v3341_v6 = vadd.f32 %v3325_v50, %v7104_v14  ;;  %v3326_v41 = vmul.f32 %v4979_v51, %v7112_v62  ;;  %v4997_v9 = vpop.f32.mrb[122].mxu0  ;;  %v3223_v17 = vpop.f32.mrb[107].mxu1 }
 0x345   : > { %v3339_v60 = vadd.f32 %v3323_v39, %v7114_v63  ;;  %v3324_v33 = vmul.f32 %v7772_v56, %v3223_v17  ;;  %v3419_v30 = vpop.f32.mrb[123].mxu0  ;;  %v3522_v5 = vmul.f32 %v4997_v9, %v3493_v48  ;;  %v3505_v2 = vpop.permute.xlu0 %3504 }
 0x346   : > { %v7202_v34 = vadd.f32 %v3521_v23, %v3341_v6  ;;  %v3342_v42 = vadd.f32 %v3326_v41, %v7120_v27  ;;  %v3520_v14 = vmul.f32 %v7145_v3, %v3419_v30 }
 0x347   : > { %v7205_v57 = vadd.f32 %v3519_v21, %v3339_v60  ;;  %v3340_v58 = vadd.f32 %v3324_v33, %v7122_v38  ;;  %v3305_v49 = vpop.permute.xlu1 %3304  ;;  %v7774_v60 = vld [vmem:[#allocation9_spill] sm:$0xff] }
 0x348   : > { %v7209_v62 = vadd.f32 %v3522_v5, %v3342_v42 }
 0x349   : > { %v7211_v55 = vadd.f32 %v3520_v14, %v3340_v58  ;;  %v4982_v63 = vpop.f32.mrb[108].mxu1  ;;  %v7224_v23 = vpop.permute.xlu0 %4048  ;;  %v7775_v14 = vld [vmem:[#allocation8_spill] sm:$0xff] }
 0x34a   : > { %v3329_v18 = vmul.f32 %v4982_v63, %v7773_v19  ;;  %v5000_v20 = vpop.f32.mrb[124].mxu0  ;;  %v3236_v26 = vpop.f32.mrb[109].mxu1  ;;  %v7776_v19 = vld [vmem:[#allocation5_spill] sm:$0xff] }
 0x34b   : > { %v3327_v29 = vmul.f32 %v3301_v36, %v3236_v26  ;;  %v3432_v27 = vpop.f32.mrb[125].mxu0  ;;  %v7214_v48 = vpop.f32.mrb[110].mxu1  ;;  %v3525_v38 = vmul.f32 %v5000_v20, %v3505_v2  ;;  %v7777_v20 = vld [vmem:[#allocation16_spill] sm:$0xff] }
 0x34c   : > { %v3345_v50 = vadd.f32 %v3329_v18, %v7135_v0  ;;  %v7217_v7 = vpop.permute.xlu1 %3688  ;;  %v7219_v3 = vpop.f32.mrb[126].mxu0 }
 0x34d   : > { %v3343_v37 = vadd.f32 %v3327_v29, %v7141_v31  ;;  %v3239_v39 = vpop.f32.mrb[111].mxu1  ;;  %v3435_v21 = vpop.f32.mrb[127].mxu0 }
 0x34e   : > { %v7222_v51 = vadd.f32 %v3525_v38, %v3345_v50  ;;  %v3328_v6 = vmul.f32 %v3305_v49, %v3239_v39  ;;  %v3524_v41 = vmul.f32 %v3501_v28, %v3435_v21  ;;  %v7778_v38 = vld [vmem:[#allocation17_spill] sm:$0xff] }
 0x350   : > { %v3344_v36 = vadd.f32 %v3328_v6, %v7149_v10  ;;  %v7779_v6 = vld [vmem:[#allocation19_spill] sm:$0xff] }
 0x351   : > { %v7227_v9 = vpop.permute.xlu1 %4068  ;;  %v5006_v0 = vpop.f32.mrb[112].mxu1 }
 0x352   : > { %v7229_v17 = vadd.f32 %v3524_v41, %v3344_v36  ;;  %v3709_v56 = vmul.f32 %v5006_v0, %v7774_v60  ;;  %v5024_v33 = vpop.f32.mrb[128].mxu0  ;;  %v3580_v30 = vpop.f32.mrb[113].mxu1 }
 0x353   : > { %v3707_v31 = vmul.f32 %v6923_v40, %v3580_v30  ;;  %v3776_v42 = vpop.f32.mrb[129].mxu0  ;;  %v5007_v5 = vpop.f32.mrb[114].mxu1  ;;  %v3905_v49 = vmul.f32 %v5024_v33, %v7775_v14 }
 0x354   : > { %v3725_v58 = vadd.f32 %v3709_v56, %v7161_v22  ;;  %v3710_v10 = vmul.f32 %v5007_v5, %v6950_v1  ;;  %v5025_v28 = vpop.f32.mrb[130].mxu0  ;;  %v3583_v2 = vpop.f32.mrb[115].mxu1  ;;  %v3903_v18 = vmul.f32 %v7776_v19, %v3776_v42 }
 0x355   : > { %v3723_v63 = vadd.f32 %v3707_v31, %v7165_v8  ;;  %v3708_v26 = vmul.f32 %v7777_v20, %v3583_v2  ;;  %v3779_v29 = vpop.f32.mrb[131].mxu0  ;;  %v3906_v39 = vmul.f32 %v5025_v28, %v7778_v38  ;;  %v7250_v0 = vpop.permute.xlu0 %4052 }
 0x356   : > { %v7239_v50 = vadd.f32 %v3905_v49, %v3725_v58  ;;  %v3726_v40 = vadd.f32 %v3710_v10, %v7169_v15  ;;  %v3117_v22 = vpop.permute.xlu1 %3116  ;;  %v3904_v36 = vmul.f32 %v7779_v6, %v3779_v29 }
 0x357   : > { %v7243_v21 = vadd.f32 %v3903_v18, %v3723_v63  ;;  %v3724_v1 = vadd.f32 %v3708_v26, %v7171_v61  ;;  %v3134_v8 = vmul.f32 %v7131_v24, %v3117_v22 }
 0x358   : > { %v7248_v41 = vadd.f32 %v3906_v39, %v3726_v40 }
 0x359   : > { %v7252_v60 = vadd.f32 %v3904_v36, %v3724_v1  ;;  %v7255_v56 = vadd.f32 %v3134_v8, %v7138_v59  ;;  %v5010_v15 = vpop.f32.mrb[116].mxu1  ;;  %v7780_v59 = vld [vmem:[#allocation7_spill] sm:$0xff]  ;;  %v7273_v38 = vpop.permute.xlu0 %4072 }
 0x35a   : > { %v3713_v33 = vmul.f32 %v5010_v15, %v7015_v43  ;;  %v5028_v30 = vpop.f32.mrb[132].mxu0  ;;  %v3596_v31 = vpop.f32.mrb[117].mxu1 }
 0x35b   : > { %v3909_v61 = vmul.f32 %v5028_v30, %v7084_v32  ;;  %v3497_v42 = vpop.permute.xlu1 %3496  ;;  %v3711_v5 = vmul.f32 %v6979_v46, %v3596_v31  ;;  %v3792_v24 = vpop.f32.mrb[133].mxu0 }
 0x35c   : > { %v3729_v58 = vadd.f32 %v3713_v33, %v7182_v13  ;;  %v3523_v14 = vmul.f32 %v3497_v42, %v3432_v27  ;;  %v5011_v49 = vpop.f32.mrb[118].mxu1  ;;  %v5029_v10 = vpop.f32.mrb[134].mxu0  ;;  %v3907_v2 = vmul.f32 %v7780_v59, %v3792_v24  ;;  %v7782_v24 = vld [vmem:[#allocation14_spill] sm:$0xff] }
 0x35d   : > { %v3727_v28 = vadd.f32 %v3711_v5, %v7187_v12  ;;  %v3714_v63 = vmul.f32 %v5011_v49, %v7034_v25  ;;  %v3910_v43 = vmul.f32 %v5029_v10, %v7097_v44  ;;  %v3599_v19 = vpop.f32.mrb[119].mxu1  ;;  %v3795_v18 = vpop.f32.mrb[135].mxu0  ;;  %v7781_v12 = vld [vmem:[#allocation24_spill] sm:$0xff] }
 0x35e   : > { %v7265_v32 = vadd.f32 %v3909_v61, %v3729_v58  ;;  %v3539_v20 = vadd.f32 %v3523_v14, %v3343_v37  ;;  %v3712_v46 = vmul.f32 %v6914_v35, %v3599_v19  ;;  %v3908_v29 = vmul.f32 %v7781_v12, %v3795_v18 }
 0x35f   : > { %v7268_v26 = vadd.f32 %v3907_v2, %v3727_v28  ;;  %v3730_v13 = vadd.f32 %v3714_v63, %v7191_v52 }
 0x360   : > { %v3728_v27 = vadd.f32 %v3712_v46, %v7193_v45  ;;  %v3881_v40 = vpop.permute.xlu1 %3880 }
 0x361   : > { %v7275_v25 = vadd.f32 %v3910_v43, %v3730_v13  ;;  %v5014_v44 = vpop.f32.mrb[120].mxu1  ;;  %v7784_v13 = vld [vmem:[#allocation29_spill] sm:$0xff] }
 0x362   : > { %v7277_v39 = vadd.f32 %v3908_v29, %v3728_v27  ;;  %v3717_v37 = vmul.f32 %v5014_v44, %v7037_v53  ;;  %v5032_v22 = vpop.f32.mrb[136].mxu0  ;;  %v3612_v35 = vpop.f32.mrb[121].mxu1 }
 0x363   : > { %v3715_v1 = vmul.f32 %v7128_v16, %v3612_v35  ;;  %v3808_v6 = vpop.f32.mrb[137].mxu0  ;;  %v5015_v52 = vpop.f32.mrb[122].mxu1  ;;  %v3913_v36 = vmul.f32 %v5032_v22, %v3881_v40 }
 0x364   : > { %v3733_v45 = vadd.f32 %v3717_v37, %v7202_v34  ;;  %v3885_v8 = vpop.permute.xlu1 %3884  ;;  %v3718_v15 = vmul.f32 %v5015_v52, %v7217_v7  ;;  %v5033_v33 = vpop.f32.mrb[138].mxu0  ;;  %v3911_v31 = vmul.f32 %v7185_v54, %v3808_v6  ;;  %v7785_v6 = vld [vmem:[#allocation13_spill] sm:$0xff] }
 0x365   : > { %v3731_v30 = vadd.f32 %v3715_v1, %v7205_v57  ;;  %v3615_v61 = vpop.f32.mrb[123].mxu1  ;;  %v3811_v42 = vpop.f32.mrb[139].mxu0  ;;  %v3914_v16 = vmul.f32 %v5033_v33, %v3885_v8  ;;  %v7783_v57 = vld [vmem:[#allocation21_spill] sm:$0xff] }
 0x366   : > { %v7285_v53 = vadd.f32 %v3913_v36, %v3733_v45  ;;  %v3734_v5 = vadd.f32 %v3718_v15, %v7209_v62  ;;  %v3716_v58 = vmul.f32 %v7782_v24, %v3615_v61  ;;  %v7291_v34 = vpop.permute.xlu0 %4084  ;;  %v3912_v10 = vmul.f32 %v7783_v57, %v3811_v42  ;;  %v7786_v36 = vld [vmem:[#allocation20_spill] sm:$0xff]  ;;  %v7787_v61 = vld [vmem:[#allocation10_spill] sm:$0xff] }
 0x367   : > { %v7289_v14 = vadd.f32 %v3911_v31, %v3731_v30 }
 0x368   : > { %v7293_v49 = vadd.f32 %v3914_v16, %v3734_v5  ;;  %v3732_v7 = vadd.f32 %v3716_v58, %v7211_v55 }
 0x369   : > { %v3313_v54 = vpop.permute.xlu1 %3312  ;;  %v7297_v28 = vpop.f32.mrb[124].mxu1 }
 0x36a   : > { %v7299_v59 = vadd.f32 %v3912_v10, %v3732_v7  ;;  %v3330_v62 = vmul.f32 %v7214_v48, %v3313_v54  ;;  %v7302_v2 = vpop.f32.mrb[140].mxu0  ;;  %v3628_v63 = vpop.f32.mrb[125].mxu1 }
 0x36b   : > { %v3824_v43 = vpop.f32.mrb[141].mxu0  ;;  %v7304_v19 = vpop.f32.mrb[126].mxu1 }
 0x36c   : > { %v3346_v18 = vadd.f32 %v3330_v62, %v7255_v56  ;;  %v7307_v46 = vpop.f32.mrb[142].mxu0  ;;  %v3631_v55 = vpop.f32.mrb[127].mxu1 }
 0x36d   : > { %v3720_v27 = vmul.f32 %v7784_v13, %v3631_v55  ;;  %v3827_v12 = vpop.f32.mrb[143].mxu0  ;;  %v3893_v29 = vpop.permute.xlu0 %3892  ;;  %v7788_v55 = vld [vmem:[#allocation22_spill] sm:$0xff] }
 0x36e   : > { %v3693_v40 = vpop.permute.xlu1 %3692  ;;  %v3916_v37 = vmul.f32 %v3893_v29, %v3827_v12 }
 0x36f   : > { %v3736_v44 = vadd.f32 %v3720_v27, %v7229_v17  ;;  %v3719_v48 = vmul.f32 %v3693_v40, %v3628_v63 }
 0x371   : > { %v7311_v22 = vadd.f32 %v3916_v37, %v3736_v44  ;;  %v3735_v35 = vadd.f32 %v3719_v48, %v3539_v20  ;;  %v5042_v1 = vpop.f32.mrb[128].mxu1 }
 0x372   : > { %v4101_v52 = vmul.f32 %v5042_v1, %v7785_v6  ;;  %v3972_v45 = vpop.f32.mrb[129].mxu1 }
 0x373   : > { %v4077_v56 = vpop.permute.xlu1 %4076  ;;  %v4099_v8 = vmul.f32 %v7786_v36, %v3972_v45  ;;  %v5043_v15 = vpop.f32.mrb[130].mxu1 }
 0x374   : > { %v4117_v33 = vadd.f32 %v4101_v52, %v7239_v50  ;;  %v4102_v30 = vmul.f32 %v5043_v15, %v7224_v23  ;;  %v3975_v31 = vpop.f32.mrb[131].mxu1 }
 0x375   : > { %v4115_v17 = vadd.f32 %v4099_v8, %v7243_v21  ;;  %v4100_v42 = vmul.f32 %v7787_v61, %v3975_v31 }
 0x376   : > { %v4118_v5 = vadd.f32 %v4102_v30, %v7248_v41 }
 0x377   : > { %v4116_v20 = vadd.f32 %v4100_v42, %v7252_v60  ;;  %v4081_v16 = vpop.permute.xlu1 %4080 }
 0x378   : > { %v4153_v24 = vpack.c.bf16 %v4118_v5, %v4117_v33 }
 0x379   : > { %v4152_v58 = vpack.c.bf16 %v4116_v20, %v4115_v17  ;;  %v5046_v7 = vpop.f32.mrb[132].mxu1  ;;  %v7789_v20 = vlaneseq }
 0x37a   : > { %v4105_v57 = vmul.f32 %v5046_v7, %v7147_v47  ;;  %v3988_v10 = vpop.f32.mrb[133].mxu1  ;;  %v7790_v7 = vld [vmem:[#allocation2_spill] sm:$0xff] }
 0x37b   : > { %v4103_v50 = vmul.f32 %v7250_v0, %v3988_v10  ;;  %v5047_v54 = vpop.f32.mrb[134].mxu1  ;;  %5057 = vmatpush3.bf16.msra.mxu0 %v4152_v58 }
 0x37c   : > { %v4121_v23 = vadd.f32 %v4105_v57, %v7265_v32  ;;  %v3509_v21 = vpop.permute.xlu1 %3508  ;;  %v4106_v62 = vmul.f32 %v5047_v54, %v7155_v4  ;;  %v3991_v63 = vpop.f32.mrb[135].mxu1  ;;  %5058 = vmatprep.subr.bf16.mxu0 %v7762_v11 }
 0x37d   : > { %v4119_v41 = vadd.f32 %v4103_v50, %v7268_v26  ;;  %v3526_v60 = vmul.f32 %v7219_v3, %v3509_v21  ;;  %v4104_v13 = vmul.f32 %v7788_v55, %v3991_v63  ;;  %v4150_v63 = vld [vmem:[%s7424_s11] sm:$0xff] }
 0x37e   : > { %v4122_v47 = vadd.f32 %v4106_v62, %v7275_v25  ;;  %v5223_v62 = vmov 1.0|1.0  }
 0x37f   : > { %v3542_v27 = vadd.f32 %v3526_v60, %v3346_v18  ;;  %v4120_v0 = vadd.f32 %v4104_v13, %v7277_v39  ;;  %5059 = vmatpush3.bf16.msra.mxu0 %v4153_v24  ;;  %v4151_v60 = vld [vmem:[%s7424_s11 + $0x8] sm:$0xff] }
 0x380   : > { %v4155_v12 = vpack.c.bf16 %v4122_v47, %v4121_v23  ;;  %5060 = vmatprep.subr.bf16.mxu0 %v7762_v11 }
 0x381   : > { %v4154_v32 = vpack.c.bf16 %v4120_v0, %v4119_v41  ;;  %v3889_v4 = vpop.permute.xlu1 %3888  ;;  %v5050_v29 = vpop.f32.mrb[136].mxu1 }
 0x382   : > { %v3915_v40 = vmul.f32 %v3889_v4, %v3824_v43  ;;  %v4109_v44 = vmul.f32 %v5050_v29, %v4077_v56  ;;  %v4004_v37 = vpop.f32.mrb[137].mxu1  ;;  %v4226_v4 = vld [vmem:[%s7413_s0] sm:$0xff] (!%p4548_p6) }
 0x383   : > { %v4107_v26 = vmul.f32 %v7227_v9, %v4004_v37  ;;  %v5051_v3 = vpop.f32.mrb[138].mxu1  ;;  %5061 = vmatpush3.bf16.msra.mxu0 %v4154_v32  ;;  %v4229_v32 = vld [vmem:[%s7421_s8 + $0x8] sm:$0x1] (!%p4548_p6) }
 0x384   : > { %v3931_v48 = vadd.f32 %v3915_v40, %v3735_v35  ;;  %v4125_v25 = vadd.f32 %v4109_v44, %v7285_v53  ;;  %v4110_v18 = vmul.f32 %v5051_v3, %v4081_v16  ;;  %v4007_v1 = vpop.f32.mrb[139].mxu1  ;;  %5062 = vmatprep.subr.bf16.mxu0 %v7762_v11  ;;  %v4133_v16 = vshrl.u32 %v7789_v20, 7  ;;  %v4212_v40 = vld [vmem:[%s7423_s10] sm:$0xff] (!%p4548_p6)  ;;  %v4227_v37 = vld [vmem:[%s7413_s0 + $0x8] sm:$0xff] (!%p4548_p6) }
 0x385   : > { %v4123_v39 = vadd.f32 %v4107_v26, %v7289_v14  ;;  %v4108_v6 = vmul.f32 %v7273_v38, %v4007_v1  ;;  %v5225_v44 = vmov (!%p4548_p6), 0   ;;  %v4213_v26 = vld [vmem:[%s7423_s10 + $0x8] sm:$0xff] (!%p4548_p6) }
 0x386   : > { %v4126_v52 = vadd.f32 %v4110_v18, %v7293_v49  ;;  %v3701_v43 = vpop.permute.xlu1 %3700  ;;  %v4134_v50 = vadd.s32 8, %v4133_v16  ;;  %5190 = vset.pattern.permute.xlu0 (!%p4548_p6), %v5225_v44 }
 0x387   : > { %v4124_v45 = vadd.f32 %v4108_v6, %v7299_v59  ;;  %v3721_v9 = vmul.f32 %v7297_v28, %v3701_v43  ;;  %5063 = vmatpush3.bf16.msra.mxu0 %v4155_v12  ;;  %v3901_v59 = vpop.permute.xlu0 %3900  ;;  %v4228_v12 = vld [vmem:[%s7421_s8] sm:$0xff] (!%p4548_p6)  ;;  %4216 = vperm.xlu0 (!%p4548_p6), %5190, %v4212_v40  }
 0x388   : > { %v4157_v56 = vpack.c.bf16 %v4126_v52, %v4125_v25  ;;  %5064 = vmatprep.subr.bf16.mxu0 %v7762_v11  ;;  %v3918_v28 = vmul.f32 %v7307_v46, %v3901_v59  ;;  %v4136_v46 = vstv %s4544_s19  ;;  %v5083_v29 = vpack.c.bf16 (!%p4548_p6), %v4229_v32, %v4228_v12  ;;  %v4552_v52 = vld [vmem:[%s7422_s9] ss:$0 sm:$0xff] (!%p4548_p6) }
 0x389   : > { %v4156_v53 = vpack.c.bf16 %v4124_v45, %v4123_v39  ;;  %v3737_v35 = vadd.f32 %v3721_v9, %v7222_v51  ;;  %v5054_v36 = vpop.f32.mrb[140].mxu1  ;;  %v4137_v57 = vadd.s32 %v4136_v46, %v7790_v7 }
 0x38a   : > { %v3705_v8 = vpop.permute.xlu1 %3704  ;;  %v4020_v15 = vpop.f32.mrb[141].mxu1 }
 0x38b   : > { %v3722_v14 = vmul.f32 %v7304_v19, %v3705_v8  ;;  %v4111_v38 = vmul.f32 %v7291_v34, %v4020_v15  ;;  %v5055_v49 = vpop.f32.mrb[142].mxu1  ;;  %5065 = vmatpush3.bf16.msra.mxu0 %v4156_v53  ;;  %vm4138_vm6 = vcmp.lt.s32.totalorder %v4137_v57, 200  ;;  %4221 = vperm.xlu0 (!%p4548_p6), %5190, %v4213_v26  }
 0x38c   : > { %v4023_v33 = vpop.f32.mrb[143].mxu1  ;;  %5066 = vmatprep.subr.bf16.mxu0 %v7762_v11 }
 0x38d   : > { %v3738_v30 = vadd.f32 %v3722_v14, %v3542_v27  ;;  %v4127_v31 = vadd.f32 %v4111_v38, %v3931_v48 }
 0x38f   : > { %v4089_v17 = vpop.permute.xlu1 %4088  ;;  %5067 = vmatpush3.bf16.msra.mxu0 %v4157_v56  ;;  %v3934_v51 = vadd.f32 %v3918_v28, %v3738_v30 }
 0x390   : > { %v4112_v61 = vmul.f32 %v4089_v17, %v4023_v33  ;;  %5068 = vmatprep.subr.bf16.mxu0 %v7762_v11 }
 0x392   : > { %v4128_v19 = vadd.f32 %v4112_v61, %v7311_v22  ;;  %v4545_v22 = vld [vmem:[%s409_s23] ss:$0 sm:$0xff] }
 0x393   : > { %vm4143_vm7 = vcmp.eq.s32.totalorder %v4133_v16, %v4545_v22  ;;  %vm4144_vm8 = vcmp.eq.s32.totalorder %v4134_v50, %v4545_v22 }
 0x394   : > { %v4158_v34 = vpack.c.bf16 %v4128_v19, %v4127_v31  ;;  %v3897_v42 = vpop.permute.xlu1 %3896  ;;  %vm4145_vm9 = vmand %vm4143_vm7, %vm4138_vm6 }
 0x395   : > { %v3917_v5 = vmul.f32 %v7302_v2, %v3897_v42  ;;  %vm4146_vm10 = vmand %vm4144_vm8, %vm4138_vm6 }
 0x396   : > { %5069 = vmatpush3.bf16.msra.mxu0 %v4158_v34  ;;  %vm4546_vm11 = vmpackc.low %vm4146_vm10, %vm4145_vm9 }
 0x397   : > { %v3933_v24 = vadd.f32 %v3917_v5, %v3737_v35  ;;  %5070 = vmatprep.subr.bf16.mxu0 %v7762_v11 }
 0x399   : > { %v4093_v58 = vpop.permute.xlu1 %4092 }
 0x39a   : > { %v4113_v10 = vmul.f32 %v5054_v36, %v4093_v58 }
 0x39c   : > { %v4129_v54 = vadd.f32 %v4113_v10, %v3933_v24 }
 0x39d   : > { %v4097_v23 = vpop.permute.xlu1 %4096 }
 0x39e   : > { %v4114_v2 = vmul.f32 %v5055_v49, %v4097_v23 }
 0x3a0   : > { %v4130_v21 = vadd.f32 %v4114_v2, %v3934_v51 }
 0x3a2   : > { %v4159_v11 = vpack.c.bf16 %v4130_v21, %v4129_v54 }
 0x3a4   : > { %5071 = vmatpush3.bf16.msra.mxu0 %v4159_v11 }
 0x3a5   : > { %5085 = vmatprep.subr.msk.bf16.mxu0 (!%p4548_p6), %vm5084_vm15, %v5083_v29 }
 0x3a7   : > { %5073 = vmatmul.mubr.msk.bf16.vlgmr.msra.gmra.mrb[144].mxu0 %vm4546_vm11, %v5223_v62 }
 0x3a8   : > { %5080 = vmatprep.mubr.msk.f32.mxu0 (!%p4548_p6), %vm866_vm4, %v4226_v4  ;;  %5088 = vmatpush3.bf16.msk.msra.mxu0 (!%p4548_p6), %vm5084_vm15, %v5083_v29 }
 0x3af   : > { %5081 = vmatmul.mubr.msk.f32.vlgmr.msra.gmra.mrb[0].mxu0 (!%p4548_p6), %vm866_vm4, %v4227_v37 }
 0x406   : > { %v4217_v3 = vpop.permute.xlu0 (!%p4548_p6), %4216 }
 0x40a   : > { %v4222_v48 = vpop.permute.xlu0 (!%p4548_p6), %4221 }
 0x479   : > { %4209 = sbr.rel (%p4548_p6) target bundleno = 1185 (0x4a1), region = 72 }
 0x47a   : > { %v4194_v41 = vpop.f32.mrb[144].mxu0 }
 0x47b   : > { %v4201_v55 = vadd.f32 %v4194_v41, %v4150_v63  ;;  %v5074_v13 = vpop.f32.mrb[145].mxu0 }
 0x47c   : > { %v4197_v47 = vpop.f32.mrb[146].mxu0 }
 0x47d   : > { %4204 = vst.msk [vmem:[%s7424_s11] sm:$0xff] %vm4203_vm12, %v4201_v55  ;;  %v4202_v27 = vadd.f32 %v4197_v47, %v4151_v60  ;;  %v5075_v0 = vpop.f32.mrb[147].mxu0 }
 0x47f   : > { %4205 = vst.msk [vmem:[%s7424_s11 + $0x8] sm:$0xff] %vm4203_vm12, %v4202_v27 }
 0x482   : > { %v5082_v6 = vpop.f32.mrb[0].mxu0 }
 0x483   : > { %v4306_v45 = vpop.f32.mrb[1].mxu0 }
 0x484   : > { %v4210_v18 = vld [vmem:[%s7424_s11] sm:$0xff] }
 0x485   : > { %v4224_v39 = vmul.f32 %v4217_v3, %v4210_v18 }
 0x486   : > { %v4211_v25 = vld [vmem:[%s7424_s11 + $0x8] sm:$0xff] }
 0x487   : > { %v4225_v1 = vmul.f32 %v4222_v48, %v4211_v25  ;;  %v4315_v9 = vadd.f32 %v4306_v45, %v4224_v39 }
 0x489   : > { %v4316_v43 = vadd.f32 %v5082_v6, %v4225_v1  ;;  %v4324_v53 = vadd.f32 %v4552_v52, %v4315_v9 }
 0x48b   : > { %v4325_v56 = vadd.f32 %v4552_v52, %v4316_v43  ;;  %v4328_v36 = vmin.f32 %v4324_v53, 0.0  ;;  %vm4326_vm1 = vcmp.gt.f32.partialorder %v4324_v53, 0.0 }
 0x48d   : > { %v4329_v35 = vmin.f32 %v4325_v56, 0.0  ;;  %v4330_v15 = vmul.f32 1.442695, %v4328_v36  ;;  %vm4327_vm0 = vcmp.gt.f32.partialorder %v4325_v56, 0.0 }
 0x48f   : > { %v4332_v8 = vmul.f32 1.442695, %v4329_v35 }
 0x491   : > { %5191 = vpow2.f32 %v4332_v8 }
 0x492   : > { %5193 = vpow2.f32 %v4330_v15 }
 0x49b   : > { %v5192_v14 = vpop.eup %5191 }
 0x49c   : > { %v5194_v38 = vpop.eup %5193  ;;  %v4554_v49 = vadd.f32 -1.0, %v5192_v14 }
 0x49d   : > { %v4553_v59 = vadd.f32 -1.0, %v5194_v38 }
 0x49e   : > { %v4337_v33 = vsel %vm4327_vm0, %v4325_v56, %v4554_v49 }
 0x49f   : > { %4339 = vst.msk [vmem:[%s7424_s11 + $0x8] sm:$0xff] %vm4203_vm12, %v4337_v33  ;;  %v4336_v28 = vsel %vm4326_vm1, %v4324_v53, %v4553_v59 }
 0x4a0   : > { %4338 = vst.msk [vmem:[%s7424_s11] sm:$0xff] %vm4203_vm12, %v4336_v28 }
 0x4a1 PF: > { %s21_s17 = sadd.s32 1, %s5201_s17  }
 0x4a2   : > { %p18_p7 = scmp.ge.s32.totalorder %s21_s17, 4  }
 0x4a4   :  { %20 = sbr.rel (!%p18_p7) target bundleno = 1 (0x1), region = 104 }

// kernel: gcn_forward.4
= control target key start
LH: loop header
LB: loop body
LE: loop exit
PB: predicated region body
PF: predicated region fallthrough
CT: control target
= control target key end

     0   :  { %s5334_s17 = smov 0   ;;  %s7514_s0 = inlined_call_operand.vmem [shape: f32[16,32], index: 0, kind: input, shape index: {}]   ;;  %s7515_s1 = inlined_call_operand.vmem [shape: f32[256,1], index: 1, kind: input, shape index: {}]   ;;  %s7516_s2 = inlined_call_operand.vmem [shape: s32[256,1], index: 2, kind: input, shape index: {}]   ;;  %s7517_s3 = inlined_call_operand.vmem [shape: s32[1,256], index: 3, kind: input, shape index: {}]   ;;  %s7518_s4 = inlined_call_operand.vmem [shape: f32[1,16], index: 4, kind: input, shape index: {}]   ;;  %s7519_s5 = inlined_call_operand.vmem [shape: f32[1,16], index: 5, kind: input, shape index: {}]   ;;  %s7520_s6 = inlined_call_operand.vmem [shape: f32[16,32,64], index: 6, kind: input, shape index: {}]   ;;  %s7521_s7 = inlined_call_operand.vmem [shape: f32[32,64], index: 7, kind: input, shape index: {}]   ;;  %s7522_s8 = inlined_call_operand.vmem [shape: f32[32,64], index: 8, kind: input, shape index: {}]   ;;  %s7523_s9 = inlined_call_operand.vmem [shape: f32[1,64], index: 9, kind: input, shape index: {}]   ;;  %s7524_s10 = inlined_call_operand.vmem [shape: f32[16,1], index: 10, kind: input, shape index: {}]   ;;  %s7525_s11 = inlined_call_operand.vmem [shape: f32[16,64], index: 11, kind: output, shape index: {}]  }
   0x1 LB: > { %s5340_s18 = sadd.s32 4294967295, %s5251_s17   ;;  %p4386_p0 = scmp.ge.s32.totalorder %s5251_s17, 1  ;;  %s5251_s17 = sphi %s5334_s17, %s21_s17  }
   0x2   : > { %p352_p1 = scmp.lt.s32.totalorder %s5251_s17, 3 }
   0x4   : > { %p353_p2 = pnand %p4386_p0, %p352_p1 }
   0x6   : > { %356 = sbr.rel (%p353_p2) target bundleno = 1185 (0x4a1), region = 64 }
   0xd   : > { %s4387_s19 = sshll.u32 %s5340_s18, 4  ;;  %p407_p3 = scmp.lt.s32.totalorder %s5340_s18, 1 }
   0xe   : > { %p396_p4 = scmp.lt.s32.totalorder %s4387_s19, 31  ;;  %p4391_p5 = scmp.ne.s32.totalorder %s5340_s18, 0 }
   0xf   : > { %s5347_s20 = scalar_select %p407_p3, %s5340_s18, 1 }
  0x10   : > { %s7893_s19 = smov (!%p396_p4, %s4387_s19), 31  ;;  %414 = sbr.rel (%p4391_p5) target bundleno = 23 (0x17), region = 68 }
  0x11   : > { %s409_s23 = scalar_lea.vmem %s7517_s3, %s5347_s20  ;;  %s4388_s24 = sshll.u32 %s7893_s19, 3  ;;  %vm415_vm0 = vcmask (!%p4391_p5), 523264   ;;  %v5253_v0 = vmov (!%p4391_p5), 0.0  }
  0x12   : > { %s5356_s27 = scalar_lea.vmem %s7515_s1, %s4388_s24  ;;  %s5361_s30 = scalar_lea.vmem %s7516_s2, %s4388_s24  ;;  %416 = vst.msk [vmem:[%s7525_s11] sm:$0xff] (!%p4391_p5), %vm415_vm0, %v5253_v0  ;;  %417 = vst.msk [vmem:[%s7525_s11 + $0x8] sm:$0xff] (!%p4391_p5), %vm415_vm0, %v5253_v0 }
  0x17 PF: > { %v420_v1 = vld [vmem:[%s5356_s27 + $0x10] sm:$0xff]  ;;  %v418_v2 = vld [vmem:[%s5356_s27] sm:$0xff]  ;;  %v5254_v3 = vmov 0   ;;  %v421_v4 = vld [vmem:[%s5356_s27 + $0x18] sm:$0xff]  ;;  %vm685_vm3 = vcmask 130048   ;;  %s4538_s29 = sshll.u32 %s5340_s18, 7 }
  0x18   : > { %5171 = vset.pattern.permute.xlu1 %v5254_v3  ;;  %5170 = vset.pattern.permute.xlu0 %v5254_v3  ;;  %v419_v5 = vld [vmem:[%s5356_s27 + $0x8] sm:$0xff]  ;;  %v422_v7 = vld [vmem:[%s5356_s27 + $0x20] sm:$0xff]  ;;  %v425_v8 = vld [vmem:[%s5356_s27 + $0x38] sm:$0xff]  ;;  %p4542_p6 = scmp.ne.s32.totalorder %s5340_s18, 1 }
  0x19   : > { %447 = vperm.xlu1 %5171, %v420_v1   ;;  %437 = vperm.xlu0 %5170, %v418_v2   ;;  %v423_v6 = vld [vmem:[%s5356_s27 + $0x28] sm:$0xff]  ;;  %v424_v9 = vld [vmem:[%s5356_s27 + $0x30] sm:$0xff]  ;;  %v426_v11 = vld [vmem:[%s5356_s27 + $0x40] sm:$0xff] }
  0x1a   : > { %v427_v10 = vld [vmem:[%s5356_s27 + $0x48] sm:$0xff]  ;;  %v429_v12 = vld [vmem:[%s5356_s27 + $0x58] sm:$0xff]  ;;  %v428_v13 = vld [vmem:[%s5356_s27 + $0x50] sm:$0xff] }
  0x1b   : > { %v431_v14 = vld [vmem:[%s5356_s27 + $0x68] sm:$0xff]  ;;  %v430_v15 = vld [vmem:[%s5356_s27 + $0x60] sm:$0xff]  ;;  %v433_v16 = vld [vmem:[%s5356_s27 + $0x78] sm:$0xff] }
  0x1c   : > { %v432_v17 = vld [vmem:[%s5356_s27 + $0x70] sm:$0xff]  ;;  %v577_v18 = vld [vmem:[%s5361_s30 + $0x8] sm:$0xff]  ;;  %v576_v19 = vld [vmem:[%s5361_s30] sm:$0xff] }
  0x1d   : > { %452 = vperm.xlu1 %5171, %v421_v4   ;;  %442 = vperm.xlu0 %5170, %v419_v5   ;;  %v579_v20 = vld [vmem:[%s5361_s30 + $0x18] sm:$0xff]  ;;  %v578_v21 = vld [vmem:[%s5361_s30 + $0x10] sm:$0xff]  ;;  %v682_v22 = vld [vmem:[%s7514_s0] sm:$0xff] }
  0x1e   : > { %v683_v23 = vld [vmem:[%s7514_s0 + $0x8] sm:$0xff]  ;;  %v580_v26 = vld [vmem:[%s5361_s30 + $0x20] sm:$0xff]  ;;  %v583_v27 = vld [vmem:[%s5361_s30 + $0x38] sm:$0xff] }
  0x1f   : > { %v684_v24 = vpack.c.bf16 %v683_v23, %v682_v22  ;;  %v581_v25 = vld [vmem:[%s5361_s30 + $0x28] sm:$0xff]  ;;  %v582_v28 = vld [vmem:[%s5361_s30 + $0x30] sm:$0xff]  ;;  %v584_v30 = vld [vmem:[%s5361_s30 + $0x40] sm:$0xff]  ;;  %v7526_v22 = vlaneseq }
  0x20   : > { %v585_v29 = vld [vmem:[%s5361_s30 + $0x48] sm:$0xff]  ;;  %v587_v31 = vld [vmem:[%s5361_s30 + $0x58] sm:$0xff]  ;;  %v586_v32 = vld [vmem:[%s5361_s30 + $0x50] sm:$0xff] }
  0x21   : > { %462 = vperm.xlu1 %5171, %v423_v6   ;;  %457 = vperm.xlu0 %5170, %v422_v7   ;;  %v589_v33 = vld [vmem:[%s5361_s30 + $0x68] sm:$0xff]  ;;  %v588_v34 = vld [vmem:[%s5361_s30 + $0x60] sm:$0xff]  ;;  %v591_v35 = vld [vmem:[%s5361_s30 + $0x78] sm:$0xff] }
  0x22   : > { %4744 = vmatprep.subr.bf16.mxu0 %v684_v24  ;;  %v590_v36 = vld [vmem:[%s5361_s30 + $0x70] sm:$0xff]  ;;  %v5411_v37 = vld [vmem:[%s7518_s4] ss:$0 sm:$0xff] }
  0x23   : > { %4745 = vmatpush3.bf16.msra.mxu0 %v684_v24  ;;  %v5416_v38 = vld [vmem:[%s7519_s5] ss:$0 sm:$0xff] }
  0x25   : > { %472 = vperm.xlu1 %5171, %v425_v8   ;;  %467 = vperm.xlu0 %5170, %v424_v9  }
  0x29   : > { %482 = vperm.xlu1 %5171, %v427_v10   ;;  %477 = vperm.xlu0 %5170, %v426_v11  }
  0x2d   : > { %492 = vperm.xlu1 %5171, %v429_v12   ;;  %487 = vperm.xlu0 %5170, %v428_v13  }
  0x31   : > { %502 = vperm.xlu1 %5171, %v431_v14   ;;  %497 = vperm.xlu0 %5170, %v430_v15  }
  0x35   : > { %512 = vperm.xlu1 %5171, %v433_v16   ;;  %507 = vperm.xlu0 %5170, %v432_v17  }
  0x39   : > { %598 = vperm.xlu1 %5171, %v577_v18   ;;  %595 = vperm.xlu0 %5170, %v576_v19  }
  0x3d   : > { %604 = vperm.xlu1 %5171, %v579_v20   ;;  %601 = vperm.xlu0 %5170, %v578_v21  }
  0x41   : > { %610 = vperm.xlu1 %5171, %v581_v25   ;;  %607 = vperm.xlu0 %5170, %v580_v26  }
  0x45   : > { %616 = vperm.xlu1 %5171, %v583_v27   ;;  %613 = vperm.xlu0 %5170, %v582_v28  }
  0x49   : > { %622 = vperm.xlu1 %5171, %v585_v29   ;;  %619 = vperm.xlu0 %5170, %v584_v30  }
  0x4d   : > { %628 = vperm.xlu1 %5171, %v587_v31   ;;  %625 = vperm.xlu0 %5170, %v586_v32   ;;  %v5480_v31 = vand.u32 127, %v7526_v22 }
  0x4f   : > { %7548 = vst [vmem:[#allocation2_spill] sm:$0xff] %v5480_v31 }
  0x51   : > { %634 = vperm.xlu1 %5171, %v589_v33   ;;  %631 = vperm.xlu0 %5170, %v588_v34  }
  0x55   : > { %640 = vperm.xlu1 %5171, %v591_v35   ;;  %637 = vperm.xlu0 %5170, %v590_v36  }
  0x98   : > { %v448_v39 = vpop.permute.xlu1 %447  ;;  %v438_v40 = vpop.permute.xlu0 %437 }
  0x99   : > { %v523_v41 = vmul.f32 %v5411_v37, %v448_v39  ;;  %v521_v42 = vmul.f32 %v5411_v37, %v438_v40 }
  0x9b   : > { %v546_v43 = vadd.f32 %v5416_v38, %v523_v41  ;;  %v544_v44 = vadd.f32 %v5416_v38, %v521_v42 }
  0x9c   : > { %v453_v45 = vpop.permute.xlu1 %452  ;;  %v443_v46 = vpop.permute.xlu0 %442 }
  0x9d   : > { %v5422_v47 = vmax.f32 %v544_v44, 0.0  ;;  %v524_v48 = vmul.f32 %v5411_v37, %v453_v45  ;;  %v522_v49 = vmul.f32 %v5411_v37, %v443_v46  ;;  %v5426_v50 = vmax.f32 %v546_v43, 0.0 }
  0x9e   : > { %v7527_v44 = vmov 0.0  }
  0x9f   : > { %v545_v51 = vadd.f32 %v5416_v38, %v522_v49  ;;  %1041 = vperm.xlu0 %5170, %v5422_v47   ;;  %v547_v54 = vadd.f32 %v5416_v38, %v524_v48 }
  0xa0   : > { %v463_v52 = vpop.permute.xlu1 %462  ;;  %v458_v53 = vpop.permute.xlu0 %457 }
  0xa1   : > { %v5431_v55 = vmax.f32 %v545_v51, 0.0  ;;  %v526_v56 = vmul.f32 %v5411_v37, %v463_v52  ;;  %v525_v57 = vmul.f32 %v5411_v37, %v458_v53  ;;  %v5439_v62 = vmax.f32 %v547_v54, 0.0 }
  0xa2   : > { %v5256_v54 = vmov 1  }
  0xa3   : > { %v548_v58 = vadd.f32 %v5416_v38, %v525_v57  ;;  %1051 = vperm.xlu0 %5170, %v5426_v50   ;;  %1046 = vperm.xlu1 %5171, %v5431_v55   ;;  %v549_v59 = vadd.f32 %v5416_v38, %v526_v56 }
  0xa4   : > { %v473_v60 = vpop.permute.xlu1 %472  ;;  %v468_v61 = vpop.permute.xlu0 %467 }
  0xa5   : > { %v5441_v63 = vmax.f32 %v548_v58, 0.0  ;;  %v528_v0 = vmul.f32 %v5411_v37, %v473_v60  ;;  %v527_v1 = vmul.f32 %v5411_v37, %v468_v61  ;;  %v5448_v3 = vmax.f32 %v549_v59, 0.0 }
  0xa7   : > { %v550_v2 = vadd.f32 %v5416_v38, %v527_v1  ;;  %1056 = vperm.xlu1 %5171, %v5439_v62   ;;  %1061 = vperm.xlu0 %5170, %v5441_v63   ;;  %v551_v6 = vadd.f32 %v5416_v38, %v528_v0 }
  0xa8   : > { %v483_v4 = vpop.permute.xlu1 %482  ;;  %v478_v5 = vpop.permute.xlu0 %477 }
  0xa9   : > { %v5451_v7 = vmax.f32 %v550_v2, 0.0  ;;  %v530_v8 = vmul.f32 %v5411_v37, %v483_v4  ;;  %v529_v9 = vmul.f32 %v5411_v37, %v478_v5  ;;  %v5459_v14 = vmax.f32 %v551_v6, 0.0 }
  0xab   : > { %v552_v10 = vadd.f32 %v5416_v38, %v529_v9  ;;  %1066 = vperm.xlu1 %5171, %v5448_v3   ;;  %1071 = vperm.xlu0 %5170, %v5451_v7   ;;  %v553_v11 = vadd.f32 %v5416_v38, %v530_v8 }
  0xac   : > { %v493_v12 = vpop.permute.xlu1 %492  ;;  %v488_v13 = vpop.permute.xlu0 %487 }
  0xad   : > { %v5461_v15 = vmax.f32 %v552_v10, 0.0  ;;  %v532_v16 = vmul.f32 %v5411_v37, %v493_v12  ;;  %v531_v17 = vmul.f32 %v5411_v37, %v488_v13  ;;  %v5468_v19 = vmax.f32 %v553_v11, 0.0 }
  0xaf   : > { %v554_v18 = vadd.f32 %v5416_v38, %v531_v17  ;;  %1076 = vperm.xlu1 %5171, %v5459_v14   ;;  %1081 = vperm.xlu0 %5170, %v5461_v15   ;;  %v555_v23 = vadd.f32 %v5416_v38, %v532_v16 }
  0xb0   : > { %v503_v20 = vpop.permute.xlu1 %502  ;;  %v498_v21 = vpop.permute.xlu0 %497 }
  0xb1   : > { %v5471_v24 = vmax.f32 %v554_v18, 0.0  ;;  %v534_v25 = vmul.f32 %v5411_v37, %v503_v20  ;;  %v533_v26 = vmul.f32 %v5411_v37, %v498_v21  ;;  %v5482_v32 = vmax.f32 %v555_v23, 0.0 }
  0xb3   : > { %v556_v27 = vadd.f32 %v5416_v38, %v533_v26  ;;  %1086 = vperm.xlu1 %5171, %v5468_v19   ;;  %1091 = vperm.xlu0 %5170, %v5471_v24   ;;  %v557_v28 = vadd.f32 %v5416_v38, %v534_v25  ;;  %7549 = vst [vmem:[#allocation3_spill] sm:$0xff] %v5482_v32 }
  0xb4   : > { %v513_v29 = vpop.permute.xlu1 %512  ;;  %v508_v30 = vpop.permute.xlu0 %507 }
  0xb5   : > { %v5484_v33 = vmax.f32 %v556_v27, 0.0  ;;  %v536_v34 = vmul.f32 %v5411_v37, %v513_v29  ;;  %v535_v35 = vmul.f32 %v5411_v37, %v508_v30  ;;  %v5491_v39 = vmax.f32 %v557_v28, 0.0 }
  0xb7   : > { %v558_v36 = vadd.f32 %v5416_v38, %v535_v35  ;;  %1096 = vperm.xlu1 %5171, %v5482_v32   ;;  %1101 = vperm.xlu0 %5170, %v5484_v33   ;;  %v559_v42 = vadd.f32 %v5416_v38, %v536_v34  ;;  %v5257_v34 = vmov 2   ;;  %v5258_v35 = vmov 3  }
  0xb8   : > { %v599_v40 = vpop.permute.xlu1 %598  ;;  %v596_v41 = vpop.permute.xlu0 %595 }
  0xb9   : > { %v5494_v43 = vmax.f32 %v558_v36, 0.0  ;;  %vm643_vm1 = vcmp.eq.s32.totalorder %v5480_v31, %v599_v40  ;;  %vm642_vm2 = vcmp.eq.s32.totalorder %v5480_v31, %v596_v41  ;;  %v5502_v38 = vmax.f32 %v559_v42, 0.0  ;;  %v815_v36 = vld [vmem:[%s7520_s6] sm:$0xff]  ;;  %v816_v40 = vld [vmem:[%s7520_s6 + $0x8] sm:$0xff] }
  0xba   : > { %v658_v37 = vsel %vm642_vm2, 1.0, %v7527_v44  ;;  %v659_v45 = vsel %vm643_vm1, 1.0, %v7527_v44  ;;  %v911_v41 = vld [vmem:[%s7521_s7] sm:$0xff]  ;;  %v879_v42 = vpack.c.bf16 %v816_v40, %v815_v36  ;;  %vm917_vm2 = vcmask 261120  }
  0xbb   : > { %7550 = vst [vmem:[#allocation4_spill] sm:$0xff] %v5494_v43  ;;  %1106 = vperm.xlu1 %5171, %v5491_v39   ;;  %1111 = vperm.xlu0 %5170, %v5494_v43   ;;  %v674_v46 = vpack.c.bf16 %v659_v45, %v658_v37  ;;  %v912_v37 = vld [vmem:[%s7521_s7 + $0x8] sm:$0xff] }
  0xbc   : > { %v605_v48 = vpop.permute.xlu1 %604  ;;  %v602_v49 = vpop.permute.xlu0 %601  ;;  %v915_v45 = vpack.c.bf16 %v912_v37, %v911_v41  ;;  %4762 = vmatprep.subr.bf16.mxu1 %v879_v42 }
  0xbd   : > { %vm645_vm4 = vcmp.eq.s32.totalorder %v5480_v31, %v605_v48  ;;  %vm644_vm5 = vcmp.eq.s32.totalorder %v5480_v31, %v602_v49  ;;  %4746 = vmatprep.mubr.msk.bf16.mxu0 %vm685_vm3, %v674_v46  ;;  %4763 = vmatpush3.bf16.msra.mxu1 %v879_v42  ;;  %v817_v46 = vld [vmem:[%s7520_s6 + $0x10] sm:$0xff]  ;;  %v818_v48 = vld [vmem:[%s7520_s6 + $0x18] sm:$0xff] }
  0xbe   : > { %v661_v51 = vsel %vm645_vm4, 1.0, %v7527_v44  ;;  %v660_v52 = vsel %vm644_vm5, 1.0, %v7527_v44  ;;  %4782 = vmatprep.subr.bf16.mxu0 %v915_v45  ;;  %v913_v49 = vld [vmem:[%s7521_s7 + $0x10] sm:$0xff] }
  0xbf   : > { %v675_v53 = vpack.c.bf16 %v661_v51, %v660_v52  ;;  %1116 = vperm.xlu1 %5171, %v5502_v38   ;;  %5172 = vset.pattern.permute.xlu0 %v5256_v54  ;;  %v880_v51 = vpack.c.bf16 %v818_v48, %v817_v46  ;;  %v914_v52 = vld [vmem:[%s7521_s7 + $0x18] sm:$0xff]  ;;  %v5261_v46 = vmov 6  }
  0xc0   : > { %v611_v56 = vpop.permute.xlu1 %610  ;;  %1330 = vperm.xlu0 %5172, %v5422_v47   ;;  %v608_v57 = vpop.permute.xlu0 %607 }
  0xc1   : > { %vm647_vm6 = vcmp.eq.s32.totalorder %v5480_v31, %v611_v56  ;;  %vm646_vm7 = vcmp.eq.s32.totalorder %v5480_v31, %v608_v57  ;;  %4747 = vmatmul.mubr.msk.bf16.vlgmr.msra.gmra.mrb[0].mxu0 %vm685_vm3, %v675_v53  ;;  %v916_v53 = vpack.c.bf16 %v914_v52, %v913_v49  ;;  %4764 = vmatprep.subr.bf16.mxu1 %v880_v51 }
  0xc2   : > { %v663_v58 = vsel %vm647_vm6, 1.0, %v7527_v44  ;;  %v662_v59 = vsel %vm646_vm7, 1.0, %v7527_v44  ;;  %4783 = vmatpush3.bf16.msra.mxu0 %v915_v45  ;;  %4765 = vmatpush3.bf16.msra.mxu1 %v880_v51 }
  0xc3   : > { %v676_v60 = vpack.c.bf16 %v663_v58, %v662_v59  ;;  %5173 = vset.pattern.permute.xlu1 %v5256_v54  ;;  %4784 = vmatprep.subr.bf16.mxu0 %v916_v53  ;;  %v5259_v54 = vmov 4  }
  0xc4   : > { %v617_v61 = vpop.permute.xlu1 %616  ;;  %1334 = vperm.xlu1 %5173, %v5431_v55   ;;  %1342 = vperm.xlu0 %5172, %v5439_v62   ;;  %v614_v0 = vpop.permute.xlu0 %613 }
  0xc5   : > { %vm649_vm8 = vcmp.eq.s32.totalorder %v5480_v31, %v617_v61  ;;  %vm648_vm9 = vcmp.eq.s32.totalorder %v5480_v31, %v614_v0  ;;  %4750 = vmatprep.mubr.msk.bf16.mxu0 %vm685_vm3, %v676_v60  ;;  %v819_v61 = vld [vmem:[%s7520_s6 + $0x20] sm:$0xff]  ;;  %v820_v0 = vld [vmem:[%s7520_s6 + $0x28] sm:$0xff] }
  0xc6   : > { %v665_v1 = vsel %vm649_vm8, 1.0, %v7527_v44  ;;  %v664_v2 = vsel %vm648_vm9, 1.0, %v7527_v44  ;;  %4785 = vmatpush3.bf16.msra.mxu0 %v916_v53 }
  0xc7   : > { %v677_v4 = vpack.c.bf16 %v665_v1, %v664_v2  ;;  %v5632_v1 = vpack.c.bf16 %v820_v0, %v819_v61 }
  0xc8   : > { %v623_v5 = vpop.permute.xlu1 %622  ;;  %1338 = vperm.xlu1 %5173, %v5426_v50   ;;  %1350 = vperm.xlu0 %5172, %v5448_v3   ;;  %v620_v6 = vpop.permute.xlu0 %619 }
  0xc9   : > { %vm651_vm10 = vcmp.eq.s32.totalorder %v5480_v31, %v623_v5  ;;  %vm650_vm11 = vcmp.eq.s32.totalorder %v5480_v31, %v620_v6  ;;  %4751 = vmatmul.mubr.msk.bf16.gmra.mrb[4].mxu0 %vm685_vm3, %v677_v4  ;;  %4802 = vmatprep.subr.bf16.mxu1 %v5632_v1 }
  0xca   : > { %v667_v8 = vsel %vm651_vm10, 1.0, %v7527_v44  ;;  %v666_v9 = vsel %vm650_vm11, 1.0, %v7527_v44  ;;  %vm4199_vm10 = vcmask 523264  }
  0xcb   : > { %v678_v10 = vpack.c.bf16 %v667_v8, %v666_v9 }
  0xcc   : > { %v629_v11 = vpop.permute.xlu1 %628  ;;  %1346 = vperm.xlu1 %5173, %v5441_v63   ;;  %1358 = vperm.xlu0 %5172, %v5459_v14   ;;  %v626_v12 = vpop.permute.xlu0 %625 }
  0xcd   : > { %vm653_vm12 = vcmp.eq.s32.totalorder %v5480_v31, %v629_v11  ;;  %vm652_vm13 = vcmp.eq.s32.totalorder %v5480_v31, %v626_v12  ;;  %4754 = vmatprep.mubr.msk.bf16.mxu0 %vm685_vm3, %v678_v10  ;;  %v823_v10 = vld [vmem:[%s7520_s6 + $0x40] sm:$0xff]  ;;  %v824_v11 = vld [vmem:[%s7520_s6 + $0x48] sm:$0xff] }
  0xce   : > { %v669_v13 = vsel %vm653_vm12, 1.0, %v7527_v44  ;;  %v668_v16 = vsel %vm652_vm13, 1.0, %v7527_v44  ;;  %v5659_v12 = vpack.c.bf16 %v824_v11, %v823_v10 }
  0xcf   : > { %v679_v17 = vpack.c.bf16 %v669_v13, %v668_v16 }
  0xd0   : > { %v635_v18 = vpop.permute.xlu1 %634  ;;  %1354 = vperm.xlu1 %5173, %v5451_v7   ;;  %1366 = vperm.xlu0 %5172, %v5468_v19   ;;  %v632_v20 = vpop.permute.xlu0 %631 }
  0xd1   : > { %vm655_vm14 = vcmp.eq.s32.totalorder %v5480_v31, %v635_v18  ;;  %vm654_vm15 = vcmp.eq.s32.totalorder %v5480_v31, %v632_v20  ;;  %4755 = vmatmul.mubr.msk.bf16.gmra.mrb[8].mxu0 %vm685_vm3, %v679_v17  ;;  %4822 = vmatprep.subr.bf16.mxu0 %v5659_v12  ;;  %v5260_v20 = vmov 5  }
  0xd2   : > { %v671_v21 = vsel %vm655_vm14, 1.0, %v7527_v44  ;;  %v670_v23 = vsel %vm654_vm15, 1.0, %v7527_v44 }
  0xd3   : > { %v680_v25 = vpack.c.bf16 %v671_v21, %v670_v23 }
  0xd4   : > { %v641_v26 = vpop.permute.xlu1 %640  ;;  %1362 = vperm.xlu1 %5173, %v5461_v15   ;;  %1374 = vperm.xlu0 %5172, %v5482_v32   ;;  %v638_v27 = vpop.permute.xlu0 %637 }
  0xd5   : > { %vm657_vm0 = vcmp.eq.s32.totalorder %v5480_v31, %v641_v26  ;;  %vm656_vm1 = vcmp.eq.s32.totalorder %v5480_v31, %v638_v27  ;;  %4758 = vmatprep.mubr.msk.bf16.mxu0 %vm685_vm3, %v680_v25 }
  0xd6   : > { %v673_v28 = vsel %vm657_vm0, 1.0, %v7527_v44  ;;  %v672_v29 = vsel %vm656_vm1, 1.0, %v7527_v44 }
  0xd7   : > { %v681_v30 = vpack.c.bf16 %v673_v28, %v672_v29 }
  0xd8   : > { %1370 = vperm.xlu1 %5173, %v5471_v24   ;;  %1382 = vperm.xlu0 %5172, %v5491_v39  }
  0xd9   : > { %4759 = vmatmul.mubr.msk.bf16.gmra.mrb[12].mxu0 %vm685_vm3, %v681_v30  ;;  %vm5271_vm3 = vmmov 0  }
  0xdc   : > { %1378 = vperm.xlu1 %5173, %v5484_v33   ;;  %1390 = vperm.xlu0 %5172, %v5502_v38  }
  0xe0   : > { %1386 = vperm.xlu1 %5173, %v5494_v43   ;;  %5175 = vset.pattern.permute.xlu0 %v5257_v34 }
  0xe1   : > { %1527 = vperm.xlu0 %5175, %v5431_v55  }
  0xe4   : > { %5174 = vset.pattern.permute.xlu1 %v5257_v34 }
  0xe5   : > { %1523 = vperm.xlu1 %5174, %v5422_v47   ;;  %1539 = vperm.xlu0 %5175, %v5441_v63  }
  0xe9   : > { %1531 = vperm.xlu1 %5174, %v5426_v50   ;;  %1547 = vperm.xlu0 %5175, %v5451_v7  }
  0xed   : > { %1535 = vperm.xlu1 %5174, %v5439_v62   ;;  %1555 = vperm.xlu0 %5175, %v5461_v15  }
  0xf1   : > { %1543 = vperm.xlu1 %5174, %v5448_v3   ;;  %1563 = vperm.xlu0 %5175, %v5471_v24  }
  0xf5   : > { %1551 = vperm.xlu1 %5174, %v5459_v14   ;;  %1571 = vperm.xlu0 %5175, %v5484_v33  }
  0xf9   : > { %1559 = vperm.xlu1 %5174, %v5468_v19   ;;  %1579 = vperm.xlu0 %5175, %v5494_v43  }
  0xfd   : > { %1567 = vperm.xlu1 %5174, %v5482_v32   ;;  %5176 = vset.pattern.permute.xlu0 %v5258_v35 }
  0xfe   : > { %1716 = vperm.xlu0 %5176, %v5422_v47  }
 0x101   : > { %1575 = vperm.xlu1 %5174, %v5491_v39  }
 0x102   : > { %1728 = vperm.xlu0 %5176, %v5439_v62  }
 0x105   : > { %1583 = vperm.xlu1 %5174, %v5502_v38  }
 0x106   : > { %1736 = vperm.xlu0 %5176, %v5448_v3  }
 0x109   : > { %5177 = vset.pattern.permute.xlu1 %v5258_v35 }
 0x10a   : > { %1720 = vperm.xlu1 %5177, %v5431_v55   ;;  %1744 = vperm.xlu0 %5176, %v5459_v14  }
 0x10e   : > { %1724 = vperm.xlu1 %5177, %v5426_v50   ;;  %1752 = vperm.xlu0 %5176, %v5468_v19  }
 0x112   : > { %1732 = vperm.xlu1 %5177, %v5441_v63   ;;  %1760 = vperm.xlu0 %5176, %v5482_v32  }
 0x116   : > { %1740 = vperm.xlu1 %5177, %v5451_v7   ;;  %1768 = vperm.xlu0 %5176, %v5491_v39  }
 0x11a   : > { %1748 = vperm.xlu1 %5177, %v5461_v15   ;;  %1776 = vperm.xlu0 %5176, %v5502_v38  }
 0x11e   : > { %1756 = vperm.xlu1 %5177, %v5471_v24   ;;  %5179 = vset.pattern.permute.xlu0 %v5259_v54  ;;  %v5611_v56 = vpop.permute.xlu0 %1041 }
 0x11f   : > { %1913 = vperm.xlu0 %5179, %v5431_v55  }
 0x122   : > { %v5614_v57 = vpop.permute.xlu1 %1046  ;;  %1764 = vperm.xlu1 %5177, %v5484_v33   ;;  %v5617_v58 = vpop.permute.xlu0 %1051 }
 0x123   : > { %1925 = vperm.xlu0 %5179, %v5441_v63  }
 0x126   : > { %v5620_v59 = vpop.permute.xlu1 %1056  ;;  %1772 = vperm.xlu1 %5177, %v5494_v43   ;;  %v5623_v60 = vpop.permute.xlu0 %1061 }
 0x127   : > { %1933 = vperm.xlu0 %5179, %v5451_v7  }
 0x12a   : > { %v5634_v2 = vpop.permute.xlu1 %1066  ;;  %5178 = vset.pattern.permute.xlu1 %v5259_v54  ;;  %v5636_v4 = vpop.permute.xlu0 %1071 }
 0x12b   : > { %1909 = vperm.xlu1 %5178, %v5422_v47   ;;  %1941 = vperm.xlu0 %5179, %v5461_v15  }
 0x12e   : > { %v5641_v5 = vpop.permute.xlu1 %1076  ;;  %v5643_v6 = vpop.permute.xlu0 %1081 }
 0x12f   : > { %1917 = vperm.xlu1 %5178, %v5426_v50   ;;  %1949 = vperm.xlu0 %5179, %v5471_v24  }
 0x132   : > { %v5647_v8 = vpop.permute.xlu1 %1086  ;;  %v5649_v9 = vpop.permute.xlu0 %1091 }
 0x133   : > { %1921 = vperm.xlu1 %5178, %v5439_v62   ;;  %1957 = vperm.xlu0 %5179, %v5484_v33  }
 0x136   : > { %v5662_v13 = vpop.permute.xlu1 %1096  ;;  %v5664_v16 = vpop.permute.xlu0 %1101 }
 0x137   : > { %1929 = vperm.xlu1 %5178, %v5448_v3   ;;  %1965 = vperm.xlu0 %5179, %v5494_v43  }
 0x13a   : > { %v5668_v17 = vpop.permute.xlu1 %1106  ;;  %v5670_v18 = vpop.permute.xlu0 %1111 }
 0x13b   : > { %1937 = vperm.xlu1 %5178, %v5459_v14   ;;  %5180 = vset.pattern.permute.xlu0 %v5260_v20 }
 0x13c   : > { %2102 = vperm.xlu0 %5180, %v5422_v47  }
 0x13e   : > { %v5674_v21 = vpop.permute.xlu1 %1116 }
 0x13f   : > { %1945 = vperm.xlu1 %5178, %v5468_v19   ;;  %v5677_v23 = vpop.permute.xlu0 %1330 }
 0x140   : > { %2114 = vperm.xlu0 %5180, %v5439_v62  }
 0x143   : > { %v5680_v25 = vpop.permute.xlu1 %1334  ;;  %1953 = vperm.xlu1 %5178, %v5482_v32   ;;  %v5683_v26 = vpop.permute.xlu0 %1342 }
 0x144   : > { %2122 = vperm.xlu0 %5180, %v5448_v3  }
 0x147   : > { %v5686_v27 = vpop.permute.xlu1 %1338  ;;  %1961 = vperm.xlu1 %5178, %v5491_v39   ;;  %v5689_v28 = vpop.permute.xlu0 %1350 }
 0x148   : > { %7551 = vst [vmem:[#allocation5_spill] sm:$0xff] %v5689_v28  ;;  %2130 = vperm.xlu0 %5180, %v5459_v14  }
 0x14b   : > { %v5692_v29 = vpop.permute.xlu1 %1346  ;;  %1969 = vperm.xlu1 %5178, %v5502_v38   ;;  %v5695_v30 = vpop.permute.xlu0 %1358 }
 0x14c   : > { %7552 = vst [vmem:[#allocation6_spill] sm:$0xff] %v5695_v30  ;;  %2138 = vperm.xlu0 %5180, %v5468_v19  }
 0x14f   : > { %v5698_v34 = vpop.permute.xlu1 %1354  ;;  %5181 = vset.pattern.permute.xlu1 %v5260_v20  ;;  %v5700_v35 = vpop.permute.xlu0 %1366 }
 0x150   : > { %7553 = vst [vmem:[#allocation7_spill] sm:$0xff] %v5700_v35  ;;  %2106 = vperm.xlu1 %5181, %v5431_v55   ;;  %2146 = vperm.xlu0 %5180, %v5482_v32  }
 0x153   : > { %v5704_v36 = vpop.permute.xlu1 %1362  ;;  %v5706_v40 = vpop.permute.xlu0 %1374 }
 0x154   : > { %7554 = vst [vmem:[#allocation8_spill] sm:$0xff] %v5704_v36  ;;  %7555 = vst [vmem:[#allocation9_spill] sm:$0xff] %v5706_v40  ;;  %2110 = vperm.xlu1 %5181, %v5426_v50   ;;  %2154 = vperm.xlu0 %5180, %v5491_v39  }
 0x157   : > { %v5710_v41 = vpop.permute.xlu1 %1370  ;;  %v5712_v42 = vpop.permute.xlu0 %1382 }
 0x158   : > { %7556 = vst [vmem:[#allocation10_spill] sm:$0xff] %v5710_v41  ;;  %7557 = vst [vmem:[#allocation11_spill] sm:$0xff] %v5712_v42  ;;  %2118 = vperm.xlu1 %5181, %v5441_v63   ;;  %2162 = vperm.xlu0 %5180, %v5502_v38  }
 0x15b   : > { %v5716_v37 = vpop.permute.xlu1 %1378  ;;  %v5718_v45 = vpop.permute.xlu0 %1390 }
 0x15c   : > { %7558 = vst [vmem:[#allocation12_spill] sm:$0xff] %v5716_v37  ;;  %7559 = vst [vmem:[#allocation13_spill] sm:$0xff] %v5718_v45  ;;  %2126 = vperm.xlu1 %5181, %v5451_v7   ;;  %5183 = vset.pattern.permute.xlu0 %v5261_v46 }
 0x15d   : > { %2299 = vperm.xlu0 %5183, %v5431_v55  }
 0x15f   : > { %v5722_v48 = vpop.permute.xlu1 %1386 }
 0x160   : > { %7560 = vst [vmem:[#allocation14_spill] sm:$0xff] %v5722_v48  ;;  %2134 = vperm.xlu1 %5181, %v5461_v15   ;;  %v5725_v49 = vpop.permute.xlu0 %1527 }
 0x161   : > { %2311 = vperm.xlu0 %5183, %v5441_v63  }
 0x164   : > { %2142 = vperm.xlu1 %5181, %v5471_v24   ;;  %v5729_v51 = vpop.permute.xlu1 %1523  ;;  %v5731_v52 = vpop.permute.xlu0 %1539 }
 0x165   : > { %7561 = vst [vmem:[#allocation15_spill] sm:$0xff] %v5731_v52  ;;  %2319 = vperm.xlu0 %5183, %v5451_v7  }
 0x168   : > { %2150 = vperm.xlu1 %5181, %v5484_v33   ;;  %v5735_v53 = vpop.permute.xlu1 %1531  ;;  %v5737_v54 = vpop.permute.xlu0 %1547 }
 0x169   : > { %2327 = vperm.xlu0 %5183, %v5461_v15  }
 0x16c   : > { %2158 = vperm.xlu1 %5181, %v5494_v43   ;;  %v5741_v61 = vpop.permute.xlu1 %1535  ;;  %v5743_v0 = vpop.permute.xlu0 %1555 }
 0x16d   : > { %7562 = vst [vmem:[#allocation16_spill] sm:$0xff] %v5743_v0  ;;  %2335 = vperm.xlu0 %5183, %v5471_v24  }
 0x170   : > { %5182 = vset.pattern.permute.xlu1 %v5261_v46  ;;  %v5746_v10 = vpop.permute.xlu1 %1543  ;;  %v5748_v11 = vpop.permute.xlu0 %1563  ;;  %v5262_v46 = vmov 7  }
 0x171   : > { %7563 = vst [vmem:[#allocation17_spill] sm:$0xff] %v5746_v10  ;;  %7564 = vst [vmem:[#allocation18_spill] sm:$0xff] %v5748_v11  ;;  %2295 = vperm.xlu1 %5182, %v5422_v47   ;;  %2343 = vperm.xlu0 %5183, %v5484_v33  }
 0x174   : > { %v5752_v20 = vpop.permute.xlu1 %1551  ;;  %v5754_v22 = vpop.permute.xlu0 %1571 }
 0x175   : > { %7565 = vst [vmem:[#allocation19_spill] sm:$0xff] %v5752_v20  ;;  %7566 = vst [vmem:[#allocation20_spill] sm:$0xff] %v5754_v22  ;;  %2303 = vperm.xlu1 %5182, %v5426_v50   ;;  %2351 = vperm.xlu0 %5183, %v5494_v43  }
 0x178   : > { %v5758_v44 = vpop.permute.xlu1 %1559  ;;  %v5760_v31 = vpop.permute.xlu0 %1579 }
 0x179   : > { %7567 = vst [vmem:[#allocation21_spill] sm:$0xff] %v5758_v44  ;;  %7568 = vst [vmem:[#allocation22_spill] sm:$0xff] %v5760_v31  ;;  %2307 = vperm.xlu1 %5182, %v5439_v62   ;;  %5184 = vset.pattern.permute.xlu0 %v5262_v46 }
 0x17a   : > { %2488 = vperm.xlu0 %5184, %v5422_v47  }
 0x17c   : > { %v5764_v42 = vpop.permute.xlu1 %1567 }
 0x17d   : > { %7569 = vst [vmem:[#allocation23_spill] sm:$0xff] %v5764_v42  ;;  %2315 = vperm.xlu1 %5182, %v5448_v3   ;;  %v5767_v45 = vpop.permute.xlu0 %1716 }
 0x17e   : > { %7570 = vst [vmem:[#allocation24_spill] sm:$0xff] %v5767_v45  ;;  %2500 = vperm.xlu0 %5184, %v5439_v62  }
 0x180   : > { %v5770_v22 = vpop.permute.xlu1 %1575 }
 0x181   : > { %7571 = vst [vmem:[#allocation25_spill] sm:$0xff] %v5770_v22  ;;  %2323 = vperm.xlu1 %5182, %v5459_v14   ;;  %v5773_v37 = vpop.permute.xlu0 %1728 }
 0x182   : > { %7572 = vst [vmem:[#allocation26_spill] sm:$0xff] %v5773_v37  ;;  %2508 = vperm.xlu0 %5184, %v5448_v3  }
 0x184   : > { %v5776_v31 = vpop.permute.xlu1 %1583 }
 0x185   : > { %7573 = vst [vmem:[#allocation27_spill] sm:$0xff] %v5776_v31  ;;  %2331 = vperm.xlu1 %5182, %v5468_v19   ;;  %v5779_v48 = vpop.permute.xlu0 %1736 }
 0x186   : > { %7574 = vst [vmem:[#allocation28_spill] sm:$0xff] %v5779_v48  ;;  %2516 = vperm.xlu0 %5184, %v5459_v14  }
 0x189   : > { %2339 = vperm.xlu1 %5182, %v5482_v32   ;;  %v5783_v45 = vpop.permute.xlu1 %1720  ;;  %v5785_v44 = vpop.permute.xlu0 %1744 }
 0x18a   : > { %7575 = vst [vmem:[#allocation29_spill] sm:$0xff] %v5783_v45  ;;  %7576 = vst [vmem:[#allocation30_spill] sm:$0xff] %v5785_v44  ;;  %2524 = vperm.xlu0 %5184, %v5468_v19  }
 0x18d   : > { %2347 = vperm.xlu1 %5182, %v5491_v39   ;;  %v5789_v37 = vpop.permute.xlu1 %1724  ;;  %v5791_v22 = vpop.permute.xlu0 %1752 }
 0x18e   : > { %7577 = vst [vmem:[#allocation31_spill] sm:$0xff] %v5789_v37  ;;  %7578 = vst [vmem:[#allocation32_spill] sm:$0xff] %v5791_v22  ;;  %2532 = vperm.xlu0 %5184, %v5482_v32  }
 0x191   : > { %2355 = vperm.xlu1 %5182, %v5502_v38   ;;  %v5795_v48 = vpop.permute.xlu1 %1732  ;;  %v5797_v31 = vpop.permute.xlu0 %1760 }
 0x192   : > { %7579 = vst [vmem:[#allocation33_spill] sm:$0xff] %v5795_v48  ;;  %7580 = vst [vmem:[#allocation34_spill] sm:$0xff] %v5797_v31  ;;  %2540 = vperm.xlu0 %5184, %v5491_v39   ;;  %v821_v31 = vld [vmem:[%s7520_s6 + $0x30] sm:$0xff] }
 0x194   : > { %v4748_v45 = vpop.f32.mrb[0].mxu0 }
 0x195   : > { %5185 = vset.pattern.permute.xlu1 %v5262_v46  ;;  %v5800_v44 = vpop.permute.xlu1 %1740  ;;  %v744_v35 = vpop.f32.mrb[1].mxu0  ;;  %v822_v46 = vld [vmem:[%s7520_s6 + $0x38] sm:$0xff] }
 0x196   : > { %7581 = vst [vmem:[#allocation35_spill] sm:$0xff] %v5800_v44  ;;  %v5802_v42 = vpop.permute.xlu0 %1768  ;;  %2492 = vperm.xlu1 %5185, %v5431_v55   ;;  %v4749_v22 = vpop.f32.mrb[2].mxu0  ;;  %2548 = vperm.xlu0 %5184, %v5502_v38  }
 0x197   : > { %7582 = vst [vmem:[#allocation36_spill] sm:$0xff] %v5802_v42  ;;  %v5806_v37 = vpack.c.bf16 %v4749_v22, %v4748_v45  ;;  %v747_v0 = vpop.f32.mrb[3].mxu0  ;;  %v825_v42 = vld [vmem:[%s7520_s6 + $0x50] sm:$0xff]  ;;  %v826_v22 = vld [vmem:[%s7520_s6 + $0x58] sm:$0xff] }
 0x198   : > { %v5811_v48 = vpack.c.bf16 %v747_v0, %v744_v35  ;;  %v7530_v35 = vmov 8   ;;  %v882_v0 = vpack.c.bf16 %v822_v46, %v821_v31  ;;  %v884_v40 = vpack.c.bf16 %v826_v22, %v825_v42  ;;  %v827_v31 = vld [vmem:[%s7520_s6 + $0x60] sm:$0xff]  ;;  %v828_v42 = vld [vmem:[%s7520_s6 + $0x68] sm:$0xff] }
 0x199   : > { %v5822_v45 = vpop.permute.xlu1 %1748 }
 0x19a   : > { %7583 = vst [vmem:[#allocation37_spill] sm:$0xff] %v5822_v45  ;;  %v5824_v44 = vpop.permute.xlu0 %1776  ;;  %2496 = vperm.xlu1 %5185, %v5426_v50   ;;  %4766 = vmatprep.mubr.msk.bf16.mxu1 %vm917_vm2, %v5811_v48 }
 0x19b   : > { %7584 = vst [vmem:[#allocation38_spill] sm:$0xff] %v5824_v44  ;;  %4786 = vmatprep.mubr.msk.bf16.mxu0 %vm917_vm2, %v5811_v48  ;;  %5187 = vset.pattern.permute.xlu0 %v7530_v35 }
 0x19c   : > { %4767 = vmatmul.mubr.msk.bf16.vlgmr.msra.gmra.mrb[0].mxu1 %vm917_vm2, %v5806_v37  ;;  %4787 = vmatmul.mubr.msk.bf16.vlgmr.msra.gmra.mrb[16].mxu0 %vm917_vm2, %v5806_v37  ;;  %v4752_v44 = vpop.f32.mrb[4].mxu0 }
 0x19d   : > { %2685 = vperm.xlu0 %5187, %v5431_v55   ;;  %v5837_v45 = vpop.permute.xlu1 %1756  ;;  %v760_v11 = vpop.f32.mrb[5].mxu0  ;;  %4803 = vmatpush3.bf16.msra.mxu1 %v5632_v1  ;;  %v831_v1 = vld [vmem:[%s7520_s6 + $0x80] sm:$0xff] }
 0x19e   : > { %7585 = vst [vmem:[#allocation39_spill] sm:$0xff] %v5837_v45  ;;  %2504 = vperm.xlu1 %5185, %v5441_v63   ;;  %v4753_v36 = vpop.f32.mrb[6].mxu0  ;;  %v5841_v35 = vpop.permute.xlu0 %1913  ;;  %4823 = vmatpush3.bf16.msra.mxu0 %v5659_v12  ;;  %v832_v12 = vld [vmem:[%s7520_s6 + $0x88] sm:$0xff] }
 0x19f   : > { %7586 = vst [vmem:[#allocation40_spill] sm:$0xff] %v5841_v35  ;;  %v5850_v46 = vpack.c.bf16 %v4753_v36, %v4752_v44  ;;  %v763_v22 = vpop.f32.mrb[7].mxu0  ;;  %4804 = vmatprep.subr.bf16.mxu1 %v882_v0  ;;  %4824 = vmatprep.subr.bf16.mxu0 %v884_v40  ;;  %v5863_v44 = vpack.c.bf16 %v828_v42, %v827_v31 }
 0x1a0   : > { %v5858_v45 = vpack.c.bf16 %v763_v22, %v760_v11  ;;  %v5870_v41 = vpack.c.bf16 %v832_v12, %v831_v1 }
 0x1a1   : > { %2697 = vperm.xlu0 %5187, %v5441_v63   ;;  %v5861_v35 = vpop.permute.xlu1 %1764  ;;  %4805 = vmatpush3.bf16.msra.mxu1 %v882_v0 }
 0x1a2   : > { %7587 = vst [vmem:[#allocation41_spill] sm:$0xff] %v5861_v35  ;;  %2512 = vperm.xlu1 %5185, %v5451_v7   ;;  %4770 = vmatprep.mubr.msk.bf16.mxu1 %vm917_vm2, %v5858_v45  ;;  %v5868_v36 = vpop.permute.xlu0 %1925 }
 0x1a3   : > { %7588 = vst [vmem:[#allocation42_spill] sm:$0xff] %v5868_v36  ;;  %4790 = vmatprep.mubr.msk.bf16.mxu0 %vm917_vm2, %v5858_v45  ;;  %4825 = vmatpush3.bf16.msra.mxu0 %v884_v40 }
 0x1a4   : > { %4771 = vmatmul.mubr.msk.bf16.gmra.mrb[4].mxu1 %vm917_vm2, %v5850_v46  ;;  %4791 = vmatmul.mubr.msk.bf16.gmra.mrb[20].mxu0 %vm917_vm2, %v5850_v46  ;;  %v4756_v11 = vpop.f32.mrb[8].mxu0 }
 0x1a5   : > { %2705 = vperm.xlu0 %5187, %v5451_v7   ;;  %v5879_v0 = vpop.permute.xlu1 %1772  ;;  %v776_v31 = vpop.f32.mrb[9].mxu0  ;;  %4842 = vmatprep.subr.bf16.mxu1 %v5863_v44 }
 0x1a6   : > { %7589 = vst [vmem:[#allocation43_spill] sm:$0xff] %v5879_v0  ;;  %2520 = vperm.xlu1 %5185, %v5461_v15   ;;  %v4757_v42 = vpop.f32.mrb[10].mxu0  ;;  %v5883_v22 = vpop.permute.xlu0 %1933  ;;  %4862 = vmatprep.subr.bf16.mxu0 %v5870_v41 }
 0x1a7   : > { %7590 = vst [vmem:[#allocation44_spill] sm:$0xff] %v5883_v22  ;;  %v5886_v40 = vpack.c.bf16 %v4757_v42, %v4756_v11  ;;  %v779_v1 = vpop.f32.mrb[11].mxu0 }
 0x1a8   : > { %v5888_v12 = vpack.c.bf16 %v779_v1, %v776_v31 }
 0x1a9   : > { %2713 = vperm.xlu0 %5187, %v5461_v15  }
 0x1aa   : > { %2528 = vperm.xlu1 %5185, %v5471_v24   ;;  %v5892_v35 = vpop.permute.xlu1 %1909  ;;  %4774 = vmatprep.mubr.msk.bf16.mxu1 %vm917_vm2, %v5888_v12  ;;  %v5896_v0 = vpop.permute.xlu0 %1941 }
 0x1ab   : > { %7591 = vst [vmem:[#allocation45_spill] sm:$0xff] %v5892_v35  ;;  %7592 = vst [vmem:[#allocation46_spill] sm:$0xff] %v5896_v0  ;;  %4794 = vmatprep.mubr.msk.bf16.mxu0 %vm917_vm2, %v5888_v12 }
 0x1ac   : > { %4775 = vmatmul.mubr.msk.bf16.gmra.mrb[8].mxu1 %vm917_vm2, %v5886_v40  ;;  %4795 = vmatmul.mubr.msk.bf16.gmra.mrb[24].mxu0 %vm917_vm2, %v5886_v40  ;;  %v4760_v11 = vpop.f32.mrb[12].mxu0 }
 0x1ad   : > { %2721 = vperm.xlu0 %5187, %v5471_v24   ;;  %v792_v31 = vpop.f32.mrb[13].mxu0 }
 0x1ae   : > { %2536 = vperm.xlu1 %5185, %v5484_v33   ;;  %v5906_v42 = vpop.permute.xlu1 %1917  ;;  %v4761_v1 = vpop.f32.mrb[14].mxu0 }
 0x1af   : > { %7593 = vst [vmem:[#allocation47_spill] sm:$0xff] %v5906_v42  ;;  %v5908_v36 = vpack.c.bf16 %v4761_v1, %v4760_v11  ;;  %v5910_v0 = vpop.permute.xlu0 %1949  ;;  %v795_v22 = vpop.f32.mrb[15].mxu0  ;;  %v829_v1 = vld [vmem:[%s7520_s6 + $0x70] sm:$0xff] }
 0x1b0   : > { %7594 = vst [vmem:[#allocation48_spill] sm:$0xff] %v5910_v0  ;;  %v5912_v35 = vpack.c.bf16 %v795_v22, %v792_v31  ;;  %v7597_v22 = vmov 8   ;;  %v830_v0 = vld [vmem:[%s7520_s6 + $0x78] sm:$0xff] }
 0x1b1   : > { %2729 = vperm.xlu0 %5187, %v5484_v33  }
 0x1b2   : > { %2544 = vperm.xlu1 %5185, %v5494_v43   ;;  %v5916_v10 = vpop.permute.xlu1 %1921  ;;  %4778 = vmatprep.mubr.msk.bf16.mxu1 %vm917_vm2, %v5912_v35 }
 0x1b3   : > { %7595 = vst [vmem:[#allocation49_spill] sm:$0xff] %v5916_v10  ;;  %4798 = vmatprep.mubr.msk.bf16.mxu0 %vm917_vm2, %v5912_v35  ;;  %v5922_v42 = vpop.permute.xlu0 %1957 }
 0x1b4   : > { %7596 = vst [vmem:[#allocation50_spill] sm:$0xff] %v5922_v42  ;;  %4779 = vmatmul.mubr.msk.bf16.gmra.mrb[12].mxu1 %vm917_vm2, %v5908_v36  ;;  %4799 = vmatmul.mubr.msk.bf16.gmra.mrb[28].mxu0 %vm917_vm2, %v5908_v36  ;;  %v7531_v42 = vmov 9  }
 0x1b5   : > { %2737 = vperm.xlu0 %5187, %v5494_v43   ;;  %4806 = vmatprep.mubr.msk.bf16.mxu1 %vm917_vm2, %v5811_v48 }
 0x1b6   : > { %4826 = vmatprep.mubr.msk.bf16.mxu0 %vm917_vm2, %v5811_v48  ;;  %5186 = vset.pattern.permute.xlu1 %v7597_v22  ;;  %v5934_v11 = vpop.permute.xlu1 %1929  ;;  %v833_v22 = vld [vmem:[%s7520_s6 + $0x90] sm:$0xff] }
 0x1b7   : > { %7598 = vst [vmem:[#allocation51_spill] sm:$0xff] %v5934_v11  ;;  %v5936_v31 = vpop.permute.xlu0 %1965  ;;  %2681 = vperm.xlu1 %5186, %v5422_v47  }
 0x1b8   : > { %7599 = vst [vmem:[#allocation52_spill] sm:$0xff] %v5936_v31  ;;  %v834_v31 = vld [vmem:[%s7520_s6 + $0x98] sm:$0xff] }
 0x1b9   : > { %5188 = vset.pattern.permute.xlu0 %v7531_v42  ;;  %v886_v42 = vpack.c.bf16 %v830_v0, %v829_v1  ;;  %v888_v28 = vpack.c.bf16 %v834_v31, %v833_v22  ;;  %v835_v0 = vld [vmem:[%s7520_s6 + $0xa0] sm:$0xff]  ;;  %v836_v31 = vld [vmem:[%s7520_s6 + $0xa8] sm:$0xff] }
 0x1ba   : > { %2874 = vperm.xlu0 %5188, %v5422_v47   ;;  %v5953_v11 = vpop.permute.xlu1 %1937  ;;  %v840_v1 = vld [vmem:[%s7520_s6 + $0xc8] sm:$0xff]  ;;  %v889_v22 = vpack.c.bf16 %v836_v31, %v835_v0 }
 0x1bb   : > { %7600 = vst [vmem:[#allocation53_spill] sm:$0xff] %v5953_v11  ;;  %2689 = vperm.xlu1 %5186, %v5426_v50   ;;  %v5956_v10 = vpop.permute.xlu0 %2102 }
 0x1bc   : > { %7601 = vst [vmem:[#allocation54_spill] sm:$0xff] %v5956_v10  ;;  %4807 = vmatmul.mubr.msk.bf16.vlgmr.msra.gmra.mrb[16].mxu1 %vm917_vm2, %v5806_v37  ;;  %4827 = vmatmul.mubr.msk.bf16.vlgmr.msra.gmra.mrb[32].mxu0 %vm917_vm2, %v5806_v37 }
 0x1bd   : > { %4810 = vmatprep.mubr.msk.bf16.mxu1 %vm917_vm2, %v5858_v45  ;;  %4830 = vmatprep.mubr.msk.bf16.mxu0 %vm917_vm2, %v5858_v45 }
 0x1be   : > { %2886 = vperm.xlu0 %5188, %v5439_v62   ;;  %v5967_v11 = vpop.permute.xlu1 %1945  ;;  %4843 = vmatpush3.bf16.msra.mxu1 %v5863_v44  ;;  %v839_v44 = vld [vmem:[%s7520_s6 + $0xc0] sm:$0xff] }
 0x1bf   : > { %7602 = vst [vmem:[#allocation55_spill] sm:$0xff] %v5967_v11  ;;  %2693 = vperm.xlu1 %5186, %v5439_v62   ;;  %v5971_v10 = vpop.permute.xlu0 %2114  ;;  %4863 = vmatpush3.bf16.msra.mxu0 %v5870_v41  ;;  %v891_v11 = vpack.c.bf16 %v840_v1, %v839_v44 }
 0x1c0   : > { %7603 = vst [vmem:[#allocation56_spill] sm:$0xff] %v5971_v10  ;;  %4844 = vmatprep.subr.bf16.mxu1 %v886_v42  ;;  %4864 = vmatprep.subr.bf16.mxu0 %v888_v28 }
 0x1c2   : > { %2894 = vperm.xlu0 %5188, %v5448_v3   ;;  %v5987_v41 = vpop.permute.xlu1 %1953  ;;  %4845 = vmatpush3.bf16.msra.mxu1 %v886_v42 }
 0x1c3   : > { %7604 = vst [vmem:[#allocation57_spill] sm:$0xff] %v5987_v41  ;;  %2701 = vperm.xlu1 %5186, %v5448_v3   ;;  %v5990_v10 = vpop.permute.xlu0 %2122  ;;  %4865 = vmatpush3.bf16.msra.mxu0 %v888_v28 }
 0x1c4   : > { %7605 = vst [vmem:[#allocation58_spill] sm:$0xff] %v5990_v10  ;;  %4811 = vmatmul.mubr.msk.bf16.gmra.mrb[20].mxu1 %vm917_vm2, %v5850_v46  ;;  %4831 = vmatmul.mubr.msk.bf16.gmra.mrb[36].mxu0 %vm917_vm2, %v5850_v46 }
 0x1c5   : > { %4814 = vmatprep.mubr.msk.bf16.mxu1 %vm917_vm2, %v5888_v12  ;;  %4834 = vmatprep.mubr.msk.bf16.mxu0 %vm917_vm2, %v5888_v12 }
 0x1c6   : > { %2902 = vperm.xlu0 %5188, %v5459_v14   ;;  %v6001_v42 = vpop.permute.xlu1 %1961  ;;  %4882 = vmatprep.subr.bf16.mxu1 %v889_v22 }
 0x1c7   : > { %7606 = vst [vmem:[#allocation59_spill] sm:$0xff] %v6001_v42  ;;  %2709 = vperm.xlu1 %5186, %v5459_v14   ;;  %v6004_v28 = vpop.permute.xlu0 %2130  ;;  %4902 = vmatprep.subr.bf16.mxu0 %v891_v11  ;;  %v842_v42 = vld [vmem:[%s7520_s6 + $0xd8] sm:$0xff] }
 0x1c8   : > { %7607 = vst [vmem:[#allocation60_spill] sm:$0xff] %v6004_v28 }
 0x1ca   : > { %2910 = vperm.xlu0 %5188, %v5468_v19   ;;  %v6007_v0 = vpop.permute.xlu1 %1969 }
 0x1cb   : > { %7608 = vst [vmem:[#allocation61_spill] sm:$0xff] %v6007_v0  ;;  %2717 = vperm.xlu1 %5186, %v5468_v19   ;;  %v6010_v31 = vpop.permute.xlu0 %2138  ;;  %v7532_v0 = vmov 10  }
 0x1cc   : > { %7609 = vst [vmem:[#allocation62_spill] sm:$0xff] %v6010_v31  ;;  %4815 = vmatmul.mubr.msk.bf16.gmra.mrb[24].mxu1 %vm917_vm2, %v5886_v40  ;;  %4835 = vmatmul.mubr.msk.bf16.gmra.mrb[40].mxu0 %vm917_vm2, %v5886_v40 }
 0x1cd   : > { %4818 = vmatprep.mubr.msk.bf16.mxu1 %vm917_vm2, %v5912_v35  ;;  %4838 = vmatprep.mubr.msk.bf16.mxu0 %vm917_vm2, %v5912_v35 }
 0x1ce   : > { %2918 = vperm.xlu0 %5188, %v5482_v32  }
 0x1cf   : > { %2725 = vperm.xlu1 %5186, %v5482_v32   ;;  %v6022_v44 = vpop.permute.xlu1 %2106  ;;  %v6024_v1 = vpop.permute.xlu0 %2146 }
 0x1d0   : > { %7610 = vst [vmem:[#allocation63_spill] sm:$0xff] %v6022_v44  ;;  %7611 = vst [vmem:[#allocation64_spill] sm:$0xff] %v6024_v1  ;;  %v838_v44 = vld [vmem:[%s7520_s6 + $0xb8] sm:$0xff] }
 0x1d2   : > { %2926 = vperm.xlu0 %5188, %v5491_v39  }
 0x1d3   : > { %2733 = vperm.xlu1 %5186, %v5491_v39   ;;  %v6028_v31 = vpop.permute.xlu1 %2110  ;;  %v6030_v10 = vpop.permute.xlu0 %2154 }
 0x1d4   : > { %7612 = vst [vmem:[#allocation65_spill] sm:$0xff] %v6028_v31  ;;  %7613 = vst [vmem:[#allocation66_spill] sm:$0xff] %v6030_v10  ;;  %4819 = vmatmul.mubr.msk.bf16.gmra.mrb[28].mxu1 %vm917_vm2, %v5908_v36  ;;  %4839 = vmatmul.mubr.msk.bf16.gmra.mrb[44].mxu0 %vm917_vm2, %v5908_v36  ;;  %v837_v10 = vld [vmem:[%s7520_s6 + $0xb0] sm:$0xff] }
 0x1d5   : > { %4846 = vmatprep.mubr.msk.bf16.mxu1 %vm917_vm2, %v5811_v48  ;;  %4866 = vmatprep.mubr.msk.bf16.mxu0 %vm917_vm2, %v5811_v48  ;;  %v841_v31 = vld [vmem:[%s7520_s6 + $0xd0] sm:$0xff]  ;;  %v890_v20 = vpack.c.bf16 %v838_v44, %v837_v10  ;;  %v844_v10 = vld [vmem:[%s7520_s6 + $0xe8] sm:$0xff] }
 0x1d6   : > { %2934 = vperm.xlu0 %5188, %v5502_v38   ;;  %v892_v52 = vpack.c.bf16 %v842_v42, %v841_v31 }
 0x1d7   : > { %2741 = vperm.xlu1 %5186, %v5502_v38   ;;  %v6042_v1 = vpop.permute.xlu1 %2118  ;;  %v6044_v28 = vpop.permute.xlu0 %2162 }
 0x1d8   : > { %7614 = vst [vmem:[#allocation67_spill] sm:$0xff] %v6042_v1  ;;  %7615 = vst [vmem:[#allocation68_spill] sm:$0xff] %v6044_v28  ;;  %v7616_v28 = vmov 9  }
 0x1da   : > { %5191 = vset.pattern.permute.xlu0 %v7532_v0  ;;  %v843_v0 = vld [vmem:[%s7520_s6 + $0xe0] sm:$0xff] }
 0x1db   : > { %3071 = vperm.xlu0 %5191, %v5431_v55   ;;  %5189 = vset.pattern.permute.xlu1 %v7616_v28  ;;  %v6061_v1 = vpop.permute.xlu1 %2126  ;;  %v893_v31 = vpack.c.bf16 %v844_v10, %v843_v0 }
 0x1dc   : > { %7617 = vst [vmem:[#allocation69_spill] sm:$0xff] %v6061_v1  ;;  %4847 = vmatmul.mubr.msk.bf16.vlgmr.msra.gmra.mrb[32].mxu1 %vm917_vm2, %v5806_v37  ;;  %4867 = vmatmul.mubr.msk.bf16.vlgmr.msra.gmra.mrb[48].mxu0 %vm917_vm2, %v5806_v37  ;;  %v6067_v41 = vpop.permute.xlu0 %2299  ;;  %v7634_v1 = vmov 10  }
 0x1dd   : > { %7618 = vst [vmem:[#allocation70_spill] sm:$0xff] %v6067_v41  ;;  %2878 = vperm.xlu1 %5189, %v5431_v55   ;;  %4850 = vmatprep.mubr.msk.bf16.mxu1 %vm917_vm2, %v5858_v45 }
 0x1de   : > { %4870 = vmatprep.mubr.msk.bf16.mxu0 %vm917_vm2, %v5858_v45  ;;  %4883 = vmatpush3.bf16.msra.mxu1 %v889_v22  ;;  %v847_v22 = vld [vmem:[%s7520_s6 + $0x100] sm:$0xff] }
 0x1df   : > { %3083 = vperm.xlu0 %5191, %v5441_v63   ;;  %v6075_v28 = vpop.permute.xlu1 %2134  ;;  %4903 = vmatpush3.bf16.msra.mxu0 %v891_v11  ;;  %v848_v11 = vld [vmem:[%s7520_s6 + $0x108] sm:$0xff] }
 0x1e0   : > { %7619 = vst [vmem:[#allocation71_spill] sm:$0xff] %v6075_v28  ;;  %v6083_v42 = vpop.permute.xlu0 %2311  ;;  %4884 = vmatprep.subr.bf16.mxu1 %v890_v20  ;;  %4904 = vmatprep.subr.bf16.mxu0 %v892_v52  ;;  %v895_v28 = vpack.c.bf16 %v848_v11, %v847_v22 }
 0x1e1   : > { %7620 = vst [vmem:[#allocation72_spill] sm:$0xff] %v6083_v42  ;;  %2882 = vperm.xlu1 %5189, %v5426_v50  }
 0x1e2   : > { %4885 = vmatpush3.bf16.msra.mxu1 %v890_v20 }
 0x1e3   : > { %3091 = vperm.xlu0 %5191, %v5451_v7   ;;  %v6093_v44 = vpop.permute.xlu1 %2142  ;;  %4905 = vmatpush3.bf16.msra.mxu0 %v892_v52 }
 0x1e4   : > { %7621 = vst [vmem:[#allocation73_spill] sm:$0xff] %v6093_v44  ;;  %4851 = vmatmul.mubr.msk.bf16.gmra.mrb[36].mxu1 %vm917_vm2, %v5850_v46  ;;  %4871 = vmatmul.mubr.msk.bf16.gmra.mrb[52].mxu0 %vm917_vm2, %v5850_v46  ;;  %v6099_v42 = vpop.permute.xlu0 %2319  ;;  %v846_v44 = vld [vmem:[%s7520_s6 + $0xf8] sm:$0xff] }
 0x1e5   : > { %7622 = vst [vmem:[#allocation74_spill] sm:$0xff] %v6099_v42  ;;  %2890 = vperm.xlu1 %5189, %v5441_v63   ;;  %4854 = vmatprep.mubr.msk.bf16.mxu1 %vm917_vm2, %v5888_v12  ;;  %v850_v42 = vld [vmem:[%s7520_s6 + $0x118] sm:$0xff] }
 0x1e6   : > { %4874 = vmatprep.mubr.msk.bf16.mxu0 %vm917_vm2, %v5888_v12  ;;  %4922 = vmatprep.subr.bf16.mxu1 %v893_v31 }
 0x1e7   : > { %3099 = vperm.xlu0 %5191, %v5461_v15   ;;  %v6107_v52 = vpop.permute.xlu1 %2150  ;;  %4942 = vmatprep.subr.bf16.mxu0 %v895_v28 }
 0x1e8   : > { %7623 = vst [vmem:[#allocation75_spill] sm:$0xff] %v6107_v52  ;;  %v6109_v20 = vpop.permute.xlu0 %2327 }
 0x1e9   : > { %7624 = vst [vmem:[#allocation76_spill] sm:$0xff] %v6109_v20  ;;  %2898 = vperm.xlu1 %5189, %v5451_v7  }
 0x1eb   : > { %3107 = vperm.xlu0 %5191, %v5471_v24   ;;  %v6113_v0 = vpop.permute.xlu1 %2158 }
 0x1ec   : > { %7625 = vst [vmem:[#allocation77_spill] sm:$0xff] %v6113_v0  ;;  %4855 = vmatmul.mubr.msk.bf16.gmra.mrb[40].mxu1 %vm917_vm2, %v5886_v40  ;;  %4875 = vmatmul.mubr.msk.bf16.gmra.mrb[56].mxu0 %vm917_vm2, %v5886_v40  ;;  %v6119_v10 = vpop.permute.xlu0 %2335 }
 0x1ed   : > { %7626 = vst [vmem:[#allocation78_spill] sm:$0xff] %v6119_v10  ;;  %2906 = vperm.xlu1 %5189, %v5461_v15   ;;  %4858 = vmatprep.mubr.msk.bf16.mxu1 %vm917_vm2, %v5912_v35 }
 0x1ee   : > { %4878 = vmatprep.mubr.msk.bf16.mxu0 %vm917_vm2, %v5912_v35 }
 0x1ef   : > { %3115 = vperm.xlu0 %5191, %v5484_v33  }
 0x1f0   : > { %v6127_v22 = vpop.permute.xlu1 %2295  ;;  %v6129_v11 = vpop.permute.xlu0 %2343 }
 0x1f1   : > { %7627 = vst [vmem:[#allocation79_spill] sm:$0xff] %v6127_v22  ;;  %7628 = vst [vmem:[#allocation80_spill] sm:$0xff] %v6129_v11  ;;  %2914 = vperm.xlu1 %5189, %v5471_v24   ;;  %v7534_v11 = vmov 14  }
 0x1f3   : > { %3123 = vperm.xlu0 %5191, %v5494_v43  }
 0x1f4   : > { %4859 = vmatmul.mubr.msk.bf16.gmra.mrb[44].mxu1 %vm917_vm2, %v5908_v36  ;;  %4879 = vmatmul.mubr.msk.bf16.gmra.mrb[60].mxu0 %vm917_vm2, %v5908_v36  ;;  %v6137_v52 = vpop.permute.xlu1 %2303  ;;  %v6139_v0 = vpop.permute.xlu0 %2351 }
 0x1f5   : > { %7629 = vst [vmem:[#allocation81_spill] sm:$0xff] %v6137_v52  ;;  %7630 = vst [vmem:[#allocation82_spill] sm:$0xff] %v6139_v0  ;;  %2922 = vperm.xlu1 %5189, %v5484_v33   ;;  %4886 = vmatprep.mubr.msk.bf16.mxu1 %vm917_vm2, %v5811_v48  ;;  %v845_v0 = vld [vmem:[%s7520_s6 + $0xf0] sm:$0xff] }
 0x1f6   : > { %4906 = vmatprep.mubr.msk.bf16.mxu0 %vm917_vm2, %v5811_v48 }
 0x1f7   : > { %5203 = vset.pattern.permute.xlu0 %v7534_v11  ;;  %v849_v11 = vld [vmem:[%s7520_s6 + $0x110] sm:$0xff] }
 0x1f8   : > { %3851 = vperm.xlu0 %5203, %v5439_v62   ;;  %v6148_v20 = vpop.permute.xlu1 %2307  ;;  %v896_v22 = vpack.c.bf16 %v850_v42, %v849_v11  ;;  %v852_v42 = vld [vmem:[%s7520_s6 + $0x128] sm:$0xff] }
 0x1f9   : > { %7631 = vst [vmem:[#allocation83_spill] sm:$0xff] %v6148_v20  ;;  %2930 = vperm.xlu1 %5189, %v5494_v43   ;;  %v6151_v10 = vpop.permute.xlu0 %2488  ;;  %v894_v20 = vpack.c.bf16 %v846_v44, %v845_v0  ;;  %v7536_v0 = vmov 11  }
 0x1fa   : > { %7632 = vst [vmem:[#allocation84_spill] sm:$0xff] %v6151_v10 }
 0x1fc   : > { %3855 = vperm.xlu0 %5203, %v5441_v63   ;;  %4887 = vmatmul.mubr.msk.bf16.vlgmr.msra.gmra.mrb[48].mxu1 %vm917_vm2, %v5806_v37  ;;  %v6168_v10 = vpop.permute.xlu1 %2315 }
 0x1fd   : > { %7633 = vst [vmem:[#allocation85_spill] sm:$0xff] %v6168_v10  ;;  %4907 = vmatmul.mubr.msk.bf16.vlgmr.msra.gmra.mrb[64].mxu0 %vm917_vm2, %v5806_v37  ;;  %5190 = vset.pattern.permute.xlu1 %v7634_v1  ;;  %v6173_v41 = vpop.permute.xlu0 %2500 }
 0x1fe   : > { %7635 = vst [vmem:[#allocation86_spill] sm:$0xff] %v6173_v41  ;;  %4890 = vmatprep.mubr.msk.bf16.mxu1 %vm917_vm2, %v5858_v45  ;;  %4910 = vmatprep.mubr.msk.bf16.mxu0 %vm917_vm2, %v5858_v45  ;;  %v851_v41 = vld [vmem:[%s7520_s6 + $0x120] sm:$0xff] }
 0x1ff   : > { %3067 = vperm.xlu1 %5190, %v5422_v47   ;;  %4923 = vmatpush3.bf16.msra.mxu1 %v893_v31  ;;  %v855_v31 = vld [vmem:[%s7520_s6 + $0x140] sm:$0xff] }
 0x200   : > { %3875 = vperm.xlu0 %5203, %v5468_v19   ;;  %v6181_v10 = vpop.permute.xlu1 %2323  ;;  %4943 = vmatpush3.bf16.msra.mxu0 %v895_v28  ;;  %v856_v28 = vld [vmem:[%s7520_s6 + $0x148] sm:$0xff] }
 0x201   : > { %7636 = vst [vmem:[#allocation87_spill] sm:$0xff] %v6181_v10  ;;  %v6186_v44 = vpop.permute.xlu0 %2508  ;;  %4924 = vmatprep.subr.bf16.mxu1 %v894_v20  ;;  %4944 = vmatprep.subr.bf16.mxu0 %v896_v22  ;;  %v899_v10 = vpack.c.bf16 %v856_v28, %v855_v31 }
 0x202   : > { %7637 = vst [vmem:[#allocation88_spill] sm:$0xff] %v6186_v44  ;;  %v897_v44 = vpack.c.bf16 %v852_v42, %v851_v41 }
 0x203   : > { %3075 = vperm.xlu1 %5190, %v5426_v50   ;;  %4925 = vmatpush3.bf16.msra.mxu1 %v894_v20 }
 0x204   : > { %5219 = vset.pattern.permute.xlu0 %v7536_v0  ;;  %4891 = vmatmul.mubr.msk.bf16.gmra.mrb[52].mxu1 %vm917_vm2, %v5850_v46  ;;  %v6201_v11 = vpop.permute.xlu1 %2331 }
 0x205   : > { %7638 = vst [vmem:[#allocation89_spill] sm:$0xff] %v6201_v11  ;;  %4911 = vmatmul.mubr.msk.bf16.gmra.mrb[68].mxu0 %vm917_vm2, %v5850_v46  ;;  %3264 = vperm.xlu0 %5219, %v5431_v55   ;;  %v6206_v1 = vpop.permute.xlu0 %2516 }
 0x206   : > { %7639 = vst [vmem:[#allocation90_spill] sm:$0xff] %v6206_v1  ;;  %4894 = vmatprep.mubr.msk.bf16.mxu1 %vm917_vm2, %v5888_v12  ;;  %4914 = vmatprep.mubr.msk.bf16.mxu0 %vm917_vm2, %v5888_v12  ;;  %v854_v1 = vld [vmem:[%s7520_s6 + $0x138] sm:$0xff] }
 0x207   : > { %3079 = vperm.xlu1 %5190, %v5439_v62   ;;  %4945 = vmatpush3.bf16.msra.mxu0 %v896_v22 }
 0x208   : > { %v6213_v20 = vpop.permute.xlu1 %2339  ;;  %4962 = vmatprep.subr.bf16.mxu1 %v897_v44  ;;  %4982 = vmatprep.subr.bf16.mxu0 %v899_v10 }
 0x209   : > { %7640 = vst [vmem:[#allocation91_spill] sm:$0xff] %v6213_v20  ;;  %3268 = vperm.xlu0 %5219, %v5426_v50   ;;  %v6216_v41 = vpop.permute.xlu0 %2524 }
 0x20a   : > { %7641 = vst [vmem:[#allocation92_spill] sm:$0xff] %v6216_v41 }
 0x20b   : > { %3087 = vperm.xlu1 %5190, %v5448_v3  }
 0x20c   : > { %4895 = vmatmul.mubr.msk.bf16.gmra.mrb[56].mxu1 %vm917_vm2, %v5886_v40  ;;  %v6221_v42 = vpop.permute.xlu1 %2347 }
 0x20d   : > { %7642 = vst [vmem:[#allocation93_spill] sm:$0xff] %v6221_v42  ;;  %4915 = vmatmul.mubr.msk.bf16.gmra.mrb[72].mxu0 %vm917_vm2, %v5886_v40  ;;  %3276 = vperm.xlu0 %5219, %v5441_v63   ;;  %v6226_v22 = vpop.permute.xlu0 %2532 }
 0x20e   : > { %7643 = vst [vmem:[#allocation94_spill] sm:$0xff] %v6226_v22  ;;  %4898 = vmatprep.mubr.msk.bf16.mxu1 %vm917_vm2, %v5912_v35  ;;  %4918 = vmatprep.mubr.msk.bf16.mxu0 %vm917_vm2, %v5912_v35  ;;  %v853_v22 = vld [vmem:[%s7520_s6 + $0x130] sm:$0xff] }
 0x20f   : > { %3095 = vperm.xlu1 %5190, %v5459_v14   ;;  %v898_v11 = vpack.c.bf16 %v854_v1, %v853_v22  ;;  %v859_v1 = vld [vmem:[%s7520_s6 + $0x160] sm:$0xff] }
 0x210   : > { %v6233_v31 = vpop.permute.xlu1 %2355 }
 0x211   : > { %7644 = vst [vmem:[#allocation95_spill] sm:$0xff] %v6233_v31  ;;  %3296 = vperm.xlu0 %5219, %v5468_v19   ;;  %v6236_v28 = vpop.permute.xlu0 %2540 }
 0x212   : > { %7645 = vst [vmem:[#allocation96_spill] sm:$0xff] %v6236_v28 }
 0x213   : > { %3103 = vperm.xlu1 %5190, %v5468_v19  }
 0x214   : > { %4899 = vmatmul.mubr.msk.bf16.gmra.mrb[60].mxu1 %vm917_vm2, %v5908_v36 }
 0x215   : > { %4919 = vmatmul.mubr.msk.bf16.gmra.mrb[76].mxu0 %vm917_vm2, %v5908_v36  ;;  %3300 = vperm.xlu0 %5219, %v5471_v24   ;;  %v6244_v0 = vpop.permute.xlu1 %2492  ;;  %v6250_v41 = vpop.permute.xlu0 %2548 }
 0x216   : > { %7646 = vst [vmem:[#allocation97_spill] sm:$0xff] %v6244_v0  ;;  %4926 = vmatprep.mubr.msk.bf16.mxu1 %vm917_vm2, %v5811_v48  ;;  %4946 = vmatprep.mubr.msk.bf16.mxu0 %vm917_vm2, %v5811_v48  ;;  %7647 = vst [vmem:[#allocation98_spill] sm:$0xff] %v6250_v41  ;;  %v857_v41 = vld [vmem:[%s7520_s6 + $0x150] sm:$0xff]  ;;  %v858_v0 = vld [vmem:[%s7520_s6 + $0x158] sm:$0xff] }
 0x217   : > { %3111 = vperm.xlu1 %5190, %v5482_v32   ;;  %v900_v20 = vpack.c.bf16 %v858_v0, %v857_v41  ;;  %v860_v0 = vld [vmem:[%s7520_s6 + $0x168] sm:$0xff]  ;;  %v863_v41 = vld [vmem:[%s7520_s6 + $0x180] sm:$0xff] }
 0x219   : > { %3316 = vperm.xlu0 %5219, %v5494_v43   ;;  %v6254_v28 = vpop.permute.xlu1 %2496 }
 0x21a   : > { %7648 = vst [vmem:[#allocation99_spill] sm:$0xff] %v6254_v28  ;;  %v7538_v28 = vmov 13  }
 0x21b   : > { %3119 = vperm.xlu1 %5190, %v5491_v39  }
 0x21c   : > { %v6269_v42 = vpop.permute.xlu0 %2685  ;;  %4927 = vmatmul.mubr.msk.bf16.vlgmr.msra.gmra.mrb[64].mxu1 %vm917_vm2, %v5806_v37 }
 0x21d   : > { %7649 = vst [vmem:[#allocation100_spill] sm:$0xff] %v6269_v42  ;;  %4947 = vmatmul.mubr.msk.bf16.vlgmr.msra.gmra.mrb[80].mxu0 %vm917_vm2, %v5806_v37  ;;  %5226 = vset.pattern.permute.xlu0 %v7538_v28  ;;  %v6276_v31 = vpop.permute.xlu1 %2504  ;;  %v7651_v42 = vmov 11  }
 0x21e   : > { %7650 = vst [vmem:[#allocation101_spill] sm:$0xff] %v6276_v31  ;;  %4930 = vmatprep.mubr.msk.bf16.mxu1 %vm917_vm2, %v5858_v45  ;;  %4950 = vmatprep.mubr.msk.bf16.mxu0 %vm917_vm2, %v5858_v45 }
 0x21f   : > { %3646 = vperm.xlu0 %5226, %v5422_v47   ;;  %5192 = vset.pattern.permute.xlu1 %v7651_v42 }
 0x220   : > { %3260 = vperm.xlu1 %5192, %v5422_v47   ;;  %v6285_v52 = vpop.permute.xlu0 %2697  ;;  %4963 = vmatpush3.bf16.msra.mxu1 %v897_v44  ;;  %v864_v44 = vld [vmem:[%s7520_s6 + $0x188] sm:$0xff] }
 0x221   : > { %7652 = vst [vmem:[#allocation102_spill] sm:$0xff] %v6285_v52  ;;  %v6287_v28 = vpop.permute.xlu1 %2512  ;;  %4983 = vmatpush3.bf16.msra.mxu0 %v899_v10  ;;  %4964 = vmatprep.subr.bf16.mxu1 %v898_v11  ;;  %v7540_v10 = vmov 12   ;;  %v901_v52 = vpack.c.bf16 %v860_v0, %v859_v1 }
 0x222   : > { %7653 = vst [vmem:[#allocation103_spill] sm:$0xff] %v6287_v28  ;;  %4984 = vmatprep.subr.bf16.mxu0 %v900_v20  ;;  %v903_v28 = vpack.c.bf16 %v864_v44, %v863_v41  ;;  %v7662_v44 = vmov 13  }
 0x223   : > { %3658 = vperm.xlu0 %5226, %v5439_v62  }
 0x224   : > { %5193 = vset.pattern.permute.xlu1 %v7540_v10  ;;  %v6303_v22 = vpop.permute.xlu0 %2705  ;;  %4931 = vmatmul.mubr.msk.bf16.gmra.mrb[68].mxu1 %vm917_vm2, %v5850_v46 }
 0x225   : > { %7654 = vst [vmem:[#allocation104_spill] sm:$0xff] %v6303_v22  ;;  %3453 = vperm.xlu1 %5193, %v5422_v47   ;;  %4951 = vmatmul.mubr.msk.bf16.gmra.mrb[84].mxu0 %vm917_vm2, %v5850_v46  ;;  %v6310_v31 = vpop.permute.xlu1 %2520  ;;  %v7667_v22 = vmov 14  }
 0x226   : > { %7655 = vst [vmem:[#allocation105_spill] sm:$0xff] %v6310_v31  ;;  %4934 = vmatprep.mubr.msk.bf16.mxu1 %vm917_vm2, %v5888_v12  ;;  %4954 = vmatprep.mubr.msk.bf16.mxu0 %vm917_vm2, %v5888_v12  ;;  %v861_v31 = vld [vmem:[%s7520_s6 + $0x170] sm:$0xff] }
 0x227   : > { %3662 = vperm.xlu0 %5226, %v5441_v63   ;;  %4965 = vmatpush3.bf16.msra.mxu1 %v898_v11 }
 0x228   : > { %v6317_v10 = vpop.permute.xlu0 %2713  ;;  %4985 = vmatpush3.bf16.msra.mxu0 %v900_v20  ;;  %5002 = vmatprep.subr.bf16.mxu1 %v901_v52 }
 0x229   : > { %7656 = vst [vmem:[#allocation106_spill] sm:$0xff] %v6317_v10  ;;  %3457 = vperm.xlu1 %5193, %v5431_v55   ;;  %v6320_v1 = vpop.permute.xlu1 %2528  ;;  %5022 = vmatprep.subr.bf16.mxu0 %v903_v28 }
 0x22a   : > { %7657 = vst [vmem:[#allocation107_spill] sm:$0xff] %v6320_v1  ;;  %v865_v1 = vld [vmem:[%s7520_s6 + $0x190] sm:$0xff] }
 0x22b   : > { %3682 = vperm.xlu0 %5226, %v5468_v19  }
 0x22c   : > { %v6323_v0 = vpop.permute.xlu0 %2721  ;;  %4935 = vmatmul.mubr.msk.bf16.gmra.mrb[72].mxu1 %vm917_vm2, %v5886_v40 }
 0x22d   : > { %7658 = vst [vmem:[#allocation108_spill] sm:$0xff] %v6323_v0  ;;  %5194 = vset.pattern.permute.xlu1 %v7651_v42  ;;  %4955 = vmatmul.mubr.msk.bf16.gmra.mrb[88].mxu0 %vm917_vm2, %v5886_v40  ;;  %v6330_v11 = vpop.permute.xlu1 %2536  ;;  %v862_v0 = vld [vmem:[%s7520_s6 + $0x178] sm:$0xff] }
 0x22e   : > { %7659 = vst [vmem:[#allocation109_spill] sm:$0xff] %v6330_v11  ;;  %3272 = vperm.xlu1 %5194, %v5439_v62   ;;  %4938 = vmatprep.mubr.msk.bf16.mxu1 %vm917_vm2, %v5912_v35 }
 0x22f   : > { %4958 = vmatprep.mubr.msk.bf16.mxu0 %vm917_vm2, %v5912_v35  ;;  %3686 = vperm.xlu0 %5226, %v5471_v24  }
 0x230   : > { %v6340_v41 = vpop.permute.xlu0 %2729 }
 0x231   : > { %v6338_v20 = vpop.permute.xlu1 %2544  ;;  %7661 = vst [vmem:[#allocation111_spill] sm:$0xff] %v6340_v41  ;;  %v7664_v41 = vmov 12  }
 0x232   : > { %7660 = vst [vmem:[#allocation110_spill] sm:$0xff] %v6338_v20  ;;  %5195 = vset.pattern.permute.xlu1 %v7662_v44 }
 0x233   : > { %3698 = vperm.xlu0 %5226, %v5491_v39   ;;  %3650 = vperm.xlu1 %5195, %v5431_v55  }
 0x234   : > { %4939 = vmatmul.mubr.msk.bf16.gmra.mrb[76].mxu1 %vm917_vm2, %v5908_v36  ;;  %v6357_v20 = vpop.permute.xlu0 %2737 }
 0x235   : > { %4959 = vmatmul.mubr.msk.bf16.gmra.mrb[92].mxu0 %vm917_vm2, %v5908_v36  ;;  %4966 = vmatprep.mubr.msk.bf16.mxu1 %vm917_vm2, %v5811_v48  ;;  %7665 = vst [vmem:[#allocation113_spill] sm:$0xff] %v6357_v20  ;;  %v866_v20 = vld [vmem:[%s7520_s6 + $0x198] sm:$0xff] }
 0x236   : > { %4986 = vmatprep.mubr.msk.bf16.mxu0 %vm917_vm2, %v5811_v48  ;;  %v6353_v11 = vpop.permute.xlu1 %2681  ;;  %v904_v30 = vpack.c.bf16 %v866_v20, %v865_v1 }
 0x237   : > { %7663 = vst [vmem:[#allocation112_spill] sm:$0xff] %v6353_v11  ;;  %5229 = vset.pattern.permute.xlu0 %v7664_v41  ;;  %5196 = vset.pattern.permute.xlu1 %v7664_v41  ;;  %v902_v11 = vpack.c.bf16 %v862_v0, %v861_v31  ;;  %v867_v31 = vld [vmem:[%s7520_s6 + $0x1a0] sm:$0xff]  ;;  %v868_v0 = vld [vmem:[%s7520_s6 + $0x1a8] sm:$0xff] }
 0x238   : > { %3465 = vperm.xlu0 %5229, %v5439_v62   ;;  %3461 = vperm.xlu1 %5196, %v5426_v50   ;;  %v905_v20 = vpack.c.bf16 %v868_v0, %v867_v31  ;;  %v7544_v0 = vmov 15  }
 0x23a   : > { %v6361_v10 = vpop.permute.xlu1 %2689 }
 0x23b   : > { %7666 = vst [vmem:[#allocation114_spill] sm:$0xff] %v6361_v10  ;;  %v6380_v10 = vpop.permute.xlu0 %2874 }
 0x23c   : > { %3469 = vperm.xlu0 %5229, %v5441_v63   ;;  %5197 = vset.pattern.permute.xlu1 %v7667_v22  ;;  %7668 = vst [vmem:[#allocation115_spill] sm:$0xff] %v6380_v10 }
 0x23d   : > { %3839 = vperm.xlu1 %5197, %v5422_v47   ;;  %4967 = vmatmul.mubr.msk.bf16.vlgmr.msra.gmra.mrb[80].mxu1 %vm917_vm2, %v5806_v37 }
 0x23e   : > { %4987 = vmatmul.mubr.msk.bf16.vlgmr.msra.gmra.mrb[96].mxu0 %vm917_vm2, %v5806_v37  ;;  %4970 = vmatprep.mubr.msk.bf16.mxu1 %vm917_vm2, %v5858_v45  ;;  %v6386_v32 = vpop.permute.xlu1 %2693 }
 0x23f   : > { %7669 = vst [vmem:[#allocation116_spill] sm:$0xff] %v6386_v32  ;;  %4990 = vmatprep.mubr.msk.bf16.mxu0 %vm917_vm2, %v5858_v45  ;;  %5003 = vmatpush3.bf16.msra.mxu1 %v901_v52  ;;  %v871_v52 = vld [vmem:[%s7520_s6 + $0x1c0] sm:$0xff]  ;;  %v6406_v1 = vpop.permute.xlu0 %2886 }
 0x240   : > { %3489 = vperm.xlu0 %5229, %v5468_v19   ;;  %5023 = vmatpush3.bf16.msra.mxu0 %v903_v28  ;;  %v872_v28 = vld [vmem:[%s7520_s6 + $0x1c8] sm:$0xff]  ;;  %7671 = vst [vmem:[#allocation118_spill] sm:$0xff] %v6406_v1 }
 0x241   : > { %3843 = vperm.xlu1 %5197, %v5431_v55   ;;  %5004 = vmatprep.subr.bf16.mxu1 %v902_v11 }
 0x242   : > { %v6398_v10 = vpop.permute.xlu1 %2701  ;;  %5024 = vmatprep.subr.bf16.mxu0 %v904_v30 }
 0x243   : > { %7670 = vst [vmem:[#allocation117_spill] sm:$0xff] %v6398_v10  ;;  %5005 = vmatpush3.bf16.msra.mxu1 %v902_v11  ;;  %v907_v10 = vpack.c.bf16 %v872_v28, %v871_v52 }
 0x244   : > { %3493 = vperm.xlu0 %5229, %v5471_v24   ;;  %5025 = vmatpush3.bf16.msra.mxu0 %v904_v30  ;;  %v6422_v30 = vpop.permute.xlu0 %2894 }
 0x245   : > { %5198 = vset.pattern.permute.xlu1 %v7651_v42  ;;  %4971 = vmatmul.mubr.msk.bf16.gmra.mrb[84].mxu1 %vm917_vm2, %v5850_v46  ;;  %7673 = vst [vmem:[#allocation120_spill] sm:$0xff] %v6422_v30 }
 0x246   : > { %4991 = vmatmul.mubr.msk.bf16.gmra.mrb[100].mxu0 %vm917_vm2, %v5850_v46  ;;  %3280 = vperm.xlu1 %5198, %v5448_v3   ;;  %v6415_v32 = vpop.permute.xlu1 %2709 }
 0x247   : > { %7672 = vst [vmem:[#allocation119_spill] sm:$0xff] %v6415_v32  ;;  %4974 = vmatprep.mubr.msk.bf16.mxu1 %vm917_vm2, %v5888_v12  ;;  %4994 = vmatprep.mubr.msk.bf16.mxu0 %vm917_vm2, %v5888_v12 }
 0x248   : > { %3505 = vperm.xlu0 %5229, %v5491_v39   ;;  %5042 = vmatprep.subr.bf16.mxu1 %v905_v20  ;;  %v6440_v52 = vpop.permute.xlu0 %2902 }
 0x249   : > { %5062 = vmatprep.subr.bf16.mxu0 %v907_v10  ;;  %7676 = vst [vmem:[#allocation123_spill] sm:$0xff] %v6440_v52  ;;  %v875_v52 = vld [vmem:[%s7520_s6 + $0x1e0] sm:$0xff] }
 0x24a   : > { %5199 = vset.pattern.permute.xlu1 %v7662_v44  ;;  %v6425_v11 = vpop.permute.xlu1 %2717 }
 0x24b   : > { %7674 = vst [vmem:[#allocation121_spill] sm:$0xff] %v6425_v11  ;;  %3654 = vperm.xlu1 %5199, %v5426_v50  }
 0x24c   : > { %3509 = vperm.xlu0 %5229, %v5494_v43   ;;  %v6451_v30 = vpop.permute.xlu0 %2910 }
 0x24d   : > { %4975 = vmatmul.mubr.msk.bf16.gmra.mrb[88].mxu1 %vm917_vm2, %v5886_v40  ;;  %7678 = vst [vmem:[#allocation125_spill] sm:$0xff] %v6451_v30  ;;  %v873_v30 = vld [vmem:[%s7520_s6 + $0x1d0] sm:$0xff] }
 0x24e   : > { %4995 = vmatmul.mubr.msk.bf16.gmra.mrb[104].mxu0 %vm917_vm2, %v5886_v40  ;;  %4978 = vmatprep.mubr.msk.bf16.mxu1 %vm917_vm2, %v5912_v35  ;;  %v6435_v31 = vpop.permute.xlu1 %2725 }
 0x24f   : > { %7675 = vst [vmem:[#allocation122_spill] sm:$0xff] %v6435_v31  ;;  %4998 = vmatprep.mubr.msk.bf16.mxu0 %vm917_vm2, %v5912_v35  ;;  %5200 = vset.pattern.permute.xlu1 %v7544_v0 }
 0x250   : > { %5231 = vset.pattern.permute.xlu0 %v7544_v0  ;;  %4032 = vperm.xlu1 %5200, %v5422_v47  }
 0x251   : > { %4044 = vperm.xlu0 %5231, %v5439_v62   ;;  %v870_v62 = vld [vmem:[%s7520_s6 + $0x1b8] sm:$0xff] }
 0x252   : > { %v6445_v28 = vpop.permute.xlu1 %2733 }
 0x253   : > { %7677 = vst [vmem:[#allocation124_spill] sm:$0xff] %v6445_v28 }
 0x254   : > { %4036 = vperm.xlu1 %5200, %v5431_v55   ;;  %v869_v55 = vld [vmem:[%s7520_s6 + $0x1b0] sm:$0xff] }
 0x255   : > { %4048 = vperm.xlu0 %5231, %v5441_v63   ;;  %4979 = vmatmul.mubr.msk.bf16.gmra.mrb[92].mxu1 %vm917_vm2, %v5908_v36  ;;  %v6470_v63 = vpop.permute.xlu0 %2918 }
 0x256   : > { %4999 = vmatmul.mubr.msk.bf16.gmra.mrb[108].mxu0 %vm917_vm2, %v5908_v36  ;;  %5006 = vmatprep.mubr.msk.bf16.mxu1 %vm917_vm2, %v5811_v48  ;;  %v6457_v47 = vpop.permute.xlu1 %2741  ;;  %7680 = vst [vmem:[#allocation127_spill] sm:$0xff] %v6470_v63  ;;  %v906_v63 = vpack.c.bf16 %v870_v62, %v869_v55 }
 0x257   : > { %7679 = vst [vmem:[#allocation126_spill] sm:$0xff] %v6457_v47  ;;  %5026 = vmatprep.mubr.msk.bf16.mxu0 %vm917_vm2, %v5811_v48 }
 0x258   : > { %5201 = vset.pattern.permute.xlu1 %v7664_v41 }
 0x259   : > { %4068 = vperm.xlu0 %5231, %v5468_v19   ;;  %3473 = vperm.xlu1 %5201, %v5448_v3   ;;  %v874_v19 = vld [vmem:[%s7520_s6 + $0x1d8] sm:$0xff]  ;;  %v6502_v62 = vpop.permute.xlu0 %2926 }
 0x25a   : > { %v908_v1 = vpack.c.bf16 %v874_v19, %v873_v30  ;;  %7683 = vst [vmem:[#allocation130_spill] sm:$0xff] %v6502_v62 }
 0x25c   : > { %v6472_v0 = vpop.permute.xlu1 %2878 }
 0x25d   : > { %7681 = vst [vmem:[#allocation128_spill] sm:$0xff] %v6472_v0  ;;  %4080 = vperm.xlu0 %5231, %v5484_v33   ;;  %5202 = vset.pattern.permute.xlu1 %v7667_v22  ;;  %v876_v0 = vld [vmem:[%s7520_s6 + $0x1e8] sm:$0xff] }
 0x25e   : > { %5007 = vmatmul.mubr.msk.bf16.vlgmr.msra.gmra.mrb[96].mxu1 %vm917_vm2, %v5806_v37  ;;  %5027 = vmatmul.mubr.msk.bf16.vlgmr.msra.gmra.mrb[112].mxu0 %vm917_vm2, %v5806_v37  ;;  %v6500_v55 = vpack.c.bf16 %v876_v0, %v875_v52  ;;  %v7688_v0 = vmov 15  }
 0x25f   : > { %3847 = vperm.xlu1 %5202, %v5426_v50   ;;  %5010 = vmatprep.mubr.msk.bf16.mxu1 %vm917_vm2, %v5858_v45 }
 0x260   : > { %5030 = vmatprep.mubr.msk.bf16.mxu0 %vm917_vm2, %v5858_v45  ;;  %v6497_v28 = vpop.permute.xlu1 %2882  ;;  %5043 = vmatpush3.bf16.msra.mxu1 %v905_v20  ;;  %v7687_v20 = vmov 0.0  }
 0x261   : > { %7682 = vst [vmem:[#allocation129_spill] sm:$0xff] %v6497_v28  ;;  %5235 = vset.pattern.permute.xlu0 %v7667_v22  ;;  %5063 = vmatpush3.bf16.msra.mxu0 %v907_v10  ;;  %v6517_v10 = vpop.permute.xlu0 %2934 }
 0x262   : > { %3891 = vperm.xlu0 %5235, %v5491_v39   ;;  %5044 = vmatprep.subr.bf16.mxu1 %v906_v63  ;;  %7685 = vst [vmem:[#allocation132_spill] sm:$0xff] %v6517_v10 }
 0x263   : > { %5204 = vset.pattern.permute.xlu1 %v7651_v42  ;;  %5064 = vmatprep.subr.bf16.mxu0 %v908_v1 }
 0x264   : > { %3284 = vperm.xlu1 %5204, %v5451_v7   ;;  %v6507_v30 = vpop.permute.xlu1 %2890  ;;  %5045 = vmatpush3.bf16.msra.mxu1 %v906_v63 }
 0x265   : > { %7684 = vst [vmem:[#allocation131_spill] sm:$0xff] %v6507_v30  ;;  %5065 = vmatpush3.bf16.msra.mxu0 %v908_v1  ;;  %5082 = vmatprep.subr.bf16.mxu1 %v6500_v55  ;;  %v6530_v63 = vpop.permute.xlu0 %3071 }
 0x266   : > { %5011 = vmatmul.mubr.msk.bf16.gmra.mrb[100].mxu1 %vm917_vm2, %v5850_v46  ;;  %5031 = vmatmul.mubr.msk.bf16.gmra.mrb[116].mxu0 %vm917_vm2, %v5850_v46  ;;  %7690 = vst [vmem:[#allocation135_spill] sm:$0xff] %v6530_v63 }
 0x267   : > { %3899 = vperm.xlu0 %5235, %v5502_v38   ;;  %5014 = vmatprep.mubr.msk.bf16.mxu1 %vm917_vm2, %v5888_v12 }
 0x268   : > { %5034 = vmatprep.mubr.msk.bf16.mxu0 %vm917_vm2, %v5888_v12  ;;  %3288 = vperm.xlu1 %5204, %v5459_v14   ;;  %v6522_v1 = vpop.permute.xlu1 %2898 }
 0x269   : > { %7686 = vst [vmem:[#allocation133_spill] sm:$0xff] %v6522_v1  ;;  %5102 = vmatprep.subr.bf16.mxu0 %v7687_v20 }
 0x26b   : > { %5239 = vset.pattern.permute.xlu0 %v7688_v0 }
 0x26c   : > { %5205 = vset.pattern.permute.xlu1 %v7662_v44  ;;  %v6527_v52 = vpop.permute.xlu1 %2906 }
 0x26d   : > { %7689 = vst [vmem:[#allocation134_spill] sm:$0xff] %v6527_v52  ;;  %3666 = vperm.xlu1 %5205, %v5448_v3  }
 0x26e   : > { %5015 = vmatmul.mubr.msk.bf16.gmra.mrb[104].mxu1 %vm917_vm2, %v5886_v40  ;;  %5035 = vmatmul.mubr.msk.bf16.gmra.mrb[120].mxu0 %vm917_vm2, %v5886_v40 }
 0x26f   : > { %5018 = vmatprep.mubr.msk.bf16.mxu1 %vm917_vm2, %v5912_v35  ;;  %5038 = vmatprep.mubr.msk.bf16.mxu0 %vm917_vm2, %v5912_v35  ;;  %v4768_v19 = vpop.f32.mrb[0].mxu1  ;;  %v4788_v62 = vpop.f32.mrb[16].mxu0 }
 0x270   : > { %v1121_v10 = vmul.f32 %v4768_v19, %v5617_v58  ;;  %v6541_v20 = vpop.permute.xlu1 %2914  ;;  %v976_v52 = vpop.f32.mrb[1].mxu1 }
 0x271   : > { %7691 = vst [vmem:[#allocation136_spill] sm:$0xff] %v6541_v20  ;;  %5206 = vset.pattern.permute.xlu1 %v7688_v0  ;;  %v1119_v30 = vmul.f32 %v5611_v56, %v976_v52  ;;  %v1169_v1 = vpop.f32.mrb[17].mxu0  ;;  %v4769_v63 = vpop.f32.mrb[2].mxu1 }
 0x272   : > { %v6545_v28 = vadd.f32 %v4788_v62, %v1121_v10  ;;  %4040 = vperm.xlu1 %5206, %v5426_v50   ;;  %v1122_v47 = vmul.f32 %v4769_v63, %v5620_v59  ;;  %v4789_v43 = vpop.f32.mrb[18].mxu0  ;;  %v979_v31 = vpop.f32.mrb[3].mxu1 }
 0x273   : > { %v6549_v11 = vadd.f32 %v1169_v1, %v1119_v30  ;;  %v1172_v58 = vpop.f32.mrb[19].mxu0  ;;  %v1120_v20 = vmul.f32 %v5614_v57, %v979_v31  ;;  %v6561_v50 = vpop.permute.xlu0 %3083 }
 0x274   : > { %v6551_v19 = vadd.f32 %v4789_v43, %v1122_v47  ;;  %v6554_v32 = vpop.permute.xlu1 %2922  ;;  %7693 = vst [vmem:[#allocation138_spill] sm:$0xff] %v6561_v50 }
 0x275   : > { %7692 = vst [vmem:[#allocation137_spill] sm:$0xff] %v6554_v32  ;;  %v6556_v56 = vadd.f32 %v1172_v58, %v1120_v20 }
 0x276   : > { %5207 = vset.pattern.permute.xlu1 %v7664_v41  ;;  %5019 = vmatmul.mubr.msk.bf16.gmra.mrb[108].mxu1 %vm917_vm2, %v5908_v36 }
 0x277   : > { %5039 = vmatmul.mubr.msk.bf16.gmra.mrb[124].mxu0 %vm917_vm2, %v5908_v36  ;;  %3477 = vperm.xlu1 %5207, %v5451_v7   ;;  %v4772_v43 = vpop.f32.mrb[4].mxu1  ;;  %v4792_v59 = vpop.f32.mrb[20].mxu0 }
 0x278   : > { %5046 = vmatprep.mubr.msk.bf16.mxu1 %vm917_vm2, %v5811_v48  ;;  %5066 = vmatprep.mubr.msk.bf16.mxu0 %vm917_vm2, %v5811_v48  ;;  %v1125_v57 = vmul.f32 %v4772_v43, %v5636_v4  ;;  %v6571_v31 = vpop.permute.xlu1 %2930  ;;  %v992_v47 = vpop.f32.mrb[5].mxu1  ;;  %v877_v4 = vld [vmem:[%s7520_s6 + $0x1f0] sm:$0xff]  ;;  %v878_v43 = vld [vmem:[%s7520_s6 + $0x1f8] sm:$0xff] }
 0x279   : > { %7694 = vst [vmem:[#allocation139_spill] sm:$0xff] %v6571_v31  ;;  %v1185_v62 = vpop.f32.mrb[21].mxu0  ;;  %v1123_v10 = vmul.f32 %v5623_v60, %v992_v47  ;;  %v4773_v1 = vpop.f32.mrb[6].mxu1 }
 0x27a   : > { %v6573_v30 = vadd.f32 %v4792_v59, %v1125_v57  ;;  %v4793_v20 = vpop.f32.mrb[22].mxu0  ;;  %v1126_v52 = vmul.f32 %v4773_v1, %v5641_v5  ;;  %v995_v63 = vpop.f32.mrb[7].mxu1  ;;  %v910_v1 = vpack.c.bf16 %v878_v43, %v877_v4 }
 0x27b   : > { %3481 = vperm.xlu1 %5207, %v5459_v14   ;;  %v1188_v58 = vpop.f32.mrb[23].mxu0  ;;  %v6584_v57 = vadd.f32 %v1185_v62, %v1123_v10  ;;  %v1124_v60 = vmul.f32 %v5634_v2, %v995_v63  ;;  %v6598_v10 = vpop.permute.xlu0 %3091 }
 0x27c   : > { %v6587_v59 = vadd.f32 %v4793_v20, %v1126_v52  ;;  %7695 = vst [vmem:[#allocation140_spill] sm:$0xff] %v6598_v10 }
 0x27d   : > { %v6589_v47 = vadd.f32 %v1188_v58, %v1124_v60 }
 0x27e   : > { %5047 = vmatmul.mubr.msk.bf16.vlgmr.msra.gmra.mrb[112].mxu1 %vm917_vm2, %v5806_v37  ;;  %v6593_v5 = vpop.permute.xlu1 %3067 }
 0x27f   : > { %5067 = vmatmul.mubr.msk.bf16.vlgmr.msra.gmra.mrb[128].mxu0 %vm917_vm2, %v5806_v37  ;;  %5208 = vset.pattern.permute.xlu1 %v7667_v22  ;;  %v4776_v32 = vpop.f32.mrb[8].mxu1  ;;  %v4796_v62 = vpop.f32.mrb[24].mxu0 }
 0x280   : > { %5050 = vmatprep.mubr.msk.bf16.mxu1 %vm917_vm2, %v5858_v45  ;;  %5070 = vmatprep.mubr.msk.bf16.mxu0 %vm917_vm2, %v5858_v45  ;;  %v1129_v2 = vmul.f32 %v4776_v32, %v5649_v9  ;;  %v1008_v20 = vpop.f32.mrb[9].mxu1  ;;  %v1201_v63 = vpop.f32.mrb[25].mxu0 }
 0x281   : > { %3859 = vperm.xlu1 %5208, %v5448_v3   ;;  %v1127_v52 = vmul.f32 %v5643_v6, %v1008_v20  ;;  %v4777_v58 = vpop.f32.mrb[10].mxu1  ;;  %5083 = vmatpush3.bf16.msra.mxu1 %v6500_v55  ;;  %v4797_v31 = vpop.f32.mrb[26].mxu0 }
 0x282   : > { %v6608_v4 = vadd.f32 %v4796_v62, %v1129_v2  ;;  %v6610_v43 = vpop.permute.xlu1 %3075  ;;  %v1130_v60 = vmul.f32 %v4777_v58, %v5662_v13  ;;  %5084 = vmatprep.subr.bf16.mxu1 %v910_v1  ;;  %v1011_v32 = vpop.f32.mrb[11].mxu1 }
 0x283   : > { %v6613_v50 = vadd.f32 %v1201_v63, %v1127_v52  ;;  %v1204_v9 = vpop.f32.mrb[27].mxu0  ;;  %v1128_v6 = vmul.f32 %v5647_v8, %v1011_v32  ;;  %v6630_v62 = vpop.permute.xlu0 %3099 }
 0x284   : > { %v6615_v10 = vadd.f32 %v4797_v31, %v1130_v60  ;;  %7697 = vst [vmem:[#allocation142_spill] sm:$0xff] %v6630_v62 }
 0x285   : > { %5209 = vset.pattern.permute.xlu1 %v7651_v42  ;;  %5085 = vmatpush3.bf16.msra.mxu1 %v910_v1  ;;  %v6619_v55 = vadd.f32 %v1204_v9, %v1128_v6 }
 0x286   : > { %3292 = vperm.xlu1 %5209, %v5461_v15   ;;  %5051 = vmatmul.mubr.msk.bf16.gmra.mrb[116].mxu1 %vm917_vm2, %v5850_v46  ;;  %v6624_v13 = vpop.permute.xlu1 %3079 }
 0x287   : > { %7696 = vst [vmem:[#allocation141_spill] sm:$0xff] %v6624_v13  ;;  %5071 = vmatmul.mubr.msk.bf16.gmra.mrb[132].mxu0 %vm917_vm2, %v5850_v46  ;;  %5054 = vmatprep.mubr.msk.bf16.mxu1 %vm917_vm2, %v5888_v12  ;;  %v4780_v31 = vpop.f32.mrb[12].mxu1  ;;  %v4800_v8 = vpop.f32.mrb[28].mxu0 }
 0x288   : > { %5074 = vmatprep.mubr.msk.bf16.mxu0 %vm917_vm2, %v5888_v12  ;;  %v1133_v1 = vmul.f32 %v4780_v31, %v5670_v18  ;;  %v1024_v2 = vpop.f32.mrb[13].mxu1  ;;  %v1217_v52 = vpop.f32.mrb[29].mxu0 }
 0x289   : > { %v1131_v20 = vmul.f32 %v5664_v16, %v1024_v2  ;;  %v4781_v63 = vpop.f32.mrb[14].mxu1  ;;  %v4801_v9 = vpop.f32.mrb[30].mxu0 }
 0x28a   : > { %5210 = vset.pattern.permute.xlu1 %v7662_v44  ;;  %v6637_v58 = vadd.f32 %v4800_v8, %v1133_v1  ;;  %v6639_v60 = vpop.permute.xlu1 %3087  ;;  %v1134_v32 = vmul.f32 %v4781_v63, %v5674_v21  ;;  %v1027_v62 = vpop.f32.mrb[15].mxu1 }
 0x28b   : > { %7698 = vst [vmem:[#allocation143_spill] sm:$0xff] %v6639_v60  ;;  %3670 = vperm.xlu1 %5210, %v5451_v7   ;;  %v6643_v6 = vadd.f32 %v1217_v52, %v1131_v20  ;;  %v1220_v18 = vpop.f32.mrb[31].mxu0  ;;  %v1132_v16 = vmul.f32 %v5668_v17, %v1027_v62  ;;  %v6657_v20 = vpop.permute.xlu0 %3107 }
 0x28c   : > { %v6645_v31 = vadd.f32 %v4801_v9, %v1134_v32  ;;  %7700 = vst [vmem:[#allocation145_spill] sm:$0xff] %v6657_v20 }
 0x28d   : > { %v6648_v2 = vadd.f32 %v1220_v18, %v1132_v16 }
 0x28e   : > { %5055 = vmatmul.mubr.msk.bf16.gmra.mrb[120].mxu1 %vm917_vm2, %v5886_v40  ;;  %v6652_v8 = vpop.permute.xlu1 %3095 }
 0x28f   : > { %7699 = vst [vmem:[#allocation144_spill] sm:$0xff] %v6652_v8  ;;  %3674 = vperm.xlu1 %5210, %v5459_v14   ;;  %5075 = vmatmul.mubr.msk.bf16.gmra.mrb[136].mxu0 %vm917_vm2, %v5886_v40  ;;  %v4808_v21 = vpop.f32.mrb[16].mxu1  ;;  %v4828_v1 = vpop.f32.mrb[32].mxu0 }
 0x290   : > { %5058 = vmatprep.mubr.msk.bf16.mxu1 %vm917_vm2, %v5912_v35  ;;  %5078 = vmatprep.mubr.msk.bf16.mxu0 %vm917_vm2, %v5912_v35  ;;  %v1395_v17 = vmul.f32 %v4808_v21, %v5686_v27  ;;  %v1266_v62 = vpop.f32.mrb[17].mxu1  ;;  %v1459_v63 = vpop.f32.mrb[33].mxu0  ;;  %v1588_v18 = vmul.f32 %v4828_v1, %v5735_v53 }
 0x291   : > { %v1393_v52 = vmul.f32 %v5677_v23, %v1266_v62  ;;  %v4809_v32 = vpop.f32.mrb[18].mxu1  ;;  %v4829_v60 = vpop.f32.mrb[34].mxu0  ;;  %v1586_v27 = vmul.f32 %v5729_v51, %v1459_v63  ;;  %v7701_v63 = vld [vmem:[#allocation6_spill] sm:$0xff] }
 0x292   : > { %v1411_v9 = vadd.f32 %v1395_v17, %v6545_v28  ;;  %v6667_v16 = vpop.permute.xlu1 %3103  ;;  %v1396_v20 = vmul.f32 %v4809_v32, %v5683_v26  ;;  %v1269_v21 = vpop.f32.mrb[19].mxu1  ;;  %v1589_v53 = vmul.f32 %v4829_v60, %v5741_v61 }
 0x293   : > { %5211 = vset.pattern.permute.xlu1 %v7688_v0  ;;  %v1409_v8 = vadd.f32 %v1393_v52, %v6549_v11  ;;  %v1462_v13 = vpop.f32.mrb[35].mxu0  ;;  %v1394_v1 = vmul.f32 %v5680_v25, %v1269_v21  ;;  %v6693_v61 = vpop.permute.xlu0 %3115 }
 0x294   : > { %v6673_v23 = vadd.f32 %v1588_v18, %v1411_v9  ;;  %4052 = vperm.xlu1 %5211, %v5448_v3   ;;  %v1412_v28 = vadd.f32 %v1396_v20, %v6551_v19  ;;  %v1587_v51 = vmul.f32 %v5725_v49, %v1462_v13 }
 0x295   : > { %v6679_v26 = vadd.f32 %v1586_v27, %v1409_v8  ;;  %v1410_v11 = vadd.f32 %v1394_v1, %v6556_v56  ;;  %v7702_v27 = vld [vmem:[#allocation15_spill] sm:$0xff] }
 0x296   : > { %v6681_v17 = vadd.f32 %v1589_v53, %v1412_v28  ;;  %5059 = vmatmul.mubr.msk.bf16.gmra.mrb[124].mxu1 %vm917_vm2, %v5908_v36  ;;  %v6687_v62 = vpop.permute.xlu1 %3111  ;;  %v7703_v1 = vld [vmem:[#allocation19_spill] sm:$0xff] }
 0x297   : > { %5079 = vmatmul.mubr.msk.bf16.gmra.mrb[140].mxu0 %vm917_vm2, %v5908_v36  ;;  %5086 = vmatprep.mubr.msk.bf16.mxu1 %vm917_vm2, %v5811_v48  ;;  %v4812_v3 = vpop.f32.mrb[20].mxu1  ;;  %v4832_v25 = vpop.f32.mrb[36].mxu0  ;;  %v6695_v19 = vadd.f32 %v1587_v51, %v1410_v11 }
 0x298   : > { %5212 = vset.pattern.permute.xlu1 %v7664_v41  ;;  %v1399_v49 = vmul.f32 %v4812_v3, %v5698_v34  ;;  %v1282_v56 = vpop.f32.mrb[21].mxu1  ;;  %v1475_v60 = vpop.f32.mrb[37].mxu0  ;;  %v1592_v48 = vmul.f32 %v4832_v25, %v5737_v54 }
 0x299   : > { %3485 = vperm.xlu1 %5212, %v5461_v15   ;;  %v1397_v13 = vmul.f32 %v5692_v29, %v1282_v56  ;;  %v4813_v8 = vpop.f32.mrb[22].mxu1  ;;  %v4833_v9 = vpop.f32.mrb[38].mxu0  ;;  %v1590_v34 = vmul.f32 %v7702_v27, %v1475_v60  ;;  %v7708_v27 = vld [vmem:[#allocation18_spill] sm:$0xff] }
 0x29a   : > { %v1415_v20 = vadd.f32 %v1399_v49, %v6573_v30  ;;  %v6703_v52 = vpop.permute.xlu1 %3119  ;;  %v1400_v32 = vmul.f32 %v4813_v8, %v7701_v63  ;;  %v1285_v21 = vpop.f32.mrb[23].mxu1  ;;  %v1593_v11 = vmul.f32 %v4833_v9, %v7703_v1  ;;  %v7704_v30 = vld [vmem:[#allocation5_spill] sm:$0xff]  ;;  %v7706_v8 = vld [vmem:[#allocation10_spill] sm:$0xff]  ;;  %v7710_v1 = vld [vmem:[#allocation16_spill] sm:$0xff] }
 0x29b   : > { %v1413_v18 = vadd.f32 %v1397_v13, %v6584_v57  ;;  %v1478_v28 = vpop.f32.mrb[39].mxu0  ;;  %v1398_v51 = vmul.f32 %v7704_v30, %v1285_v21  ;;  %v6716_v3 = vpop.permute.xlu0 %3123  ;;  %v7705_v49 = vld [vmem:[#allocation17_spill] sm:$0xff] }
 0x29c   : > { %v6708_v53 = vadd.f32 %v1592_v48, %v1415_v20  ;;  %v1416_v29 = vadd.f32 %v1400_v32, %v6587_v59  ;;  %v1591_v56 = vmul.f32 %v7705_v49, %v1478_v28 }
 0x29d   : > { %v6713_v54 = vadd.f32 %v1590_v34, %v1413_v18  ;;  %5213 = vset.pattern.permute.xlu1 %v7667_v22  ;;  %v1414_v57 = vadd.f32 %v1398_v51, %v6589_v47  ;;  %v7707_v47 = vld [vmem:[#allocation8_spill] sm:$0xff] }
 0x29e   : > { %v6718_v25 = vadd.f32 %v1593_v11, %v1416_v29  ;;  %3863 = vperm.xlu1 %5213, %v5451_v7   ;;  %5087 = vmatmul.mubr.msk.bf16.vlgmr.msra.gmra.mrb[128].mxu1 %vm917_vm2, %v5806_v37 }
 0x29f   : > { %5090 = vmatprep.mubr.msk.bf16.mxu1 %vm917_vm2, %v5858_v45  ;;  %v6727_v59 = vpop.permute.xlu1 %3260  ;;  %v4816_v13 = vpop.f32.mrb[24].mxu1  ;;  %v6729_v60 = vadd.f32 %v1591_v56, %v1414_v57  ;;  %v7709_v45 = vld [vmem:[#allocation9_spill] sm:$0xff]  ;;  %v7711_v56 = vld [vmem:[#allocation23_spill] sm:$0xff] }
 0x2a0   : > { %v1403_v20 = vmul.f32 %v4816_v13, %v7706_v8  ;;  %v4836_v48 = vpop.f32.mrb[40].mxu0  ;;  %v1298_v63 = vpop.f32.mrb[25].mxu1  ;;  %v7712_v8 = vld [vmem:[#allocation7_spill] sm:$0xff] }
 0x2a1   : > { %v1401_v32 = vmul.f32 %v7707_v47, %v1298_v63  ;;  %v1491_v9 = vpop.f32.mrb[41].mxu0  ;;  %v4817_v18 = vpop.f32.mrb[26].mxu1  ;;  %v1596_v34 = vmul.f32 %v4836_v48, %v7708_v27 }
 0x2a2   : > { %3867 = vperm.xlu1 %5213, %v5459_v14   ;;  %v1419_v37 = vadd.f32 %v1403_v20, %v6608_v4  ;;  %v1404_v21 = vmul.f32 %v4817_v18, %v7709_v45  ;;  %v4837_v28 = vpop.f32.mrb[42].mxu0  ;;  %v1594_v11 = vmul.f32 %v7710_v1, %v1491_v9  ;;  %v1301_v30 = vpop.f32.mrb[27].mxu1  ;;  %v7716_v45 = vld [vmem:[#allocation14_spill] sm:$0xff] }
 0x2a3   : > { %v1417_v29 = vadd.f32 %v1401_v32, %v6613_v50  ;;  %v1494_v51 = vpop.f32.mrb[43].mxu0  ;;  %v1597_v13 = vmul.f32 %v4837_v28, %v7711_v56  ;;  %v1402_v63 = vmul.f32 %v7712_v8, %v1301_v30  ;;  %v6748_v48 = vpop.permute.xlu0 %3851  ;;  %v7714_v32 = vld [vmem:[#allocation21_spill] sm:$0xff]  ;;  %v7717_v28 = vld [vmem:[#allocation12_spill] sm:$0xff]  ;;  %v7718_v30 = vld [vmem:[#allocation22_spill] sm:$0xff] }
 0x2a4   : > { %v6739_v57 = vadd.f32 %v1596_v34, %v1419_v37  ;;  %v1420_v49 = vadd.f32 %v1404_v21, %v6615_v10  ;;  %v6744_v4 = vpop.permute.xlu1 %3453  ;;  %7713 = vst [vmem:[#allocation6_spill] sm:$0xff] %v6748_v48  ;;  %v1595_v9 = vmul.f32 %v7714_v32, %v1494_v51  ;;  %v7715_v10 = vld [vmem:[#allocation3_spill] sm:$0xff]  ;;  %v7720_v8 = vld [vmem:[#allocation20_spill] sm:$0xff] }
 0x2a5   : > { %v6746_v20 = vadd.f32 %v1594_v11, %v1417_v29  ;;  %v1418_v50 = vadd.f32 %v1402_v63, %v6619_v55 }
 0x2a6   : > { %v6750_v47 = vadd.f32 %v1597_v13, %v1420_v49  ;;  %5214 = vset.pattern.permute.xlu1 %v7651_v42  ;;  %5091 = vmatmul.mubr.msk.bf16.gmra.mrb[132].mxu1 %vm917_vm2, %v5850_v46  ;;  %v7719_v49 = vld [vmem:[#allocation13_spill] sm:$0xff] }
 0x2a7   : > { %3304 = vperm.xlu1 %5214, %v7715_v10   ;;  %5094 = vmatprep.mubr.msk.bf16.mxu1 %vm917_vm2, %v5888_v12  ;;  %v4820_v18 = vpop.f32.mrb[28].mxu1  ;;  %v4840_v37 = vpop.f32.mrb[44].mxu0  ;;  %v6760_v27 = vadd.f32 %v1595_v9, %v1418_v50 }
 0x2a8   : > { %v6762_v34 = vpop.permute.xlu1 %3457  ;;  %v1407_v55 = vmul.f32 %v4820_v18, %v7716_v45  ;;  %v1314_v21 = vpop.f32.mrb[29].mxu1  ;;  %v1600_v51 = vmul.f32 %v4840_v37, %v7718_v30  ;;  %v7722_v37 = vld [vmem:[#allocation11_spill] sm:$0xff] }
 0x2a9   : > { %v1405_v29 = vmul.f32 %v7717_v28, %v1314_v21  ;;  %v1507_v1 = vpop.f32.mrb[45].mxu0  ;;  %v4821_v11 = vpop.f32.mrb[30].mxu1 }
 0x2aa   : > { %v1423_v46 = vadd.f32 %v1407_v55, %v6637_v58  ;;  %v1408_v56 = vmul.f32 %v4821_v11, %v7719_v49  ;;  %v4841_v12 = vpop.f32.mrb[46].mxu0  ;;  %v1598_v63 = vmul.f32 %v7720_v8, %v1507_v1  ;;  %v1317_v50 = vpop.f32.mrb[31].mxu1  ;;  %v7721_v58 = vld [vmem:[#allocation27_spill] sm:$0xff]  ;;  %v7724_v1 = vld [vmem:[#allocation25_spill] sm:$0xff] }
 0x2ab   : > { %5215 = vset.pattern.permute.xlu1 %v7662_v44  ;;  %v1421_v13 = vadd.f32 %v1405_v29, %v6643_v6  ;;  %v1510_v32 = vpop.f32.mrb[47].mxu0  ;;  %v1601_v45 = vmul.f32 %v4841_v12, %v7721_v58  ;;  %v1406_v55 = vmul.f32 %v7722_v37, %v1317_v50  ;;  %v6782_v11 = vpop.permute.xlu0 %3855  ;;  %v7725_v49 = vld [vmem:[#allocation31_spill] sm:$0xff]  ;;  %v7729_v58 = vld [vmem:[#allocation26_spill] sm:$0xff] }
 0x2ac   : > { %v6772_v9 = vadd.f32 %v1600_v51, %v1423_v46  ;;  %3678 = vperm.xlu1 %5215, %v5461_v15   ;;  %v1424_v18 = vadd.f32 %v1408_v56, %v6645_v31  ;;  %7723 = vst [vmem:[#allocation15_spill] sm:$0xff] %v6782_v11  ;;  %v1599_v46 = vmul.f32 %v7724_v1, %v1510_v32  ;;  %v7727_v32 = vld [vmem:[#allocation47_spill] sm:$0xff] }
 0x2ad   : > { %v6778_v21 = vadd.f32 %v1598_v63, %v1421_v13  ;;  %v6780_v28 = vpop.permute.xlu1 %3272  ;;  %v1422_v29 = vadd.f32 %v1406_v55, %v6648_v2  ;;  %v7726_v2 = vld [vmem:[#allocation24_spill] sm:$0xff]  ;;  %v7730_v55 = vld [vmem:[#allocation45_spill] sm:$0xff] }
 0x2ae   : > { %v6784_v6 = vadd.f32 %v1601_v45, %v1424_v18  ;;  %5095 = vmatmul.mubr.msk.bf16.gmra.mrb[136].mxu1 %vm917_vm2, %v5886_v40 }
 0x2af   : > { %5098 = vmatprep.mubr.msk.bf16.mxu1 %vm917_vm2, %v5912_v35  ;;  %v4848_v31 = vpop.f32.mrb[32].mxu1  ;;  %v4868_v30 = vpop.f32.mrb[48].mxu0  ;;  %v6792_v51 = vadd.f32 %v1599_v46, %v1422_v29 }
 0x2b0   : > { %5216 = vset.pattern.permute.xlu1 %v7688_v0  ;;  %v1781_v56 = vmul.f32 %v4848_v31, %v7725_v49  ;;  %v1652_v12 = vpop.f32.mrb[33].mxu1  ;;  %v1845_v13 = vpop.f32.mrb[49].mxu0  ;;  %v1974_v35 = vmul.f32 %v4868_v30, %v7727_v32  ;;  %v7731_v49 = vld [vmem:[#allocation49_spill] sm:$0xff] }
 0x2b1   : > { %4056 = vperm.xlu1 %5216, %v5451_v7   ;;  %v1779_v8 = vmul.f32 %v7726_v2, %v1652_v12  ;;  %v4849_v63 = vpop.f32.mrb[34].mxu1  ;;  %v4869_v50 = vpop.f32.mrb[50].mxu0  ;;  %v1972_v29 = vmul.f32 %v7730_v55, %v1845_v13  ;;  %v7732_v2 = vld [vmem:[#allocation29_spill] sm:$0xff] }
 0x2b2   : > { %v1797_v40 = vadd.f32 %v1781_v56, %v6673_v23  ;;  %v6800_v18 = vpop.permute.xlu1 %3650  ;;  %v1782_v45 = vmul.f32 %v4849_v63, %v7729_v58  ;;  %v1655_v1 = vpop.f32.mrb[35].mxu1  ;;  %v1975_v12 = vmul.f32 %v4869_v50, %v7731_v49 }
 0x2b3   : > { %7728 = vst [vmem:[#allocation19_spill] sm:$0xff] %v6800_v18  ;;  %v1795_v37 = vadd.f32 %v1779_v8, %v6679_v26  ;;  %v1848_v46 = vpop.f32.mrb[51].mxu0  ;;  %v1780_v23 = vmul.f32 %v7732_v2, %v1655_v1  ;;  %v7733_v8 = vld [vmem:[#allocation40_spill] sm:$0xff]  ;;  %v6819_v63 = vpop.permute.xlu0 %3875 }
 0x2b4   : > { %v6805_v31 = vadd.f32 %v1974_v35, %v1797_v40  ;;  %v1798_v7 = vadd.f32 %v1782_v45, %v6681_v17  ;;  %v1973_v13 = vmul.f32 %v7733_v8, %v1848_v46  ;;  %7734 = vst [vmem:[#allocation5_spill] sm:$0xff] %v6819_v63  ;;  %v7737_v1 = vld [vmem:[#allocation44_spill] sm:$0xff] }
 0x2b5   : > { %v6810_v56 = vadd.f32 %v1972_v29, %v1795_v37  ;;  %4060 = vperm.xlu1 %5216, %v5459_v14   ;;  %v1796_v26 = vadd.f32 %v1780_v23, %v6695_v19  ;;  %v7735_v14 = vld [vmem:[#allocation35_spill] sm:$0xff]  ;;  %v7736_v19 = vld [vmem:[#allocation33_spill] sm:$0xff]  ;;  %v7739_v23 = vld [vmem:[#allocation42_spill] sm:$0xff] }
 0x2b6   : > { %v6813_v30 = vadd.f32 %v1975_v12, %v1798_v7  ;;  %5099 = vmatmul.mubr.msk.bf16.gmra.mrb[140].mxu1 %vm917_vm2, %v5908_v36  ;;  %v7738_v7 = vld [vmem:[#allocation30_spill] sm:$0xff]  ;;  %v7740_v8 = vld [vmem:[#allocation28_spill] sm:$0xff] }
 0x2b7   : > { %v6821_v17 = vpop.permute.xlu1 %3461  ;;  %v6823_v50 = vadd.f32 %v1973_v13, %v1796_v26  ;;  %v4852_v40 = vpop.f32.mrb[36].mxu1 }
 0x2b8   : > { %v4872_v32 = vpop.f32.mrb[52].mxu0  ;;  %v1785_v35 = vmul.f32 %v4852_v40, %v7735_v14  ;;  %v1668_v58 = vpop.f32.mrb[37].mxu1 }
 0x2b9   : > { %5217 = vset.pattern.permute.xlu1 %v7664_v41  ;;  %v1861_v45 = vpop.f32.mrb[53].mxu0  ;;  %v1783_v37 = vmul.f32 %v7736_v19, %v1668_v58  ;;  %v4853_v55 = vpop.f32.mrb[38].mxu1  ;;  %v1978_v46 = vmul.f32 %v4872_v32, %v7737_v1  ;;  %v7742_v19 = vld [vmem:[#allocation53_spill] sm:$0xff] }
 0x2ba   : > { %3497 = vperm.xlu1 %5217, %v7715_v10   ;;  %v4873_v36 = vpop.f32.mrb[54].mxu0  ;;  %v1801_v29 = vadd.f32 %v1785_v35, %v6708_v53  ;;  %v1786_v49 = vmul.f32 %v4853_v55, %v7738_v7  ;;  %v1671_v12 = vpop.f32.mrb[39].mxu1  ;;  %v1976_v26 = vmul.f32 %v7739_v23, %v1861_v45  ;;  %v7743_v55 = vld [vmem:[#allocation51_spill] sm:$0xff] }
 0x2bb   : > { %v1799_v2 = vadd.f32 %v1783_v37, %v6713_v54  ;;  %v1784_v13 = vmul.f32 %v7740_v8, %v1671_v12  ;;  %v1864_v40 = vpop.f32.mrb[55].mxu0  ;;  %v1979_v53 = vmul.f32 %v4873_v36, %v7742_v19  ;;  %v6846_v54 = vpop.permute.xlu0 %3264  ;;  %v7745_v36 = vld [vmem:[#allocation39_spill] sm:$0xff] }
 0x2bc   : > { %v6835_v14 = vpop.permute.xlu1 %3839  ;;  %v6837_v63 = vadd.f32 %v1978_v46, %v1801_v29  ;;  %v1802_v58 = vadd.f32 %v1786_v49, %v6718_v25  ;;  %v1977_v1 = vmul.f32 %v7743_v55, %v1864_v40 }
 0x2bd   : > { %7741 = vst [vmem:[#allocation17_spill] sm:$0xff] %v6835_v14  ;;  %v6841_v35 = vadd.f32 %v1976_v26, %v1799_v2  ;;  %v1800_v32 = vadd.f32 %v1784_v13, %v6729_v60  ;;  %v7746_v2 = vld [vmem:[#allocation48_spill] sm:$0xff]  ;;  %v7747_v26 = vld [vmem:[#allocation37_spill] sm:$0xff] }
 0x2be   : > { %5218 = vset.pattern.permute.xlu1 %v7667_v22  ;;  %v6848_v45 = vadd.f32 %v1979_v53, %v1802_v58  ;;  %v7748_v58 = vld [vmem:[#allocation34_spill] sm:$0xff] }
 0x2bf   : > { %3871 = vperm.xlu1 %5218, %v5461_v15   ;;  %v4856_v37 = vpop.f32.mrb[40].mxu1  ;;  %v6851_v29 = vadd.f32 %v1977_v1, %v1800_v32  ;;  %v4876_v7 = vpop.f32.mrb[56].mxu0  ;;  %v7749_v1 = vld [vmem:[#allocation46_spill] sm:$0xff] }
 0x2c0   : > { %v6853_v25 = vpop.permute.xlu1 %3843  ;;  %v1789_v46 = vmul.f32 %v4856_v37, %v7745_v36  ;;  %v1684_v49 = vpop.f32.mrb[41].mxu1  ;;  %v1982_v23 = vmul.f32 %v4876_v7, %v7746_v2 }
 0x2c1   : > { %7744 = vst [vmem:[#allocation10_spill] sm:$0xff] %v6853_v25  ;;  %v1877_v60 = vpop.f32.mrb[57].mxu0  ;;  %v1787_v8 = vmul.f32 %v7747_v26, %v1684_v49  ;;  %v4857_v13 = vpop.f32.mrb[42].mxu1  ;;  %v7751_v49 = vld [vmem:[#allocation57_spill] sm:$0xff] }
 0x2c2   : > { %v1805_v12 = vadd.f32 %v1789_v46, %v6739_v57  ;;  %v4877_v40 = vpop.f32.mrb[58].mxu0  ;;  %v1790_v19 = vmul.f32 %v4857_v13, %v7748_v58  ;;  %v1687_v53 = vpop.f32.mrb[43].mxu1  ;;  %v1980_v37 = vmul.f32 %v7749_v1, %v1877_v60  ;;  %v7750_v57 = vld [vmem:[#allocation32_spill] sm:$0xff]  ;;  %v7755_v1 = vld [vmem:[#allocation41_spill] sm:$0xff] }
 0x2c3   : > { %5220 = vset.pattern.permute.xlu1 %v7651_v42  ;;  %v1803_v55 = vadd.f32 %v1787_v8, %v6746_v20  ;;  %v1788_v36 = vmul.f32 %v7750_v57, %v1687_v53  ;;  %v1880_v46 = vpop.f32.mrb[59].mxu0  ;;  %v1983_v2 = vmul.f32 %v4877_v40, %v7751_v49  ;;  %v6875_v20 = vpop.permute.xlu0 %3268 }
 0x2c4   : > { %v6861_v32 = vadd.f32 %v1982_v23, %v1805_v12  ;;  %3308 = vperm.xlu1 %5220, %v5484_v33   ;;  %v1806_v7 = vadd.f32 %v1790_v19, %v6750_v47  ;;  %v7753_v23 = vld [vmem:[#allocation55_spill] sm:$0xff] }
 0x2c5   : > { %v6869_v26 = vpop.permute.xlu1 %3280  ;;  %v6871_v11 = vadd.f32 %v1980_v37, %v1803_v55  ;;  %v1804_v12 = vadd.f32 %v1788_v36, %v6760_v27  ;;  %v1981_v13 = vmul.f32 %v7753_v23, %v1880_v46  ;;  %v7754_v47 = vld [vmem:[#allocation43_spill] sm:$0xff]  ;;  %v7756_v36 = vld [vmem:[#allocation52_spill] sm:$0xff] }
 0x2c6   : > { %7752 = vst [vmem:[#allocation8_spill] sm:$0xff] %v6869_v26  ;;  %v6877_v60 = vadd.f32 %v1983_v2, %v1806_v7  ;;  %v7758_v7 = vld [vmem:[#allocation38_spill] sm:$0xff] }
 0x2c7   : > { %v4860_v8 = vpop.f32.mrb[44].mxu1  ;;  %v6879_v58 = vadd.f32 %v1981_v13, %v1804_v12  ;;  %v4880_v40 = vpop.f32.mrb[60].mxu0  ;;  %v7759_v13 = vld [vmem:[#allocation50_spill] sm:$0xff] }
 0x2c8   : > { %3312 = vperm.xlu1 %5220, %v5491_v39   ;;  %v1793_v19 = vmul.f32 %v4860_v8, %v7754_v47  ;;  %v1700_v53 = vpop.f32.mrb[45].mxu1  ;;  %v1893_v37 = vpop.f32.mrb[61].mxu0  ;;  %v1986_v46 = vmul.f32 %v4880_v40, %v7756_v36 }
 0x2c9   : > { %v1791_v55 = vmul.f32 %v7755_v1, %v1700_v53  ;;  %v4861_v57 = vpop.f32.mrb[46].mxu1  ;;  %v4881_v12 = vpop.f32.mrb[62].mxu0  ;;  %v1984_v25 = vmul.f32 %v7759_v13, %v1893_v37  ;;  %v7760_v1 = vld [vmem:[#allocation61_spill] sm:$0xff] }
 0x2ca   : > { %v1809_v27 = vadd.f32 %v1793_v19, %v6772_v9  ;;  %v6886_v49 = vpop.permute.xlu1 %3654  ;;  %v1794_v2 = vmul.f32 %v4861_v57, %v7758_v7  ;;  %v1703_v8 = vpop.f32.mrb[47].mxu1  ;;  %v1987_v9 = vmul.f32 %v4881_v12, %v7760_v1  ;;  %v7761_v19 = vld [vmem:[#allocation36_spill] sm:$0xff]  ;;  %v7766_v1 = vld [vmem:[#allocation54_spill] sm:$0xff] }
 0x2cb   : > { %7757 = vst [vmem:[#allocation18_spill] sm:$0xff] %v6886_v49  ;;  %v1807_v23 = vadd.f32 %v1791_v55, %v6778_v21  ;;  %v1792_v40 = vmul.f32 %v7761_v19, %v1703_v8  ;;  %v1896_v36 = vpop.f32.mrb[63].mxu0  ;;  %v7762_v55 = vld [vmem:[#allocation59_spill] sm:$0xff]  ;;  %v6906_v7 = vpop.permute.xlu0 %3276  ;;  %v7765_v8 = vld [vmem:[#allocation81_spill] sm:$0xff] }
 0x2cc   : > { %v6891_v47 = vadd.f32 %v1986_v46, %v1809_v27  ;;  %5221 = vset.pattern.permute.xlu1 %v7662_v44  ;;  %v1810_v53 = vadd.f32 %v1794_v2, %v6784_v6  ;;  %v1985_v37 = vmul.f32 %v7762_v55, %v1896_v36  ;;  %v7764_v2 = vld [vmem:[#allocation65_spill] sm:$0xff]  ;;  %v7767_v36 = vld [vmem:[#allocation56_spill] sm:$0xff] }
 0x2cd   : > { %v6897_v48 = vadd.f32 %v1984_v25, %v1807_v23  ;;  %3690 = vperm.xlu1 %5221, %v7715_v10   ;;  %v1808_v21 = vadd.f32 %v1792_v40, %v6792_v51 }
 0x2ce   : > { %v6900_v57 = vadd.f32 %v1987_v9, %v1810_v53 }
 0x2cf   : > { %v6904_v27 = vpop.permute.xlu1 %4032  ;;  %v4888_v46 = vpop.f32.mrb[48].mxu1  ;;  %v6908_v6 = vadd.f32 %v1985_v37, %v1808_v21 }
 0x2d0   : > { %7763 = vst [vmem:[#allocation9_spill] sm:$0xff] %v6904_v27  ;;  %v2167_v12 = vmul.f32 %v4888_v46, %v7764_v2  ;;  %v4908_v13 = vpop.f32.mrb[64].mxu0  ;;  %v2038_v25 = vpop.f32.mrb[49].mxu1  ;;  %v7769_v27 = vld [vmem:[#allocation79_spill] sm:$0xff] }
 0x2d1   : > { %5222 = vset.pattern.permute.xlu1 %v7688_v0  ;;  %v2231_v23 = vpop.f32.mrb[65].mxu0  ;;  %v2360_v53 = vmul.f32 %v4908_v13, %v7765_v8  ;;  %v2165_v9 = vmul.f32 %v7766_v1, %v2038_v25  ;;  %v4889_v19 = vpop.f32.mrb[50].mxu1  ;;  %v7771_v13 = vld [vmem:[#allocation83_spill] sm:$0xff] }
 0x2d2   : > { %4064 = vperm.xlu1 %5222, %v5461_v15   ;;  %v2183_v51 = vadd.f32 %v2167_v12, %v6805_v31  ;;  %v4909_v40 = vpop.f32.mrb[66].mxu0  ;;  %v2168_v21 = vmul.f32 %v4889_v19, %v7767_v36  ;;  %v2041_v37 = vpop.f32.mrb[51].mxu1  ;;  %v2358_v18 = vmul.f32 %v7769_v27, %v2231_v23  ;;  %v7770_v15 = vld [vmem:[#allocation63_spill] sm:$0xff]  ;;  %v7772_v19 = vld [vmem:[#allocation70_spill] sm:$0xff] }
 0x2d3   : > { %v6917_v55 = vpop.permute.xlu1 %4036  ;;  %v2181_v2 = vadd.f32 %v2165_v9, %v6810_v56  ;;  %v2166_v14 = vmul.f32 %v7770_v15, %v2041_v37  ;;  %v2234_v31 = vpop.f32.mrb[67].mxu0  ;;  %v2361_v25 = vmul.f32 %v4909_v40, %v7771_v13 }
 0x2d4   : > { %7768 = vst [vmem:[#allocation16_spill] sm:$0xff] %v6917_v55  ;;  %v6919_v46 = vadd.f32 %v2360_v53, %v2183_v51  ;;  %v2184_v12 = vadd.f32 %v2168_v21, %v6813_v30  ;;  %v2359_v36 = vmul.f32 %v7772_v19, %v2234_v31  ;;  %v7773_v55 = vmov 10   ;;  %v6934_v27 = vpop.permute.xlu0 %3296  ;;  %v7776_v53 = vld [vmem:[#allocation69_spill] sm:$0xff]  ;;  %v7779_v31 = vld [vmem:[#allocation60_spill] sm:$0xff] }
 0x2d5   : > { %v6926_v8 = vadd.f32 %v2358_v18, %v2181_v2  ;;  %v2182_v1 = vadd.f32 %v2166_v14, %v6823_v50  ;;  %7774 = vst [vmem:[#allocation23_spill] sm:$0xff] %v6934_v27  ;;  %v7777_v14 = vld [vmem:[#allocation74_spill] sm:$0xff] }
 0x2d6   : > { %5223 = vset.pattern.permute.xlu1 %v7773_v55  ;;  %v6931_v51 = vadd.f32 %v2361_v25, %v2184_v12  ;;  %v7778_v55 = vld [vmem:[#allocation67_spill] sm:$0xff]  ;;  %v7791_v27 = vld [vmem:[#allocation62_spill] sm:$0xff] }
 0x2d7   : > { %3127 = vperm.xlu1 %5223, %v5502_v38   ;;  %v4892_v56 = vpop.f32.mrb[52].mxu1  ;;  %v6936_v23 = vadd.f32 %v2359_v36, %v2182_v1  ;;  %v7780_v36 = vld [vmem:[#allocation72_spill] sm:$0xff] }
 0x2d8   : > { %v6938_v30 = vpop.permute.xlu1 %3473  ;;  %v2171_v18 = vmul.f32 %v4892_v56, %v7776_v53  ;;  %v4912_v9 = vpop.f32.mrb[68].mxu0 }
 0x2d9   : > { %7775 = vst [vmem:[#allocation7_spill] sm:$0xff] %v6938_v30  ;;  %v2054_v40 = vpop.f32.mrb[53].mxu1  ;;  %v2364_v21 = vmul.f32 %v4912_v9, %v7777_v14  ;;  %v2247_v2 = vpop.f32.mrb[69].mxu0  ;;  %v7801_v30 = vld [vmem:[#allocation95_spill] sm:$0xff] }
 0x2da   : > { %v2187_v50 = vadd.f32 %v2171_v18, %v6837_v63  ;;  %v2169_v37 = vmul.f32 %v7778_v55, %v2054_v40  ;;  %v4893_v15 = vpop.f32.mrb[54].mxu1  ;;  %v4913_v13 = vpop.f32.mrb[70].mxu0  ;;  %v2362_v56 = vmul.f32 %v7780_v36, %v2247_v2  ;;  %v7781_v63 = vld [vmem:[#allocation58_spill] sm:$0xff]  ;;  %v7782_v40 = vld [vmem:[#allocation87_spill] sm:$0xff] }
 0x2db   : > { %5224 = vset.pattern.permute.xlu1 %v7664_v41  ;;  %v2172_v12 = vmul.f32 %v4893_v15, %v7779_v31  ;;  %v2057_v25 = vpop.f32.mrb[55].mxu1  ;;  %v2250_v18 = vpop.f32.mrb[71].mxu0  ;;  %v2365_v14 = vmul.f32 %v4913_v13, %v7782_v40  ;;  %v7783_v31 = vld [vmem:[#allocation85_spill] sm:$0xff] }
 0x2dc   : > { %v6946_v1 = vadd.f32 %v2364_v21, %v2187_v50  ;;  %v2185_v19 = vadd.f32 %v2169_v37, %v6841_v35  ;;  %3501 = vperm.xlu1 %5224, %v5484_v33   ;;  %v2170_v53 = vmul.f32 %v7781_v63, %v2057_v25  ;;  %v2363_v50 = vmul.f32 %v7783_v31, %v2250_v18  ;;  %v6960_v35 = vpop.permute.xlu0 %3300 }
 0x2dd   : > { %v2188_v9 = vadd.f32 %v2172_v12, %v6848_v45  ;;  %7785 = vst [vmem:[#allocation3_spill] sm:$0xff] %v6960_v35  ;;  %v7786_v45 = vld [vmem:[#allocation73_spill] sm:$0xff] }
 0x2de   : > { %v6954_v55 = vadd.f32 %v2362_v56, %v2185_v19  ;;  %v2186_v15 = vadd.f32 %v2170_v53, %v6851_v29  ;;  %v6958_v21 = vpop.permute.xlu1 %3847  ;;  %v7787_v29 = vld [vmem:[#allocation71_spill] sm:$0xff]  ;;  %v7788_v53 = vld [vmem:[#allocation78_spill] sm:$0xff] }
 0x2df   : > { %7784 = vst [vmem:[#allocation21_spill] sm:$0xff] %v6958_v21  ;;  %v6962_v37 = vadd.f32 %v2365_v14, %v2188_v9  ;;  %v4896_v2 = vpop.f32.mrb[56].mxu1 }
 0x2e0   : > { %v6964_v36 = vadd.f32 %v2363_v50, %v2186_v15  ;;  %5225 = vset.pattern.permute.xlu1 %v7667_v22  ;;  %v2175_v12 = vmul.f32 %v4896_v2, %v7786_v45  ;;  %v4916_v13 = vpop.f32.mrb[72].mxu0  ;;  %v2070_v25 = vpop.f32.mrb[57].mxu1  ;;  %v7789_v15 = vld [vmem:[#allocation76_spill] sm:$0xff] }
 0x2e1   : > { %3879 = vperm.xlu1 %5225, %v5471_v24   ;;  %v2173_v19 = vmul.f32 %v7787_v29, %v2070_v25  ;;  %v2263_v56 = vpop.f32.mrb[73].mxu0  ;;  %v2368_v18 = vmul.f32 %v4916_v13, %v7788_v53  ;;  %v4897_v9 = vpop.f32.mrb[58].mxu1  ;;  %v7790_v2 = vld [vmem:[#allocation64_spill] sm:$0xff] }
 0x2e2   : > { %v2191_v63 = vadd.f32 %v2175_v12, %v6861_v32  ;;  %v4917_v40 = vpop.f32.mrb[74].mxu0  ;;  %v2366_v31 = vmul.f32 %v7789_v15, %v2263_v56  ;;  %v2176_v45 = vmul.f32 %v4897_v9, %v7790_v2  ;;  %v2073_v21 = vpop.f32.mrb[59].mxu1  ;;  %v7792_v12 = vld [vmem:[#allocation91_spill] sm:$0xff]  ;;  %v7794_v56 = vld [vmem:[#allocation89_spill] sm:$0xff] }
 0x2e3   : > { %v2189_v14 = vadd.f32 %v2173_v19, %v6871_v11  ;;  %v6974_v50 = vpop.permute.xlu1 %3284  ;;  %v2174_v25 = vmul.f32 %v7791_v27, %v2073_v21  ;;  %v2266_v29 = vpop.f32.mrb[75].mxu0  ;;  %v2369_v13 = vmul.f32 %v4917_v40, %v7792_v12  ;;  %v7796_v40 = vld [vmem:[#allocation75_spill] sm:$0xff] }
 0x2e4   : > { %v6977_v49 = vadd.f32 %v2368_v18, %v2191_v63  ;;  %v2192_v32 = vadd.f32 %v2176_v45, %v6877_v60  ;;  %v6985_v11 = vpop.permute.xlu0 %3316  ;;  %v2367_v53 = vmul.f32 %v7794_v56, %v2266_v29  ;;  %v7795_v18 = vld [vmem:[#allocation77_spill] sm:$0xff] }
 0x2e5   : > { %v6980_v35 = vadd.f32 %v2366_v31, %v2189_v14  ;;  %3883 = vperm.xlu1 %5225, %v7715_v10   ;;  %7793 = vst [vmem:[#allocation14_spill] sm:$0xff] %v6985_v11  ;;  %v2190_v19 = vadd.f32 %v2174_v25, %v6879_v58  ;;  %v7797_v25 = vld [vmem:[#allocation82_spill] sm:$0xff] }
 0x2e6   : > { %v6989_v9 = vadd.f32 %v2369_v13, %v2192_v32  ;;  %v7798_v32 = vld [vmem:[#allocation68_spill] sm:$0xff] }
 0x2e7   : > { %v6991_v63 = vpop.permute.xlu1 %3288  ;;  %v4900_v27 = vpop.f32.mrb[60].mxu1  ;;  %v6993_v21 = vadd.f32 %v2367_v53, %v2190_v19  ;;  %v7799_v53 = vld [vmem:[#allocation80_spill] sm:$0xff] }
 0x2e8   : > { %v2179_v14 = vmul.f32 %v4900_v27, %v7795_v18  ;;  %v4920_v60 = vpop.f32.mrb[76].mxu0  ;;  %v2086_v15 = vpop.f32.mrb[61].mxu1  ;;  %v7800_v18 = vld [vmem:[#allocation66_spill] sm:$0xff] }
 0x2e9   : > { %5227 = vset.pattern.permute.xlu1 %v7651_v42  ;;  %v2177_v31 = vmul.f32 %v7796_v40, %v2086_v15  ;;  %v2279_v2 = vpop.f32.mrb[77].mxu0  ;;  %v4901_v45 = vpop.f32.mrb[62].mxu1  ;;  %v2372_v29 = vmul.f32 %v4920_v60, %v7797_v25 }
 0x2ea   : > { %3320 = vperm.xlu1 %5227, %v5502_v38   ;;  %v2195_v58 = vadd.f32 %v2179_v14, %v6891_v47  ;;  %v2180_v12 = vmul.f32 %v4901_v45, %v7798_v32  ;;  %v4921_v13 = vpop.f32.mrb[78].mxu0  ;;  %v2089_v19 = vpop.f32.mrb[63].mxu1  ;;  %v2370_v27 = vmul.f32 %v7799_v53, %v2279_v2  ;;  %v7803_v45 = vld [vmem:[#allocation93_spill] sm:$0xff] }
 0x2eb   : > { %v2193_v56 = vadd.f32 %v2177_v31, %v6897_v48  ;;  %v2178_v42 = vmul.f32 %v7800_v18, %v2089_v19  ;;  %v2282_v11 = vpop.f32.mrb[79].mxu0  ;;  %v2373_v26 = vmul.f32 %v4921_v13, %v7801_v30  ;;  %v7018_v31 = vpop.permute.xlu0 %3646  ;;  %v7804_v30 = vld [vmem:[#allocation99_spill] sm:$0xff]  ;;  %v7807_v19 = vld [vmem:[#allocation114_spill] sm:$0xff] }
 0x2ec   : > { %v7005_v15 = vadd.f32 %v2372_v29, %v2195_v58  ;;  %v2196_v40 = vadd.f32 %v2180_v12, %v6900_v57  ;;  %v7009_v47 = vpop.permute.xlu1 %3666  ;;  %v2371_v25 = vmul.f32 %v7803_v45, %v2282_v11 }
 0x2ed   : > { %7802 = vst [vmem:[#allocation12_spill] sm:$0xff] %v7009_v47  ;;  %v7011_v14 = vadd.f32 %v2370_v27, %v2193_v56  ;;  %v2194_v60 = vadd.f32 %v2178_v42, %v6908_v6  ;;  %v7806_v6 = vld [vmem:[#allocation84_spill] sm:$0xff] }
 0x2ee   : > { %v7015_v48 = vadd.f32 %v2373_v26, %v2196_v40  ;;  %5228 = vset.pattern.permute.xlu1 %v7662_v44  ;;  %v7808_v42 = vld [vmem:[#allocation112_spill] sm:$0xff] }
 0x2ef   : > { %v7020_v2 = vadd.f32 %v2371_v25, %v2194_v60  ;;  %3694 = vperm.xlu1 %5228, %v5484_v33   ;;  %v4928_v57 = vpop.f32.mrb[64].mxu1  ;;  %v7809_v60 = vld [vmem:[#allocation86_spill] sm:$0xff]  ;;  %v7828_v47 = vld [vmem:[#allocation92_spill] sm:$0xff] }
 0x2f0   : > { %v2553_v58 = vmul.f32 %v4928_v57, %v7804_v30  ;;  %v4948_v29 = vpop.f32.mrb[80].mxu0  ;;  %v2424_v32 = vpop.f32.mrb[65].mxu1 }
 0x2f1   : > { %v7024_v12 = vpop.permute.xlu1 %4040  ;;  %v2551_v13 = vmul.f32 %v7806_v6, %v2424_v32  ;;  %v2617_v11 = vpop.f32.mrb[81].mxu0  ;;  %v2746_v56 = vmul.f32 %v4948_v29, %v7807_v19  ;;  %v7810_v32 = vld [vmem:[#allocation97_spill] sm:$0xff]  ;;  %v7811_v6 = vld [vmem:[#allocation116_spill] sm:$0xff] }
 0x2f2   : > { %7805 = vst [vmem:[#allocation22_spill] sm:$0xff] %v7024_v12  ;;  %v2569_v26 = vadd.f32 %v2553_v58, %v6919_v46  ;;  %v4929_v53 = vpop.f32.mrb[66].mxu1  ;;  %v4949_v27 = vpop.f32.mrb[82].mxu0  ;;  %v2744_v40 = vmul.f32 %v7808_v42, %v2617_v11 }
 0x2f3   : > { %5230 = vset.pattern.permute.xlu1 %v7688_v0  ;;  %v2567_v18 = vadd.f32 %v2551_v13, %v6926_v8  ;;  %v2554_v45 = vmul.f32 %v4929_v53, %v7809_v60  ;;  %v2427_v25 = vpop.f32.mrb[67].mxu1  ;;  %v2620_v57 = vpop.f32.mrb[83].mxu0  ;;  %v2747_v19 = vmul.f32 %v4949_v27, %v7811_v6  ;;  %v7812_v13 = vld [vmem:[#allocation100_spill] sm:$0xff]  ;;  %v7814_v27 = vld [vmem:[#allocation101_spill] sm:$0xff] }
 0x2f4   : > { %v7033_v30 = vadd.f32 %v2746_v56, %v2569_v26  ;;  %4072 = vperm.xlu1 %5230, %v5471_v24   ;;  %v2552_v46 = vmul.f32 %v7810_v32, %v2427_v25  ;;  %v2745_v11 = vmul.f32 %v7812_v13, %v2620_v57  ;;  %v7045_v53 = vpop.permute.xlu0 %3658  ;;  %v7815_v32 = vld [vmem:[#allocation104_spill] sm:$0xff] }
 0x2f5   : > { %v7037_v58 = vadd.f32 %v2744_v40, %v2567_v18  ;;  %v2570_v29 = vadd.f32 %v2554_v45, %v6931_v51  ;;  %v7813_v18 = vld [vmem:[#allocation103_spill] sm:$0xff] }
 0x2f6   : > { %v2568_v8 = vadd.f32 %v2552_v46, %v6936_v23  ;;  %v7043_v42 = vpop.permute.xlu1 %3477 }
 0x2f7   : > { %v7047_v26 = vadd.f32 %v2747_v19, %v2570_v29  ;;  %v4932_v56 = vpop.f32.mrb[68].mxu1  ;;  %v7816_v29 = vld [vmem:[#allocation90_spill] sm:$0xff] }
 0x2f8   : > { %v7049_v24 = vadd.f32 %v2745_v11, %v2568_v8  ;;  %4076 = vperm.xlu1 %5230, %v7715_v10   ;;  %v2557_v40 = vmul.f32 %v4932_v56, %v7813_v18  ;;  %v4952_v51 = vpop.f32.mrb[84].mxu0  ;;  %v2440_v60 = vpop.f32.mrb[69].mxu1  ;;  %v7817_v10 = vld [vmem:[#allocation102_spill] sm:$0xff] }
 0x2f9   : > { %v2555_v45 = vmul.f32 %v7814_v27, %v2440_v60  ;;  %v2633_v23 = vpop.f32.mrb[85].mxu0  ;;  %v4933_v25 = vpop.f32.mrb[70].mxu1  ;;  %v2750_v46 = vmul.f32 %v4952_v51, %v7815_v32  ;;  %v7819_v51 = vld [vmem:[#allocation88_spill] sm:$0xff] }
 0x2fa   : > { %v2573_v57 = vadd.f32 %v2557_v40, %v6946_v1  ;;  %v7056_v6 = vpop.permute.xlu1 %3481  ;;  %v2558_v19 = vmul.f32 %v4933_v25, %v7816_v29  ;;  %v4953_v8 = vpop.f32.mrb[86].mxu0  ;;  %v2748_v11 = vmul.f32 %v7817_v10, %v2633_v23  ;;  %v7818_v1 = vld [vmem:[#allocation119_spill] sm:$0xff] }
 0x2fb   : > { %v2571_v13 = vadd.f32 %v2555_v45, %v6954_v55  ;;  %v2443_v56 = vpop.f32.mrb[71].mxu1  ;;  %v2636_v18 = vpop.f32.mrb[87].mxu0  ;;  %v2751_v40 = vmul.f32 %v4953_v8, %v7818_v1  ;;  %v7820_v45 = vld [vmem:[#allocation117_spill] sm:$0xff]  ;;  %v7823_v29 = vld [vmem:[#allocation107_spill] sm:$0xff] }
 0x2fc   : > { %v7061_v12 = vadd.f32 %v2750_v46, %v2573_v57  ;;  %5232 = vset.pattern.permute.xlu1 %v7664_v41  ;;  %v2574_v60 = vadd.f32 %v2558_v19, %v6962_v37  ;;  %v2556_v27 = vmul.f32 %v7819_v51, %v2443_v56  ;;  %v2749_v23 = vmul.f32 %v7820_v45, %v2636_v18  ;;  %v7074_v57 = vpop.permute.xlu0 %3662  ;;  %v7825_v18 = vld [vmem:[#allocation105_spill] sm:$0xff]  ;;  %v7826_v51 = vld [vmem:[#allocation94_spill] sm:$0xff] }
 0x2fd   : > { %v7067_v32 = vadd.f32 %v2748_v11, %v2571_v13  ;;  %3513 = vperm.xlu1 %5232, %v5502_v38   ;;  %7821 = vst [vmem:[#allocation13_spill] sm:$0xff] %v7074_v57  ;;  %v7824_v11 = vld [vmem:[#allocation108_spill] sm:$0xff] }
 0x2fe   : > { %v7070_v25 = vadd.f32 %v2751_v40, %v2574_v60  ;;  %v2572_v55 = vadd.f32 %v2556_v27, %v6964_v36 }
 0x2ff   : > { %v4936_v46 = vpop.f32.mrb[72].mxu1 }
 0x300   : > { %v7076_v41 = vadd.f32 %v2749_v23, %v2572_v55  ;;  %v7078_v37 = vpop.permute.xlu1 %3859  ;;  %v2561_v19 = vmul.f32 %v4936_v46, %v7823_v29  ;;  %v4956_v8 = vpop.f32.mrb[88].mxu0  ;;  %v7827_v29 = vld [vmem:[#allocation106_spill] sm:$0xff] }
 0x301   : > { %7822 = vst [vmem:[#allocation20_spill] sm:$0xff] %v7078_v37  ;;  %5233 = vset.pattern.permute.xlu1 %v7667_v22  ;;  %v2456_v13 = vpop.f32.mrb[73].mxu1  ;;  %v2649_v10 = vpop.f32.mrb[89].mxu0  ;;  %v2754_v56 = vmul.f32 %v4956_v8, %v7824_v11 }
 0x302   : > { %3887 = vperm.xlu1 %5233, %v5484_v33   ;;  %v2577_v36 = vadd.f32 %v2561_v19, %v6977_v49  ;;  %v2559_v60 = vmul.f32 %v7825_v18, %v2456_v13  ;;  %v4937_v1 = vpop.f32.mrb[74].mxu1  ;;  %v4957_v40 = vpop.f32.mrb[90].mxu0  ;;  %v2752_v37 = vmul.f32 %v7827_v29, %v2649_v10  ;;  %v7829_v19 = vld [vmem:[#allocation122_spill] sm:$0xff]  ;;  %v7832_v10 = vld [vmem:[#allocation4_spill] sm:$0xff]  ;;  %v7835_v29 = vld [vmem:[#allocation113_spill] sm:$0xff] }
 0x303   : > { %v2562_v27 = vmul.f32 %v4937_v1, %v7826_v51  ;;  %v2459_v55 = vpop.f32.mrb[75].mxu1  ;;  %v2652_v45 = vpop.f32.mrb[91].mxu0  ;;  %v2755_v8 = vmul.f32 %v4957_v40, %v7829_v19  ;;  %v7830_v1 = vld [vmem:[#allocation121_spill] sm:$0xff] }
 0x304   : > { %v7087_v23 = vadd.f32 %v2754_v56, %v2577_v36  ;;  %v2575_v46 = vadd.f32 %v2559_v60, %v6980_v35  ;;  %v2560_v33 = vmul.f32 %v7828_v47, %v2459_v55  ;;  %v2753_v51 = vmul.f32 %v7830_v1, %v2652_v45  ;;  %v7101_v36 = vpop.permute.xlu0 %3682  ;;  %v7833_v56 = vld [vmem:[#allocation110_spill] sm:$0xff]  ;;  %v7837_v1 = vld [vmem:[#allocation111_spill] sm:$0xff] }
 0x305   : > { %v2578_v49 = vadd.f32 %v2562_v27, %v6989_v9  ;;  %v7094_v11 = vpop.permute.xlu1 %3292  ;;  %7831 = vst [vmem:[#allocation27_spill] sm:$0xff] %v7101_v36  ;;  %v7834_v27 = vld [vmem:[#allocation109_spill] sm:$0xff]  ;;  %v7838_v36 = vld [vmem:[#allocation126_spill] sm:$0xff] }
 0x306   : > { %v7096_v13 = vadd.f32 %v2752_v37, %v2575_v46  ;;  %v2576_v18 = vadd.f32 %v2560_v33, %v6993_v21  ;;  %5234 = vset.pattern.permute.xlu1 %v7662_v44 }
 0x307   : > { %v7103_v35 = vadd.f32 %v2755_v8, %v2578_v49  ;;  %3702 = vperm.xlu1 %5234, %v7832_v10   ;;  %v4940_v47 = vpop.f32.mrb[76].mxu1  ;;  %v7836_v49 = vld [vmem:[#allocation98_spill] sm:$0xff] }
 0x308   : > { %v7106_v9 = vadd.f32 %v2753_v51, %v2576_v18  ;;  %v2565_v60 = vmul.f32 %v4940_v47, %v7833_v56  ;;  %v4960_v40 = vpop.f32.mrb[92].mxu0  ;;  %v2472_v37 = vpop.f32.mrb[77].mxu1 }
 0x309   : > { %v2563_v55 = vmul.f32 %v7834_v27, %v2472_v37  ;;  %v2665_v21 = vpop.f32.mrb[93].mxu0  ;;  %v4941_v46 = vpop.f32.mrb[78].mxu1  ;;  %v2758_v33 = vmul.f32 %v4960_v40, %v7835_v29 }
 0x30a   : > { %v7110_v45 = vpop.permute.xlu1 %3670  ;;  %v2581_v44 = vadd.f32 %v2565_v60, %v7005_v15  ;;  %v2566_v19 = vmul.f32 %v4941_v46, %v7836_v49  ;;  %v4961_v8 = vpop.f32.mrb[94].mxu0  ;;  %v2756_v51 = vmul.f32 %v7837_v1, %v2665_v21  ;;  %v7839_v15 = vld [vmem:[#allocation96_spill] sm:$0xff] }
 0x30b   : > { %3706 = vperm.xlu1 %5234, %v5502_v38   ;;  %v2579_v18 = vadd.f32 %v2563_v55, %v7011_v14  ;;  %v2475_v47 = vpop.f32.mrb[79].mxu1  ;;  %v2668_v56 = vpop.f32.mrb[95].mxu0  ;;  %v2759_v57 = vmul.f32 %v4961_v8, %v7838_v36  ;;  %v7840_v49 = vld [vmem:[#allocation124_spill] sm:$0xff]  ;;  %v7841_v36 = vld [vmem:[#allocation129_spill] sm:$0xff]  ;;  %v7842_v8 = vld [vmem:[#allocation115_spill] sm:$0xff] }
 0x30c   : > { %v7118_v37 = vadd.f32 %v2758_v33, %v2581_v44  ;;  %v2582_v27 = vadd.f32 %v2566_v19, %v7015_v48  ;;  %v2564_v60 = vmul.f32 %v7839_v15, %v2475_v47  ;;  %v2757_v14 = vmul.f32 %v7840_v49, %v2668_v56  ;;  %v7132_v21 = vpop.permute.xlu0 %3686 }
 0x30d   : > { %v7123_v40 = vadd.f32 %v2756_v51, %v2579_v18 }
 0x30e   : > { %v7125_v46 = vadd.f32 %v2759_v57, %v2582_v27  ;;  %v2580_v29 = vadd.f32 %v2564_v60, %v7020_v2  ;;  %v7129_v55 = vpop.permute.xlu1 %3674  ;;  %v7844_v27 = vld [vmem:[#allocation118_spill] sm:$0xff] }
 0x30f   : > { %5236 = vset.pattern.permute.xlu1 %v7688_v0 }
 0x310   : > { %v7134_v44 = vadd.f32 %v2757_v14, %v2580_v29  ;;  %4084 = vperm.xlu1 %5236, %v5491_v39   ;;  %v4968_v48 = vpop.f32.mrb[80].mxu1 }
 0x311   : > { %v2939_v33 = vmul.f32 %v4968_v48, %v7841_v36  ;;  %v4988_v19 = vpop.f32.mrb[96].mxu0  ;;  %v2810_v57 = vpop.f32.mrb[81].mxu1 }
 0x312   : > { %v2937_v18 = vmul.f32 %v7842_v8, %v2810_v57  ;;  %v3003_v2 = vpop.f32.mrb[97].mxu0  ;;  %v4969_v1 = vpop.f32.mrb[82].mxu1  ;;  %v3132_v47 = vmul.f32 %v4988_v19, %v6610_v43  ;;  %v7846_v43 = vld [vmem:[#allocation128_spill] sm:$0xff] }
 0x313   : > { %v2955_v51 = vadd.f32 %v2939_v33, %v7033_v30  ;;  %v7141_v56 = vpop.permute.xlu1 %4052  ;;  %v2940_v15 = vmul.f32 %v4969_v1, %v7844_v27  ;;  %v4989_v60 = vpop.f32.mrb[98].mxu0  ;;  %v3130_v29 = vmul.f32 %v6593_v5, %v3003_v2  ;;  %v7845_v30 = vld [vmem:[#allocation141_spill] sm:$0xff]  ;;  %v7848_v5 = vld [vmem:[#allocation135_spill] sm:$0xff] }
 0x314   : > { %7843 = vst [vmem:[#allocation11_spill] sm:$0xff] %v7141_v56  ;;  %v2953_v39 = vadd.f32 %v2937_v18, %v7037_v58  ;;  %5237 = vset.pattern.permute.xlu1 %v7667_v22  ;;  %v2813_v49 = vpop.f32.mrb[83].mxu1  ;;  %v3006_v14 = vpop.f32.mrb[99].mxu0  ;;  %v3133_v33 = vmul.f32 %v4989_v60, %v7845_v30  ;;  %v7850_v60 = vld [vmem:[#allocation131_spill] sm:$0xff] }
 0x315   : > { %v7147_v48 = vadd.f32 %v3132_v47, %v2955_v51  ;;  %v2956_v36 = vadd.f32 %v2940_v15, %v7047_v26  ;;  %3895 = vperm.xlu1 %5237, %v7832_v10   ;;  %v2938_v19 = vmul.f32 %v7846_v43, %v2813_v49  ;;  %v7155_v8 = vpop.permute.xlu0 %3698  ;;  %v3131_v18 = vmul.f32 %v7848_v5, %v3006_v14  ;;  %v7849_v51 = vld [vmem:[#allocation133_spill] sm:$0xff]  ;;  %v7851_v14 = vld [vmem:[#allocation140_spill] sm:$0xff]  ;;  %v7852_v30 = vld [vmem:[#allocation123_spill] sm:$0xff] }
 0x316   : > { %v7153_v57 = vadd.f32 %v3130_v29, %v2953_v39  ;;  %7847 = vst [vmem:[#allocation25_spill] sm:$0xff] %v7155_v8 }
 0x317   : > { %v7157_v58 = vadd.f32 %v3133_v33, %v2956_v36  ;;  %v2954_v22 = vadd.f32 %v2938_v19, %v7049_v24 }
 0x318   : > { %v7161_v2 = vpop.permute.xlu1 %3485  ;;  %v4972_v1 = vpop.f32.mrb[84].mxu1 }
 0x319   : > { %v7163_v26 = vadd.f32 %v3131_v18, %v2954_v22  ;;  %5238 = vset.pattern.permute.xlu1 %v7688_v0  ;;  %v2943_v47 = vmul.f32 %v4972_v1, %v7849_v51  ;;  %v4992_v27 = vpop.f32.mrb[100].mxu0  ;;  %v2826_v15 = vpop.f32.mrb[85].mxu1  ;;  %v7853_v22 = vld [vmem:[#allocation138_spill] sm:$0xff]  ;;  %v7854_v18 = vld [vmem:[#allocation120_spill] sm:$0xff] }
 0x31a   : > { %4088 = vperm.xlu1 %5238, %v7832_v10   ;;  %v2941_v39 = vmul.f32 %v7850_v60, %v2826_v15  ;;  %v3019_v29 = vpop.f32.mrb[101].mxu0  ;;  %v4973_v49 = vpop.f32.mrb[86].mxu1  ;;  %v3136_v36 = vmul.f32 %v4992_v27, %v7851_v14  ;;  %v7855_v60 = vld [vmem:[#allocation144_spill] sm:$0xff] }
 0x31b   : > { %v2959_v24 = vadd.f32 %v2943_v47, %v7061_v12  ;;  %v2944_v33 = vmul.f32 %v4973_v49, %v7852_v30  ;;  %v4993_v43 = vpop.f32.mrb[102].mxu0  ;;  %v2829_v19 = vpop.f32.mrb[87].mxu1  ;;  %v3134_v5 = vmul.f32 %v7853_v22, %v3019_v29  ;;  %v7856_v49 = vld [vmem:[#allocation143_spill] sm:$0xff] }
 0x31c   : > { %v2957_v0 = vadd.f32 %v2941_v39, %v7067_v32  ;;  %v2942_v1 = vmul.f32 %v7854_v18, %v2829_v19  ;;  %v3022_v51 = vpop.f32.mrb[103].mxu0  ;;  %v3137_v56 = vmul.f32 %v4993_v43, %v7855_v60  ;;  %v7188_v39 = vpop.permute.xlu0 %3465 }
 0x31d   : > { %v7175_v10 = vadd.f32 %v3136_v36, %v2959_v24  ;;  %v2960_v15 = vadd.f32 %v2944_v33, %v7070_v25  ;;  %v7179_v12 = vpop.permute.xlu1 %3863  ;;  %v3135_v14 = vmul.f32 %v7856_v49, %v3022_v51  ;;  %v7857_v36 = vld [vmem:[#allocation136_spill] sm:$0xff] }
 0x31e   : > { %v7181_v47 = vadd.f32 %v3134_v5, %v2957_v0  ;;  %v2958_v27 = vadd.f32 %v2942_v1, %v7076_v41  ;;  %4092 = vperm.xlu1 %5238, %v5502_v38   ;;  %v7858_v0 = vld [vmem:[#allocation145_spill] sm:$0xff]  ;;  %v7859_v5 = vld [vmem:[#allocation134_spill] sm:$0xff]  ;;  %v7860_v1 = vld [vmem:[#allocation127_spill] sm:$0xff] }
 0x31f   : > { %v7186_v32 = vadd.f32 %v3137_v56, %v2960_v15 }
 0x320   : > { %v7190_v29 = vadd.f32 %v3135_v14, %v2958_v27  ;;  %v4976_v24 = vpop.f32.mrb[88].mxu1  ;;  %v7861_v14 = vld [vmem:[#allocation142_spill] sm:$0xff] }
 0x321   : > { %v7192_v25 = vpop.permute.xlu1 %3867  ;;  %v2947_v30 = vmul.f32 %v4976_v24, %v7857_v36  ;;  %v4996_v33 = vpop.f32.mrb[104].mxu0  ;;  %v7862_v36 = vld [vmem:[#allocation125_spill] sm:$0xff] }
 0x322   : > { %v2842_v43 = vpop.f32.mrb[89].mxu1  ;;  %v3035_v19 = vpop.f32.mrb[105].mxu0  ;;  %v3140_v22 = vmul.f32 %v4996_v33, %v7858_v0 }
 0x323   : > { %v2963_v41 = vadd.f32 %v2947_v30, %v7087_v23  ;;  %v2945_v38 = vmul.f32 %v7859_v5, %v2842_v43  ;;  %v4977_v56 = vpop.f32.mrb[90].mxu1  ;;  %v4997_v18 = vpop.f32.mrb[106].mxu0  ;;  %v3138_v24 = vmul.f32 %v7861_v14, %v3035_v19  ;;  %v7863_v23 = vmov 0.0  }
 0x324   : > { %v2948_v51 = vmul.f32 %v4977_v56, %v7860_v1  ;;  %v2845_v15 = vpop.f32.mrb[91].mxu1  ;;  %v3038_v60 = vpop.f32.mrb[107].mxu0  ;;  %5118 = vmatprep.mubr.msk.bf16.mxu0 %vm5271_vm3, %v7863_v23  ;;  %v3141_v33 = vmul.f32 %v4997_v18, %v6687_v62  ;;  %v7864_v56 = vld [vmem:[#allocation139_spill] sm:$0xff]  ;;  %v7865_v62 = vld [vmem:[#allocation137_spill] sm:$0xff] }
 0x325   : > { %v7199_v27 = vadd.f32 %v3140_v22, %v2963_v41  ;;  %v2961_v49 = vadd.f32 %v2945_v38, %v7096_v13  ;;  %v2946_v8 = vmul.f32 %v7862_v36, %v2845_v15  ;;  %v3139_v22 = vmul.f32 %v6667_v16, %v3038_v60  ;;  %v7213_v13 = vpop.permute.xlu0 %3469 }
 0x326   : > { %v2964_v30 = vadd.f32 %v2948_v51, %v7103_v35  ;;  %v7207_v43 = vpop.permute.xlu1 %3304 }
 0x327   : > { %v7209_v0 = vadd.f32 %v3138_v24, %v2961_v49  ;;  %v2962_v41 = vadd.f32 %v2946_v8, %v7106_v9  ;;  %v7866_v8 = vld [vmem:[#allocation132_spill] sm:$0xff] }
 0x328   : > { %v7215_v19 = vadd.f32 %v3141_v33, %v2964_v30  ;;  %v4980_v5 = vpop.f32.mrb[92].mxu1 }
 0x329   : > { %v7217_v38 = vadd.f32 %v3139_v22, %v2962_v41  ;;  %v2951_v1 = vmul.f32 %v4980_v5, %v7864_v56  ;;  %v5000_v35 = vpop.f32.mrb[108].mxu0  ;;  %v2858_v51 = vpop.f32.mrb[93].mxu1 }
 0x32a   : > { %v2949_v18 = vmul.f32 %v7865_v62, %v2858_v51  ;;  %v3051_v15 = vpop.f32.mrb[109].mxu0  ;;  %v4981_v49 = vpop.f32.mrb[94].mxu1  ;;  %v3144_v9 = vmul.f32 %v5000_v35, %v6716_v3 }
 0x32b   : > { %v2967_v14 = vadd.f32 %v2951_v1, %v7118_v37  ;;  %v7223_v16 = vpop.permute.xlu1 %3678  ;;  %v2952_v60 = vmul.f32 %v4981_v49, %v7866_v8  ;;  %v7226_v24 = vpop.f32.mrb[110].mxu0  ;;  %v3142_v30 = vmul.f32 %v6693_v61, %v3051_v15  ;;  %v7867_v37 = vld [vmem:[#allocation130_spill] sm:$0xff] }
 0x32c   : > { %v2965_v36 = vadd.f32 %v2949_v18, %v7123_v40  ;;  %v2861_v33 = vpop.f32.mrb[95].mxu1  ;;  %v3054_v41 = vpop.f32.mrb[111].mxu0 }
 0x32d   : > { %v7230_v22 = vadd.f32 %v3144_v9, %v2967_v14  ;;  %v7233_v5 = vadd.f32 %v2952_v60, %v7125_v46  ;;  %v2950_v56 = vmul.f32 %v7867_v37, %v2861_v33  ;;  %v3143_v35 = vmul.f32 %v6703_v52, %v3054_v41  ;;  %v7240_v51 = vpop.permute.xlu0 %3489 }
 0x32e   : > { %v7236_v3 = vadd.f32 %v3142_v30, %v2965_v36 }
 0x32f   : > { %v2966_v1 = vadd.f32 %v2950_v56, %v7134_v44 }
 0x330   : > { %v7242_v40 = vpop.permute.xlu1 %4056 }
 0x331   : > { %v7244_v61 = vadd.f32 %v3143_v35, %v2966_v1  ;;  %v5008_v62 = vpop.f32.mrb[96].mxu1  ;;  %v5028_v18 = vpop.f32.mrb[112].mxu0 }
 0x332   : > { %v3325_v15 = vmul.f32 %v5008_v62, %v6875_v20  ;;  %v3196_v46 = vpop.f32.mrb[97].mxu1  ;;  %v3389_v49 = vpop.f32.mrb[113].mxu0  ;;  %v3518_v52 = vmul.f32 %v5028_v18, %v6821_v17 }
 0x333   : > { %v3323_v14 = vmul.f32 %v6727_v59, %v3196_v46  ;;  %v5009_v9 = vpop.f32.mrb[98].mxu1  ;;  %v5029_v8 = vpop.f32.mrb[114].mxu0  ;;  %v3516_v41 = vmul.f32 %v6744_v4, %v3389_v49 }
 0x334   : > { %v3341_v44 = vadd.f32 %v3325_v15, %v7147_v48  ;;  %v7250_v60 = vpop.permute.xlu1 %4060  ;;  %v3326_v36 = vmul.f32 %v5009_v9, %v6780_v28  ;;  %v3199_v30 = vpop.f32.mrb[99].mxu1  ;;  %v3519_v48 = vmul.f32 %v5029_v8, %v7188_v39 }
 0x335   : > { %v3339_v33 = vadd.f32 %v3323_v14, %v7153_v57  ;;  %v3324_v20 = vmul.f32 %v6846_v54, %v3199_v30  ;;  %v3392_v37 = vpop.f32.mrb[115].mxu0  ;;  %v3494_v35 = vpop.permute.xlu0 %3493 }
 0x336   : > { %v7256_v56 = vadd.f32 %v3518_v52, %v3341_v44  ;;  %v3342_v59 = vadd.f32 %v3326_v36, %v7157_v58  ;;  %v3517_v28 = vmul.f32 %v6762_v34, %v3392_v37  ;;  %v7868_v36 = vld [vmem:[#allocation8_spill] sm:$0xff] }
 0x337   : > { %v7260_v1 = vadd.f32 %v3516_v41, %v3339_v33  ;;  %v3340_v17 = vadd.f32 %v3324_v20, %v7163_v26  ;;  %v7869_v20 = vld [vmem:[#allocation7_spill] sm:$0xff] }
 0x338   : > { %v7264_v62 = vadd.f32 %v3519_v48, %v3342_v59 }
 0x339   : > { %v7266_v57 = vadd.f32 %v3517_v28, %v3340_v17  ;;  %v3498_v4 = vpop.permute.xlu1 %3497  ;;  %v5012_v54 = vpop.f32.mrb[100].mxu1  ;;  %v7870_v17 = vld [vmem:[#allocation3_spill] sm:$0xff] }
 0x33a   : > { %v3329_v18 = vmul.f32 %v5012_v54, %v6974_v50  ;;  %v5032_v15 = vpop.f32.mrb[116].mxu0  ;;  %v3212_v46 = vpop.f32.mrb[101].mxu1 }
 0x33b   : > { %v3327_v58 = vmul.f32 %v6906_v7, %v3212_v46  ;;  %v3405_v39 = vpop.f32.mrb[117].mxu0  ;;  %v5013_v49 = vpop.f32.mrb[102].mxu1  ;;  %v3522_v26 = vmul.f32 %v5032_v15, %v7043_v42 }
 0x33c   : > { %v3345_v14 = vadd.f32 %v3329_v18, %v7175_v10  ;;  %v3330_v34 = vmul.f32 %v5013_v49, %v6991_v63  ;;  %v5033_v9 = vpop.f32.mrb[118].mxu0  ;;  %v3215_v8 = vpop.f32.mrb[103].mxu1  ;;  %v3520_v52 = vmul.f32 %v7213_v13, %v3405_v39 }
 0x33d   : > { %v3343_v44 = vadd.f32 %v3327_v58, %v7181_v47  ;;  %v3523_v50 = vmul.f32 %v5033_v9, %v7056_v6  ;;  %v3328_v30 = vmul.f32 %v7868_v36, %v3215_v8  ;;  %v3408_v33 = vpop.f32.mrb[119].mxu0  ;;  %v3506_v47 = vpop.permute.xlu0 %3505  ;;  %v7871_v9 = vld [vmem:[#allocation23_spill] sm:$0xff] }
 0x33e   : > { %v7277_v7 = vadd.f32 %v3522_v26, %v3345_v14  ;;  %v3346_v41 = vadd.f32 %v3330_v34, %v7186_v32  ;;  %v7280_v10 = vpop.permute.xlu1 %3871  ;;  %v3521_v37 = vmul.f32 %v7869_v20, %v3408_v33 }
 0x33f   : > { %v7282_v42 = vadd.f32 %v3520_v52, %v3343_v44  ;;  %v3344_v63 = vadd.f32 %v3328_v30, %v7190_v29 }
 0x340   : > { %v7286_v59 = vadd.f32 %v3523_v50, %v3346_v41  ;;  %v7872_v41 = vld [vmem:[#allocation14_spill] sm:$0xff] }
 0x341   : > { %v7288_v13 = vadd.f32 %v3521_v37, %v3344_v63  ;;  %v5016_v6 = vpop.f32.mrb[104].mxu1  ;;  %v5036_v48 = vpop.f32.mrb[120].mxu0 }
 0x342   : > { %v3333_v28 = vmul.f32 %v5016_v6, %v7870_v17  ;;  %v3228_v54 = vpop.f32.mrb[105].mxu1  ;;  %v3421_v18 = vpop.f32.mrb[121].mxu0  ;;  %v3526_v39 = vmul.f32 %v5036_v48, %v3494_v35 }
 0x343   : > { %v3309_v32 = vpop.permute.xlu1 %3308  ;;  %v3331_v15 = vmul.f32 %v7094_v11, %v3228_v54  ;;  %v3524_v46 = vmul.f32 %v7161_v2, %v3421_v18  ;;  %v5017_v58 = vpop.f32.mrb[106].mxu1 }
 0x344   : > { %v3349_v29 = vadd.f32 %v3333_v28, %v7199_v27  ;;  %v3334_v49 = vmul.f32 %v5017_v58, %v7207_v43  ;;  %v5037_v14 = vpop.f32.mrb[122].mxu0  ;;  %v3231_v26 = vpop.f32.mrb[107].mxu1 }
 0x345   : > { %v3347_v34 = vadd.f32 %v3331_v15, %v7209_v0  ;;  %v3332_v8 = vmul.f32 %v7871_v9, %v3231_v26  ;;  %v3424_v44 = vpop.f32.mrb[123].mxu0  ;;  %v3527_v11 = vmul.f32 %v5037_v14, %v3498_v4  ;;  %v3510_v30 = vpop.permute.xlu0 %3509  ;;  %v7873_v14 = vld [vmem:[#allocation18_spill] sm:$0xff] }
 0x346   : > { %v7297_v52 = vadd.f32 %v3526_v39, %v3349_v29  ;;  %v3350_v50 = vadd.f32 %v3334_v49, %v7215_v19  ;;  %v3525_v27 = vmul.f32 %v7240_v51, %v3424_v44 }
 0x347   : > { %v7300_v36 = vadd.f32 %v3524_v46, %v3347_v34  ;;  %v3348_v2 = vadd.f32 %v3332_v8, %v7217_v38  ;;  %v3313_v35 = vpop.permute.xlu1 %3312 }
 0x348   : > { %v7304_v43 = vadd.f32 %v3527_v11, %v3350_v50  ;;  %v7874_v11 = vld [vmem:[#allocation21_spill] sm:$0xff] }
 0x349   : > { %v7306_v33 = vadd.f32 %v3525_v27, %v3348_v2  ;;  %v5020_v0 = vpop.f32.mrb[108].mxu1  ;;  %v7319_v58 = vpop.permute.xlu0 %4044 }
 0x34a   : > { %v3337_v63 = vmul.f32 %v5020_v0, %v7872_v41  ;;  %v5040_v20 = vpop.f32.mrb[124].mxu0  ;;  %v3244_v37 = vpop.f32.mrb[109].mxu1  ;;  %v7876_v41 = vld [vmem:[#allocation19_spill] sm:$0xff] }
 0x34b   : > { %v3335_v6 = vmul.f32 %v3309_v32, %v3244_v37  ;;  %v3437_v19 = vpop.f32.mrb[125].mxu0  ;;  %v7309_v4 = vpop.f32.mrb[110].mxu1  ;;  %v3530_v38 = vmul.f32 %v5040_v20, %v3510_v30  ;;  %v7875_v30 = vld [vmem:[#allocation17_spill] sm:$0xff] }
 0x34c   : > { %v3353_v48 = vadd.f32 %v3337_v63, %v7230_v22  ;;  %v7312_v17 = vpop.permute.xlu1 %3690  ;;  %v7314_v51 = vpop.f32.mrb[126].mxu0 }
 0x34d   : > { %v3351_v28 = vadd.f32 %v3335_v6, %v7236_v3  ;;  %v3247_v54 = vpop.f32.mrb[111].mxu1  ;;  %v3440_v18 = vpop.f32.mrb[127].mxu0  ;;  %v7877_v6 = vld [vmem:[#allocation6_spill] sm:$0xff] }
 0x34e   : > { %v7317_v15 = vadd.f32 %v3530_v38, %v3353_v48  ;;  %v3336_v46 = vmul.f32 %v3313_v35, %v3247_v54  ;;  %v3529_v29 = vmul.f32 %v3506_v47, %v3440_v18  ;;  %v7878_v54 = vld [vmem:[#allocation10_spill] sm:$0xff] }
 0x350   : > { %v3352_v32 = vadd.f32 %v3336_v46, %v7244_v61 }
 0x351   : > { %v7322_v39 = vpop.permute.xlu1 %4064  ;;  %v5048_v22 = vpop.f32.mrb[112].mxu1 }
 0x352   : > { %v7324_v49 = vadd.f32 %v3529_v29, %v3352_v32  ;;  %v3711_v26 = vmul.f32 %v5048_v22, %v7873_v14  ;;  %v5068_v34 = vpop.f32.mrb[128].mxu0  ;;  %v3582_v9 = vpop.f32.mrb[113].mxu1 }
 0x353   : > { %v3709_v3 = vmul.f32 %v7018_v31, %v3582_v9  ;;  %v3775_v8 = vpop.f32.mrb[129].mxu0  ;;  %v5049_v44 = vpop.f32.mrb[114].mxu1  ;;  %v3904_v2 = vmul.f32 %v5068_v34, %v7874_v11 }
 0x354   : > { %v3727_v50 = vadd.f32 %v3711_v26, %v7256_v56  ;;  %v3712_v61 = vmul.f32 %v5049_v44, %v7045_v53  ;;  %v5069_v47 = vpop.f32.mrb[130].mxu0  ;;  %v3585_v27 = vpop.f32.mrb[115].mxu1  ;;  %v3902_v0 = vmul.f32 %v7875_v30, %v3775_v8 }
 0x355   : > { %v3725_v35 = vadd.f32 %v3709_v3, %v7260_v1  ;;  %v3710_v63 = vmul.f32 %v7876_v41, %v3585_v27  ;;  %v3778_v20 = vpop.f32.mrb[131].mxu0  ;;  %v3905_v48 = vmul.f32 %v5069_v47, %v7877_v6  ;;  %v7345_v32 = vpop.permute.xlu0 %4048  ;;  %v7879_v3 = vld [vmem:[#allocation13_spill] sm:$0xff]  ;;  %v7881_v41 = vld [vmem:[#allocation12_spill] sm:$0xff] }
 0x356   : > { %v7334_v37 = vadd.f32 %v3904_v2, %v3727_v50  ;;  %v3728_v31 = vadd.f32 %v3712_v61, %v7264_v62  ;;  %v3128_v56 = vpop.permute.xlu1 %3127  ;;  %v3903_v18 = vmul.f32 %v7878_v54, %v3778_v20 }
 0x357   : > { %v7338_v38 = vadd.f32 %v3902_v0, %v3725_v35  ;;  %v3726_v53 = vadd.f32 %v3710_v63, %v7266_v57  ;;  %v3145_v1 = vmul.f32 %v7226_v24, %v3128_v56 }
 0x358   : > { %v7343_v46 = vadd.f32 %v3905_v48, %v3728_v31 }
 0x359   : > { %v7347_v29 = vadd.f32 %v3903_v18, %v3726_v53  ;;  %v7350_v22 = vadd.f32 %v3145_v1, %v7233_v5  ;;  %v5052_v62 = vpop.f32.mrb[116].mxu1  ;;  %v7880_v5 = vld [vmem:[#allocation15_spill] sm:$0xff]  ;;  %v7368_v48 = vpop.permute.xlu0 %4068 }
 0x35a   : > { %v3715_v14 = vmul.f32 %v5052_v62, %v7110_v45  ;;  %v5072_v26 = vpop.f32.mrb[132].mxu0  ;;  %v3598_v34 = vpop.f32.mrb[117].mxu1 }
 0x35b   : > { %v3908_v57 = vmul.f32 %v5072_v26, %v7179_v12  ;;  %v3502_v9 = vpop.permute.xlu1 %3501  ;;  %v3713_v8 = vmul.f32 %v7879_v3, %v3598_v34  ;;  %v3791_v24 = vpop.f32.mrb[133].mxu0 }
 0x35c   : > { %v3731_v44 = vadd.f32 %v3715_v14, %v7277_v7  ;;  %v3528_v50 = vmul.f32 %v3502_v9, %v3437_v19  ;;  %v5053_v11 = vpop.f32.mrb[118].mxu1  ;;  %v5073_v2 = vpop.f32.mrb[134].mxu0  ;;  %v3906_v47 = vmul.f32 %v7880_v5, %v3791_v24 }
 0x35d   : > { %v3729_v61 = vadd.f32 %v3713_v8, %v7282_v42  ;;  %v3716_v27 = vmul.f32 %v5053_v11, %v7129_v55  ;;  %v3909_v45 = vmul.f32 %v5073_v2, %v7192_v25  ;;  %v3601_v35 = vpop.f32.mrb[119].mxu1  ;;  %v3794_v30 = vpop.f32.mrb[135].mxu0  ;;  %v7882_v42 = vld [vmem:[#allocation20_spill] sm:$0xff] }
 0x35e   : > { %v7360_v12 = vadd.f32 %v3908_v57, %v3731_v44  ;;  %v3544_v0 = vadd.f32 %v3528_v50, %v3351_v28  ;;  %v3714_v63 = vmul.f32 %v7881_v41, %v3601_v35  ;;  %v3907_v31 = vmul.f32 %v7882_v42, %v3794_v30  ;;  %v7883_v44 = vld [vmem:[#allocation27_spill] sm:$0xff] }
 0x35f   : > { %v7363_v20 = vadd.f32 %v3906_v47, %v3729_v61  ;;  %v3732_v7 = vadd.f32 %v3716_v27, %v7286_v59 }
 0x360   : > { %v3730_v19 = vadd.f32 %v3714_v63, %v7288_v13  ;;  %v3880_v6 = vpop.permute.xlu1 %3879 }
 0x361   : > { %v7370_v55 = vadd.f32 %v3909_v45, %v3732_v7  ;;  %v5056_v25 = vpop.f32.mrb[120].mxu1  ;;  %v7885_v7 = vld [vmem:[#allocation25_spill] sm:$0xff] }
 0x362   : > { %v7372_v56 = vadd.f32 %v3907_v31, %v3730_v19  ;;  %v3719_v28 = vmul.f32 %v5056_v25, %v7132_v21  ;;  %v5076_v53 = vpop.f32.mrb[136].mxu0  ;;  %v3614_v54 = vpop.f32.mrb[121].mxu1 }
 0x363   : > { %v3717_v18 = vmul.f32 %v7223_v16, %v3614_v54  ;;  %v3807_v1 = vpop.f32.mrb[137].mxu0  ;;  %v5057_v59 = vpop.f32.mrb[122].mxu1  ;;  %v3912_v62 = vmul.f32 %v5076_v53, %v3880_v6 }
 0x364   : > { %v3735_v13 = vadd.f32 %v3719_v28, %v7297_v52  ;;  %v3884_v14 = vpop.permute.xlu1 %3883  ;;  %v3720_v26 = vmul.f32 %v5057_v59, %v7312_v17  ;;  %v5077_v34 = vpop.f32.mrb[138].mxu0  ;;  %v3910_v9 = vmul.f32 %v7280_v10, %v3807_v1  ;;  %v7886_v1 = vld [vmem:[#allocation22_spill] sm:$0xff] }
 0x365   : > { %v3733_v57 = vadd.f32 %v3717_v18, %v7300_v36  ;;  %v3617_v3 = vpop.f32.mrb[123].mxu1  ;;  %v3810_v8 = vpop.f32.mrb[139].mxu0  ;;  %v3913_v16 = vmul.f32 %v5077_v34, %v3884_v14  ;;  %v7884_v36 = vld [vmem:[#allocation5_spill] sm:$0xff] }
 0x366   : > { %v7380_v21 = vadd.f32 %v3912_v62, %v3735_v13  ;;  %v3736_v24 = vadd.f32 %v3720_v26, %v7304_v43  ;;  %v3718_v50 = vmul.f32 %v7883_v44, %v3617_v3  ;;  %v7386_v52 = vpop.permute.xlu0 %4080  ;;  %v3911_v61 = vmul.f32 %v7884_v36, %v3810_v8  ;;  %v7887_v62 = vld [vmem:[#allocation9_spill] sm:$0xff]  ;;  %v7888_v3 = vld [vmem:[#allocation16_spill] sm:$0xff] }
 0x367   : > { %v7384_v11 = vadd.f32 %v3910_v9, %v3733_v57 }
 0x368   : > { %v7388_v2 = vadd.f32 %v3913_v16, %v3736_v24  ;;  %v3734_v17 = vadd.f32 %v3718_v50, %v7306_v33 }
 0x369   : > { %v3321_v10 = vpop.permute.xlu1 %3320  ;;  %v7392_v5 = vpop.f32.mrb[124].mxu1 }
 0x36a   : > { %v7394_v47 = vadd.f32 %v3911_v61, %v3734_v17  ;;  %v3338_v43 = vmul.f32 %v7309_v4, %v3321_v10  ;;  %v7397_v27 = vpop.f32.mrb[140].mxu0  ;;  %v3630_v45 = vpop.f32.mrb[125].mxu1 }
 0x36b   : > { %v3823_v35 = vpop.f32.mrb[141].mxu0  ;;  %v7399_v30 = vpop.f32.mrb[126].mxu1 }
 0x36c   : > { %v3354_v41 = vadd.f32 %v3338_v43, %v7350_v22  ;;  %v7402_v63 = vpop.f32.mrb[142].mxu0  ;;  %v3633_v33 = vpop.f32.mrb[127].mxu1 }
 0x36d   : > { %v3722_v19 = vmul.f32 %v7885_v7, %v3633_v33  ;;  %v3826_v42 = vpop.f32.mrb[143].mxu0  ;;  %v3892_v31 = vpop.permute.xlu0 %3891  ;;  %v7889_v33 = vld [vmem:[#allocation11_spill] sm:$0xff] }
 0x36e   : > { %v3695_v6 = vpop.permute.xlu1 %3694  ;;  %v3915_v28 = vmul.f32 %v3892_v31, %v3826_v42 }
 0x36f   : > { %v3738_v25 = vadd.f32 %v3722_v19, %v7324_v49  ;;  %v3721_v4 = vmul.f32 %v3695_v6, %v3630_v45 }
 0x371   : > { %v7406_v53 = vadd.f32 %v3915_v28, %v3738_v25  ;;  %v3737_v54 = vadd.f32 %v3721_v4, %v3544_v0  ;;  %v5088_v18 = vpop.f32.mrb[128].mxu1 }
 0x372   : > { %v4097_v59 = vmul.f32 %v5088_v18, %v7886_v1  ;;  %v3968_v13 = vpop.f32.mrb[129].mxu1 }
 0x373   : > { %v4073_v22 = vpop.permute.xlu1 %4072  ;;  %v4095_v14 = vmul.f32 %v7887_v62, %v3968_v13  ;;  %v5089_v26 = vpop.f32.mrb[130].mxu1 }
 0x374   : > { %v4113_v34 = vadd.f32 %v4097_v59, %v7334_v37  ;;  %v4098_v57 = vmul.f32 %v5089_v26, %v7319_v58  ;;  %v3971_v9 = vpop.f32.mrb[131].mxu1 }
 0x375   : > { %v4111_v49 = vadd.f32 %v4095_v14, %v7338_v38  ;;  %v4096_v8 = vmul.f32 %v7888_v3, %v3971_v9 }
 0x376   : > { %v4114_v24 = vadd.f32 %v4098_v57, %v7343_v46 }
 0x377   : > { %v4112_v0 = vadd.f32 %v4096_v8, %v7347_v29  ;;  %v4077_v16 = vpop.permute.xlu1 %4076 }
 0x378   : > { %v4149_v44 = vpack.c.bf16 %v4114_v24, %v4113_v34 }
 0x379   : > { %v4148_v50 = vpack.c.bf16 %v4112_v0, %v4111_v49  ;;  %v5092_v17 = vpop.f32.mrb[132].mxu1  ;;  %v7890_v0 = vlaneseq }
 0x37a   : > { %v4101_v36 = vmul.f32 %v5092_v17, %v7242_v40  ;;  %v3984_v61 = vpop.f32.mrb[133].mxu1  ;;  %v7891_v17 = vld [vmem:[#allocation2_spill] sm:$0xff] }
 0x37b   : > { %v4099_v37 = vmul.f32 %v7345_v32, %v3984_v61  ;;  %v5093_v10 = vpop.f32.mrb[134].mxu1  ;;  %5103 = vmatpush3.bf16.msra.mxu0 %v4148_v50 }
 0x37c   : > { %v4117_v58 = vadd.f32 %v4101_v36, %v7360_v12  ;;  %v3514_v38 = vpop.permute.xlu1 %3513  ;;  %v4102_v43 = vmul.f32 %v5093_v10, %v7250_v60  ;;  %v3987_v45 = vpop.f32.mrb[135].mxu1  ;;  %5104 = vmatprep.subr.bf16.mxu0 %v7863_v23 }
 0x37d   : > { %v4115_v46 = vadd.f32 %v4099_v37, %v7363_v20  ;;  %v3531_v29 = vmul.f32 %v7314_v51, %v3514_v38  ;;  %v4100_v7 = vmul.f32 %v7889_v33, %v3987_v45  ;;  %v4146_v45 = vld [vmem:[%s7525_s11] sm:$0xff] }
 0x37e   : > { %v4118_v40 = vadd.f32 %v4102_v43, %v7370_v55  ;;  %v5272_v43 = vmov 1.0|1.0  }
 0x37f   : > { %v3547_v19 = vadd.f32 %v3531_v29, %v3354_v41  ;;  %v4116_v32 = vadd.f32 %v4100_v7, %v7372_v56  ;;  %5105 = vmatpush3.bf16.msra.mxu0 %v4149_v44  ;;  %v4147_v29 = vld [vmem:[%s7525_s11 + $0x8] sm:$0xff] }
 0x380   : > { %v4151_v42 = vpack.c.bf16 %v4118_v40, %v4117_v58  ;;  %5106 = vmatprep.subr.bf16.mxu0 %v7863_v23 }
 0x381   : > { %v4150_v12 = vpack.c.bf16 %v4116_v32, %v4115_v46  ;;  %v3888_v60 = vpop.permute.xlu1 %3887  ;;  %v5096_v31 = vpop.f32.mrb[136].mxu1 }
 0x382   : > { %v3914_v6 = vmul.f32 %v3888_v60, %v3823_v35  ;;  %v4105_v25 = vmul.f32 %v5096_v31, %v4073_v22  ;;  %v4000_v28 = vpop.f32.mrb[137].mxu1  ;;  %v4226_v60 = vld [vmem:[%s7522_s8 + $0x10] sm:$0xff] (!%p4542_p6) }
 0x383   : > { %v4103_v20 = vmul.f32 %v7322_v39, %v4000_v28  ;;  %v5097_v51 = vpop.f32.mrb[138].mxu1  ;;  %5107 = vmatpush3.bf16.msra.mxu0 %v4150_v12  ;;  %v4225_v12 = vld [vmem:[%s7522_s8 + $0x8] sm:$0xff] (!%p4542_p6)  ;;  %v5273_v28 = vmov (!%p4542_p6), 0  }
 0x384   : > { %v3930_v4 = vadd.f32 %v3914_v6, %v3737_v54  ;;  %v4121_v55 = vadd.f32 %v4105_v25, %v7380_v21  ;;  %v4106_v41 = vmul.f32 %v5097_v51, %v4077_v16  ;;  %v4003_v18 = vpop.f32.mrb[139].mxu1  ;;  %5108 = vmatprep.subr.bf16.mxu0 %v7863_v23  ;;  %v4129_v16 = vshrl.u32 %v7890_v0, 7  ;;  %v4227_v6 = vld [vmem:[%s7522_s8 + $0x18] sm:$0xff] (!%p4542_p6)  ;;  %v4222_v25 = vld [vmem:[%s7514_s0] sm:$0xff] (!%p4542_p6)  ;;  %5240 = vset.pattern.permute.xlu0 (!%p4542_p6), %v5273_v28 }
 0x385   : > { %v4119_v56 = vadd.f32 %v4103_v20, %v7384_v11  ;;  %v4104_v1 = vmul.f32 %v7368_v48, %v4003_v18  ;;  %v5137_v20 = vpack.c.bf16 (!%p4542_p6), %v4227_v6, %v4226_v60  ;;  %v4208_v51 = vld [vmem:[%s7524_s10] sm:$0xff] (!%p4542_p6) }
 0x386   : > { %v4122_v59 = vadd.f32 %v4106_v41, %v7388_v2  ;;  %v3703_v35 = vpop.permute.xlu1 %3702  ;;  %v4130_v37 = vadd.s32 8, %v4129_v16  ;;  %4212 = vperm.xlu0 (!%p4542_p6), %5240, %v4208_v51  }
 0x387   : > { %v4120_v13 = vadd.f32 %v4104_v1, %v7394_v47  ;;  %v3723_v39 = vmul.f32 %v7392_v5, %v3703_v35  ;;  %5109 = vmatpush3.bf16.msra.mxu0 %v4151_v42  ;;  %v3900_v47 = vpop.permute.xlu0 %3899  ;;  %v4224_v42 = vld [vmem:[%s7522_s8] sm:$0xff] (!%p4542_p6) }
 0x388   : > { %v4153_v22 = vpack.c.bf16 %v4122_v59, %v4121_v55  ;;  %5110 = vmatprep.subr.bf16.mxu0 %v7863_v23  ;;  %v3917_v5 = vmul.f32 %v7402_v63, %v3900_v47  ;;  %v4132_v63 = vstv %s4538_s29  ;;  %v5133_v31 = vpack.c.bf16 (!%p4542_p6), %v4225_v12, %v4224_v42  ;;  %v4223_v55 = vld [vmem:[%s7514_s0 + $0x8] sm:$0xff] (!%p4542_p6) }
 0x389   : > { %v4152_v21 = vpack.c.bf16 %v4120_v13, %v4119_v56  ;;  %v3739_v54 = vadd.f32 %v3723_v39, %v7317_v15  ;;  %v5100_v62 = vpop.f32.mrb[140].mxu1  ;;  %v4133_v36 = vadd.s32 %v4132_v63, %v7891_v17  ;;  %v4545_v39 = vld [vmem:[%s7523_s9] ss:$0 sm:$0xff] (!%p4542_p6) }
 0x38a   : > { %v3707_v14 = vpop.permute.xlu1 %3706  ;;  %v4016_v26 = vpop.f32.mrb[141].mxu1 }
 0x38b   : > { %v3724_v11 = vmul.f32 %v7399_v30, %v3707_v14  ;;  %v4107_v48 = vmul.f32 %v7386_v52, %v4016_v26  ;;  %v5101_v2 = vpop.f32.mrb[142].mxu1  ;;  %5111 = vmatpush3.bf16.msra.mxu0 %v4152_v21  ;;  %vm4134_vm4 = vcmp.lt.s32.totalorder %v4133_v36, 200 }
 0x38c   : > { %v4019_v34 = vpop.f32.mrb[143].mxu1  ;;  %5112 = vmatprep.subr.bf16.mxu0 %v7863_v23 }
 0x38d   : > { %v3740_v57 = vadd.f32 %v3724_v11, %v3547_v19  ;;  %v4123_v9 = vadd.f32 %v4107_v48, %v3930_v4  ;;  %v4209_v4 = vld [vmem:[%s7524_s10 + $0x8] sm:$0xff] (!%p4542_p6) }
 0x38e   : > { %4217 = vperm.xlu0 (!%p4542_p6), %5240, %v4209_v4  }
 0x38f   : > { %v4085_v49 = vpop.permute.xlu1 %4084  ;;  %5113 = vmatpush3.bf16.msra.mxu0 %v4153_v22  ;;  %v3933_v15 = vadd.f32 %v3917_v5, %v3740_v57 }
 0x390   : > { %v4108_v3 = vmul.f32 %v4085_v49, %v4019_v34  ;;  %5114 = vmatprep.subr.bf16.mxu0 %v7863_v23 }
 0x392   : > { %v4124_v30 = vadd.f32 %v4108_v3, %v7406_v53  ;;  %v4539_v53 = vld [vmem:[%s409_s23] ss:$0 sm:$0xff] }
 0x393   : > { %vm4139_vm5 = vcmp.eq.s32.totalorder %v4129_v16, %v4539_v53  ;;  %vm4140_vm6 = vcmp.eq.s32.totalorder %v4130_v37, %v4539_v53 }
 0x394   : > { %v4154_v52 = vpack.c.bf16 %v4124_v30, %v4123_v9  ;;  %v3896_v8 = vpop.permute.xlu1 %3895  ;;  %vm4141_vm7 = vmand %vm4139_vm5, %vm4134_vm4 }
 0x395   : > { %v3916_v24 = vmul.f32 %v7397_v27, %v3896_v8  ;;  %vm4142_vm8 = vmand %vm4140_vm6, %vm4134_vm4 }
 0x396   : > { %5115 = vmatpush3.bf16.msra.mxu0 %v4154_v52  ;;  %vm4540_vm9 = vmpackc.low %vm4142_vm8, %vm4141_vm7 }
 0x397   : > { %v3932_v44 = vadd.f32 %v3916_v24, %v3739_v54  ;;  %5116 = vmatprep.subr.bf16.mxu0 %v7863_v23 }
 0x399   : > { %v4089_v50 = vpop.permute.xlu1 %4088 }
 0x39a   : > { %v4109_v61 = vmul.f32 %v5100_v62, %v4089_v50 }
 0x39c   : > { %v4125_v10 = vadd.f32 %v4109_v61, %v3932_v44 }
 0x39d   : > { %v4093_v58 = vpop.permute.xlu1 %4092 }
 0x39e   : > { %v4110_v27 = vmul.f32 %v5101_v2, %v4093_v58 }
 0x3a0   : > { %v4126_v38 = vadd.f32 %v4110_v27, %v3933_v15 }
 0x3a2   : > { %v4155_v23 = vpack.c.bf16 %v4126_v38, %v4125_v10 }
 0x3a4   : > { %5117 = vmatpush3.bf16.msra.mxu0 %v4155_v23 }
 0x3a5   : > { %5134 = vmatprep.subr.bf16.mxu0 (!%p4542_p6), %v5133_v31 }
 0x3a7   : > { %5119 = vmatmul.mubr.msk.bf16.vlgmr.msra.gmra.mrb[144].mxu0 %vm4540_vm9, %v5272_v43 }
 0x3a8   : > { %5130 = vmatprep.mubr.msk.f32.mxu0 (!%p4542_p6), %vm917_vm2, %v4222_v25  ;;  %5136 = vmatpush3.bf16.msra.mxu0 (!%p4542_p6), %v5133_v31 }
 0x3a9   : > { %5138 = vmatprep.subr.bf16.mxu0 (!%p4542_p6), %v5137_v20 }
 0x3ac   : > { %5140 = vmatpush3.bf16.msra.mxu0 (!%p4542_p6), %v5137_v20 }
 0x3af   : > { %5131 = vmatmul.mubr.msk.f32.vlgmr.msra.gmra.mrb[0].mxu0 (!%p4542_p6), %vm917_vm2, %v4223_v55 }
 0x405   : > { %v4213_v41 = vpop.permute.xlu0 (!%p4542_p6), %4212 }
 0x40d   : > { %v4218_v18 = vpop.permute.xlu0 (!%p4542_p6), %4217 }
 0x479   : > { %4205 = sbr.rel (%p4542_p6) target bundleno = 1185 (0x4a1), region = 72 }
 0x47a   : > { %v4190_v46 = vpop.f32.mrb[144].mxu0 }
 0x47b   : > { %v4197_v33 = vadd.f32 %v4190_v46, %v4146_v45  ;;  %v5120_v7 = vpop.f32.mrb[145].mxu0 }
 0x47c   : > { %v4193_v40 = vpop.f32.mrb[146].mxu0 }
 0x47d   : > { %4200 = vst.msk [vmem:[%s7525_s11] sm:$0xff] %vm4199_vm10, %v4197_v33  ;;  %v4198_v19 = vadd.f32 %v4193_v40, %v4147_v29  ;;  %v5121_v32 = vpop.f32.mrb[147].mxu0 }
 0x47f   : > { %4201 = vst.msk [vmem:[%s7525_s11 + $0x8] sm:$0xff] %vm4199_vm10, %v4198_v19 }
 0x482   : > { %v5132_v13 = vpop.f32.mrb[0].mxu0 }
 0x483   : > { %v4300_v21 = vpop.f32.mrb[1].mxu0 }
 0x484   : > { %v4206_v1 = vld [vmem:[%s7525_s11] sm:$0xff] }
 0x485   : > { %v4220_v35 = vmul.f32 %v4213_v41, %v4206_v1 }
 0x486   : > { %v4207_v56 = vld [vmem:[%s7525_s11 + $0x8] sm:$0xff] }
 0x487   : > { %v4221_v59 = vmul.f32 %v4218_v18, %v4207_v56  ;;  %v4309_v54 = vadd.f32 %v4300_v21, %v4220_v35 }
 0x489   : > { %v4310_v22 = vadd.f32 %v5132_v13, %v4221_v59  ;;  %v4318_v14 = vadd.f32 %v4545_v39, %v4309_v54 }
 0x48b   : > { %v4319_v62 = vadd.f32 %v4545_v39, %v4310_v22  ;;  %v4322_v11 = vmin.f32 %v4318_v14, 0.0  ;;  %vm4320_vm12 = vcmp.gt.f32.partialorder %v4318_v14, 0.0 }
 0x48d   : > { %v4323_v26 = vmin.f32 %v4319_v62, 0.0  ;;  %v4324_v2 = vmul.f32 1.442695, %v4322_v11  ;;  %vm4321_vm11 = vcmp.gt.f32.partialorder %v4319_v62, 0.0 }
 0x48f   : > { %v4326_v48 = vmul.f32 1.442695, %v4323_v26 }
 0x491   : > { %5241 = vpow2.f32 %v4326_v48 }
 0x492   : > { %5243 = vpow2.f32 %v4324_v2 }
 0x49b   : > { %v5242_v47 = vpop.eup %5241 }
 0x49c   : > { %v5244_v34 = vpop.eup %5243  ;;  %v4547_v5 = vadd.f32 -1.0, %v5242_v47 }
 0x49d   : > { %v4546_v57 = vadd.f32 -1.0, %v5244_v34 }
 0x49e   : > { %v4331_v9 = vsel %vm4321_vm11, %v4319_v62, %v4547_v5 }
 0x49f   : > { %4333 = vst.msk [vmem:[%s7525_s11 + $0x8] sm:$0xff] %vm4199_vm10, %v4331_v9  ;;  %v4330_v49 = vsel %vm4320_vm12, %v4318_v14, %v4546_v57 }
 0x4a0   : > { %4332 = vst.msk [vmem:[%s7525_s11] sm:$0xff] %vm4199_vm10, %v4330_v49 }
 0x4a1 PF: > { %s21_s17 = sadd.s32 1, %s5251_s17  }
 0x4a2   : > { %p18_p7 = scmp.ge.s32.totalorder %s21_s17, 4  }
 0x4a4   :  { %20 = sbr.rel (!%p18_p7) target bundleno = 1 (0x1), region = 104 }

</bundles_post_ra>
